<compile_context>
chip_gen: v5e
topology: v5e:2x2
jax: 0.10.0
libtpu: 0.0.40
codegen_flags: <defaults>
</compile_context>

<pallas_src>
import numpy as np
import jax
import jax.numpy as jnp
from jax import lax
from jax.experimental import pallas as pl

# ----------------------------------------------------------------------------
# model constants
# ----------------------------------------------------------------------------

ATOM_INPUT_FEATURES = 92
NODE_FEATURES = 92
EDGE_FEATURES = 40
FC_FEATURES = 256
OUTPUT_FEATURES = 1
CONV_LAYERS = 3

FP = 128          # lane-padded feature width (92 -> 128, 40 -> 128)

# RBF expansion constants (match alignn RBFExpansion defaults)
RBF_CENTERS = np.linspace(0.0, 8.0, EDGE_FEATURES).astype(np.float32)
RBF_GAMMA = float(1.0 / np.diff(RBF_CENTERS).mean())
ABF_CENTERS = np.linspace(-np.pi / 2, np.pi / 2, EDGE_FEATURES).astype(np.float32)
ABF_GAMMA = float(1.0 / np.diff(ABF_CENTERS).mean())


# ----------------------------------------------------------------------------
# fused Pallas kernel (whole forward pass)
# ----------------------------------------------------------------------------


def acgcnn_fused_kernel(
    bondlen_ref, angle_ref, rbf_c_ref, abf_c_ref,
    atom_ref, emb_w_ref, emb_b_ref,
    a_src_g_ref, a_dst_g_ref,
    a_src_lg_ref, a_dst_lg_ref,
    pool_ref,
    c1_w_nodes_ref, c1_w_edge_ref,
    c1_b_m_ref, c1_g_m_ref, c1_bt_m_ref, c1_g_n_ref, c1_bt_n_ref,
    c2_w_nodes_ref, c2_w_edge_ref,
    c2_b_m_ref, c2_g_m_ref, c2_bt_m_ref, c2_g_n_ref, c2_bt_n_ref,
    fc_w_ref, fc_b_ref, out_w_ref, out_b_ref,
    out_ref,
):
    f32, bf16 = jnp.float32, jnp.bfloat16

    def softplus(x):
        # torch.nn.functional.softplus (beta=1, threshold=20)
        return jnp.where(x > 20.0, x, jnp.log(1.0 + jnp.exp(jnp.minimum(x, 20.0))))

    def sigmoid(x):
        # exact sigmoid via a single EUP tanh (no exp + reciprocal)
        return 0.5 * jnp.tanh(0.5 * x) + 0.5

    def batchnorm(x, gamma, beta):
        # PyTorch BatchNorm1d in training mode: batch stats, biased var, eps=1e-5.
        # Single-pass: accumulate sum and sum-of-squares in one traversal.
        inv_n = 1.0 / x.shape[0]
        s = jnp.sum(x, axis=0, keepdims=True)
        ss = jnp.sum(x * x, axis=0, keepdims=True)
        mu = s * inv_n
        var = jnp.maximum(ss * inv_n - mu * mu, 0.0)
        return (x - mu) * lax.rsqrt(var + 1e-5) * gamma + beta

    def lane_mask(n):
        return (lax.broadcasted_iota(jnp.int32, (1, FP), 1) < n).astype(f32)

    mask_node = lane_mask(NODE_FEATURES)   # valid lanes of g node features
    mask_edge = lane_mask(EDGE_FEATURES)   # valid lanes of edge / angle features

    # --- RBF / ABF expansions (lane-padded; padded bins zeroed) --------------
    edge_feats = jnp.exp(-RBF_GAMMA * (bondlen_ref[...] - rbf_c_ref[...]) ** 2) * mask_edge
    angle_feats = jnp.exp(-ABF_GAMMA * (angle_ref[...] - abf_c_ref[...]) ** 2) * mask_edge
    angle_bf = angle_feats.astype(bf16)    # constant across layers; cast once

    # --- atom embedding -------------------------------------------------------
    node_feats = (jnp.dot(atom_ref[...], emb_w_ref[...],
                          preferred_element_type=f32) + emb_b_ref[...])

    def conv(x, xb, e_bf, a_src, a_dst,
             w_nodes, w_edge, b_m, g_m, bt_m, g_n, bt_n, fmask):
        """One ACGCNNConv (Xie & Grossman Eq. 5) on lane-padded features.

        x:  (V, FP) f32 node features; xb its bf16 copy.
        e_bf: (Ed, FP) bf16 edge features.
        a_src/a_dst: (Ed, V) bf16 one-hot incidence.
        w_nodes: (FP, 4*FP) = [w_src | w_dst] packed as one wide matmul.
        """
        # single wide projection: h_src || h_dst in one (V,128)x(128,512) dot
        h_nodes = jnp.dot(xb, w_nodes, preferred_element_type=f32)             # (V, 4*FP)
        h_edge = jnp.dot(e_bf, w_edge, preferred_element_type=f32)             # (Ed, 2*FP)
        h_src = h_nodes[:, :2 * FP].astype(bf16)                               # tile-boundary slice
        h_dst = h_nodes[:, 2 * FP:].astype(bf16)
        # per-edge message m[e] = h_src[src(e)] + h_dst[dst(e)] + h_edge[e] + bias
        # (the three linear biases are pre-combined into b_m; one-hot rows sum to 1)
        m = (jnp.dot(a_src, h_src, preferred_element_type=f32)
             + jnp.dot(a_dst, h_dst, preferred_element_type=f32)
             + h_edge + b_m)                                                   # (Ed, 2*FP)
        m = batchnorm(m, g_m, bt_m)                                            # bn_message
        # filter / core halves sit at the 128-lane tile boundary -> free split
        gated = sigmoid(m[:, :FP]) * softplus(m[:, FP:]) * fmask               # (Ed, FP)
        # scatter-sum onto destination nodes: a_dst^T @ gated as a transposed
        # contraction on the MXU (no explicit transposed incidence input)
        h = lax.dot_general(a_dst, gated.astype(bf16),
                            dimension_numbers=(((0,), (0,)), ((), ())),
                            preferred_element_type=f32)                        # (V, FP)
        h = batchnorm(h, g_n, bt_n)                                            # bn
        # mask the residual so padded lanes stay exactly zero
        return softplus(x + h) * fmask

    a_src_g, a_dst_g = a_src_g_ref[...], a_dst_g_ref[...]
    a_src_lg, a_dst_lg = a_src_lg_ref[...], a_dst_lg_ref[...]

    for l in range(CONV_LAYERS):          # 3 layers, unrolled; static weight indexing
        edge_bf = edge_feats.astype(bf16)  # used by conv1 (edge input) and conv2 (node input)
        node_feats = conv(node_feats, node_feats.astype(bf16), edge_bf,
                          a_src_g, a_dst_g,
                          c1_w_nodes_ref[l], c1_w_edge_ref[l],
                          c1_b_m_ref[l], c1_g_m_ref[l], c1_bt_m_ref[l],
                          c1_g_n_ref[l], c1_bt_n_ref[l], mask_node)
        edge_feats = conv(edge_feats, edge_bf, angle_bf,
                          a_src_lg, a_dst_lg,
                          c2_w_nodes_ref[l], c2_w_edge_ref[l],
                          c2_b_m_ref[l], c2_g_m_ref[l], c2_bt_m_ref[l],
                          c2_g_n_ref[l], c2_bt_n_ref[l], mask_edge)

    # --- readout: AvgPool -> softplus -> (Linear + Softplus) -> softplus -> Linear
    pooled = jnp.dot(pool_ref[...], node_feats.astype(bf16), preferred_element_type=f32)
    feat = softplus(pooled)
    feat = softplus(jnp.dot(feat.astype(bf16), fc_w_ref[...],
                            preferred_element_type=f32) + fc_b_ref[...])
    feat = softplus(feat)
    out_ref[...] = (jnp.dot(feat.astype(bf16), out_w_ref[...],
                            preferred_element_type=f32) + out_b_ref[...])


# ----------------------------------------------------------------------------
# pallas_call wrapper
# ----------------------------------------------------------------------------


def _vmem_spec(shape):
    """Whole-array VMEM block (grid = ())."""
    nd = len(shape)
    return pl.BlockSpec(shape, lambda *_, _nd=nd: (0,) * _nd)


def acgcnn_forward(params, atom_feats_p, r, angles,
                   a_src_g, a_dst_g, a_src_lg, a_dst_lg, pool):
    # cheap glue in plain XLA: bond length + column-vector reshape
    # TODO(synk): pack bondlength/angles lane-dense for real E/L (v7x VMEM).
    bondlength = jnp.sqrt(jnp.sum(r * r, axis=1, keepdims=True))   # (E, 1)
    angles2d = angles[:, None]                                     # (L, 1)

    c1, c2 = params['conv1'], params['conv2']
    args = [
        bondlength, angles2d,
        params['rbf_centers'], params['abf_centers'],
        atom_feats_p, params['emb_w'], params['emb_b'],
        a_src_g, a_dst_g,
        a_src_lg, a_dst_lg,
        pool,
        c1['w_nodes'], c1['w_edge'],
        c1['b_m'], c1['g_m'], c1['bt_m'], c1['g_n'], c1['bt_n'],
        c2['w_nodes'], c2['w_edge'],
        c2['b_m'], c2['g_m'], c2['bt_m'], c2['g_n'], c2['bt_n'],
        params['fc_w'], params['fc_b'], params['out_w'], params['out_b'],
    ]
    G = pool.shape[0]
    out_p = pl.pallas_call(
        acgcnn_fused_kernel,
        out_shape=jax.ShapeDtypeStruct((G, FP), jnp.float32),
        in_specs=[_vmem_spec(a.shape) for a in args],
        out_specs=_vmem_spec((G, FP)),
    )(*args)
    # identity link + torch.squeeze
    return jnp.squeeze(out_p[:, :OUTPUT_FEATURES])


# ----------------------------------------------------------------------------
# parameter init (deterministic, PyTorch-Linear-style uniform fan-in init)
# ----------------------------------------------------------------------------


def init_linear_params(key, fan_in, fan_out):
    k1, k2 = jax.random.split(key)
    bound = 1.0 / float(np.sqrt(fan_in))
    w = jax.random.uniform(k1, (fan_in, fan_out), minval=-bound, maxval=bound,
                           dtype=jnp.float32)
    b = jax.random.uniform(k2, (fan_out,), minval=-bound, maxval=bound,
                           dtype=jnp.float32)
    return w, b


def pad_2d(w, rows, cols):
    wp = jnp.zeros((rows, cols), jnp.float32)
    return wp.at[:w.shape[0], :w.shape[1]].set(w)


def pad_lane_vec(v):
    v = jnp.asarray(v, jnp.float32).reshape(-1)
    out = jnp.zeros((1, FP), jnp.float32)
    return out.at[0, :v.shape[0]].set(v)


def pad_gated_linear(w, b, f_in, f_half):
    """Lay the filter/core halves of a (f_in, 2*f_half) linear at 128-lane tiles."""
    wp = jnp.zeros((FP, 2 * FP), jnp.float32)
    wp = wp.at[:f_in, :f_half].set(w[:, :f_half])
    wp = wp.at[:f_in, FP:FP + f_half].set(w[:, f_half:])
    bp = jnp.zeros((2 * FP,), jnp.float32)
    bp = bp.at[:f_half].set(b[:f_half])
    bp = bp.at[FP:FP + f_half].set(b[f_half:])
    return wp, bp


def init_conv_params(key, node_f, edge_f):
    ks = jax.random.split(key, 3)
    w_src, b_src = init_linear_params(ks[0], node_f, 2 * node_f)
    w_dst, b_dst = init_linear_params(ks[1], node_f, 2 * node_f)
    w_edge, b_edge = init_linear_params(ks[2], edge_f, 2 * node_f)
    wsp, bsp = pad_gated_linear(w_src, b_src, node_f, node_f)
    wdp, bdp = pad_gated_linear(w_dst, b_dst, node_f, node_f)
    wep, bep = pad_gated_linear(w_edge, b_edge, edge_f, node_f)
    return {
        # src & dst projections packed side by side -> one (128, 512) matmul
        'w_nodes': jnp.concatenate([wsp, wdp], axis=1).astype(jnp.bfloat16),
        'w_edge': wep.astype(jnp.bfloat16),
        'b_m': (bsp + bdp + bep)[None, :],                    # combined linear biases
        'g_m': jnp.ones((1, 2 * FP), jnp.float32),
        'bt_m': jnp.zeros((1, 2 * FP), jnp.float32),
        'g_n': jnp.ones((1, FP), jnp.float32),
        'bt_n': jnp.zeros((1, FP), jnp.float32),
    }


def stack_conv(layer_params):
    return {k: jnp.stack([p[k] for p in layer_params], axis=0)
            for k in layer_params[0]}


# ----------------------------------------------------------------------------
# main
# ----------------------------------------------------------------------------

if __name__ == "__main__":
    key = jax.random.PRNGKey(0)

    # --- synthetic batched graph: 2 ring graphs with 8 nodes each ------------
    G_graphs, N_per = 2, 8
    src_list, dst_list = [], []
    for gi in range(G_graphs):
        off = gi * N_per
        for i in range(N_per):
            for d in (1, 2):
                src_list.append(off + i)
                dst_list.append(off + (i + d) % N_per)
    g_src = np.asarray(src_list, dtype=np.int32)
    g_dst = np.asarray(dst_list, dtype=np.int32)
    N = G_graphs * N_per                      # 16 atoms
    E = len(g_src)                            # 32 bonds

    # line graph: lg-node = g-edge; lg-edge e1->e2 iff dst(e1) == src(e2)
    lg_src, lg_dst = [], []
    for e1 in range(E):
        for e2 in range(E):
            if g_dst[e1] == g_src[e2]:
                lg_src.append(e1)
                lg_dst.append(e2)
    lg_src = np.asarray(lg_src, dtype=np.int32)
    lg_dst = np.asarray(lg_dst, dtype=np.int32)
    L = len(lg_src)                           # 64 angle triplets

    # dense one-hot incidence matrices in bf16 (exact 0/1 values)
    # TODO(synk): replace with scalar-prefetch index gathers + segment sums at scale.
    a_src_g = jax.nn.one_hot(g_src, N, dtype=jnp.bfloat16)        # (E, N)
    a_dst_g = jax.nn.one_hot(g_dst, N, dtype=jnp.bfloat16)        # (E, N)
    a_src_lg = jax.nn.one_hot(lg_src, E, dtype=jnp.bfloat16)      # (L, E)
    a_dst_lg = jax.nn.one_hot(lg_dst, E, dtype=jnp.bfloat16)      # (L, E)

    # AvgPooling matrix (G, N): mean over nodes of each graph (1/8 exact in bf16)
    pool = np.zeros((G_graphs, N), dtype=np.float32)
    for gi in range(G_graphs):
        pool[gi, gi * N_per:(gi + 1) * N_per] = 1.0 / N_per
    pool = jnp.asarray(pool, dtype=jnp.bfloat16)

    # --- inputs --------------------------------------------------------------
    k_atom, k_r, k_ang, k_par = jax.random.split(key, 4)
    atom_feats = jax.random.normal(k_atom, (N, ATOM_INPUT_FEATURES), dtype=jnp.float32)
    atom_feats_p = (jnp.zeros((N, FP), jnp.float32)
                    .at[:, :ATOM_INPUT_FEATURES].set(atom_feats)
                    .astype(jnp.bfloat16))                                # pre-cast bf16
    r = jax.random.normal(k_r, (E, 3), dtype=jnp.float32)                 # bond vectors
    angles = jax.random.uniform(k_ang, (L,), minval=-np.pi / 2,
                                maxval=np.pi / 2, dtype=jnp.float32)      # lg.edata['h']

    # --- parameters ----------------------------------------------------------
    keys = jax.random.split(k_par, 2 + 2 * CONV_LAYERS + 1)
    emb_w, emb_b = init_linear_params(keys[0], ATOM_INPUT_FEATURES, NODE_FEATURES)
    fc_w, fc_b = init_linear_params(keys[1], NODE_FEATURES, FC_FEATURES)
    conv1 = stack_conv([init_conv_params(keys[2 + i], NODE_FEATURES, EDGE_FEATURES)
                        for i in range(CONV_LAYERS)])
    conv2 = stack_conv([init_conv_params(keys[2 + CONV_LAYERS + i], EDGE_FEATURES, EDGE_FEATURES)
                        for i in range(CONV_LAYERS)])
    out_w, out_b = init_linear_params(keys[-1], FC_FEATURES, OUTPUT_FEATURES)

    params = {
        'rbf_centers': pad_lane_vec(RBF_CENTERS),
        'abf_centers': pad_lane_vec(ABF_CENTERS),
        'emb_w': pad_2d(emb_w, FP, FP).astype(jnp.bfloat16),
        'emb_b': pad_lane_vec(emb_b),
        'conv1': conv1,
        'conv2': conv2,
        'fc_w': pad_2d(fc_w, FP, FC_FEATURES).astype(jnp.bfloat16),
        'fc_b': jnp.asarray(fc_b)[None, :],
        'out_w': pad_2d(out_w, FC_FEATURES, FP).astype(jnp.bfloat16),
        'out_b': pad_lane_vec(out_b),
    }

    fwd = jax.jit(acgcnn_forward)
    out = fwd(params, atom_feats_p, r, angles,
              a_src_g, a_dst_g, a_src_lg, a_dst_lg, pool)
    out = jax.block_until_ready(out)
    assert out.shape == (G_graphs,) and bool(jnp.all(jnp.isfinite(out)))
    print("KERNEL_OK")
</pallas_src>

<mosaic_0001>
module attributes {stable_mosaic.version = 11 : i64} {
  func.func @acgcnn_fused_kernel(%arg0: memref<32x1xf32, #tpu.memory_space<vmem>>, %arg1: memref<64x1xf32, #tpu.memory_space<vmem>>, %arg2: memref<1x128xf32, #tpu.memory_space<vmem>>, %arg3: memref<1x128xf32, #tpu.memory_space<vmem>>, %arg4: memref<16x128xbf16, #tpu.memory_space<vmem>>, %arg5: memref<128x128xbf16, #tpu.memory_space<vmem>>, %arg6: memref<1x128xf32, #tpu.memory_space<vmem>>, %arg7: memref<32x16xbf16, #tpu.memory_space<vmem>>, %arg8: memref<32x16xbf16, #tpu.memory_space<vmem>>, %arg9: memref<64x32xbf16, #tpu.memory_space<vmem>>, %arg10: memref<64x32xbf16, #tpu.memory_space<vmem>>, %arg11: memref<2x16xbf16, #tpu.memory_space<vmem>>, %arg12: memref<3x128x512xbf16, #tpu.memory_space<vmem>>, %arg13: memref<3x128x256xbf16, #tpu.memory_space<vmem>>, %arg14: memref<3x1x256xf32, #tpu.memory_space<vmem>>, %arg15: memref<3x1x256xf32, #tpu.memory_space<vmem>>, %arg16: memref<3x1x256xf32, #tpu.memory_space<vmem>>, %arg17: memref<3x1x128xf32, #tpu.memory_space<vmem>>, %arg18: memref<3x1x128xf32, #tpu.memory_space<vmem>>, %arg19: memref<3x128x512xbf16, #tpu.memory_space<vmem>>, %arg20: memref<3x128x256xbf16, #tpu.memory_space<vmem>>, %arg21: memref<3x1x256xf32, #tpu.memory_space<vmem>>, %arg22: memref<3x1x256xf32, #tpu.memory_space<vmem>>, %arg23: memref<3x1x256xf32, #tpu.memory_space<vmem>>, %arg24: memref<3x1x128xf32, #tpu.memory_space<vmem>>, %arg25: memref<3x1x128xf32, #tpu.memory_space<vmem>>, %arg26: memref<128x256xbf16, #tpu.memory_space<vmem>>, %arg27: memref<1x256xf32, #tpu.memory_space<vmem>>, %arg28: memref<256x128xbf16, #tpu.memory_space<vmem>>, %arg29: memref<1x128xf32, #tpu.memory_space<vmem>>, %arg30: memref<2x128xf32, #tpu.memory_space<vmem>>) attributes {dimension_semantics = [], scalar_prefetch = 0 : i64, scratch_operands = 0 : i64, tpu.core_type = #tpu.core_type<tc>} {
    %0 = tpu.iota {dimensions = array<i32: 1>} : vector<1x128xi32>
    %c92_i32 = arith.constant 92 : i32
    %1 = vector.broadcast %c92_i32 : i32 to vector<1x128xi32>
    %2 = arith.cmpi slt, %0, %1 : vector<1x128xi32>
    %3 = arith.extui %2 : vector<1x128xi1> to vector<1x128xi32>
    %4 = arith.sitofp %3 : vector<1x128xi32> to vector<1x128xf32>
    %5 = tpu.iota {dimensions = array<i32: 1>} : vector<1x128xi32>
    %c40_i32 = arith.constant 40 : i32
    %6 = vector.broadcast %c40_i32 : i32 to vector<1x128xi32>
    %7 = arith.cmpi slt, %5, %6 : vector<1x128xi32>
    %8 = arith.extui %7 : vector<1x128xi1> to vector<1x128xi32>
    %9 = arith.sitofp %8 : vector<1x128xi32> to vector<1x128xf32>
    %c0 = arith.constant 0 : index
    %c0_0 = arith.constant 0 : index
    %10 = vector.load %arg0[%c0, %c0_0] : memref<32x1xf32, #tpu.memory_space<vmem>>, vector<32x1xf32>
    %c0_1 = arith.constant 0 : index
    %c0_2 = arith.constant 0 : index
    %11 = vector.load %arg2[%c0_1, %c0_2] : memref<1x128xf32, #tpu.memory_space<vmem>>, vector<1x128xf32>
    %12 = vector.broadcast %10 : vector<32x1xf32> to vector<32x128xf32>
    %13 = vector.broadcast %11 : vector<1x128xf32> to vector<32x128xf32>
    %14 = arith.subf %12, %13 : vector<32x128xf32>
    %15 = arith.mulf %14, %14 : vector<32x128xf32>
    %cst = arith.constant -4.875000e+00 : f32
    %16 = vector.broadcast %cst : f32 to vector<32x128xf32>
    %17 = arith.mulf %16, %15 : vector<32x128xf32>
    %18 = math.exp %17 : vector<32x128xf32>
    %19 = vector.broadcast %9 : vector<1x128xf32> to vector<32x128xf32>
    %20 = arith.mulf %18, %19 : vector<32x128xf32>
    %c0_3 = arith.constant 0 : index
    %c0_4 = arith.constant 0 : index
    %21 = vector.load %arg1[%c0_3, %c0_4] : memref<64x1xf32, #tpu.memory_space<vmem>>, vector<64x1xf32>
    %c0_5 = arith.constant 0 : index
    %c0_6 = arith.constant 0 : index
    %22 = vector.load %arg3[%c0_5, %c0_6] : memref<1x128xf32, #tpu.memory_space<vmem>>, vector<1x128xf32>
    %23 = vector.broadcast %21 : vector<64x1xf32> to vector<64x128xf32>
    %24 = vector.broadcast %22 : vector<1x128xf32> to vector<64x128xf32>
    %25 = arith.subf %23, %24 : vector<64x128xf32>
    %26 = arith.mulf %25, %25 : vector<64x128xf32>
    %cst_7 = arith.constant -12.4140882 : f32
    %27 = vector.broadcast %cst_7 : f32 to vector<64x128xf32>
    %28 = arith.mulf %27, %26 : vector<64x128xf32>
    %29 = math.exp %28 : vector<64x128xf32>
    %30 = vector.broadcast %9 : vector<1x128xf32> to vector<64x128xf32>
    %31 = arith.mulf %29, %30 : vector<64x128xf32>
    %32 = arith.truncf %31 : vector<64x128xf32> to vector<64x128xbf16>
    %c0_8 = arith.constant 0 : index
    %c0_9 = arith.constant 0 : index
    %33 = vector.load %arg4[%c0_8, %c0_9] : memref<16x128xbf16, #tpu.memory_space<vmem>>, vector<16x128xbf16>
    %c0_10 = arith.constant 0 : index
    %c0_11 = arith.constant 0 : index
    %34 = vector.load %arg5[%c0_10, %c0_11] : memref<128x128xbf16, #tpu.memory_space<vmem>>, vector<128x128xbf16>
    %cst_12 = arith.constant dense<0.000000e+00> : vector<16x128xf32>
    %35 = tpu.matmul %33, %34, %cst_12 {dimension_numbers = #tpu.dot_dimension_numbers<[1], [0], [0], [1], [0, 0, 1, 1], [], []>} : vector<16x128xbf16>, vector<128x128xbf16>, vector<16x128xf32> -> vector<16x128xf32>
    %c0_13 = arith.constant 0 : index
    %c0_14 = arith.constant 0 : index
    %36 = vector.load %arg6[%c0_13, %c0_14] : memref<1x128xf32, #tpu.memory_space<vmem>>, vector<1x128xf32>
    %37 = vector.broadcast %36 : vector<1x128xf32> to vector<16x128xf32>
    %38 = arith.addf %35, %37 : vector<16x128xf32>
    %c0_15 = arith.constant 0 : index
    %c0_16 = arith.constant 0 : index
    %39 = vector.load %arg7[%c0_15, %c0_16] : memref<32x16xbf16, #tpu.memory_space<vmem>>, vector<32x16xbf16>
    %c0_17 = arith.constant 0 : index
    %c0_18 = arith.constant 0 : index
    %40 = vector.load %arg8[%c0_17, %c0_18] : memref<32x16xbf16, #tpu.memory_space<vmem>>, vector<32x16xbf16>
    %c0_19 = arith.constant 0 : index
    %c0_20 = arith.constant 0 : index
    %41 = vector.load %arg9[%c0_19, %c0_20] : memref<64x32xbf16, #tpu.memory_space<vmem>>, vector<64x32xbf16>
    %c0_21 = arith.constant 0 : index
    %c0_22 = arith.constant 0 : index
    %42 = vector.load %arg10[%c0_21, %c0_22] : memref<64x32xbf16, #tpu.memory_space<vmem>>, vector<64x32xbf16>
    %43 = arith.truncf %20 : vector<32x128xf32> to vector<32x128xbf16>
    %44 = arith.truncf %38 : vector<16x128xf32> to vector<16x128xbf16>
    %c0_23 = arith.constant 0 : index
    %c0_24 = arith.constant 0 : index
    %c0_25 = arith.constant 0 : index
    %45 = vector.load %arg12[%c0_23, %c0_24, %c0_25] : memref<3x128x512xbf16, #tpu.memory_space<vmem>>, vector<1x128x512xbf16>
    %46 = vector.shape_cast %45 : vector<1x128x512xbf16> to vector<128x512xbf16>
    %c0_26 = arith.constant 0 : index
    %c0_27 = arith.constant 0 : index
    %c0_28 = arith.constant 0 : index
    %47 = vector.load %arg13[%c0_26, %c0_27, %c0_28] : memref<3x128x256xbf16, #tpu.memory_space<vmem>>, vector<1x128x256xbf16>
    %48 = vector.shape_cast %47 : vector<1x128x256xbf16> to vector<128x256xbf16>
    %c0_29 = arith.constant 0 : index
    %c0_30 = arith.constant 0 : index
    %c0_31 = arith.constant 0 : index
    %49 = vector.load %arg14[%c0_29, %c0_30, %c0_31] : memref<3x1x256xf32, #tpu.memory_space<vmem>>, vector<1x1x256xf32>
    %50 = vector.shape_cast %49 : vector<1x1x256xf32> to vector<1x256xf32>
    %c0_32 = arith.constant 0 : index
    %c0_33 = arith.constant 0 : index
    %c0_34 = arith.constant 0 : index
    %51 = vector.load %arg15[%c0_32, %c0_33, %c0_34] : memref<3x1x256xf32, #tpu.memory_space<vmem>>, vector<1x1x256xf32>
    %52 = vector.shape_cast %51 : vector<1x1x256xf32> to vector<1x256xf32>
    %c0_35 = arith.constant 0 : index
    %c0_36 = arith.constant 0 : index
    %c0_37 = arith.constant 0 : index
    %53 = vector.load %arg16[%c0_35, %c0_36, %c0_37] : memref<3x1x256xf32, #tpu.memory_space<vmem>>, vector<1x1x256xf32>
    %54 = vector.shape_cast %53 : vector<1x1x256xf32> to vector<1x256xf32>
    %c0_38 = arith.constant 0 : index
    %c0_39 = arith.constant 0 : index
    %c0_40 = arith.constant 0 : index
    %55 = vector.load %arg17[%c0_38, %c0_39, %c0_40] : memref<3x1x128xf32, #tpu.memory_space<vmem>>, vector<1x1x128xf32>
    %56 = vector.shape_cast %55 : vector<1x1x128xf32> to vector<1x128xf32>
    %c0_41 = arith.constant 0 : index
    %c0_42 = arith.constant 0 : index
    %c0_43 = arith.constant 0 : index
    %57 = vector.load %arg18[%c0_41, %c0_42, %c0_43] : memref<3x1x128xf32, #tpu.memory_space<vmem>>, vector<1x1x128xf32>
    %58 = vector.shape_cast %57 : vector<1x1x128xf32> to vector<1x128xf32>
    %cst_44 = arith.constant dense<0.000000e+00> : vector<16x512xf32>
    %59 = tpu.matmul %44, %46, %cst_44 {dimension_numbers = #tpu.dot_dimension_numbers<[1], [0], [0], [1], [0, 0, 1, 1], [], []>} : vector<16x128xbf16>, vector<128x512xbf16>, vector<16x512xf32> -> vector<16x512xf32>
    %cst_45 = arith.constant dense<0.000000e+00> : vector<32x256xf32>
    %60 = tpu.matmul %43, %48, %cst_45 {dimension_numbers = #tpu.dot_dimension_numbers<[1], [0], [0], [1], [0, 0, 1, 1], [], []>} : vector<32x128xbf16>, vector<128x256xbf16>, vector<32x256xf32> -> vector<32x256xf32>
    %61 = vector.extract_strided_slice %59 {offsets = [0, 0], sizes = [16, 256], strides = [1, 1]} : vector<16x512xf32> to vector<16x256xf32>
    %62 = arith.truncf %61 : vector<16x256xf32> to vector<16x256xbf16>
    %63 = vector.extract_strided_slice %59 {offsets = [0, 256], sizes = [16, 256], strides = [1, 1]} : vector<16x512xf32> to vector<16x256xf32>
    %64 = arith.truncf %63 : vector<16x256xf32> to vector<16x256xbf16>
    %cst_46 = arith.constant dense<0.000000e+00> : vector<32x256xf32>
    %65 = tpu.matmul %39, %62, %cst_46 {dimension_numbers = #tpu.dot_dimension_numbers<[1], [0], [0], [1], [0, 0, 1, 1], [], []>} : vector<32x16xbf16>, vector<16x256xbf16>, vector<32x256xf32> -> vector<32x256xf32>
    %cst_47 = arith.constant dense<0.000000e+00> : vector<32x256xf32>
    %66 = tpu.matmul %40, %64, %cst_47 {dimension_numbers = #tpu.dot_dimension_numbers<[1], [0], [0], [1], [0, 0, 1, 1], [], []>} : vector<32x16xbf16>, vector<16x256xbf16>, vector<32x256xf32> -> vector<32x256xf32>
    %67 = arith.addf %65, %66 : vector<32x256xf32>
    %68 = arith.addf %67, %60 : vector<32x256xf32>
    %69 = vector.broadcast %50 : vector<1x256xf32> to vector<32x256xf32>
    %70 = arith.addf %68, %69 : vector<32x256xf32>
    %cst_48 = arith.constant dense<0.000000e+00> : vector<256xf32>
    %71 = vector.multi_reduction <add>, %70, %cst_48 [0] : vector<32x256xf32> to vector<256xf32>
    %72 = vector.shape_cast %71 : vector<256xf32> to vector<1x256xf32>
    %73 = arith.mulf %70, %70 : vector<32x256xf32>
    %cst_49 = arith.constant dense<0.000000e+00> : vector<256xf32>
    %74 = vector.multi_reduction <add>, %73, %cst_49 [0] : vector<32x256xf32> to vector<256xf32>
    %75 = vector.shape_cast %74 : vector<256xf32> to vector<1x256xf32>
    %cst_50 = arith.constant 3.125000e-02 : f32
    %76 = vector.broadcast %cst_50 : f32 to vector<1x256xf32>
    %77 = arith.mulf %72, %76 : vector<1x256xf32>
    %cst_51 = arith.constant 3.125000e-02 : f32
    %78 = vector.broadcast %cst_51 : f32 to vector<1x256xf32>
    %79 = arith.mulf %75, %78 : vector<1x256xf32>
    %80 = arith.mulf %77, %77 : vector<1x256xf32>
    %81 = arith.subf %79, %80 : vector<1x256xf32>
    %cst_52 = arith.constant 0.000000e+00 : f32
    %82 = vector.broadcast %cst_52 : f32 to vector<1x256xf32>
    %83 = arith.maximumf %81, %82 : vector<1x256xf32>
    %84 = vector.broadcast %77 : vector<1x256xf32> to vector<32x256xf32>
    %85 = arith.subf %70, %84 : vector<32x256xf32>
    %cst_53 = arith.constant 9.99999974E-6 : f32
    %86 = vector.broadcast %cst_53 : f32 to vector<1x256xf32>
    %87 = arith.addf %83, %86 : vector<1x256xf32>
    %88 = math.rsqrt %87 : vector<1x256xf32>
    %89 = vector.broadcast %88 : vector<1x256xf32> to vector<32x256xf32>
    %90 = arith.mulf %85, %89 : vector<32x256xf32>
    %91 = vector.broadcast %52 : vector<1x256xf32> to vector<32x256xf32>
    %92 = arith.mulf %90, %91 : vector<32x256xf32>
    %93 = vector.broadcast %54 : vector<1x256xf32> to vector<32x256xf32>
    %94 = arith.addf %92, %93 : vector<32x256xf32>
    %95 = vector.extract_strided_slice %94 {offsets = [0, 0], sizes = [32, 128], strides = [1, 1]} : vector<32x256xf32> to vector<32x128xf32>
    %cst_54 = arith.constant 5.000000e-01 : f32
    %96 = vector.broadcast %cst_54 : f32 to vector<32x128xf32>
    %97 = arith.mulf %96, %95 : vector<32x128xf32>
    %98 = math.tanh %97 : vector<32x128xf32>
    %cst_55 = arith.constant 5.000000e-01 : f32
    %99 = vector.broadcast %cst_55 : f32 to vector<32x128xf32>
    %100 = arith.mulf %99, %98 : vector<32x128xf32>
    %cst_56 = arith.constant 5.000000e-01 : f32
    %101 = vector.broadcast %cst_56 : f32 to vector<32x128xf32>
    %102 = arith.addf %100, %101 : vector<32x128xf32>
    %103 = vector.extract_strided_slice %94 {offsets = [0, 128], sizes = [32, 128], strides = [1, 1]} : vector<32x256xf32> to vector<32x128xf32>
    %cst_57 = arith.constant 2.000000e+01 : f32
    %104 = vector.broadcast %cst_57 : f32 to vector<32x128xf32>
    %105 = arith.cmpf ogt, %103, %104 : vector<32x128xf32>
    %cst_58 = arith.constant 2.000000e+01 : f32
    %106 = vector.broadcast %cst_58 : f32 to vector<32x128xf32>
    %107 = arith.minimumf %103, %106 : vector<32x128xf32>
    %108 = math.exp %107 : vector<32x128xf32>
    %cst_59 = arith.constant 1.000000e+00 : f32
    %109 = vector.broadcast %cst_59 : f32 to vector<32x128xf32>
    %110 = arith.addf %109, %108 : vector<32x128xf32>
    %111 = math.log %110 : vector<32x128xf32>
    %112 = arith.select %105, %103, %111 : vector<32x128xi1>, vector<32x128xf32>
    %113 = arith.mulf %102, %112 : vector<32x128xf32>
    %114 = vector.broadcast %4 : vector<1x128xf32> to vector<32x128xf32>
    %115 = arith.mulf %113, %114 : vector<32x128xf32>
    %116 = arith.truncf %115 : vector<32x128xf32> to vector<32x128xbf16>
    %cst_60 = arith.constant dense<0.000000e+00> : vector<16x128xf32>
    %117 = tpu.matmul %40, %116, %cst_60 {dimension_numbers = #tpu.dot_dimension_numbers<[0], [0], [1], [1], [0, 1, 1, 1], [], []>} : vector<32x16xbf16>, vector<32x128xbf16>, vector<16x128xf32> -> vector<16x128xf32>
    %cst_61 = arith.constant dense<0.000000e+00> : vector<128xf32>
    %118 = vector.multi_reduction <add>, %117, %cst_61 [0] : vector<16x128xf32> to vector<128xf32>
    %119 = vector.shape_cast %118 : vector<128xf32> to vector<1x128xf32>
    %120 = arith.mulf %117, %117 : vector<16x128xf32>
    %cst_62 = arith.constant dense<0.000000e+00> : vector<128xf32>
    %121 = vector.multi_reduction <add>, %120, %cst_62 [0] : vector<16x128xf32> to vector<128xf32>
    %122 = vector.shape_cast %121 : vector<128xf32> to vector<1x128xf32>
    %cst_63 = arith.constant 6.250000e-02 : f32
    %123 = vector.broadcast %cst_63 : f32 to vector<1x128xf32>
    %124 = arith.mulf %119, %123 : vector<1x128xf32>
    %cst_64 = arith.constant 6.250000e-02 : f32
    %125 = vector.broadcast %cst_64 : f32 to vector<1x128xf32>
    %126 = arith.mulf %122, %125 : vector<1x128xf32>
    %127 = arith.mulf %124, %124 : vector<1x128xf32>
    %128 = arith.subf %126, %127 : vector<1x128xf32>
    %cst_65 = arith.constant 0.000000e+00 : f32
    %129 = vector.broadcast %cst_65 : f32 to vector<1x128xf32>
    %130 = arith.maximumf %128, %129 : vector<1x128xf32>
    %131 = vector.broadcast %124 : vector<1x128xf32> to vector<16x128xf32>
    %132 = arith.subf %117, %131 : vector<16x128xf32>
    %cst_66 = arith.constant 9.99999974E-6 : f32
    %133 = vector.broadcast %cst_66 : f32 to vector<1x128xf32>
    %134 = arith.addf %130, %133 : vector<1x128xf32>
    %135 = math.rsqrt %134 : vector<1x128xf32>
    %136 = vector.broadcast %135 : vector<1x128xf32> to vector<16x128xf32>
    %137 = arith.mulf %132, %136 : vector<16x128xf32>
    %138 = vector.broadcast %56 : vector<1x128xf32> to vector<16x128xf32>
    %139 = arith.mulf %137, %138 : vector<16x128xf32>
    %140 = vector.broadcast %58 : vector<1x128xf32> to vector<16x128xf32>
    %141 = arith.addf %139, %140 : vector<16x128xf32>
    %142 = arith.addf %38, %141 : vector<16x128xf32>
    %cst_67 = arith.constant 2.000000e+01 : f32
    %143 = vector.broadcast %cst_67 : f32 to vector<16x128xf32>
    %144 = arith.cmpf ogt, %142, %143 : vector<16x128xf32>
    %cst_68 = arith.constant 2.000000e+01 : f32
    %145 = vector.broadcast %cst_68 : f32 to vector<16x128xf32>
    %146 = arith.minimumf %142, %145 : vector<16x128xf32>
    %147 = math.exp %146 : vector<16x128xf32>
    %cst_69 = arith.constant 1.000000e+00 : f32
    %148 = vector.broadcast %cst_69 : f32 to vector<16x128xf32>
    %149 = arith.addf %148, %147 : vector<16x128xf32>
    %150 = math.log %149 : vector<16x128xf32>
    %151 = arith.select %144, %142, %150 : vector<16x128xi1>, vector<16x128xf32>
    %152 = vector.broadcast %4 : vector<1x128xf32> to vector<16x128xf32>
    %153 = arith.mulf %151, %152 : vector<16x128xf32>
    %c0_70 = arith.constant 0 : index
    %c0_71 = arith.constant 0 : index
    %c0_72 = arith.constant 0 : index
    %154 = vector.load %arg19[%c0_70, %c0_71, %c0_72] : memref<3x128x512xbf16, #tpu.memory_space<vmem>>, vector<1x128x512xbf16>
    %155 = vector.shape_cast %154 : vector<1x128x512xbf16> to vector<128x512xbf16>
    %c0_73 = arith.constant 0 : index
    %c0_74 = arith.constant 0 : index
    %c0_75 = arith.constant 0 : index
    %156 = vector.load %arg20[%c0_73, %c0_74, %c0_75] : memref<3x128x256xbf16, #tpu.memory_space<vmem>>, vector<1x128x256xbf16>
    %157 = vector.shape_cast %156 : vector<1x128x256xbf16> to vector<128x256xbf16>
    %c0_76 = arith.constant 0 : index
    %c0_77 = arith.constant 0 : index
    %c0_78 = arith.constant 0 : index
    %158 = vector.load %arg21[%c0_76, %c0_77, %c0_78] : memref<3x1x256xf32, #tpu.memory_space<vmem>>, vector<1x1x256xf32>
    %159 = vector.shape_cast %158 : vector<1x1x256xf32> to vector<1x256xf32>
    %c0_79 = arith.constant 0 : index
    %c0_80 = arith.constant 0 : index
    %c0_81 = arith.constant 0 : index
    %160 = vector.load %arg22[%c0_79, %c0_80, %c0_81] : memref<3x1x256xf32, #tpu.memory_space<vmem>>, vector<1x1x256xf32>
    %161 = vector.shape_cast %160 : vector<1x1x256xf32> to vector<1x256xf32>
    %c0_82 = arith.constant 0 : index
    %c0_83 = arith.constant 0 : index
    %c0_84 = arith.constant 0 : index
    %162 = vector.load %arg23[%c0_82, %c0_83, %c0_84] : memref<3x1x256xf32, #tpu.memory_space<vmem>>, vector<1x1x256xf32>
    %163 = vector.shape_cast %162 : vector<1x1x256xf32> to vector<1x256xf32>
    %c0_85 = arith.constant 0 : index
    %c0_86 = arith.constant 0 : index
    %c0_87 = arith.constant 0 : index
    %164 = vector.load %arg24[%c0_85, %c0_86, %c0_87] : memref<3x1x128xf32, #tpu.memory_space<vmem>>, vector<1x1x128xf32>
    %165 = vector.shape_cast %164 : vector<1x1x128xf32> to vector<1x128xf32>
    %c0_88 = arith.constant 0 : index
    %c0_89 = arith.constant 0 : index
    %c0_90 = arith.constant 0 : index
    %166 = vector.load %arg25[%c0_88, %c0_89, %c0_90] : memref<3x1x128xf32, #tpu.memory_space<vmem>>, vector<1x1x128xf32>
    %167 = vector.shape_cast %166 : vector<1x1x128xf32> to vector<1x128xf32>
    %cst_91 = arith.constant dense<0.000000e+00> : vector<32x512xf32>
    %168 = tpu.matmul %43, %155, %cst_91 {dimension_numbers = #tpu.dot_dimension_numbers<[1], [0], [0], [1], [0, 0, 1, 1], [], []>} : vector<32x128xbf16>, vector<128x512xbf16>, vector<32x512xf32> -> vector<32x512xf32>
    %cst_92 = arith.constant dense<0.000000e+00> : vector<64x256xf32>
    %169 = tpu.matmul %32, %157, %cst_92 {dimension_numbers = #tpu.dot_dimension_numbers<[1], [0], [0], [1], [0, 0, 1, 1], [], []>} : vector<64x128xbf16>, vector<128x256xbf16>, vector<64x256xf32> -> vector<64x256xf32>
    %170 = vector.extract_strided_slice %168 {offsets = [0, 0], sizes = [32, 256], strides = [1, 1]} : vector<32x512xf32> to vector<32x256xf32>
    %171 = arith.truncf %170 : vector<32x256xf32> to vector<32x256xbf16>
    %172 = vector.extract_strided_slice %168 {offsets = [0, 256], sizes = [32, 256], strides = [1, 1]} : vector<32x512xf32> to vector<32x256xf32>
    %173 = arith.truncf %172 : vector<32x256xf32> to vector<32x256xbf16>
    %cst_93 = arith.constant dense<0.000000e+00> : vector<64x256xf32>
    %174 = tpu.matmul %41, %171, %cst_93 {dimension_numbers = #tpu.dot_dimension_numbers<[1], [0], [0], [1], [0, 0, 1, 1], [], []>} : vector<64x32xbf16>, vector<32x256xbf16>, vector<64x256xf32> -> vector<64x256xf32>
    %cst_94 = arith.constant dense<0.000000e+00> : vector<64x256xf32>
    %175 = tpu.matmul %42, %173, %cst_94 {dimension_numbers = #tpu.dot_dimension_numbers<[1], [0], [0], [1], [0, 0, 1, 1], [], []>} : vector<64x32xbf16>, vector<32x256xbf16>, vector<64x256xf32> -> vector<64x256xf32>
    %176 = arith.addf %174, %175 : vector<64x256xf32>
    %177 = arith.addf %176, %169 : vector<64x256xf32>
    %178 = vector.broadcast %159 : vector<1x256xf32> to vector<64x256xf32>
    %179 = arith.addf %177, %178 : vector<64x256xf32>
    %cst_95 = arith.constant dense<0.000000e+00> : vector<256xf32>
    %180 = vector.multi_reduction <add>, %179, %cst_95 [0] : vector<64x256xf32> to vector<256xf32>
    %181 = vector.shape_cast %180 : vector<256xf32> to vector<1x256xf32>
    %182 = arith.mulf %179, %179 : vector<64x256xf32>
    %cst_96 = arith.constant dense<0.000000e+00> : vector<256xf32>
    %183 = vector.multi_reduction <add>, %182, %cst_96 [0] : vector<64x256xf32> to vector<256xf32>
    %184 = vector.shape_cast %183 : vector<256xf32> to vector<1x256xf32>
    %cst_97 = arith.constant 1.562500e-02 : f32
    %185 = vector.broadcast %cst_97 : f32 to vector<1x256xf32>
    %186 = arith.mulf %181, %185 : vector<1x256xf32>
    %cst_98 = arith.constant 1.562500e-02 : f32
    %187 = vector.broadcast %cst_98 : f32 to vector<1x256xf32>
    %188 = arith.mulf %184, %187 : vector<1x256xf32>
    %189 = arith.mulf %186, %186 : vector<1x256xf32>
    %190 = arith.subf %188, %189 : vector<1x256xf32>
    %cst_99 = arith.constant 0.000000e+00 : f32
    %191 = vector.broadcast %cst_99 : f32 to vector<1x256xf32>
    %192 = arith.maximumf %190, %191 : vector<1x256xf32>
    %193 = vector.broadcast %186 : vector<1x256xf32> to vector<64x256xf32>
    %194 = arith.subf %179, %193 : vector<64x256xf32>
    %cst_100 = arith.constant 9.99999974E-6 : f32
    %195 = vector.broadcast %cst_100 : f32 to vector<1x256xf32>
    %196 = arith.addf %192, %195 : vector<1x256xf32>
    %197 = math.rsqrt %196 : vector<1x256xf32>
    %198 = vector.broadcast %197 : vector<1x256xf32> to vector<64x256xf32>
    %199 = arith.mulf %194, %198 : vector<64x256xf32>
    %200 = vector.broadcast %161 : vector<1x256xf32> to vector<64x256xf32>
    %201 = arith.mulf %199, %200 : vector<64x256xf32>
    %202 = vector.broadcast %163 : vector<1x256xf32> to vector<64x256xf32>
    %203 = arith.addf %201, %202 : vector<64x256xf32>
    %204 = vector.extract_strided_slice %203 {offsets = [0, 0], sizes = [64, 128], strides = [1, 1]} : vector<64x256xf32> to vector<64x128xf32>
    %cst_101 = arith.constant 5.000000e-01 : f32
    %205 = vector.broadcast %cst_101 : f32 to vector<64x128xf32>
    %206 = arith.mulf %205, %204 : vector<64x128xf32>
    %207 = math.tanh %206 : vector<64x128xf32>
    %cst_102 = arith.constant 5.000000e-01 : f32
    %208 = vector.broadcast %cst_102 : f32 to vector<64x128xf32>
    %209 = arith.mulf %208, %207 : vector<64x128xf32>
    %cst_103 = arith.constant 5.000000e-01 : f32
    %210 = vector.broadcast %cst_103 : f32 to vector<64x128xf32>
    %211 = arith.addf %209, %210 : vector<64x128xf32>
    %212 = vector.extract_strided_slice %203 {offsets = [0, 128], sizes = [64, 128], strides = [1, 1]} : vector<64x256xf32> to vector<64x128xf32>
    %cst_104 = arith.constant 2.000000e+01 : f32
    %213 = vector.broadcast %cst_104 : f32 to vector<64x128xf32>
    %214 = arith.cmpf ogt, %212, %213 : vector<64x128xf32>
    %cst_105 = arith.constant 2.000000e+01 : f32
    %215 = vector.broadcast %cst_105 : f32 to vector<64x128xf32>
    %216 = arith.minimumf %212, %215 : vector<64x128xf32>
    %217 = math.exp %216 : vector<64x128xf32>
    %cst_106 = arith.constant 1.000000e+00 : f32
    %218 = vector.broadcast %cst_106 : f32 to vector<64x128xf32>
    %219 = arith.addf %218, %217 : vector<64x128xf32>
    %220 = math.log %219 : vector<64x128xf32>
    %221 = arith.select %214, %212, %220 : vector<64x128xi1>, vector<64x128xf32>
    %222 = arith.mulf %211, %221 : vector<64x128xf32>
    %223 = vector.broadcast %9 : vector<1x128xf32> to vector<64x128xf32>
    %224 = arith.mulf %222, %223 : vector<64x128xf32>
    %225 = arith.truncf %224 : vector<64x128xf32> to vector<64x128xbf16>
    %cst_107 = arith.constant dense<0.000000e+00> : vector<32x128xf32>
    %226 = tpu.matmul %42, %225, %cst_107 {dimension_numbers = #tpu.dot_dimension_numbers<[0], [0], [1], [1], [0, 1, 1, 1], [], []>} : vector<64x32xbf16>, vector<64x128xbf16>, vector<32x128xf32> -> vector<32x128xf32>
    %cst_108 = arith.constant dense<0.000000e+00> : vector<128xf32>
    %227 = vector.multi_reduction <add>, %226, %cst_108 [0] : vector<32x128xf32> to vector<128xf32>
    %228 = vector.shape_cast %227 : vector<128xf32> to vector<1x128xf32>
    %229 = arith.mulf %226, %226 : vector<32x128xf32>
    %cst_109 = arith.constant dense<0.000000e+00> : vector<128xf32>
    %230 = vector.multi_reduction <add>, %229, %cst_109 [0] : vector<32x128xf32> to vector<128xf32>
    %231 = vector.shape_cast %230 : vector<128xf32> to vector<1x128xf32>
    %cst_110 = arith.constant 3.125000e-02 : f32
    %232 = vector.broadcast %cst_110 : f32 to vector<1x128xf32>
    %233 = arith.mulf %228, %232 : vector<1x128xf32>
    %cst_111 = arith.constant 3.125000e-02 : f32
    %234 = vector.broadcast %cst_111 : f32 to vector<1x128xf32>
    %235 = arith.mulf %231, %234 : vector<1x128xf32>
    %236 = arith.mulf %233, %233 : vector<1x128xf32>
    %237 = arith.subf %235, %236 : vector<1x128xf32>
    %cst_112 = arith.constant 0.000000e+00 : f32
    %238 = vector.broadcast %cst_112 : f32 to vector<1x128xf32>
    %239 = arith.maximumf %237, %238 : vector<1x128xf32>
    %240 = vector.broadcast %233 : vector<1x128xf32> to vector<32x128xf32>
    %241 = arith.subf %226, %240 : vector<32x128xf32>
    %cst_113 = arith.constant 9.99999974E-6 : f32
    %242 = vector.broadcast %cst_113 : f32 to vector<1x128xf32>
    %243 = arith.addf %239, %242 : vector<1x128xf32>
    %244 = math.rsqrt %243 : vector<1x128xf32>
    %245 = vector.broadcast %244 : vector<1x128xf32> to vector<32x128xf32>
    %246 = arith.mulf %241, %245 : vector<32x128xf32>
    %247 = vector.broadcast %165 : vector<1x128xf32> to vector<32x128xf32>
    %248 = arith.mulf %246, %247 : vector<32x128xf32>
    %249 = vector.broadcast %167 : vector<1x128xf32> to vector<32x128xf32>
    %250 = arith.addf %248, %249 : vector<32x128xf32>
    %251 = arith.addf %20, %250 : vector<32x128xf32>
    %cst_114 = arith.constant 2.000000e+01 : f32
    %252 = vector.broadcast %cst_114 : f32 to vector<32x128xf32>
    %253 = arith.cmpf ogt, %251, %252 : vector<32x128xf32>
    %cst_115 = arith.constant 2.000000e+01 : f32
    %254 = vector.broadcast %cst_115 : f32 to vector<32x128xf32>
    %255 = arith.minimumf %251, %254 : vector<32x128xf32>
    %256 = math.exp %255 : vector<32x128xf32>
    %cst_116 = arith.constant 1.000000e+00 : f32
    %257 = vector.broadcast %cst_116 : f32 to vector<32x128xf32>
    %258 = arith.addf %257, %256 : vector<32x128xf32>
    %259 = math.log %258 : vector<32x128xf32>
    %260 = arith.select %253, %251, %259 : vector<32x128xi1>, vector<32x128xf32>
    %261 = vector.broadcast %9 : vector<1x128xf32> to vector<32x128xf32>
    %262 = arith.mulf %260, %261 : vector<32x128xf32>
    %263 = arith.truncf %262 : vector<32x128xf32> to vector<32x128xbf16>
    %264 = arith.truncf %153 : vector<16x128xf32> to vector<16x128xbf16>
    %c1 = arith.constant 1 : index
    %c0_117 = arith.constant 0 : index
    %c0_118 = arith.constant 0 : index
    %265 = vector.load %arg12[%c1, %c0_117, %c0_118] : memref<3x128x512xbf16, #tpu.memory_space<vmem>>, vector<1x128x512xbf16>
    %266 = vector.shape_cast %265 : vector<1x128x512xbf16> to vector<128x512xbf16>
    %c1_119 = arith.constant 1 : index
    %c0_120 = arith.constant 0 : index
    %c0_121 = arith.constant 0 : index
    %267 = vector.load %arg13[%c1_119, %c0_120, %c0_121] : memref<3x128x256xbf16, #tpu.memory_space<vmem>>, vector<1x128x256xbf16>
    %268 = vector.shape_cast %267 : vector<1x128x256xbf16> to vector<128x256xbf16>
    %c1_122 = arith.constant 1 : index
    %c0_123 = arith.constant 0 : index
    %c0_124 = arith.constant 0 : index
    %269 = vector.load %arg14[%c1_122, %c0_123, %c0_124] : memref<3x1x256xf32, #tpu.memory_space<vmem>>, vector<1x1x256xf32>
    %270 = vector.shape_cast %269 : vector<1x1x256xf32> to vector<1x256xf32>
    %c1_125 = arith.constant 1 : index
    %c0_126 = arith.constant 0 : index
    %c0_127 = arith.constant 0 : index
    %271 = vector.load %arg15[%c1_125, %c0_126, %c0_127] : memref<3x1x256xf32, #tpu.memory_space<vmem>>, vector<1x1x256xf32>
    %272 = vector.shape_cast %271 : vector<1x1x256xf32> to vector<1x256xf32>
    %c1_128 = arith.constant 1 : index
    %c0_129 = arith.constant 0 : index
    %c0_130 = arith.constant 0 : index
    %273 = vector.load %arg16[%c1_128, %c0_129, %c0_130] : memref<3x1x256xf32, #tpu.memory_space<vmem>>, vector<1x1x256xf32>
    %274 = vector.shape_cast %273 : vector<1x1x256xf32> to vector<1x256xf32>
    %c1_131 = arith.constant 1 : index
    %c0_132 = arith.constant 0 : index
    %c0_133 = arith.constant 0 : index
    %275 = vector.load %arg17[%c1_131, %c0_132, %c0_133] : memref<3x1x128xf32, #tpu.memory_space<vmem>>, vector<1x1x128xf32>
    %276 = vector.shape_cast %275 : vector<1x1x128xf32> to vector<1x128xf32>
    %c1_134 = arith.constant 1 : index
    %c0_135 = arith.constant 0 : index
    %c0_136 = arith.constant 0 : index
    %277 = vector.load %arg18[%c1_134, %c0_135, %c0_136] : memref<3x1x128xf32, #tpu.memory_space<vmem>>, vector<1x1x128xf32>
    %278 = vector.shape_cast %277 : vector<1x1x128xf32> to vector<1x128xf32>
    %cst_137 = arith.constant dense<0.000000e+00> : vector<16x512xf32>
    %279 = tpu.matmul %264, %266, %cst_137 {dimension_numbers = #tpu.dot_dimension_numbers<[1], [0], [0], [1], [0, 0, 1, 1], [], []>} : vector<16x128xbf16>, vector<128x512xbf16>, vector<16x512xf32> -> vector<16x512xf32>
    %cst_138 = arith.constant dense<0.000000e+00> : vector<32x256xf32>
    %280 = tpu.matmul %263, %268, %cst_138 {dimension_numbers = #tpu.dot_dimension_numbers<[1], [0], [0], [1], [0, 0, 1, 1], [], []>} : vector<32x128xbf16>, vector<128x256xbf16>, vector<32x256xf32> -> vector<32x256xf32>
    %281 = vector.extract_strided_slice %279 {offsets = [0, 0], sizes = [16, 256], strides = [1, 1]} : vector<16x512xf32> to vector<16x256xf32>
    %282 = arith.truncf %281 : vector<16x256xf32> to vector<16x256xbf16>
    %283 = vector.extract_strided_slice %279 {offsets = [0, 256], sizes = [16, 256], strides = [1, 1]} : vector<16x512xf32> to vector<16x256xf32>
    %284 = arith.truncf %283 : vector<16x256xf32> to vector<16x256xbf16>
    %cst_139 = arith.constant dense<0.000000e+00> : vector<32x256xf32>
    %285 = tpu.matmul %39, %282, %cst_139 {dimension_numbers = #tpu.dot_dimension_numbers<[1], [0], [0], [1], [0, 0, 1, 1], [], []>} : vector<32x16xbf16>, vector<16x256xbf16>, vector<32x256xf32> -> vector<32x256xf32>
    %cst_140 = arith.constant dense<0.000000e+00> : vector<32x256xf32>
    %286 = tpu.matmul %40, %284, %cst_140 {dimension_numbers = #tpu.dot_dimension_numbers<[1], [0], [0], [1], [0, 0, 1, 1], [], []>} : vector<32x16xbf16>, vector<16x256xbf16>, vector<32x256xf32> -> vector<32x256xf32>
    %287 = arith.addf %285, %286 : vector<32x256xf32>
    %288 = arith.addf %287, %280 : vector<32x256xf32>
    %289 = vector.broadcast %270 : vector<1x256xf32> to vector<32x256xf32>
    %290 = arith.addf %288, %289 : vector<32x256xf32>
    %cst_141 = arith.constant dense<0.000000e+00> : vector<256xf32>
    %291 = vector.multi_reduction <add>, %290, %cst_141 [0] : vector<32x256xf32> to vector<256xf32>
    %292 = vector.shape_cast %291 : vector<256xf32> to vector<1x256xf32>
    %293 = arith.mulf %290, %290 : vector<32x256xf32>
    %cst_142 = arith.constant dense<0.000000e+00> : vector<256xf32>
    %294 = vector.multi_reduction <add>, %293, %cst_142 [0] : vector<32x256xf32> to vector<256xf32>
    %295 = vector.shape_cast %294 : vector<256xf32> to vector<1x256xf32>
    %cst_143 = arith.constant 3.125000e-02 : f32
    %296 = vector.broadcast %cst_143 : f32 to vector<1x256xf32>
    %297 = arith.mulf %292, %296 : vector<1x256xf32>
    %cst_144 = arith.constant 3.125000e-02 : f32
    %298 = vector.broadcast %cst_144 : f32 to vector<1x256xf32>
    %299 = arith.mulf %295, %298 : vector<1x256xf32>
    %300 = arith.mulf %297, %297 : vector<1x256xf32>
    %301 = arith.subf %299, %300 : vector<1x256xf32>
    %cst_145 = arith.constant 0.000000e+00 : f32
    %302 = vector.broadcast %cst_145 : f32 to vector<1x256xf32>
    %303 = arith.maximumf %301, %302 : vector<1x256xf32>
    %304 = vector.broadcast %297 : vector<1x256xf32> to vector<32x256xf32>
    %305 = arith.subf %290, %304 : vector<32x256xf32>
    %cst_146 = arith.constant 9.99999974E-6 : f32
    %306 = vector.broadcast %cst_146 : f32 to vector<1x256xf32>
    %307 = arith.addf %303, %306 : vector<1x256xf32>
    %308 = math.rsqrt %307 : vector<1x256xf32>
    %309 = vector.broadcast %308 : vector<1x256xf32> to vector<32x256xf32>
    %310 = arith.mulf %305, %309 : vector<32x256xf32>
    %311 = vector.broadcast %272 : vector<1x256xf32> to vector<32x256xf32>
    %312 = arith.mulf %310, %311 : vector<32x256xf32>
    %313 = vector.broadcast %274 : vector<1x256xf32> to vector<32x256xf32>
    %314 = arith.addf %312, %313 : vector<32x256xf32>
    %315 = vector.extract_strided_slice %314 {offsets = [0, 0], sizes = [32, 128], strides = [1, 1]} : vector<32x256xf32> to vector<32x128xf32>
    %cst_147 = arith.constant 5.000000e-01 : f32
    %316 = vector.broadcast %cst_147 : f32 to vector<32x128xf32>
    %317 = arith.mulf %316, %315 : vector<32x128xf32>
    %318 = math.tanh %317 : vector<32x128xf32>
    %cst_148 = arith.constant 5.000000e-01 : f32
    %319 = vector.broadcast %cst_148 : f32 to vector<32x128xf32>
    %320 = arith.mulf %319, %318 : vector<32x128xf32>
    %cst_149 = arith.constant 5.000000e-01 : f32
    %321 = vector.broadcast %cst_149 : f32 to vector<32x128xf32>
    %322 = arith.addf %320, %321 : vector<32x128xf32>
    %323 = vector.extract_strided_slice %314 {offsets = [0, 128], sizes = [32, 128], strides = [1, 1]} : vector<32x256xf32> to vector<32x128xf32>
    %cst_150 = arith.constant 2.000000e+01 : f32
    %324 = vector.broadcast %cst_150 : f32 to vector<32x128xf32>
    %325 = arith.cmpf ogt, %323, %324 : vector<32x128xf32>
    %cst_151 = arith.constant 2.000000e+01 : f32
    %326 = vector.broadcast %cst_151 : f32 to vector<32x128xf32>
    %327 = arith.minimumf %323, %326 : vector<32x128xf32>
    %328 = math.exp %327 : vector<32x128xf32>
    %cst_152 = arith.constant 1.000000e+00 : f32
    %329 = vector.broadcast %cst_152 : f32 to vector<32x128xf32>
    %330 = arith.addf %329, %328 : vector<32x128xf32>
    %331 = math.log %330 : vector<32x128xf32>
    %332 = arith.select %325, %323, %331 : vector<32x128xi1>, vector<32x128xf32>
    %333 = arith.mulf %322, %332 : vector<32x128xf32>
    %334 = vector.broadcast %4 : vector<1x128xf32> to vector<32x128xf32>
    %335 = arith.mulf %333, %334 : vector<32x128xf32>
    %336 = arith.truncf %335 : vector<32x128xf32> to vector<32x128xbf16>
    %cst_153 = arith.constant dense<0.000000e+00> : vector<16x128xf32>
    %337 = tpu.matmul %40, %336, %cst_153 {dimension_numbers = #tpu.dot_dimension_numbers<[0], [0], [1], [1], [0, 1, 1, 1], [], []>} : vector<32x16xbf16>, vector<32x128xbf16>, vector<16x128xf32> -> vector<16x128xf32>
    %cst_154 = arith.constant dense<0.000000e+00> : vector<128xf32>
    %338 = vector.multi_reduction <add>, %337, %cst_154 [0] : vector<16x128xf32> to vector<128xf32>
    %339 = vector.shape_cast %338 : vector<128xf32> to vector<1x128xf32>
    %340 = arith.mulf %337, %337 : vector<16x128xf32>
    %cst_155 = arith.constant dense<0.000000e+00> : vector<128xf32>
    %341 = vector.multi_reduction <add>, %340, %cst_155 [0] : vector<16x128xf32> to vector<128xf32>
    %342 = vector.shape_cast %341 : vector<128xf32> to vector<1x128xf32>
    %cst_156 = arith.constant 6.250000e-02 : f32
    %343 = vector.broadcast %cst_156 : f32 to vector<1x128xf32>
    %344 = arith.mulf %339, %343 : vector<1x128xf32>
    %cst_157 = arith.constant 6.250000e-02 : f32
    %345 = vector.broadcast %cst_157 : f32 to vector<1x128xf32>
    %346 = arith.mulf %342, %345 : vector<1x128xf32>
    %347 = arith.mulf %344, %344 : vector<1x128xf32>
    %348 = arith.subf %346, %347 : vector<1x128xf32>
    %cst_158 = arith.constant 0.000000e+00 : f32
    %349 = vector.broadcast %cst_158 : f32 to vector<1x128xf32>
    %350 = arith.maximumf %348, %349 : vector<1x128xf32>
    %351 = vector.broadcast %344 : vector<1x128xf32> to vector<16x128xf32>
    %352 = arith.subf %337, %351 : vector<16x128xf32>
    %cst_159 = arith.constant 9.99999974E-6 : f32
    %353 = vector.broadcast %cst_159 : f32 to vector<1x128xf32>
    %354 = arith.addf %350, %353 : vector<1x128xf32>
    %355 = math.rsqrt %354 : vector<1x128xf32>
    %356 = vector.broadcast %355 : vector<1x128xf32> to vector<16x128xf32>
    %357 = arith.mulf %352, %356 : vector<16x128xf32>
    %358 = vector.broadcast %276 : vector<1x128xf32> to vector<16x128xf32>
    %359 = arith.mulf %357, %358 : vector<16x128xf32>
    %360 = vector.broadcast %278 : vector<1x128xf32> to vector<16x128xf32>
    %361 = arith.addf %359, %360 : vector<16x128xf32>
    %362 = arith.addf %153, %361 : vector<16x128xf32>
    %cst_160 = arith.constant 2.000000e+01 : f32
    %363 = vector.broadcast %cst_160 : f32 to vector<16x128xf32>
    %364 = arith.cmpf ogt, %362, %363 : vector<16x128xf32>
    %cst_161 = arith.constant 2.000000e+01 : f32
    %365 = vector.broadcast %cst_161 : f32 to vector<16x128xf32>
    %366 = arith.minimumf %362, %365 : vector<16x128xf32>
    %367 = math.exp %366 : vector<16x128xf32>
    %cst_162 = arith.constant 1.000000e+00 : f32
    %368 = vector.broadcast %cst_162 : f32 to vector<16x128xf32>
    %369 = arith.addf %368, %367 : vector<16x128xf32>
    %370 = math.log %369 : vector<16x128xf32>
    %371 = arith.select %364, %362, %370 : vector<16x128xi1>, vector<16x128xf32>
    %372 = vector.broadcast %4 : vector<1x128xf32> to vector<16x128xf32>
    %373 = arith.mulf %371, %372 : vector<16x128xf32>
    %c1_163 = arith.constant 1 : index
    %c0_164 = arith.constant 0 : index
    %c0_165 = arith.constant 0 : index
    %374 = vector.load %arg19[%c1_163, %c0_164, %c0_165] : memref<3x128x512xbf16, #tpu.memory_space<vmem>>, vector<1x128x512xbf16>
    %375 = vector.shape_cast %374 : vector<1x128x512xbf16> to vector<128x512xbf16>
    %c1_166 = arith.constant 1 : index
    %c0_167 = arith.constant 0 : index
    %c0_168 = arith.constant 0 : index
    %376 = vector.load %arg20[%c1_166, %c0_167, %c0_168] : memref<3x128x256xbf16, #tpu.memory_space<vmem>>, vector<1x128x256xbf16>
    %377 = vector.shape_cast %376 : vector<1x128x256xbf16> to vector<128x256xbf16>
    %c1_169 = arith.constant 1 : index
    %c0_170 = arith.constant 0 : index
    %c0_171 = arith.constant 0 : index
    %378 = vector.load %arg21[%c1_169, %c0_170, %c0_171] : memref<3x1x256xf32, #tpu.memory_space<vmem>>, vector<1x1x256xf32>
    %379 = vector.shape_cast %378 : vector<1x1x256xf32> to vector<1x256xf32>
    %c1_172 = arith.constant 1 : index
    %c0_173 = arith.constant 0 : index
    %c0_174 = arith.constant 0 : index
    %380 = vector.load %arg22[%c1_172, %c0_173, %c0_174] : memref<3x1x256xf32, #tpu.memory_space<vmem>>, vector<1x1x256xf32>
    %381 = vector.shape_cast %380 : vector<1x1x256xf32> to vector<1x256xf32>
    %c1_175 = arith.constant 1 : index
    %c0_176 = arith.constant 0 : index
    %c0_177 = arith.constant 0 : index
    %382 = vector.load %arg23[%c1_175, %c0_176, %c0_177] : memref<3x1x256xf32, #tpu.memory_space<vmem>>, vector<1x1x256xf32>
    %383 = vector.shape_cast %382 : vector<1x1x256xf32> to vector<1x256xf32>
    %c1_178 = arith.constant 1 : index
    %c0_179 = arith.constant 0 : index
    %c0_180 = arith.constant 0 : index
    %384 = vector.load %arg24[%c1_178, %c0_179, %c0_180] : memref<3x1x128xf32, #tpu.memory_space<vmem>>, vector<1x1x128xf32>
    %385 = vector.shape_cast %384 : vector<1x1x128xf32> to vector<1x128xf32>
    %c1_181 = arith.constant 1 : index
    %c0_182 = arith.constant 0 : index
    %c0_183 = arith.constant 0 : index
    %386 = vector.load %arg25[%c1_181, %c0_182, %c0_183] : memref<3x1x128xf32, #tpu.memory_space<vmem>>, vector<1x1x128xf32>
    %387 = vector.shape_cast %386 : vector<1x1x128xf32> to vector<1x128xf32>
    %cst_184 = arith.constant dense<0.000000e+00> : vector<32x512xf32>
    %388 = tpu.matmul %263, %375, %cst_184 {dimension_numbers = #tpu.dot_dimension_numbers<[1], [0], [0], [1], [0, 0, 1, 1], [], []>} : vector<32x128xbf16>, vector<128x512xbf16>, vector<32x512xf32> -> vector<32x512xf32>
    %cst_185 = arith.constant dense<0.000000e+00> : vector<64x256xf32>
    %389 = tpu.matmul %32, %377, %cst_185 {dimension_numbers = #tpu.dot_dimension_numbers<[1], [0], [0], [1], [0, 0, 1, 1], [], []>} : vector<64x128xbf16>, vector<128x256xbf16>, vector<64x256xf32> -> vector<64x256xf32>
    %390 = vector.extract_strided_slice %388 {offsets = [0, 0], sizes = [32, 256], strides = [1, 1]} : vector<32x512xf32> to vector<32x256xf32>
    %391 = arith.truncf %390 : vector<32x256xf32> to vector<32x256xbf16>
    %392 = vector.extract_strided_slice %388 {offsets = [0, 256], sizes = [32, 256], strides = [1, 1]} : vector<32x512xf32> to vector<32x256xf32>
    %393 = arith.truncf %392 : vector<32x256xf32> to vector<32x256xbf16>
    %cst_186 = arith.constant dense<0.000000e+00> : vector<64x256xf32>
    %394 = tpu.matmul %41, %391, %cst_186 {dimension_numbers = #tpu.dot_dimension_numbers<[1], [0], [0], [1], [0, 0, 1, 1], [], []>} : vector<64x32xbf16>, vector<32x256xbf16>, vector<64x256xf32> -> vector<64x256xf32>
    %cst_187 = arith.constant dense<0.000000e+00> : vector<64x256xf32>
    %395 = tpu.matmul %42, %393, %cst_187 {dimension_numbers = #tpu.dot_dimension_numbers<[1], [0], [0], [1], [0, 0, 1, 1], [], []>} : vector<64x32xbf16>, vector<32x256xbf16>, vector<64x256xf32> -> vector<64x256xf32>
    %396 = arith.addf %394, %395 : vector<64x256xf32>
    %397 = arith.addf %396, %389 : vector<64x256xf32>
    %398 = vector.broadcast %379 : vector<1x256xf32> to vector<64x256xf32>
    %399 = arith.addf %397, %398 : vector<64x256xf32>
    %cst_188 = arith.constant dense<0.000000e+00> : vector<256xf32>
    %400 = vector.multi_reduction <add>, %399, %cst_188 [0] : vector<64x256xf32> to vector<256xf32>
    %401 = vector.shape_cast %400 : vector<256xf32> to vector<1x256xf32>
    %402 = arith.mulf %399, %399 : vector<64x256xf32>
    %cst_189 = arith.constant dense<0.000000e+00> : vector<256xf32>
    %403 = vector.multi_reduction <add>, %402, %cst_189 [0] : vector<64x256xf32> to vector<256xf32>
    %404 = vector.shape_cast %403 : vector<256xf32> to vector<1x256xf32>
    %cst_190 = arith.constant 1.562500e-02 : f32
    %405 = vector.broadcast %cst_190 : f32 to vector<1x256xf32>
    %406 = arith.mulf %401, %405 : vector<1x256xf32>
    %cst_191 = arith.constant 1.562500e-02 : f32
    %407 = vector.broadcast %cst_191 : f32 to vector<1x256xf32>
    %408 = arith.mulf %404, %407 : vector<1x256xf32>
    %409 = arith.mulf %406, %406 : vector<1x256xf32>
    %410 = arith.subf %408, %409 : vector<1x256xf32>
    %cst_192 = arith.constant 0.000000e+00 : f32
    %411 = vector.broadcast %cst_192 : f32 to vector<1x256xf32>
    %412 = arith.maximumf %410, %411 : vector<1x256xf32>
    %413 = vector.broadcast %406 : vector<1x256xf32> to vector<64x256xf32>
    %414 = arith.subf %399, %413 : vector<64x256xf32>
    %cst_193 = arith.constant 9.99999974E-6 : f32
    %415 = vector.broadcast %cst_193 : f32 to vector<1x256xf32>
    %416 = arith.addf %412, %415 : vector<1x256xf32>
    %417 = math.rsqrt %416 : vector<1x256xf32>
    %418 = vector.broadcast %417 : vector<1x256xf32> to vector<64x256xf32>
    %419 = arith.mulf %414, %418 : vector<64x256xf32>
    %420 = vector.broadcast %381 : vector<1x256xf32> to vector<64x256xf32>
    %421 = arith.mulf %419, %420 : vector<64x256xf32>
    %422 = vector.broadcast %383 : vector<1x256xf32> to vector<64x256xf32>
    %423 = arith.addf %421, %422 : vector<64x256xf32>
    %424 = vector.extract_strided_slice %423 {offsets = [0, 0], sizes = [64, 128], strides = [1, 1]} : vector<64x256xf32> to vector<64x128xf32>
    %cst_194 = arith.constant 5.000000e-01 : f32
    %425 = vector.broadcast %cst_194 : f32 to vector<64x128xf32>
    %426 = arith.mulf %425, %424 : vector<64x128xf32>
    %427 = math.tanh %426 : vector<64x128xf32>
    %cst_195 = arith.constant 5.000000e-01 : f32
    %428 = vector.broadcast %cst_195 : f32 to vector<64x128xf32>
    %429 = arith.mulf %428, %427 : vector<64x128xf32>
    %cst_196 = arith.constant 5.000000e-01 : f32
    %430 = vector.broadcast %cst_196 : f32 to vector<64x128xf32>
    %431 = arith.addf %429, %430 : vector<64x128xf32>
    %432 = vector.extract_strided_slice %423 {offsets = [0, 128], sizes = [64, 128], strides = [1, 1]} : vector<64x256xf32> to vector<64x128xf32>
    %cst_197 = arith.constant 2.000000e+01 : f32
    %433 = vector.broadcast %cst_197 : f32 to vector<64x128xf32>
    %434 = arith.cmpf ogt, %432, %433 : vector<64x128xf32>
    %cst_198 = arith.constant 2.000000e+01 : f32
    %435 = vector.broadcast %cst_198 : f32 to vector<64x128xf32>
    %436 = arith.minimumf %432, %435 : vector<64x128xf32>
    %437 = math.exp %436 : vector<64x128xf32>
    %cst_199 = arith.constant 1.000000e+00 : f32
    %438 = vector.broadcast %cst_199 : f32 to vector<64x128xf32>
    %439 = arith.addf %438, %437 : vector<64x128xf32>
    %440 = math.log %439 : vector<64x128xf32>
    %441 = arith.select %434, %432, %440 : vector<64x128xi1>, vector<64x128xf32>
    %442 = arith.mulf %431, %441 : vector<64x128xf32>
    %443 = vector.broadcast %9 : vector<1x128xf32> to vector<64x128xf32>
    %444 = arith.mulf %442, %443 : vector<64x128xf32>
    %445 = arith.truncf %444 : vector<64x128xf32> to vector<64x128xbf16>
    %cst_200 = arith.constant dense<0.000000e+00> : vector<32x128xf32>
    %446 = tpu.matmul %42, %445, %cst_200 {dimension_numbers = #tpu.dot_dimension_numbers<[0], [0], [1], [1], [0, 1, 1, 1], [], []>} : vector<64x32xbf16>, vector<64x128xbf16>, vector<32x128xf32> -> vector<32x128xf32>
    %cst_201 = arith.constant dense<0.000000e+00> : vector<128xf32>
    %447 = vector.multi_reduction <add>, %446, %cst_201 [0] : vector<32x128xf32> to vector<128xf32>
    %448 = vector.shape_cast %447 : vector<128xf32> to vector<1x128xf32>
    %449 = arith.mulf %446, %446 : vector<32x128xf32>
    %cst_202 = arith.constant dense<0.000000e+00> : vector<128xf32>
    %450 = vector.multi_reduction <add>, %449, %cst_202 [0] : vector<32x128xf32> to vector<128xf32>
    %451 = vector.shape_cast %450 : vector<128xf32> to vector<1x128xf32>
    %cst_203 = arith.constant 3.125000e-02 : f32
    %452 = vector.broadcast %cst_203 : f32 to vector<1x128xf32>
    %453 = arith.mulf %448, %452 : vector<1x128xf32>
    %cst_204 = arith.constant 3.125000e-02 : f32
    %454 = vector.broadcast %cst_204 : f32 to vector<1x128xf32>
    %455 = arith.mulf %451, %454 : vector<1x128xf32>
    %456 = arith.mulf %453, %453 : vector<1x128xf32>
    %457 = arith.subf %455, %456 : vector<1x128xf32>
    %cst_205 = arith.constant 0.000000e+00 : f32
    %458 = vector.broadcast %cst_205 : f32 to vector<1x128xf32>
    %459 = arith.maximumf %457, %458 : vector<1x128xf32>
    %460 = vector.broadcast %453 : vector<1x128xf32> to vector<32x128xf32>
    %461 = arith.subf %446, %460 : vector<32x128xf32>
    %cst_206 = arith.constant 9.99999974E-6 : f32
    %462 = vector.broadcast %cst_206 : f32 to vector<1x128xf32>
    %463 = arith.addf %459, %462 : vector<1x128xf32>
    %464 = math.rsqrt %463 : vector<1x128xf32>
    %465 = vector.broadcast %464 : vector<1x128xf32> to vector<32x128xf32>
    %466 = arith.mulf %461, %465 : vector<32x128xf32>
    %467 = vector.broadcast %385 : vector<1x128xf32> to vector<32x128xf32>
    %468 = arith.mulf %466, %467 : vector<32x128xf32>
    %469 = vector.broadcast %387 : vector<1x128xf32> to vector<32x128xf32>
    %470 = arith.addf %468, %469 : vector<32x128xf32>
    %471 = arith.addf %262, %470 : vector<32x128xf32>
    %cst_207 = arith.constant 2.000000e+01 : f32
    %472 = vector.broadcast %cst_207 : f32 to vector<32x128xf32>
    %473 = arith.cmpf ogt, %471, %472 : vector<32x128xf32>
    %cst_208 = arith.constant 2.000000e+01 : f32
    %474 = vector.broadcast %cst_208 : f32 to vector<32x128xf32>
    %475 = arith.minimumf %471, %474 : vector<32x128xf32>
    %476 = math.exp %475 : vector<32x128xf32>
    %cst_209 = arith.constant 1.000000e+00 : f32
    %477 = vector.broadcast %cst_209 : f32 to vector<32x128xf32>
    %478 = arith.addf %477, %476 : vector<32x128xf32>
    %479 = math.log %478 : vector<32x128xf32>
    %480 = arith.select %473, %471, %479 : vector<32x128xi1>, vector<32x128xf32>
    %481 = vector.broadcast %9 : vector<1x128xf32> to vector<32x128xf32>
    %482 = arith.mulf %480, %481 : vector<32x128xf32>
    %483 = arith.truncf %482 : vector<32x128xf32> to vector<32x128xbf16>
    %484 = arith.truncf %373 : vector<16x128xf32> to vector<16x128xbf16>
    %c2 = arith.constant 2 : index
    %c0_210 = arith.constant 0 : index
    %c0_211 = arith.constant 0 : index
    %485 = vector.load %arg12[%c2, %c0_210, %c0_211] : memref<3x128x512xbf16, #tpu.memory_space<vmem>>, vector<1x128x512xbf16>
    %486 = vector.shape_cast %485 : vector<1x128x512xbf16> to vector<128x512xbf16>
    %c2_212 = arith.constant 2 : index
    %c0_213 = arith.constant 0 : index
    %c0_214 = arith.constant 0 : index
    %487 = vector.load %arg13[%c2_212, %c0_213, %c0_214] : memref<3x128x256xbf16, #tpu.memory_space<vmem>>, vector<1x128x256xbf16>
    %488 = vector.shape_cast %487 : vector<1x128x256xbf16> to vector<128x256xbf16>
    %c2_215 = arith.constant 2 : index
    %c0_216 = arith.constant 0 : index
    %c0_217 = arith.constant 0 : index
    %489 = vector.load %arg14[%c2_215, %c0_216, %c0_217] : memref<3x1x256xf32, #tpu.memory_space<vmem>>, vector<1x1x256xf32>
    %490 = vector.shape_cast %489 : vector<1x1x256xf32> to vector<1x256xf32>
    %c2_218 = arith.constant 2 : index
    %c0_219 = arith.constant 0 : index
    %c0_220 = arith.constant 0 : index
    %491 = vector.load %arg15[%c2_218, %c0_219, %c0_220] : memref<3x1x256xf32, #tpu.memory_space<vmem>>, vector<1x1x256xf32>
    %492 = vector.shape_cast %491 : vector<1x1x256xf32> to vector<1x256xf32>
    %c2_221 = arith.constant 2 : index
    %c0_222 = arith.constant 0 : index
    %c0_223 = arith.constant 0 : index
    %493 = vector.load %arg16[%c2_221, %c0_222, %c0_223] : memref<3x1x256xf32, #tpu.memory_space<vmem>>, vector<1x1x256xf32>
    %494 = vector.shape_cast %493 : vector<1x1x256xf32> to vector<1x256xf32>
    %c2_224 = arith.constant 2 : index
    %c0_225 = arith.constant 0 : index
    %c0_226 = arith.constant 0 : index
    %495 = vector.load %arg17[%c2_224, %c0_225, %c0_226] : memref<3x1x128xf32, #tpu.memory_space<vmem>>, vector<1x1x128xf32>
    %496 = vector.shape_cast %495 : vector<1x1x128xf32> to vector<1x128xf32>
    %c2_227 = arith.constant 2 : index
    %c0_228 = arith.constant 0 : index
    %c0_229 = arith.constant 0 : index
    %497 = vector.load %arg18[%c2_227, %c0_228, %c0_229] : memref<3x1x128xf32, #tpu.memory_space<vmem>>, vector<1x1x128xf32>
    %498 = vector.shape_cast %497 : vector<1x1x128xf32> to vector<1x128xf32>
    %cst_230 = arith.constant dense<0.000000e+00> : vector<16x512xf32>
    %499 = tpu.matmul %484, %486, %cst_230 {dimension_numbers = #tpu.dot_dimension_numbers<[1], [0], [0], [1], [0, 0, 1, 1], [], []>} : vector<16x128xbf16>, vector<128x512xbf16>, vector<16x512xf32> -> vector<16x512xf32>
    %cst_231 = arith.constant dense<0.000000e+00> : vector<32x256xf32>
    %500 = tpu.matmul %483, %488, %cst_231 {dimension_numbers = #tpu.dot_dimension_numbers<[1], [0], [0], [1], [0, 0, 1, 1], [], []>} : vector<32x128xbf16>, vector<128x256xbf16>, vector<32x256xf32> -> vector<32x256xf32>
    %501 = vector.extract_strided_slice %499 {offsets = [0, 0], sizes = [16, 256], strides = [1, 1]} : vector<16x512xf32> to vector<16x256xf32>
    %502 = arith.truncf %501 : vector<16x256xf32> to vector<16x256xbf16>
    %503 = vector.extract_strided_slice %499 {offsets = [0, 256], sizes = [16, 256], strides = [1, 1]} : vector<16x512xf32> to vector<16x256xf32>
    %504 = arith.truncf %503 : vector<16x256xf32> to vector<16x256xbf16>
    %cst_232 = arith.constant dense<0.000000e+00> : vector<32x256xf32>
    %505 = tpu.matmul %39, %502, %cst_232 {dimension_numbers = #tpu.dot_dimension_numbers<[1], [0], [0], [1], [0, 0, 1, 1], [], []>} : vector<32x16xbf16>, vector<16x256xbf16>, vector<32x256xf32> -> vector<32x256xf32>
    %cst_233 = arith.constant dense<0.000000e+00> : vector<32x256xf32>
    %506 = tpu.matmul %40, %504, %cst_233 {dimension_numbers = #tpu.dot_dimension_numbers<[1], [0], [0], [1], [0, 0, 1, 1], [], []>} : vector<32x16xbf16>, vector<16x256xbf16>, vector<32x256xf32> -> vector<32x256xf32>
    %507 = arith.addf %505, %506 : vector<32x256xf32>
    %508 = arith.addf %507, %500 : vector<32x256xf32>
    %509 = vector.broadcast %490 : vector<1x256xf32> to vector<32x256xf32>
    %510 = arith.addf %508, %509 : vector<32x256xf32>
    %cst_234 = arith.constant dense<0.000000e+00> : vector<256xf32>
    %511 = vector.multi_reduction <add>, %510, %cst_234 [0] : vector<32x256xf32> to vector<256xf32>
    %512 = vector.shape_cast %511 : vector<256xf32> to vector<1x256xf32>
    %513 = arith.mulf %510, %510 : vector<32x256xf32>
    %cst_235 = arith.constant dense<0.000000e+00> : vector<256xf32>
    %514 = vector.multi_reduction <add>, %513, %cst_235 [0] : vector<32x256xf32> to vector<256xf32>
    %515 = vector.shape_cast %514 : vector<256xf32> to vector<1x256xf32>
    %cst_236 = arith.constant 3.125000e-02 : f32
    %516 = vector.broadcast %cst_236 : f32 to vector<1x256xf32>
    %517 = arith.mulf %512, %516 : vector<1x256xf32>
    %cst_237 = arith.constant 3.125000e-02 : f32
    %518 = vector.broadcast %cst_237 : f32 to vector<1x256xf32>
    %519 = arith.mulf %515, %518 : vector<1x256xf32>
    %520 = arith.mulf %517, %517 : vector<1x256xf32>
    %521 = arith.subf %519, %520 : vector<1x256xf32>
    %cst_238 = arith.constant 0.000000e+00 : f32
    %522 = vector.broadcast %cst_238 : f32 to vector<1x256xf32>
    %523 = arith.maximumf %521, %522 : vector<1x256xf32>
    %524 = vector.broadcast %517 : vector<1x256xf32> to vector<32x256xf32>
    %525 = arith.subf %510, %524 : vector<32x256xf32>
    %cst_239 = arith.constant 9.99999974E-6 : f32
    %526 = vector.broadcast %cst_239 : f32 to vector<1x256xf32>
    %527 = arith.addf %523, %526 : vector<1x256xf32>
    %528 = math.rsqrt %527 : vector<1x256xf32>
    %529 = vector.broadcast %528 : vector<1x256xf32> to vector<32x256xf32>
    %530 = arith.mulf %525, %529 : vector<32x256xf32>
    %531 = vector.broadcast %492 : vector<1x256xf32> to vector<32x256xf32>
    %532 = arith.mulf %530, %531 : vector<32x256xf32>
    %533 = vector.broadcast %494 : vector<1x256xf32> to vector<32x256xf32>
    %534 = arith.addf %532, %533 : vector<32x256xf32>
    %535 = vector.extract_strided_slice %534 {offsets = [0, 0], sizes = [32, 128], strides = [1, 1]} : vector<32x256xf32> to vector<32x128xf32>
    %cst_240 = arith.constant 5.000000e-01 : f32
    %536 = vector.broadcast %cst_240 : f32 to vector<32x128xf32>
    %537 = arith.mulf %536, %535 : vector<32x128xf32>
    %538 = math.tanh %537 : vector<32x128xf32>
    %cst_241 = arith.constant 5.000000e-01 : f32
    %539 = vector.broadcast %cst_241 : f32 to vector<32x128xf32>
    %540 = arith.mulf %539, %538 : vector<32x128xf32>
    %cst_242 = arith.constant 5.000000e-01 : f32
    %541 = vector.broadcast %cst_242 : f32 to vector<32x128xf32>
    %542 = arith.addf %540, %541 : vector<32x128xf32>
    %543 = vector.extract_strided_slice %534 {offsets = [0, 128], sizes = [32, 128], strides = [1, 1]} : vector<32x256xf32> to vector<32x128xf32>
    %cst_243 = arith.constant 2.000000e+01 : f32
    %544 = vector.broadcast %cst_243 : f32 to vector<32x128xf32>
    %545 = arith.cmpf ogt, %543, %544 : vector<32x128xf32>
    %cst_244 = arith.constant 2.000000e+01 : f32
    %546 = vector.broadcast %cst_244 : f32 to vector<32x128xf32>
    %547 = arith.minimumf %543, %546 : vector<32x128xf32>
    %548 = math.exp %547 : vector<32x128xf32>
    %cst_245 = arith.constant 1.000000e+00 : f32
    %549 = vector.broadcast %cst_245 : f32 to vector<32x128xf32>
    %550 = arith.addf %549, %548 : vector<32x128xf32>
    %551 = math.log %550 : vector<32x128xf32>
    %552 = arith.select %545, %543, %551 : vector<32x128xi1>, vector<32x128xf32>
    %553 = arith.mulf %542, %552 : vector<32x128xf32>
    %554 = vector.broadcast %4 : vector<1x128xf32> to vector<32x128xf32>
    %555 = arith.mulf %553, %554 : vector<32x128xf32>
    %556 = arith.truncf %555 : vector<32x128xf32> to vector<32x128xbf16>
    %cst_246 = arith.constant dense<0.000000e+00> : vector<16x128xf32>
    %557 = tpu.matmul %40, %556, %cst_246 {dimension_numbers = #tpu.dot_dimension_numbers<[0], [0], [1], [1], [0, 1, 1, 1], [], []>} : vector<32x16xbf16>, vector<32x128xbf16>, vector<16x128xf32> -> vector<16x128xf32>
    %cst_247 = arith.constant dense<0.000000e+00> : vector<128xf32>
    %558 = vector.multi_reduction <add>, %557, %cst_247 [0] : vector<16x128xf32> to vector<128xf32>
    %559 = vector.shape_cast %558 : vector<128xf32> to vector<1x128xf32>
    %560 = arith.mulf %557, %557 : vector<16x128xf32>
    %cst_248 = arith.constant dense<0.000000e+00> : vector<128xf32>
    %561 = vector.multi_reduction <add>, %560, %cst_248 [0] : vector<16x128xf32> to vector<128xf32>
    %562 = vector.shape_cast %561 : vector<128xf32> to vector<1x128xf32>
    %cst_249 = arith.constant 6.250000e-02 : f32
    %563 = vector.broadcast %cst_249 : f32 to vector<1x128xf32>
    %564 = arith.mulf %559, %563 : vector<1x128xf32>
    %cst_250 = arith.constant 6.250000e-02 : f32
    %565 = vector.broadcast %cst_250 : f32 to vector<1x128xf32>
    %566 = arith.mulf %562, %565 : vector<1x128xf32>
    %567 = arith.mulf %564, %564 : vector<1x128xf32>
    %568 = arith.subf %566, %567 : vector<1x128xf32>
    %cst_251 = arith.constant 0.000000e+00 : f32
    %569 = vector.broadcast %cst_251 : f32 to vector<1x128xf32>
    %570 = arith.maximumf %568, %569 : vector<1x128xf32>
    %571 = vector.broadcast %564 : vector<1x128xf32> to vector<16x128xf32>
    %572 = arith.subf %557, %571 : vector<16x128xf32>
    %cst_252 = arith.constant 9.99999974E-6 : f32
    %573 = vector.broadcast %cst_252 : f32 to vector<1x128xf32>
    %574 = arith.addf %570, %573 : vector<1x128xf32>
    %575 = math.rsqrt %574 : vector<1x128xf32>
    %576 = vector.broadcast %575 : vector<1x128xf32> to vector<16x128xf32>
    %577 = arith.mulf %572, %576 : vector<16x128xf32>
    %578 = vector.broadcast %496 : vector<1x128xf32> to vector<16x128xf32>
    %579 = arith.mulf %577, %578 : vector<16x128xf32>
    %580 = vector.broadcast %498 : vector<1x128xf32> to vector<16x128xf32>
    %581 = arith.addf %579, %580 : vector<16x128xf32>
    %582 = arith.addf %373, %581 : vector<16x128xf32>
    %cst_253 = arith.constant 2.000000e+01 : f32
    %583 = vector.broadcast %cst_253 : f32 to vector<16x128xf32>
    %584 = arith.cmpf ogt, %582, %583 : vector<16x128xf32>
    %cst_254 = arith.constant 2.000000e+01 : f32
    %585 = vector.broadcast %cst_254 : f32 to vector<16x128xf32>
    %586 = arith.minimumf %582, %585 : vector<16x128xf32>
    %587 = math.exp %586 : vector<16x128xf32>
    %cst_255 = arith.constant 1.000000e+00 : f32
    %588 = vector.broadcast %cst_255 : f32 to vector<16x128xf32>
    %589 = arith.addf %588, %587 : vector<16x128xf32>
    %590 = math.log %589 : vector<16x128xf32>
    %591 = arith.select %584, %582, %590 : vector<16x128xi1>, vector<16x128xf32>
    %592 = vector.broadcast %4 : vector<1x128xf32> to vector<16x128xf32>
    %593 = arith.mulf %591, %592 : vector<16x128xf32>
    %c0_256 = arith.constant 0 : index
    %c0_257 = arith.constant 0 : index
    %594 = vector.load %arg11[%c0_256, %c0_257] : memref<2x16xbf16, #tpu.memory_space<vmem>>, vector<2x16xbf16>
    %595 = arith.truncf %593 : vector<16x128xf32> to vector<16x128xbf16>
    %cst_258 = arith.constant dense<0.000000e+00> : vector<2x128xf32>
    %596 = tpu.matmul %594, %595, %cst_258 {dimension_numbers = #tpu.dot_dimension_numbers<[1], [0], [0], [1], [0, 0, 1, 1], [], []>} : vector<2x16xbf16>, vector<16x128xbf16>, vector<2x128xf32> -> vector<2x128xf32>
    %cst_259 = arith.constant 2.000000e+01 : f32
    %597 = vector.broadcast %cst_259 : f32 to vector<2x128xf32>
    %598 = arith.cmpf ogt, %596, %597 : vector<2x128xf32>
    %cst_260 = arith.constant 2.000000e+01 : f32
    %599 = vector.broadcast %cst_260 : f32 to vector<2x128xf32>
    %600 = arith.minimumf %596, %599 : vector<2x128xf32>
    %601 = math.exp %600 : vector<2x128xf32>
    %cst_261 = arith.constant 1.000000e+00 : f32
    %602 = vector.broadcast %cst_261 : f32 to vector<2x128xf32>
    %603 = arith.addf %602, %601 : vector<2x128xf32>
    %604 = math.log %603 : vector<2x128xf32>
    %605 = arith.select %598, %596, %604 : vector<2x128xi1>, vector<2x128xf32>
    %606 = arith.truncf %605 : vector<2x128xf32> to vector<2x128xbf16>
    %c0_262 = arith.constant 0 : index
    %c0_263 = arith.constant 0 : index
    %607 = vector.load %arg26[%c0_262, %c0_263] : memref<128x256xbf16, #tpu.memory_space<vmem>>, vector<128x256xbf16>
    %cst_264 = arith.constant dense<0.000000e+00> : vector<2x256xf32>
    %608 = tpu.matmul %606, %607, %cst_264 {dimension_numbers = #tpu.dot_dimension_numbers<[1], [0], [0], [1], [0, 0, 1, 1], [], []>} : vector<2x128xbf16>, vector<128x256xbf16>, vector<2x256xf32> -> vector<2x256xf32>
    %c0_265 = arith.constant 0 : index
    %c0_266 = arith.constant 0 : index
    %609 = vector.load %arg27[%c0_265, %c0_266] : memref<1x256xf32, #tpu.memory_space<vmem>>, vector<1x256xf32>
    %610 = vector.broadcast %609 : vector<1x256xf32> to vector<2x256xf32>
    %611 = arith.addf %608, %610 : vector<2x256xf32>
    %cst_267 = arith.constant 2.000000e+01 : f32
    %612 = vector.broadcast %cst_267 : f32 to vector<2x256xf32>
    %613 = arith.cmpf ogt, %611, %612 : vector<2x256xf32>
    %cst_268 = arith.constant 2.000000e+01 : f32
    %614 = vector.broadcast %cst_268 : f32 to vector<2x256xf32>
    %615 = arith.minimumf %611, %614 : vector<2x256xf32>
    %616 = math.exp %615 : vector<2x256xf32>
    %cst_269 = arith.constant 1.000000e+00 : f32
    %617 = vector.broadcast %cst_269 : f32 to vector<2x256xf32>
    %618 = arith.addf %617, %616 : vector<2x256xf32>
    %619 = math.log %618 : vector<2x256xf32>
    %620 = arith.select %613, %611, %619 : vector<2x256xi1>, vector<2x256xf32>
    %cst_270 = arith.constant 2.000000e+01 : f32
    %621 = vector.broadcast %cst_270 : f32 to vector<2x256xf32>
    %622 = arith.cmpf ogt, %620, %621 : vector<2x256xf32>
    %cst_271 = arith.constant 2.000000e+01 : f32
    %623 = vector.broadcast %cst_271 : f32 to vector<2x256xf32>
    %624 = arith.minimumf %620, %623 : vector<2x256xf32>
    %625 = math.exp %624 : vector<2x256xf32>
    %cst_272 = arith.constant 1.000000e+00 : f32
    %626 = vector.broadcast %cst_272 : f32 to vector<2x256xf32>
    %627 = arith.addf %626, %625 : vector<2x256xf32>
    %628 = math.log %627 : vector<2x256xf32>
    %629 = arith.select %622, %620, %628 : vector<2x256xi1>, vector<2x256xf32>
    %630 = arith.truncf %629 : vector<2x256xf32> to vector<2x256xbf16>
    %c0_273 = arith.constant 0 : index
    %c0_274 = arith.constant 0 : index
    %631 = vector.load %arg28[%c0_273, %c0_274] : memref<256x128xbf16, #tpu.memory_space<vmem>>, vector<256x128xbf16>
    %cst_275 = arith.constant dense<0.000000e+00> : vector<2x128xf32>
    %632 = tpu.matmul %630, %631, %cst_275 {dimension_numbers = #tpu.dot_dimension_numbers<[1], [0], [0], [1], [0, 0, 1, 1], [], []>} : vector<2x256xbf16>, vector<256x128xbf16>, vector<2x128xf32> -> vector<2x128xf32>
    %c0_276 = arith.constant 0 : index
    %c0_277 = arith.constant 0 : index
    %633 = vector.load %arg29[%c0_276, %c0_277] : memref<1x128xf32, #tpu.memory_space<vmem>>, vector<1x128xf32>
    %634 = vector.broadcast %633 : vector<1x128xf32> to vector<2x128xf32>
    %635 = arith.addf %632, %634 : vector<2x128xf32>
    %c0_278 = arith.constant 0 : index
    %c0_279 = arith.constant 0 : index
    %636 = vector.load %arg30[%c0_278, %c0_279] : memref<2x128xf32, #tpu.memory_space<vmem>>, vector<2x128xf32>
    tpu.vector_store %arg30[%c0_278, %c0_279], %635 {strides = array<i32>} : memref<2x128xf32, #tpu.memory_space<vmem>>, vector<2x128xf32>,
    return
  }
}

</mosaic_0001>

<bundles_post_ra>
// kernel: acgcnn_forward.1
= control target key start
LH: loop header
LB: loop body
LE: loop exit
PB: predicated region body
PF: predicated region fallthrough
CT: control target
= control target key end

     0   :  { %s7360_s6 = smov 1   ;;  %s7361_s10 = smov 2   ;;  %s8908_s0 = inlined_call_operand.smem [shape: u32[31], index: -1, kind: input, shape index: {}] }
   0x1   :  { %s7412_s5 = sld [smem:[%s8908_s0]]   ;;  %s7362_s14 = smov 3  }
   0x2   :  { %s7417_s9 = sld [smem:[%s8908_s0 + %s7360_s6]]   ;;  %s7363_s18 = smov 4  }
   0x3   :  { %s7422_s13 = sld [smem:[%s8908_s0 + %s7361_s10]]   ;;  %s7364_s22 = smov 5  }
   0x4   :  { %s7427_s17 = sld [smem:[%s8908_s0 + %s7362_s14]]   ;;  %s7365_s26 = smov 6  }
   0x5   :  { %s7432_s21 = sld [smem:[%s8908_s0 + %s7363_s18]]   ;;  %s7366_s30 = smov 7  }
   0x6   :  { %s7437_s25 = sld [smem:[%s8908_s0 + %s7364_s22]]   ;;  %s7367_s4 = smov 8  }
   0x7   :  { %s7442_s29 = sld [smem:[%s8908_s0 + %s7365_s26]]   ;;  %s7368_s10 = smov 9  }
   0x8   :  { %s7447_s3 = sld [smem:[%s8908_s0 + %s7366_s30]]   ;;  %s7369_s15 = smov 10  }
   0x9   :  { %s7452_s8 = sld [smem:[%s8908_s0 + %s7367_s4]]   ;;  %s7370_s20 = smov 11  }
   0xa   :  { %s7457_s14 = sld [smem:[%s8908_s0 + %s7368_s10]]   ;;  %s7371_s26 = smov 12  }
   0xb   :  { %s7462_s19 = sld [smem:[%s8908_s0 + %s7369_s15]]   ;;  %s7372_s1 = smov 13  }
   0xc   :  { %s7467_s24 = sld [smem:[%s8908_s0 + %s7370_s20]]   ;;  %s7373_s7 = smov 14  }
   0xd   :  { %s7472_s30 = sld [smem:[%s8908_s0 + %s7371_s26]]   ;;  %s7374_s15 = smov 15  }
   0xe   :  { %s7477_s6 = sld [smem:[%s8908_s0 + %s7372_s1]]   ;;  %s7375_s22 = smov 16  }
   0xf   :  { %s7482_s12 = sld [smem:[%s8908_s0 + %s7373_s7]]   ;;  %s7376_s28 = smov 17  }
  0x10   :  { %8921 = sst [smem:[#allocation16_spill]] %s7457_s14  ;;  %s7377_s7 = smov 18  }
  0x11   :  { %8922 = sst [smem:[#allocation17_spill]] %s7462_s19 }
  0x12   :  { %8923 = sst [smem:[#allocation18_spill]] %s7467_s24 }
  0x13   :  { %s7487_s20 = sld [smem:[%s8908_s0 + %s7374_s15]]   ;;  %s7378_s15 = smov 19  }
  0x14   :  { %s7492_s27 = sld [smem:[%s8908_s0 + %s7375_s22]]   ;;  %s7379_s22 = smov 20  }
  0x15   :  { %8924 = sst [smem:[#allocation19_spill]] %s7482_s12 }
  0x16   :  { %s7497_s4 = sld [smem:[%s8908_s0 + %s7376_s28]]   ;;  %s7380_s28 = smov 21  }
  0x17   :  { %s7502_s24 = sld [smem:[%s8908_s0 + %s7377_s7]]   ;;  %s7381_s7 = smov 22  }
  0x19   :  { %8925 = sst [smem:[#allocation20_spill]] %s7487_s20 }
  0x1a   :  { %8926 = sst [smem:[#allocation21_spill]] %s7492_s27 }
  0x1b   :  { %s7507_s20 = sld [smem:[%s8908_s0 + %s7378_s15]]   ;;  %s7382_s15 = smov 23  }
  0x1c   :  { %8927 = sst [smem:[#allocation22_spill]] %s7497_s4 }
  0x1d   :  { %8928 = sst [smem:[#allocation23_spill]] %s7502_s24 }
  0x1e   :  { %s7512_s27 = sld [smem:[%s8908_s0 + %s7379_s22]]   ;;  %s7383_s22 = smov 24  }
  0x1f   :  { %s7517_s4 = sld [smem:[%s8908_s0 + %s7380_s28]]   ;;  %s7384_s28 = smov 25  }
  0x20   :  { %s7522_s24 = sld [smem:[%s8908_s0 + %s7381_s7]]   ;;  %s7385_s7 = smov 26  }
  0x21   :  { %s7527_s14 = sld [smem:[%s8908_s0 + %s7382_s15]]   ;;  %s7386_s15 = smov 27  }
  0x22   :  { %s7532_s19 = sld [smem:[%s8908_s0 + %s7383_s22]]   ;;  %s7387_s22 = smov 28  }
  0x25   :  { %8929 = sst [smem:[#allocation24_spill]] %s7517_s4 }
  0x26   :  { %8930 = sst [smem:[#allocation25_spill]] %s7522_s24 }
  0x27   :  { %8931 = sst [smem:[#allocation26_spill]] %s7527_s14 }
  0x28   :  { %8932 = sst [smem:[#allocation27_spill]] %s7532_s19 }
  0x29   :  { %s7537_s4 = sld [smem:[%s8908_s0 + %s7384_s28]]   ;;  %s7388_s28 = smov 29  }
  0x2a   :  { %s7542_s24 = sld [smem:[%s8908_s0 + %s7385_s7]]   ;;  %s7389_s7 = smov 30  }
  0x2b   :  { %s7547_s14 = sld [smem:[%s8908_s0 + %s7386_s15]]  }
  0x2c   :  { %s7552_s19 = sld [smem:[%s8908_s0 + %s7387_s22]]  }
  0x2d   :  { %s7562_s12 = sld [smem:[%s8908_s0 + %s7389_s7]]  }
  0x2f   :  { %8933 = sst [smem:[#allocation28_spill]] %s7537_s4 }
  0x30   :  { %s7557_s4 = sld [smem:[%s8908_s0 + %s7388_s28]]  }
  0x31   :  { %66 = vsyncpa [#allocation3], 0 }
  0x32   :  { %67 = vsyncpa [#allocation5], 0 }
  0x33   :  { %68 = vsyncpa [#allocation8], 0  ;;  %s111_s15 = sshll.u32 %s7477_s6, 4  ;;  %s112_s15 = int_to_ptr.hbm [resolvable:$true] %s111_s15 }
  0x34   :  { %69 = vsyncpa [#allocation11], 0  ;;  %s7390_s16 = smov [#allocation4]   ;;  %s147_s22 = sshll.u32 %s7512_s27, 4  ;;  %s148_s22 = int_to_ptr.hbm [resolvable:$true] %s147_s22 }
  0x35   :  { %s113_s18 = sshll.u32 %s7390_s16, 4  ;;  %s7208_s23 = sshra.s32 %s112_s15, 4  ;;  %s114_s18 = int_to_ptr.vmem [resolvable:$true] %s113_s18  ;;  %s7209_s23 = int_to_ptr.hbm [resolvable:$true] %s7208_s23 }
  0x36   :  { %s7210_s26 = scalar_lea.hbm %s7209_s23, 384  ;;  %s7212_s0 = scalar_lea.hbm %s7477_s6, 384 }
  0x37   :  { %p7211_p0 = scmp.ne.s32.totalorder %s7209_s23, %s7210_s26  ;;  %p7213_p1 = scmp.lt.s32.totalorder %s7209_s23, %s7477_s6 }
  0x38   :  { %p7214_p2 = scmp.lt.s32.totalorder %s7212_s0, %s7210_s26 }
  0x3a   :  { %p7215_p3 = por %p7214_p2, %p7213_p1 }
  0x3c   :  { %p7216_p4 = pnand %p7215_p3, %p7211_p0 }
  0x3e   :  { %7219 = shalt.err (!%p7216_p4)
}
  0x3f   :  { %s7391_s28 = smov 128   ;;  %s7392_s1 = smov 8  }
  0x40   :  { %119 = dma.hbm_to_vmem [thread:$0]  %s112_s15, 6144, %s114_s18, [#allocation5], %s7391_s28, %s7391_s28, %s7392_s1  }
  0x41   :  { %s7393_s2 = smov [#allocation7]   ;;  %s98_s10 = sshll.u32 %s7472_s30, 4  ;;  %s7572_s10 = int_to_ptr.hbm [resolvable:$true] %s98_s10 }
  0x42   :  { %s149_s7 = sshll.u32 %s7393_s2, 4  ;;  %s7232_s6 = sshra.s32 %s148_s22, 4  ;;  %s150_s7 = int_to_ptr.vmem [resolvable:$true] %s149_s7  ;;  %s7233_s6 = int_to_ptr.hbm [resolvable:$true] %s7232_s6 }
  0x43   :  { %s7234_s11 = scalar_lea.hbm %s7233_s6, 384  ;;  %s7236_s16 = scalar_lea.hbm %s7512_s27, 384 }
  0x44   :  { %p7235_p5 = scmp.ne.s32.totalorder %s7233_s6, %s7234_s11  ;;  %p7237_p6 = scmp.lt.s32.totalorder %s7233_s6, %s7512_s27 }
  0x45   :  { %p7238_p7 = scmp.lt.s32.totalorder %s7236_s16, %s7234_s11 }
  0x47   :  { %p7239_p8 = por %p7238_p7, %p7237_p6 }
  0x49   :  { %p7240_p9 = pnand %p7239_p8, %p7235_p5 }
  0x4b   :  { %7243 = shalt.err (!%p7240_p9)
}
  0x4c   :  { %155 = dma.hbm_to_vmem [thread:$0]  %s148_s22, 6144, %s150_s7, [#allocation8], %s7391_s28, %s7391_s28, %s7392_s1  }
  0x4d   :  { %s7394_s15 = smov [#allocation2]   ;;  %s134_s23 = sshll.u32 %s7507_s20, 4  ;;  %s135_s23 = int_to_ptr.hbm [resolvable:$true] %s134_s23 }
  0x4e   :  { %s100_s18 = sshll.u32 %s7394_s15, 4  ;;  %s7256_s26 = sshra.s32 %s7572_s10, 4  ;;  %s101_s18 = int_to_ptr.vmem [resolvable:$true] %s100_s18  ;;  %s7257_s26 = int_to_ptr.hbm [resolvable:$true] %s7256_s26 }
  0x4f   :  { %s7258_s0 = scalar_lea.hbm %s7257_s26, 768  ;;  %s7260_s27 = scalar_lea.hbm %s7472_s30, 768 }
  0x50   :  { %p7259_p10 = scmp.ne.s32.totalorder %s7257_s26, %s7258_s0  ;;  %p7261_p11 = scmp.lt.s32.totalorder %s7257_s26, %s7472_s30 }
  0x51   :  { %p7262_p12 = scmp.lt.s32.totalorder %s7260_s27, %s7258_s0 }
  0x53   :  { %p7263_p13 = por %p7262_p12, %p7261_p11 }
  0x55   :  { %p7264_p0 = pnand %p7263_p13, %p7259_p10 }
  0x57   :  { %7267 = shalt.err (!%p7264_p0)
}
  0x58   :  { %s7395_s2 = smov 256   ;;  %s7396_s22 = smov 16  }
  0x59   :  { %106 = dma.hbm_to_vmem [thread:$0]  %s7572_s10, 12288, %s101_s18, [#allocation3], %s7395_s2, %s7395_s2, %s7396_s22  }
  0x5a   :  { %s7397_s7 = smov [#allocation6]   ;;  %s170_s11 = sshll.u32 %s7542_s24, 4  ;;  %s7585_s11 = int_to_ptr.hbm [resolvable:$true] %s170_s11 }
  0x5b   :  { %s136_s6 = sshll.u32 %s7397_s7, 4  ;;  %s7280_s16 = sshra.s32 %s135_s23, 4  ;;  %s137_s6 = int_to_ptr.vmem [resolvable:$true] %s136_s6  ;;  %s7281_s16 = int_to_ptr.hbm [resolvable:$true] %s7280_s16 }
  0x5c   :  { %s7282_s30 = scalar_lea.hbm %s7281_s16, 768  ;;  %s7284_s15 = scalar_lea.hbm %s7507_s20, 768 }
  0x5d   :  { %p7283_p1 = scmp.ne.s32.totalorder %s7281_s16, %s7282_s30  ;;  %p7285_p2 = scmp.lt.s32.totalorder %s7281_s16, %s7507_s20 }
  0x5e   :  { %p7286_p3 = scmp.lt.s32.totalorder %s7284_s15, %s7282_s30 }
  0x60   :  { %p7287_p4 = por %p7286_p3, %p7285_p2 }
  0x62   :  { %p7288_p5 = pnand %p7287_p4, %p7283_p1 }
  0x64   :  { %7291 = shalt.err (!%p7288_p5)
}
  0x65   :  { %142 = dma.hbm_to_vmem [thread:$0]  %s135_s23, 12288, %s137_s6, [#allocation5], %s7395_s2, %s7395_s2, %s7396_s22  }
  0x66   :  { %s185_s10 = sshll.u32 %s7552_s19, 4  ;;  %s7398_s18 = smov [#allocation9]   ;;  %s7590_s10 = int_to_ptr.hbm [resolvable:$true] %s185_s10 }
  0x67   :  { %s172_s26 = sshll.u32 %s7398_s18, 4  ;;  %s7304_s0 = sshra.s32 %s7585_s11, 4  ;;  %s173_s26 = int_to_ptr.vmem [resolvable:$true] %s172_s26  ;;  %s7305_s0 = int_to_ptr.hbm [resolvable:$true] %s7304_s0 }
  0x68   :  { %s7306_s27 = scalar_lea.hbm %s7305_s0, 128  ;;  %s7308_s20 = scalar_lea.hbm %s7542_s24, 128 }
  0x69   :  { %p7307_p6 = scmp.ne.s32.totalorder %s7305_s0, %s7306_s27  ;;  %p7309_p7 = scmp.lt.s32.totalorder %s7305_s0, %s7542_s24 }
  0x6a   :  { %p7310_p8 = scmp.lt.s32.totalorder %s7308_s20, %s7306_s27 }
  0x6c   :  { %p7311_p9 = por %p7310_p8, %p7309_p7 }
  0x6e   :  { %p7312_p10 = pnand %p7311_p9, %p7307_p6 }
  0x70   :  { %7315 = shalt.err (!%p7312_p10)
}
  0x71   :  { %178 = dma.hbm_to_vmem [thread:$0]  %s7585_s11, 2048, %s173_s26, [#allocation8], %s7391_s28, %s7391_s28, %s7392_s1  }
  0x72   :  { %s7399_s23 = smov [#allocation10]   ;;  %s7328_s22 = sshra.s32 %s7590_s10, 4  ;;  %s7329_s22 = int_to_ptr.hbm [resolvable:$true] %s7328_s22 }
  0x73   :  { %s187_s2 = sshll.u32 %s7399_s23, 4  ;;  %s7330_s7 = scalar_lea.hbm %s7329_s22, 128  ;;  %s188_s2 = int_to_ptr.vmem [resolvable:$true] %s187_s2 }
  0x74   :  { %p7331_p11 = scmp.ne.s32.totalorder %s7329_s22, %s7330_s7  ;;  %s7332_s24 = scalar_lea.hbm %s7552_s19, 128 }
  0x75   :  { %p7333_p12 = scmp.lt.s32.totalorder %s7329_s22, %s7552_s19  ;;  %p7334_p13 = scmp.lt.s32.totalorder %s7332_s24, %s7330_s7 }
  0x77   :  { %p7335_p0 = por %p7334_p13, %p7333_p12 }
  0x79   :  { %p7336_p1 = pnand %p7335_p0, %p7331_p11 }
  0x7b   :  { %7339 = shalt.err (!%p7336_p1)
}
  0x7c   :  { %s7400_s6 = smov 64   ;;  %s7401_s16 = smov 4  }
  0x7d   :  { %193 = dma.hbm_to_vmem [thread:$0]  %s7590_s10, 2048, %s188_s2, [#allocation11], %s7400_s6, %s7400_s6, %s7401_s16  }
  0x7e   :  { %7352 = dma.done.wait [#allocation3], 12288  }
  0x7f   :  { %7353 = vsyncadd [#allocation3], 4294955008 }
  0x80   :  { %7354 = dma.done.wait [#allocation5], 18432  }
  0x81   :  { %7355 = vsyncadd [#allocation5], 4294948864 }
  0x82   :  { %7356 = dma.done.wait [#allocation8], 8192  }
  0x83   :  { %7357 = vsyncadd [#allocation8], 4294959104 }
  0x84   :  { %7358 = dma.done.wait [#allocation11], 2048  }
  0x85   :  { %7359 = vsyncadd [#allocation11], 4294965248  ;;  %v6548_v0 = vld [vmem:[%s7437_s25 + $0x38] sm:$0xff]  ;;  %v6547_v1 = vld [vmem:[%s7437_s25 + $0x30] sm:$0xff]  ;;  %v7402_v2 = vmov 0   ;;  %vm903_vm1 = vcmask 130048  }
  0x86   :  { %461 = vmatpush.bf16.msra.mxu0 %v6548_v0  ;;  %6877 = vset.pattern.permute.xlu0 %v7402_v2  ;;  %v7607_v3 = vld [vmem:[%s7452_s8] sm:$0xff]  ;;  %v231_v5 = vld [vmem:[%s7412_s5 + $0x10] sm:$0xff]  ;;  %v6546_v7 = vld [vmem:[%s7437_s25 + $0x28] sm:$0xff]  ;;  %vm1217_vm2 = vcmask 261120   ;;  %s8941_s19 = sld [smem:[#allocation23_spill]] }
  0x87   :  { %v229_v4 = vld [vmem:[%s7412_s5] sm:$0xff]  ;;  %6878 = vset.pattern.permute.xlu1 %v7402_v2  ;;  %1201 = vxpose.xlu2.c.b16.start [1/2] (short) (narrow) %v7607_v3, 16  ;;  %v6591_v8 = vld [vmem:[#allocation2 + $0xec] sm:$0xf0]  ;;  %v5441_v11 = vld [vmem:[#allocation2 + $0xf0] sm:$0xf0] }
  0x88   :  { %236 = vperm.xlu0 %6877, %v229_v4   ;;  %v5439_v6 = vld [vmem:[#allocation2 + $0xe0] sm:$0xf]  ;;  %246 = vperm.xlu1 %6878, %v231_v5   ;;  %v6589_v9 = vld [vmem:[#allocation2 + $0xe4] sm:$0xf]  ;;  %v5447_v12 = vld [vmem:[#allocation2 + $0xe8] sm:$0xf] }
  0x89   :  { %v5440_v10 = vor.u32 %v6591_v8, %v5439_v6  ;;  %v6592_v13 = vld [vmem:[#allocation2 + $0xf4] sm:$0xf0]  ;;  %v5444_v14 = vor.u32 %v6589_v9, %v5441_v11  ;;  %v5423_v16 = vld [vmem:[#allocation2 + $0xc0] sm:$0xf]  ;;  %v6587_v17 = vld [vmem:[#allocation2 + $0xcc] sm:$0xf0] }
  0x8a   :  { %462 = vmatpush.bf16.msra.mxu0 %v6547_v1  ;;  %v5448_v15 = vor.u32 %v6592_v13, %v5447_v12  ;;  %v6585_v18 = vld [vmem:[#allocation2 + $0xc4] sm:$0xf]  ;;  %v5425_v19 = vld [vmem:[#allocation2 + $0xd0] sm:$0xf0]  ;;  %v230_v20 = vld [vmem:[%s7412_s5 + $0x8] sm:$0xff]  ;;  %v5424_v21 = vor.u32 %v6587_v17, %v5423_v16  ;;  %s8942_s28 = sld [smem:[#allocation25_spill]] }
  0x8b   :  { %715 = vmatpush.bf16.msra.mxu1 %v5440_v10  ;;  %729 = vmatpush.bf16.msra.mxu2 %v5444_v14  ;;  %v5428_v22 = vor.u32 %v6585_v18, %v5425_v19  ;;  %v5431_v23 = vld [vmem:[#allocation2 + $0xc8] sm:$0xf]  ;;  %v6588_v24 = vld [vmem:[#allocation2 + $0xd4] sm:$0xf0]  ;;  %v6545_v25 = vld [vmem:[%s7437_s25 + $0x20] sm:$0xff]  ;;  %s8943_s1 = sld [smem:[#allocation26_spill]] }
  0x8c   :  { %743 = vmatpush.bf16.msra.mxu3 %v5448_v15  ;;  %v5432_v26 = vor.u32 %v6588_v24, %v5431_v23  ;;  %v232_v27 = vld [vmem:[%s7412_s5 + $0x18] sm:$0xff]  ;;  %v5407_v28 = vld [vmem:[#allocation2 + $0xa0] sm:$0xf]  ;;  %v6583_v29 = vld [vmem:[#allocation2 + $0xac] sm:$0xf0]  ;;  %s8934_s5 = sld [smem:[#allocation19_spill]] }
  0x8d   :  { %v6581_v30 = vld [vmem:[#allocation2 + $0xa4] sm:$0xf]  ;;  %v5409_v31 = vld [vmem:[#allocation2 + $0xb0] sm:$0xf0]  ;;  %v5408_v32 = vor.u32 %v6583_v29, %v5407_v28  ;;  %v5415_v33 = vld [vmem:[#allocation2 + $0xa8] sm:$0xf] }
  0x8e   :  { %463 = vmatpush.bf16.msra.mxu0 %v6546_v7  ;;  %v6584_v34 = vld [vmem:[#allocation2 + $0xb4] sm:$0xf0]  ;;  %v5412_v35 = vor.u32 %v6581_v30, %v5409_v31  ;;  %v5391_v37 = vld [vmem:[#allocation2 + $0x80] sm:$0xf]  ;;  %v6579_v38 = vld [vmem:[#allocation2 + $0x8c] sm:$0xf0] }
  0x8f   :  { %716 = vmatpush.bf16.msra.mxu1 %v5424_v21  ;;  %730 = vmatpush.bf16.msra.mxu2 %v5428_v22  ;;  %v5416_v36 = vor.u32 %v6584_v34, %v5415_v33  ;;  %v6544_v39 = vld [vmem:[%s7437_s25 + $0x18] sm:$0xff]  ;;  %v6577_v40 = vld [vmem:[#allocation2 + $0x84] sm:$0xf]  ;;  %v5393_v41 = vld [vmem:[#allocation2 + $0x90] sm:$0xf0]  ;;  %v5392_v46 = vor.u32 %v6579_v38, %v5391_v37  ;;  %s8944_s11 = sld [smem:[#allocation27_spill]] }
  0x90   :  { %241 = vperm.xlu0 %6877, %v230_v20   ;;  %744 = vmatpush.bf16.msra.mxu3 %v5432_v26  ;;  %v5399_v42 = vld [vmem:[#allocation2 + $0x88] sm:$0xf]  ;;  %v6580_v43 = vld [vmem:[#allocation2 + $0x94] sm:$0xf0]  ;;  %v6543_v44 = vld [vmem:[%s7437_s25 + $0x10] sm:$0xff]  ;;  %v5396_v48 = vor.u32 %v6577_v40, %v5393_v41  ;;  %s8945_s30 = sld [smem:[#allocation28_spill]] }
  0x91   :  { %251 = vperm.xlu1 %6878, %v232_v27   ;;  %v7620_v45 = vld [vmem:[%s7452_s8 + $0x8] sm:$0xff]  ;;  %v281_v47 = vld [vmem:[%s7417_s9] sm:$0xff]  ;;  %v6575_v50 = vld [vmem:[#allocation2 + $0x6c] sm:$0xf0]  ;;  %v5400_v51 = vor.u32 %v6580_v43, %v5399_v42 }
  0x92   :  { %464 = vmatpush.bf16.msra.mxu0 %v6545_v25  ;;  %v5375_v49 = vld [vmem:[#allocation2 + $0x60] sm:$0xf]  ;;  %v282_v52 = vld [vmem:[%s7417_s9 + $0x8] sm:$0xff]  ;;  %v6573_v53 = vld [vmem:[#allocation2 + $0x64] sm:$0xf] }
  0x93   :  { %717 = vmatpush.bf16.msra.mxu1 %v5408_v32  ;;  %731 = vmatpush.bf16.msra.mxu2 %v5412_v35  ;;  %v5377_v54 = vld [vmem:[#allocation2 + $0x70] sm:$0xf0]  ;;  %v5383_v55 = vld [vmem:[#allocation2 + $0x68] sm:$0xf]  ;;  %v6576_v56 = vld [vmem:[#allocation2 + $0x74] sm:$0xf0]  ;;  %v5376_v57 = vor.u32 %v6575_v50, %v5375_v49 }
  0x94   :  { %745 = vmatpush.bf16.msra.mxu3 %v5416_v36  ;;  %v6542_v58 = vld [vmem:[%s7437_s25 + $0x8] sm:$0xff]  ;;  %v5380_v59 = vor.u32 %v6573_v53, %v5377_v54  ;;  %v5384_v61 = vor.u32 %v6576_v56, %v5383_v55  ;;  %v5449_v62 = vld [vmem:[#allocation2 + $0xf8] sm:$0xf0]  ;;  %v283_v63 = vld [vmem:[%s7417_s9 + $0x10] sm:$0xff] }
  0x95   :  { %v6590_v60 = vld [vmem:[#allocation2 + $0xec] sm:$0xf]  ;;  %v6541_v0 = vld [vmem:[%s7437_s25] sm:$0xff]  ;;  %v5433_v5 = vld [vmem:[#allocation2 + $0xd8] sm:$0xf0]  ;;  %s8939_s25 = sld [smem:[#allocation24_spill]] }
  0x96   :  { %465 = vmatpush.bf16.msra.mxu0 %v6544_v39  ;;  %v5452_v1 = vor.u32 %v6590_v60, %v5449_v62  ;;  %v6586_v4 = vld [vmem:[#allocation2 + $0xcc] sm:$0xf]  ;;  %v6540_v6 = vld [vmem:[%s7432_s21] sm:$0xff]  ;;  %v5417_v9 = vld [vmem:[#allocation2 + $0xb8] sm:$0xf0]  ;;  %s8938_s21 = sld [smem:[#allocation21_spill]] }
  0x97   :  { %718 = vmatpush.bf16.msra.mxu1 %v5392_v46  ;;  %1202 = vxpose.xlu2.c.b16.end [2/2] (short) (narrow) %v7620_v45, 16  ;;  %v5436_v7 = vor.u32 %v6586_v4, %v5433_v5  ;;  %v6582_v8 = vld [vmem:[#allocation2 + $0xac] sm:$0xf]  ;;  %v5401_v12 = vld [vmem:[#allocation2 + $0x98] sm:$0xf0]  ;;  %v287_v55 = vld [vmem:[%s7417_s9 + $0x30] sm:$0xff] }
  0x98   :  { %292 = vperm.xlu0 %6877, %v281_v47   ;;  %732 = vmatpush.bf16.msra.mxu2 %v5396_v48  ;;  %v5420_v10 = vor.u32 %v6582_v8, %v5417_v9  ;;  %v6578_v11 = vld [vmem:[#allocation2 + $0x8c] sm:$0xf]  ;;  %v5385_v15 = vld [vmem:[#allocation2 + $0x78] sm:$0xf0]  ;;  %v5359_v17 = vld [vmem:[#allocation2 + $0x40] sm:$0xf] }
  0x99   :  { %746 = vmatpush.bf16.msra.mxu3 %v5400_v51  ;;  %297 = vperm.xlu1 %6878, %v282_v52   ;;  %v5404_v13 = vor.u32 %v6578_v11, %v5401_v12  ;;  %v6574_v14 = vld [vmem:[#allocation2 + $0x6c] sm:$0xf]  ;;  %v6571_v18 = vld [vmem:[#allocation2 + $0x4c] sm:$0xf0]  ;;  %v6569_v19 = vld [vmem:[#allocation2 + $0x44] sm:$0xf] }
  0x9a   :  { %466 = vmatpush.bf16.msra.mxu0 %v6543_v44  ;;  %v5388_v16 = vor.u32 %v6574_v14, %v5385_v15  ;;  %v5360_v20 = vor.u32 %v6571_v18, %v5359_v17  ;;  %v5361_v21 = vld [vmem:[#allocation2 + $0x50] sm:$0xf0]  ;;  %v5367_v22 = vld [vmem:[#allocation2 + $0x48] sm:$0xf]  ;;  %v6572_v23 = vld [vmem:[#allocation2 + $0x54] sm:$0xf0] }
  0x9b   :  { %719 = vmatpush.bf16.msra.mxu1 %v5376_v57  ;;  %v5364_v24 = vor.u32 %v6569_v19, %v5361_v21  ;;  %v5368_v25 = vor.u32 %v6572_v23, %v5367_v22  ;;  %v6570_v26 = vld [vmem:[#allocation2 + $0x4c] sm:$0xf]  ;;  %v5369_v27 = vld [vmem:[#allocation2 + $0x58] sm:$0xf0]  ;;  %v5343_v31 = vld [vmem:[#allocation2 + $0x20] sm:$0xf] }
  0x9c   :  { %733 = vmatpush.bf16.msra.mxu2 %v5380_v59  ;;  %v284_v28 = vld [vmem:[%s7417_s9 + $0x18] sm:$0xff]  ;;  %v5372_v29 = vor.u32 %v6570_v26, %v5369_v27  ;;  %v286_v30 = vld [vmem:[%s7417_s9 + $0x28] sm:$0xff]  ;;  %v6567_v32 = vld [vmem:[#allocation2 + $0x2c] sm:$0xf0] }
  0x9d   :  { %747 = vmatpush.bf16.msra.mxu3 %v5384_v61  ;;  %v6565_v33 = vld [vmem:[#allocation2 + $0x24] sm:$0xf]  ;;  %v5345_v34 = vld [vmem:[#allocation2 + $0x30] sm:$0xf0]  ;;  %v5351_v35 = vld [vmem:[#allocation2 + $0x28] sm:$0xf] }
  0x9e   :  { %467 = vmatpush.bf16.msra.mxu0 %v6542_v58  ;;  %v5348_v36 = vor.u32 %v6565_v33, %v5345_v34  ;;  %v6568_v37 = vld [vmem:[#allocation2 + $0x34] sm:$0xf0]  ;;  %v6566_v38 = vld [vmem:[#allocation2 + $0x2c] sm:$0xf]  ;;  %v5353_v39 = vld [vmem:[#allocation2 + $0x38] sm:$0xf0] }
  0x9f   :  { %720 = vmatpush.bf16.msra.mxu1 %v5360_v20  ;;  %v5352_v40 = vor.u32 %v6568_v37, %v5351_v35  ;;  %v5356_v41 = vor.u32 %v6566_v38, %v5353_v39  ;;  %v5327_v42 = vld [vmem:[#allocation2] sm:$0xf]  ;;  %v6563_v43 = vld [vmem:[#allocation2 + $0xc] sm:$0xf0]  ;;  %v6561_v44 = vld [vmem:[#allocation2 + $0x4] sm:$0xf]  ;;  %v221_v38 = vlaneseq }
  0xa0   :  { %302 = vperm.xlu0 %6877, %v283_v63   ;;  %734 = vmatpush.bf16.msra.mxu2 %v5364_v24  ;;  %v5328_v46 = vor.u32 %v6563_v43, %v5327_v42  ;;  %v5329_v47 = vld [vmem:[#allocation2 + $0x10] sm:$0xf0]  ;;  %v5335_v48 = vld [vmem:[#allocation2 + $0x8] sm:$0xf]  ;;  %v6564_v49 = vld [vmem:[#allocation2 + $0x14] sm:$0xf0] }
  0xa1   :  { %307 = vperm.xlu1 %6878, %v284_v28   ;;  %748 = vmatpush.bf16.msra.mxu3 %v5368_v25  ;;  %v5332_v50 = vor.u32 %v6561_v44, %v5329_v47  ;;  %v5336_v51 = vor.u32 %v6564_v49, %v5335_v48  ;;  %v6562_v52 = vld [vmem:[#allocation2 + $0xc] sm:$0xf]  ;;  %v5337_v53 = vld [vmem:[#allocation2 + $0x18] sm:$0xf0]  ;;  %v285_v57 = vld [vmem:[%s7417_s9 + $0x20] sm:$0xff]  ;;  %v7643_v44 = vand.u32 127, %v221_v38 }
  0xa2   :  { %468 = vmatpush.bf16.msra.mxu0 %v6541_v0  ;;  %v5340_v54 = vor.u32 %v6562_v52, %v5337_v53  ;;  %v288_v56 = vld [vmem:[%s7417_s9 + $0x38] sm:$0xff]  ;;  %v5511_v58 = vld [vmem:[#allocation4 + $0x70] sm:$0xf]  ;;  %v5503_v60 = vld [vmem:[#allocation4 + $0x60] sm:$0xf]  ;;  %s8935_s9 = sld [smem:[#allocation17_spill]] }
  0xa3   :  { %v6608_v59 = vld [vmem:[#allocation4 + $0x74] sm:$0xf0]  ;;  %v6606_v61 = vld [vmem:[#allocation4 + $0x64] sm:$0xf0]  ;;  %v6607_v0 = vld [vmem:[#allocation4 + $0x74] sm:$0xf] }
  0xa4   :  { %735 = vmatpush.bf16.msra.mxu2 %v5348_v36  ;;  %v5512_v62 = vor.u32 %v6608_v59, %v5511_v58  ;;  %v5504_v63 = vor.u32 %v6606_v61, %v5503_v60  ;;  %v5495_v4 = vld [vmem:[#allocation4 + $0x50] sm:$0xf]  ;;  %v6604_v5 = vld [vmem:[#allocation4 + $0x54] sm:$0xf0]  ;;  %v5505_v8 = vld [vmem:[#allocation4 + $0x68] sm:$0xf0] }
  0xa5   :  { %469 = vmatmul.bf16.vlgmr.msra.gmra.mxu0 %v6540_v6  ;;  %749 = vmatpush.bf16.msra.mxu3 %v5352_v40  ;;  %v6603_v11 = vld [vmem:[#allocation4 + $0x54] sm:$0xf]  ;;  %v5497_v12 = vld [vmem:[#allocation4 + $0x58] sm:$0xf0]  ;;  %v6602_v14 = vld [vmem:[#allocation4 + $0x44] sm:$0xf0] }
  0xa6   :  { %757 = vmatpush.bf16.msrb.mxu0 %v5452_v1  ;;  %v5513_v1 = vld [vmem:[#allocation4 + $0x78] sm:$0xf0]  ;;  %v5500_v15 = vor.u32 %v6603_v11, %v5497_v12  ;;  %v5479_v17 = vld [vmem:[#allocation4 + $0x30] sm:$0xf]  ;;  %v6600_v18 = vld [vmem:[#allocation4 + $0x34] sm:$0xf0] }
  0xa7   :  { %v5516_v6 = vor.u32 %v6607_v0, %v5513_v1  ;;  %v5480_v19 = vor.u32 %v6600_v18, %v5479_v17  ;;  %v5471_v20 = vld [vmem:[#allocation4 + $0x20] sm:$0xf]  ;;  %v6598_v21 = vld [vmem:[#allocation4 + $0x24] sm:$0xf0]  ;;  %vm226_vm0 = vcmp.lt.s32.totalorder %v7643_v44, 40  ;;  %vm223_vm9 = vcmp.lt.s32.totalorder %v7643_v44, 92 }
  0xa8   :  { %317 = vperm.xlu0 %6877, %v286_v30   ;;  %736 = vmatpush.bf16.msra.mxu2 %v5332_v50  ;;  %v5472_v23 = vor.u32 %v6598_v21, %v5471_v20  ;;  %v6880_v24 = vld [vmem:[%s7442_s29] ss:$0 sm:$0xff]  ;;  %v7403_v50 = vmov 0.0   ;;  %v5489_v58 = vld [vmem:[#allocation4 + $0x48] sm:$0xf0]  ;;  %s8940_s29 = sld [smem:[#allocation22_spill]] }
  0xa9   :  { %750 = vmatpush.bf16.msra.mxu3 %v5336_v51  ;;  %322 = vperm.xlu1 %6878, %v287_v55   ;;  %v6881_v30 = vld [vmem:[%s7422_s13] ss:$0 sm:$0xff]  ;;  %v7647_v51 = vsel %vm226_vm0, 1.0, %v7403_v50  ;;  %v6596_v55 = vld [vmem:[#allocation4 + $0x14] sm:$0xf0]  ;;  %s8936_s13 = sld [smem:[#allocation16_spill]] }
  0xaa   :  { %758 = vmatpush.bf16.msrb.mxu0 %v5436_v7  ;;  %v6605_v7 = vld [vmem:[#allocation4 + $0x64] sm:$0xf]  ;;  %v5455_v59 = vld [vmem:[#allocation4] sm:$0xf]  ;;  %v6594_v60 = vld [vmem:[#allocation4 + $0x4] sm:$0xf0] }
  0xab   :  { %v5508_v9 = vor.u32 %v6605_v7, %v5505_v8  ;;  %v6599_v0 = vld [vmem:[#allocation4 + $0x34] sm:$0xf]  ;;  %v5481_v1 = vld [vmem:[#allocation4 + $0x38] sm:$0xf0] }
  0xac   :  { %870 = vmatpush.bf16.msrb.mxu2 %v5516_v6  ;;  %v5484_v6 = vor.u32 %v6599_v0, %v5481_v1  ;;  %v6595_v11 = vld [vmem:[#allocation4 + $0x14] sm:$0xf] }
  0xae   :  { %759 = vmatpush.bf16.msrb.mxu0 %v5420_v10  ;;  %v5496_v10 = vor.u32 %v6604_v5, %v5495_v4  ;;  %v5456_v4 = vor.u32 %v6594_v60, %v5455_v59  ;;  %v6632_v59 = vld [vmem:[#allocation6 + $0xb4] sm:$0xf0]  ;;  %v6637_v60 = vld [vmem:[#allocation6 + $0xe4] sm:$0xf] }
  0xb0   :  { %327 = vperm.xlu0 %6877, %v288_v56   ;;  %871 = vmatpush.bf16.msrb.mxu2 %v5508_v9  ;;  %v6601_v56 = vld [vmem:[#allocation4 + $0x44] sm:$0xf] }
  0xb1   :  { %v6597_v9 = vld [vmem:[#allocation4 + $0x24] sm:$0xf] }
  0xb2   :  { %760 = vmatpush.bf16.msrb.mxu0 %v5404_v13  ;;  %v5487_v13 = vld [vmem:[#allocation4 + $0x40] sm:$0xf] }
  0xb4   :  { %872 = vmatpush.bf16.msrb.mxu2 %v5500_v15  ;;  %v6593_v15 = vld [vmem:[#allocation4 + $0x4] sm:$0xf] }
  0xb6   :  { %761 = vmatpush.bf16.msrb.mxu0 %v5388_v16  ;;  %v5488_v16 = vor.u32 %v6602_v14, %v5487_v13  ;;  %v5465_v13 = vld [vmem:[#allocation4 + $0x18] sm:$0xf0] }
  0xb7   :  { %v5468_v14 = vor.u32 %v6595_v11, %v5465_v13  ;;  %v6628_v11 = vld [vmem:[#allocation6 + $0x94] sm:$0xf0]  ;;  %v6629_v13 = vld [vmem:[#allocation6 + $0xa4] sm:$0xf] }
  0xba   :  { %762 = vmatpush.bf16.msrb.mxu0 %v5372_v29 }
  0xbe   :  { %763 = vmatpush.bf16.msrb.mxu0 %v5356_v41 }
  0xc2   :  { %764 = vmatpush.bf16.msrb.mxu0 %v5340_v54  ;;  %v5463_v54 = vld [vmem:[#allocation4 + $0x10] sm:$0xf] }
  0xf9   :  { %6879 = vset.pattern.permute.xlu2 %v7402_v2  ;;  %v5344_v2 = vor.u32 %v6567_v32, %v5343_v31 }
  0xfa   :  { %v237_v29 = vpop.permute.xlu0 %236  ;;  %v247_v34 = vpop.permute.xlu1 %246 }
  0xfb   :  { %721 = vmatpush.bf16.msra.mxu1 %v5344_v2  ;;  %v257_v31 = vsub.f32 %v237_v29, %v6881_v30  ;;  %v259_v42 = vsub.f32 %v247_v34, %v6881_v30  ;;  %v6639_v29 = vld [vmem:[#allocation6 + $0xec] sm:$0xf0] }
  0xfc   :  { %v6635_v34 = vld [vmem:[#allocation6 + $0xcc] sm:$0xf0] }
  0xfd   :  { %v261_v33 = vmul.f32 %v257_v31, %v257_v31 }
  0xff   :  { %722 = vmatpush.bf16.msra.mxu1 %v5328_v46  ;;  %v265_v36 = vmul.f32 -4.875, %v261_v33  ;;  %v263_v46 = vmul.f32 %v259_v42, %v259_v42  ;;  %v5640_v33 = vld [vmem:[#allocation6 + $0xc0] sm:$0xf]  ;;  %v6631_v42 = vld [vmem:[#allocation6 + $0xac] sm:$0xf0] }
 0x100   :  { %312 = vperm.xlu2 %6879, %v285_v57   ;;  %v5464_v57 = vor.u32 %v6596_v55, %v5463_v54 }
 0x101   :  { %v269_v39 = vmul.f32 1.442695, %v265_v36  ;;  %v267_v52 = vmul.f32 -4.875, %v263_v46  ;;  %v6640_v36 = vld [vmem:[#allocation6 + $0xf4] sm:$0xf0] }
 0x102   :  { %v242_v32 = vpop.permute.xlu0 %241 }
 0x103   :  { %851 = vmatpush.bf16.msrb.mxu1 %v5512_v62  ;;  %v258_v2 = vsub.f32 %v242_v32, %v6881_v30  ;;  %v252_v41 = vpop.permute.xlu1 %251  ;;  %6894 = vpow2.f32 %v269_v39  ;;  %v273_v5 = vmul.f32 1.442695, %v267_v52  ;;  %v7676_v52 = vld [vmem:[%s7447_s3] sm:$0xff] }
 0x104   :  { %v260_v43 = vsub.f32 %v252_v41, %v6881_v30  ;;  %v5624_v41 = vld [vmem:[#allocation6 + $0xa0] sm:$0xf] }
 0x105   :  { %v262_v35 = vmul.f32 %v258_v2, %v258_v2  ;;  %v5625_v54 = vor.u32 %v6631_v42, %v5624_v41  ;;  %v5728_v41 = vld [vmem:[#allocation7 + $0x70] sm:$0xf]  ;;  %v6656_v42 = vld [vmem:[#allocation7 + $0x74] sm:$0xf0] }
 0x106   :  { %v264_v47 = vmul.f32 %v260_v43, %v260_v43 }
 0x107   :  { %852 = vmatpush.bf16.msrb.mxu1 %v5504_v63  ;;  %v266_v37 = vmul.f32 -4.875, %v262_v35  ;;  %v5492_v63 = vor.u32 %v6601_v56, %v5489_v58  ;;  %v5664_v35 = vld [vmem:[#allocation6 + $0xe8] sm:$0xf]  ;;  %v5608_v56 = vld [vmem:[#allocation6 + $0x80] sm:$0xf] }
 0x108   :  { %v268_v53 = vmul.f32 -4.875, %v264_v47  ;;  %v5648_v47 = vld [vmem:[#allocation6 + $0xc8] sm:$0xf] }
 0x109   :  { %v271_v40 = vmul.f32 1.442695, %v266_v37  ;;  %v6895_v48 = vpop.eup %6894  ;;  %873 = vmatpush.bf16.msrb.mxu2 %v5492_v63  ;;  %v5641_v37 = vor.u32 %v6635_v34, %v5640_v33  ;;  %v5632_v58 = vld [vmem:[#allocation6 + $0xa8] sm:$0xf]  ;;  %v5658_v63 = vld [vmem:[#allocation6 + $0xf0] sm:$0xf0] }
 0x10a   :  { %v7650_v61 = vmul.f32 %v6895_v48, %v7647_v51  ;;  %v275_v7 = vmul.f32 1.442695, %v268_v53  ;;  %v6636_v48 = vld [vmem:[#allocation6 + $0xd4] sm:$0xf0]  ;;  %v5661_v0 = vor.u32 %v6637_v60, %v5658_v63  ;;  %v7685_v33 = vld [vmem:[%s7447_s3 + $0x8] sm:$0xff] }
 0x10b   :  { %853 = vmatpush.bf16.msrb.mxu1 %v5496_v10  ;;  %6896 = vpow2.f32 %v271_v40  ;;  %v5473_v10 = vld [vmem:[#allocation4 + $0x28] sm:$0xf0]  ;;  %v5665_v40 = vor.u32 %v6640_v36, %v5664_v35  ;;  %v5649_v55 = vor.u32 %v6636_v48, %v5648_v47  ;;  %v5544_v36 = vld [vmem:[#allocation6] sm:$0xf]  ;;  %v6613_v63 = vld [vmem:[#allocation6 + $0x24] sm:$0xf] }
 0x10c   :  { %6898 = vpow2.f32 %v273_v5  ;;  %v5476_v12 = vor.u32 %v6597_v9, %v5473_v10  ;;  %v6633_v5 = vld [vmem:[#allocation6 + $0xc4] sm:$0xf]  ;;  %v5616_v9 = vld [vmem:[#allocation6 + $0x88] sm:$0xf]  ;;  %v5642_v10 = vld [vmem:[#allocation6 + $0xd0] sm:$0xf0] }
 0x10d   :  { %874 = vmatpush.bf16.msrb.mxu2 %v5484_v6  ;;  %6900 = vpow2.f32 %v275_v7  ;;  %v5633_v6 = vor.u32 %v6632_v59, %v5632_v58  ;;  %v6623_v7 = vld [vmem:[#allocation6 + $0x6c] sm:$0xf0]  ;;  %v5720_v58 = vld [vmem:[#allocation7 + $0x60] sm:$0xf]  ;;  %v6654_v59 = vld [vmem:[#allocation7 + $0x64] sm:$0xf0] }
 0x10f   :  { %854 = vmatpush.bf16.msrb.mxu1 %v5488_v16  ;;  %v5457_v16 = vld [vmem:[#allocation4 + $0x8] sm:$0xf0] }
 0x111   :  { %v6897_v49 = vpop.eup %6896  ;;  %875 = vmatpush.bf16.msrb.mxu2 %v5476_v12  ;;  %v5645_v12 = vor.u32 %v6633_v5, %v5642_v10  ;;  %v5712_v5 = vld [vmem:[#allocation7 + $0x50] sm:$0xf] }
 0x112   :  { %v7653_v62 = vmul.f32 %v6897_v49, %v7647_v51  ;;  %v6899_v17 = vpop.eup %6898 }
 0x113   :  { %855 = vmatpush.bf16.msrb.mxu1 %v5480_v19  ;;  %v6901_v18 = vpop.eup %6900  ;;  %v5460_v19 = vor.u32 %v6593_v15, %v5457_v16  ;;  %v7661_v20 = vmul.f32 %v6899_v17, %v7647_v51  ;;  %v5617_v16 = vor.u32 %v6628_v11, %v5616_v9  ;;  %v5576_v17 = vld [vmem:[#allocation6 + $0x40] sm:$0xf]  ;;  %v293_v9 = vpop.permute.xlu0 %292 }
 0x114   :  { %v7657_v8 = vpack.c.bf16 %v7653_v62, %v7650_v61  ;;  %v7664_v21 = vmul.f32 %v6901_v18, %v7647_v51 }
 0x115   :  { %876 = vmatpush.bf16.msrb.mxu2 %v5468_v14  ;;  %v5626_v14 = vld [vmem:[#allocation6 + $0xb0] sm:$0xf0] }
 0x116   :  { %v5629_v18 = vor.u32 %v6629_v13, %v5626_v14  ;;  %v298_v13 = vpop.permute.xlu1 %297  ;;  %v6650_v14 = vld [vmem:[#allocation7 + $0x44] sm:$0xf0] }
 0x117   :  { %856 = vmatpush.bf16.msrb.mxu1 %v5472_v23 }
 0x119   :  { %877 = vmatpush.bf16.msrb.mxu2 %v5460_v19  ;;  %v5600_v19 = vld [vmem:[#allocation6 + $0x68] sm:$0xf] }
 0x11b   :  { %857 = vmatpush.bf16.msrb.mxu1 %v5464_v57  ;;  %v6627_v57 = vld [vmem:[#allocation6 + $0x8c] sm:$0xf0] }
 0x11c   :  { %v5609_v1 = vor.u32 %v6627_v57, %v5608_v56  ;;  %v5578_v56 = vld [vmem:[#allocation6 + $0x50] sm:$0xf0]  ;;  %v6612_v57 = vld [vmem:[#allocation6 + $0x14] sm:$0xf0] }
 0x11f   :  { %858 = vmatpush.bf16.msrb.mxu1 %v5456_v4  ;;  %v5592_v4 = vld [vmem:[#allocation6 + $0x60] sm:$0xf] }
 0x120   :  { %v5593_v15 = vor.u32 %v6623_v7, %v5592_v4  ;;  %v5721_v4 = vor.u32 %v6654_v59, %v5720_v58  ;;  %v5706_v58 = vld [vmem:[#allocation7 + $0x48] sm:$0xf0] }
 0x122   :  { %v470_v22 = vpop.f32.mrf.mxu0 }
 0x123   :  { %v7636_v26 = vadd.f32 %v6880_v24, %v470_v22  ;;  %v7668_v22 = vpack.c.bf16 %v7664_v21, %v7661_v20 }
 0x12a   :  { %v472_v25 = vpop.f32.mrf.mxu0 }
 0x12b   :  { %v7638_v27 = vadd.f32 %v6880_v24, %v472_v25 }
 0x12d   :  { %v501_v28 = vpack.c.bf16 %v7638_v27, %v7636_v26 }
 0x12f   :  { %723 = vmatmul.bf16.vlgmr.msra.gmra.mxu1 %v501_v28  ;;  %737 = vmatmul.bf16.vlgmr.msra.gmra.mxu2 %v501_v28 }
 0x130   :  { %751 = vmatmul.bf16.vlgmr.msra.gmra.mxu3 %v501_v28  ;;  %765 = vmatmul.bf16.vlgmr.msrb.gmra.mxu0 %v501_v28  ;;  %v5656_v28 = vld [vmem:[#allocation6 + $0xe0] sm:$0xf] }
 0x131   :  { %v5657_v32 = vor.u32 %v6639_v29, %v5656_v28  ;;  %v5560_v28 = vld [vmem:[#allocation6 + $0x20] sm:$0xf]  ;;  %v6615_v29 = vld [vmem:[#allocation6 + $0x2c] sm:$0xf0] }
 0x132   :  { %v5561_v35 = vor.u32 %v6615_v29, %v5560_v28  ;;  %v5730_v28 = vld [vmem:[#allocation7 + $0x78] sm:$0xf0] }
 0x13f   :  { %859 = vmatmul.bf16.vlgmr.msrb.gmra.mxu1 %v7657_v8  ;;  %878 = vmatmul.bf16.vlgmr.msrb.gmra.mxu2 %v7657_v8 }
 0x14f   :  { %864 = vmatmul.bf16.gmra.mxu1 %v7668_v22  ;;  %883 = vmatmul.bf16.gmra.mxu2 %v7668_v22 }
 0x1ac   :  { %v724_v24 = vpop.f32.mrf.mxu1 }
 0x1ad   :  { %v766_v23 = vpop.f32.mrf.mxu0 }
 0x1b2   :  { %v738_v25 = vpop.f32.mrf.mxu2 }
 0x1b3   :  { %v752_v30 = vpop.f32.mrf.mxu3 }
 0x1b4   :  { %v726_v38 = vpop.f32.mrf.mxu1 }
 0x1b5   :  { %v768_v31 = vpop.f32.mrf.mxu0  ;;  %v889_v53 = vpack.c.bf16 %v726_v38, %v724_v24 }
 0x1b6   :  { %v892_v2 = vpack.c.bf16 %v768_v31, %v766_v23  ;;  %v6624_v23 = vld [vmem:[#allocation6 + $0x74] sm:$0xf0] }
 0x1b7   :  { %v6620_v31 = vld [vmem:[#allocation6 + $0x54] sm:$0xf0] }
 0x1b8   :  { %936 = vmatpush.bf16.msra.mxu0 %v892_v2  ;;  %v5610_v2 = vld [vmem:[#allocation6 + $0x90] sm:$0xf0] }
 0x1ba   :  { %v740_v39 = vpop.f32.mrf.mxu2 }
 0x1bb   :  { %v890_v43 = vpack.c.bf16 %v740_v39, %v738_v25  ;;  %v754_v46 = vpop.f32.mrf.mxu3  ;;  %5527 = vmatmul.msk.bf16.vlgmr.msra.gmra.mxu0 %vm903_vm1, %v7607_v3  ;;  %v5601_v25 = vor.u32 %v6624_v23, %v5600_v19  ;;  %v5568_v39 = vld [vmem:[#allocation6 + $0x28] sm:$0xf]  ;;  %v5696_v23 = vld [vmem:[#allocation7 + $0x30] sm:$0xf] }
 0x1bc   :  { %1514 = vmatpush.bf16.msrb.mxu0 %v5657_v32  ;;  %v891_v49 = vpack.c.bf16 %v754_v46, %v752_v30  ;;  %v5584_v30 = vld [vmem:[#allocation6 + $0x48] sm:$0xf]  ;;  %v6625_v32 = vld [vmem:[#allocation6 + $0x84] sm:$0xf]  ;;  %v5594_v46 = vld [vmem:[#allocation6 + $0x70] sm:$0xf0] }
 0x1bd   :  { %990 = vmatpush.bf16.msra.mxu1 %v890_v43  ;;  %v5613_v34 = vor.u32 %v6625_v32, %v5610_v2  ;;  %v5585_v38 = vor.u32 %v6620_v31, %v5584_v30  ;;  %v6621_v43 = vld [vmem:[#allocation6 + $0x64] sm:$0xf]  ;;  %v5722_v32 = vld [vmem:[#allocation7 + $0x68] sm:$0xf0] }
 0x1be   :  { %917 = vmatpush.bf16.msrb.mxu3 %v891_v49  ;;  %v5597_v47 = vor.u32 %v6621_v43, %v5594_v46  ;;  %v6617_v49 = vld [vmem:[#allocation6 + $0x44] sm:$0xf]  ;;  %v5680_v46 = vld [vmem:[#allocation7 + $0x10] sm:$0xf] }
 0x1bf   :  { %v5581_v60 = vor.u32 %v6617_v49, %v5578_v56  ;;  %v6653_v31 = vld [vmem:[#allocation7 + $0x64] sm:$0xf]  ;;  %v6642_v56 = vld [vmem:[#allocation7 + $0x4] sm:$0xf0] }
 0x1c0   :  { %1515 = vmatpush.bf16.msrb.mxu0 %v5641_v37  ;;  %5539 = vmatmul.msk.bf16.vlgmr.msra.gmra.mxu1 %vm903_vm1, %v7676_v52  ;;  %v6611_v37 = vld [vmem:[#allocation6 + $0xc] sm:$0xf0] }
 0x1c1   :  { %1552 = vmatpush.bf16.msrb.mxu1 %v5665_v40  ;;  %5525 = vmatmul.msk.bf16.vlgmr.msrb.gmra.mxu3 %vm903_vm1, %v7607_v3  ;;  %v6619_v3 = vld [vmem:[#allocation6 + $0x4c] sm:$0xf0]  ;;  %v6616_v40 = vld [vmem:[#allocation6 + $0x34] sm:$0xf0]  ;;  %v5545_v48 = vor.u32 %v6611_v37, %v5544_v36  ;;  %v5725_v36 = vor.u32 %v6653_v31, %v5722_v32  ;;  %v6646_v37 = vld [vmem:[#allocation7 + $0x24] sm:$0xf0] }
 0x1c2   :  { %971 = vmatpush.bf16.msra.mxu3 %v889_v53  ;;  %v5577_v24 = vor.u32 %v6619_v3, %v5576_v17  ;;  %v5569_v53 = vor.u32 %v6616_v40, %v5568_v39  ;;  %v5714_v39 = vld [vmem:[#allocation7 + $0x58] sm:$0xf0]  ;;  %v5674_v31 = vld [vmem:[#allocation7 + $0x8] sm:$0xf0] }
 0x1c4   :  { %1516 = vmatpush.bf16.msrb.mxu0 %v5625_v54  ;;  %v5729_v54 = vor.u32 %v6656_v42, %v5728_v41 }
 0x1c5   :  { %1553 = vmatpush.bf16.msrb.mxu1 %v5649_v55  ;;  %v5552_v55 = vld [vmem:[#allocation6 + $0x8] sm:$0xf] }
 0x1c6   :  { %1533 = vmatpush.bf16.msrb.mxu3 %v5661_v0  ;;  %v5562_v0 = vld [vmem:[#allocation6 + $0x30] sm:$0xf0] }
 0x1c7   :  { %v5565_v7 = vor.u32 %v6613_v63, %v5562_v0  ;;  %v7703_v63 = vpop.trf.xlu2 }
 0x1c8   :  { %1517 = vmatpush.bf16.msrb.mxu0 %v5609_v1  ;;  %v7692_v1 = vld [vmem:[%s7427_s17] ss:$0 sm:$0xff]  ;;  %s8937_s17 = sld [smem:[#allocation20_spill]] }
 0x1c9   :  { %1554 = vmatpush.bf16.msrb.mxu1 %v5633_v6  ;;  %v6652_v6 = vld [vmem:[#allocation7 + $0x54] sm:$0xf0]  ;;  %v333_v10 = vsub.f32 %v293_v9, %v7692_v1  ;;  %v334_v17 = vsub.f32 %v298_v13, %v7692_v1 }
 0x1ca   :  { %1534 = vmatpush.bf16.msrb.mxu3 %v5645_v12  ;;  %v5713_v11 = vor.u32 %v6652_v6, %v5712_v5  ;;  %v5704_v12 = vld [vmem:[#allocation7 + $0x40] sm:$0xf]  ;;  %v5698_v5 = vld [vmem:[#allocation7 + $0x38] sm:$0xf0] }
 0x1cb   :  { %5528 = vmatmul.msk.bf16.gmra.mxu0 %vm903_vm1, %v7620_v45  ;;  %v5705_v19 = vor.u32 %v6650_v14, %v5704_v12  ;;  %v342_v29 = vmul.f32 %v334_v17, %v334_v17 }
 0x1cc   :  { %1518 = vmatpush.bf16.msrb.mxu0 %v5593_v15  ;;  %v6609_v15 = vld [vmem:[#allocation6 + $0x4] sm:$0xf] }
 0x1cd   :  { %1555 = vmatpush.bf16.msrb.mxu1 %v5617_v16  ;;  %v5546_v16 = vld [vmem:[#allocation6 + $0x10] sm:$0xf0]  ;;  %v350_v40 = vmul.f32 -12.414088, %v342_v29 }
 0x1ce   :  { %1535 = vmatpush.bf16.msrb.mxu3 %v5629_v18  ;;  %v5549_v3 = vor.u32 %v6609_v15, %v5546_v16  ;;  %v341_v18 = vmul.f32 %v333_v10, %v333_v10  ;;  %v6645_v10 = vld [vmem:[#allocation7 + $0x24] sm:$0xf]  ;;  %v6643_v15 = vld [vmem:[#allocation7 + $0x14] sm:$0xf]  ;;  %v5682_v16 = vld [vmem:[#allocation7 + $0x18] sm:$0xf0] }
 0x1d0   :  { %1519 = vmatpush.bf16.msrb.mxu0 %v5577_v24  ;;  %5540 = vmatmul.msk.bf16.gmra.mxu1 %vm903_vm1, %v7685_v33  ;;  %v6648_v24 = vld [vmem:[#allocation7 + $0x34] sm:$0xf0]  ;;  %v349_v2 = vmul.f32 -12.414088, %v341_v18 }
 0x1d1   :  { %1556 = vmatpush.bf16.msrb.mxu1 %v5601_v25  ;;  %5526 = vmatmul.msk.bf16.gmra.mxu3 %vm903_vm1, %v7620_v45  ;;  %v5553_v45 = vor.u32 %v6612_v57, %v5552_v55  ;;  %v6655_v25 = vld [vmem:[#allocation7 + $0x74] sm:$0xf]  ;;  %v308_v55 = vpop.permute.xlu1 %307  ;;  %v6649_v57 = vld [vmem:[#allocation7 + $0x44] sm:$0xf] }
 0x1d2   :  { %1536 = vmatpush.bf16.msrb.mxu3 %v5613_v34  ;;  %v5733_v30 = vor.u32 %v6655_v25, %v5730_v28  ;;  %v5697_v34 = vor.u32 %v6648_v24, %v5696_v23  ;;  %v357_v43 = vmul.f32 1.442695, %v349_v2  ;;  %v336_v59 = vsub.f32 %v308_v55, %v7692_v1  ;;  %v313_v25 = vpop.permute.xlu2 %312 }
 0x1d3   :  { %v337_v29 = vsub.f32 %v313_v25, %v7692_v1 }
 0x1d4   :  { %1520 = vmatpush.bf16.msrb.mxu0 %v5561_v35  ;;  %v5688_v35 = vld [vmem:[#allocation7 + $0x20] sm:$0xf]  ;;  %6902 = vpow2.f32 %v357_v43  ;;  %v344_v6 = vmul.f32 %v336_v59, %v336_v59 }
 0x1d5   :  { %1557 = vmatpush.bf16.msrb.mxu1 %v5585_v38  ;;  %v6651_v38 = vld [vmem:[#allocation7 + $0x54] sm:$0xf]  ;;  %v5689_v41 = vor.u32 %v6646_v37, %v5688_v35 }
 0x1d6   :  { %1537 = vmatpush.bf16.msrb.mxu3 %v5597_v47  ;;  %v5717_v42 = vor.u32 %v6651_v38, %v5714_v39  ;;  %v6644_v47 = vld [vmem:[#allocation7 + $0x14] sm:$0xf0]  ;;  %v352_v17 = vmul.f32 -12.414088, %v344_v6 }
 0x1d7   :  { %v5681_v49 = vor.u32 %v6644_v47, %v5680_v46 }
 0x1d8   :  { %1521 = vmatpush.bf16.msrb.mxu0 %v5545_v48  ;;  %v303_v48 = vpop.permute.xlu0 %302  ;;  %v363_v24 = vmul.f32 1.442695, %v352_v17 }
 0x1d9   :  { %1558 = vmatpush.bf16.msrb.mxu1 %v5569_v53  ;;  %v5672_v53 = vld [vmem:[#allocation7] sm:$0xf]  ;;  %v323_v46 = vpop.permute.xlu1 %322 }
 0x1da   :  { %1538 = vmatpush.bf16.msrb.mxu3 %v5581_v60  ;;  %v5709_v60 = vor.u32 %v6649_v57, %v5706_v58  ;;  %v5673_v0 = vor.u32 %v6642_v56, %v5672_v53  ;;  %v6903_v9 = vpop.eup %6902 }
 0x1db   :  { %1522 = vmatmul.bf16.vlgmr.msrb.gmra.mxu0 %v7657_v8 }
 0x1dc   :  { %1670 = vmatpush.bf16.msra.mxu0 %v5729_v54  ;;  %v335_v54 = vsub.f32 %v303_v48, %v7692_v1  ;;  %v339_v48 = vsub.f32 %v323_v46, %v7692_v1 }
 0x1dd   :  { %1559 = vmatpush.bf16.msrb.mxu1 %v5553_v45 }
 0x1de   :  { %1539 = vmatpush.bf16.msrb.mxu3 %v5565_v7  ;;  %v343_v45 = vmul.f32 %v335_v54, %v335_v54  ;;  %v347_v53 = vmul.f32 %v339_v48, %v339_v48 }
 0x1e0   :  { %1671 = vmatpush.bf16.msra.mxu0 %v5721_v4  ;;  %1560 = vmatmul.bf16.vlgmr.msrb.gmra.mxu1 %v7657_v8  ;;  %v6647_v4 = vld [vmem:[#allocation7 + $0x34] sm:$0xf]  ;;  %v351_v14 = vmul.f32 -12.414088, %v343_v45  ;;  %v318_v28 = vpop.permute.xlu0 %317  ;;  %v355_v57 = vmul.f32 -12.414088, %v347_v53 }
 0x1e1   :  { %5537 = vmatmul.msk.bf16.vlgmr.msra.gmra.mxu3 %vm903_vm1, %v7676_v52  ;;  %v359_v52 = vmul.f32 1.442695, %v350_v40  ;;  %v5701_v7 = vor.u32 %v6647_v4, %v5698_v5  ;;  %v338_v32 = vsub.f32 %v318_v28, %v7692_v1 }
 0x1e2   :  { %1540 = vmatpush.bf16.msrb.mxu3 %v5549_v3  ;;  %v373_v3 = vmul.f32 %v6903_v9, %v7647_v51  ;;  %v361_v23 = vmul.f32 1.442695, %v351_v14  ;;  %v369_v45 = vmul.f32 1.442695, %v355_v57 }
 0x1e3   :  { %6904 = vpow2.f32 %v359_v52  ;;  %v346_v35 = vmul.f32 %v338_v32, %v338_v32 }
 0x1e4   :  { %1672 = vmatpush.bf16.msra.mxu0 %v5713_v11  ;;  %v5690_v11 = vld [vmem:[#allocation7 + $0x28] sm:$0xf0]  ;;  %6906 = vpow2.f32 %v361_v23 }
 0x1e5   :  { %v5693_v13 = vor.u32 %v6645_v10, %v5690_v11  ;;  %6908 = vpow2.f32 %v363_v24  ;;  %v354_v39 = vmul.f32 -12.414088, %v346_v35 }
 0x1e6   :  { %1699 = vmatpush.bf16.msra.mxu3 %v5733_v30  ;;  %v6641_v30 = vld [vmem:[#allocation7 + $0x4] sm:$0xf] }
 0x1e7   :  { %v5677_v2 = vor.u32 %v6641_v30, %v5674_v31  ;;  %v367_v43 = vmul.f32 1.442695, %v354_v39 }
 0x1e8   :  { %1673 = vmatpush.bf16.msra.mxu0 %v5705_v19  ;;  %v5685_v19 = vor.u32 %v6643_v15, %v5682_v16  ;;  %v328_v47 = vpop.permute.xlu0 %327  ;;  %v879_v15 = vpop.f32.mrf.mxu2 }
 0x1e9   :  { %v6905_v12 = vpop.eup %6904 }
 0x1ea   :  { %1700 = vmatpush.bf16.msra.mxu3 %v5725_v36  ;;  %v374_v18 = vmul.f32 %v6905_v12, %v7647_v51  ;;  %v6907_v36 = vpop.eup %6906 }
 0x1eb   :  { %1527 = vmatmul.bf16.gmra.mxu0 %v7668_v22  ;;  %v6909_v37 = vpop.eup %6908  ;;  %v375_v40 = vmul.f32 %v6907_v36, %v7647_v51 }
 0x1ec   :  { %1674 = vmatpush.bf16.msra.mxu0 %v5697_v34  ;;  %v345_v34 = vmul.f32 %v337_v29, %v337_v29  ;;  %v7748_v29 = vld [vmem:[%s8934_s5] sm:$0x3] }
 0x1ed   :  { %v1012_v35 = vperm.slane %v7748_v29, 1 }
 0x1ee   :  { %1701 = vmatpush.bf16.msra.mxu3 %v5717_v42  ;;  %v353_v38 = vmul.f32 -12.414088, %v345_v34 }
 0x1f0   :  { %1675 = vmatpush.bf16.msra.mxu0 %v5689_v41  ;;  %1565 = vmatmul.bf16.gmra.mxu1 %v7668_v22  ;;  %v376_v41 = vmul.f32 %v6909_v37, %v7647_v51  ;;  %v365_v42 = vmul.f32 1.442695, %v353_v38 }
 0x1f1   :  { %5538 = vmatmul.msk.bf16.gmra.mxu3 %vm903_vm1, %v7685_v33  ;;  %v7710_v33 = vpack.c.bf16 %v374_v18, %v373_v3  ;;  %v881_v3 = vpop.f32.mrf.mxu2 }
 0x1f2   :  { %1702 = vmatpush.bf16.msra.mxu3 %v5709_v60  ;;  %v7718_v52 = vpack.c.bf16 %v376_v41, %v375_v40  ;;  %6910 = vpow2.f32 %v365_v42 }
 0x1f3   :  { %6912 = vpow2.f32 %v367_v43 }
 0x1f4   :  { %1676 = vmatpush.bf16.msra.mxu0 %v5681_v49  ;;  %v340_v49 = vsub.f32 %v328_v47, %v7692_v1  ;;  %6914 = vpow2.f32 %v369_v45 }
 0x1f6   :  { %1703 = vmatpush.bf16.msra.mxu3 %v5701_v7  ;;  %v348_v54 = vmul.f32 %v340_v49, %v340_v49 }
 0x1f8   :  { %1677 = vmatpush.bf16.msra.mxu0 %v5673_v0  ;;  %v6911_v55 = vpop.eup %6910  ;;  %v356_v58 = vmul.f32 -12.414088, %v348_v54  ;;  %v7726_v0 = vpop.f32.mrf.mxu1 }
 0x1f9   :  { %v6913_v56 = vpop.eup %6912  ;;  %v377_v59 = vmul.f32 %v6911_v55, %v7647_v51  ;;  %v884_v30 = vpop.f32.mrf.mxu2 }
 0x1fa   :  { %1704 = vmatpush.bf16.msra.mxu3 %v5693_v13  ;;  %v378_v60 = vmul.f32 %v6913_v56, %v7647_v51  ;;  %v371_v4 = vmul.f32 1.442695, %v356_v58  ;;  %v6915_v6 = vpop.eup %6914 }
 0x1fb   :  { %1678 = vmatmul.bf16.vlgmr.msra.gmra.mxu0 %v7710_v33  ;;  %v379_v9 = vmul.f32 %v6915_v6, %v7647_v51 }
 0x1fc   :  { %v7728_v5 = vpack.c.bf16 %v378_v60, %v377_v59  ;;  %6916 = vpow2.f32 %v371_v4 }
 0x1fe   :  { %1705 = vmatpush.bf16.msra.mxu3 %v5685_v19 }
 0x200   :  { %v7731_v1 = vpop.f32.mrf.mxu1 }
 0x201   :  { %1541 = vmatmul.bf16.vlgmr.msrb.gmra.mxu3 %v7657_v8  ;;  %v886_v47 = vpop.f32.mrf.mxu2 }
 0x202   :  { %1706 = vmatpush.bf16.msra.mxu3 %v5677_v2  ;;  %v6917_v7 = vpop.eup %6916 }
 0x203   :  { %v380_v10 = vmul.f32 %v6917_v7, %v7647_v51 }
 0x205   :  { %v7736_v11 = vpack.c.bf16 %v380_v10, %v379_v9  ;;  %v7773_v10 = vld [vmem:[%s8935_s9] sm:$0xff] }
 0x206   :  { %2247 = vxpose.xlu1.c.b16.start [1/4] (short) (narrow) %v7773_v10, 32 }
 0x208   :  { %v7738_v12 = vpop.f32.mrf.mxu1 }
 0x20b   :  { %1683 = vmatmul.bf16.gmra.mxu0 %v7718_v52 }
 0x210   :  { %v7742_v13 = vpop.f32.mrf.mxu1 }
 0x211   :  { %1546 = vmatmul.bf16.gmra.mxu3 %v7668_v22 }
 0x21b   :  { %1688 = vmatmul.bf16.gmra.mxu0 %v7728_v5 }
 0x221   :  { %1707 = vmatmul.bf16.vlgmr.msra.gmra.mxu3 %v7710_v33 }
 0x22b   :  { %1693 = vmatmul.bf16.gmra.mxu0 %v7736_v11 }
 0x231   :  { %1712 = vmatmul.bf16.gmra.mxu3 %v7718_v52 }
 0x238   :  { %v938_v14 = vpop.f32.mrf.mxu0 }
 0x23d   :  { %v992_v16 = vpop.f32.mrf.mxu1 }
 0x23e   :  { %v993_v25 = vadd.f32 %v992_v16, %v938_v14 }
 0x240   :  { %v940_v17 = vpop.f32.mrf.mxu0  ;;  %v1003_v34 = vadd.f32 %v993_v25, %v879_v15 }
 0x241   :  { %1717 = vmatmul.bf16.gmra.mxu3 %v7728_v5 }
 0x242   :  { %v7754_v39 = vadd.f32 %v1012_v35, %v1003_v34 }
 0x244   :  { %v7745_v18 = vpop.f32.mrf.mxu3  ;;  %v1042_v48 = vmul.f32 %v7754_v39, %v7754_v39 }
 0x245   :  { %v994_v19 = vpop.f32.mrf.mxu1 }
 0x246   :  { %v995_v24 = vadd.f32 %v994_v19, %v940_v17 }
 0x248   :  { %v943_v23 = vpop.f32.mrf.mxu0  ;;  %v1005_v32 = vadd.f32 %v995_v24, %v881_v3 }
 0x24a   :  { %v7752_v38 = vadd.f32 %v1012_v35, %v1005_v32 }
 0x24c   :  { %v921_v28 = vpop.f32.mrf.mxu3  ;;  %v1044_v43 = vmul.f32 %v7752_v38, %v7752_v38  ;;  %v1032_v49 = vadd.f32 %v7752_v38, %v7754_v39 }
 0x24d   :  { %v997_v31 = vpop.f32.mrf.mxu1 }
 0x24e   :  { %v998_v2 = vadd.f32 %v997_v31, %v943_v23  ;;  %v1058_v56 = vadd.f32 %v1044_v43, %v1042_v48  ;;  %v7781_v48 = vld [vmem:[%s8935_s9 + $0x8] sm:$0xff] }
 0x24f   :  { %2248 = vxpose.xlu1.c.b16.cont [2/4] (short) (narrow) %v7781_v48, 32 }
 0x250   :  { %v1007_v36 = vadd.f32 %v998_v2, %v884_v30  ;;  %v945_v37 = vpop.f32.mrf.mxu0 }
 0x251   :  { %1722 = vmatmul.bf16.gmra.mxu3 %v7736_v11 }
 0x252   :  { %v7756_v40 = vadd.f32 %v1012_v35, %v1007_v36 }
 0x254   :  { %v924_v41 = vpop.f32.mrf.mxu3  ;;  %v1046_v53 = vmul.f32 %v7756_v40, %v7756_v40  ;;  %v1033_v57 = vadd.f32 %v1032_v49, %v7756_v40 }
 0x255   :  { %v999_v42 = vpop.f32.mrf.mxu1 }
 0x256   :  { %v1000_v46 = vadd.f32 %v999_v42, %v945_v37  ;;  %v1059_v59 = vadd.f32 %v1058_v56, %v1046_v53 }
 0x258   :  { %v1009_v54 = vadd.f32 %v1000_v46, %v886_v47  ;;  %v1523_v55 = vpop.f32.mrf.mxu0 }
 0x25a   :  { %v7767_v58 = vadd.f32 %v1012_v35, %v1009_v54 }
 0x25c   :  { %v1034_v60 = vadd.f32 %v1033_v57, %v7767_v58  ;;  %v1048_v45 = vmul.f32 %v7767_v58, %v7767_v58  ;;  %v926_v4 = vpop.f32.mrf.mxu3 }
 0x25d   :  { %v1561_v6 = vpop.f32.mrf.mxu1 }
 0x25e   :  { %v1035_v7 = vrot.slane %v1034_v60, 4  ;;  %v1060_v9 = vadd.f32 %v1059_v59, %v1048_v45 }
 0x260   :  { %v1036_v14 = vadd.f32 %v1035_v7, %v1034_v60  ;;  %v1061_v15 = vrot.slane %v1060_v9, 4  ;;  %v1525_v16 = vpop.f32.mrf.mxu0 }
 0x261   :  { %v1728_v45 = vpack.c.bf16 %v1525_v16, %v1523_v55 }
 0x262   :  { %v1037_v17 = vrot.slane %v1036_v14, 2  ;;  %v1062_v3 = vadd.f32 %v1061_v15, %v1060_v9 }
 0x264   :  { %v1038_v19 = vadd.f32 %v1037_v17, %v1036_v14  ;;  %v1063_v23 = vrot.slane %v1062_v3, 2  ;;  %v973_v24 = vpop.f32.mrf.mxu3  ;;  %v7787_v17 = vld [vmem:[%s8936_s13] sm:$0xff] }
 0x265   :  { %v1563_v25 = vpop.f32.mrf.mxu1  ;;  %v974_v59 = vadd.f32 %v973_v24, %v7745_v18 }
 0x266   :  { %v1039_v30 = vrot.slane %v1038_v19, 1  ;;  %v1064_v31 = vadd.f32 %v1063_v23, %v1062_v3  ;;  %v1732_v16 = vpack.c.bf16 %v1563_v25, %v1561_v6 }
 0x267   :  { %v1002_v3 = vadd.f32 %v974_v59, %v7726_v0 }
 0x268   :  { %v1040_v32 = vadd.f32 %v1039_v30, %v1038_v19  ;;  %v1065_v2 = vrot.slane %v1064_v31, 1  ;;  %v1528_v34 = vpop.f32.mrf.mxu0  ;;  %v1011_v19 = vperm.slane %v7748_v29, 0  ;;  %v7803_v30 = vld [vmem:[%s8935_s9 + $0x10] sm:$0xff] }
 0x269   :  { %2249 = vxpose.xlu1.c.b16.cont [3/4] (short) (narrow) %v7803_v30, 32 }
 0x26a   :  { %v1066_v35 = vadd.f32 %v1065_v2, %v1064_v31  ;;  %v7776_v36 = vmul.f32 0.03125, %v1040_v32 }
 0x26c   :  { %v1070_v37 = vmul.f32 0.03125, %v1066_v35  ;;  %v1072_v42 = vmul.f32 %v7776_v36, %v7776_v36  ;;  %v975_v43 = vpop.f32.mrf.mxu3 }
 0x26d   :  { %v1566_v46 = vpop.f32.mrf.mxu1  ;;  %v976_v54 = vadd.f32 %v975_v43, %v921_v28 }
 0x26e   :  { %v1074_v47 = vsub.f32 %v1070_v37, %v1072_v42 }
 0x26f   :  { %v1004_v7 = vadd.f32 %v976_v54, %v7731_v1 }
 0x270   :  { %v1076_v49 = vmax.f32 %v1074_v47, 0.0  ;;  %v1530_v53 = vpop.f32.mrf.mxu0 }
 0x271   :  { %v1730_v56 = vpack.c.bf16 %v1530_v53, %v1528_v34  ;;  %v7792_v18 = vadd.f32 %v1011_v19, %v1004_v7  ;;  %v7824_v53 = vld [vmem:[%s8936_s13 + $0x8] sm:$0xff]  ;;  %v7829_v7 = vld [vmem:[%s8937_s17] sm:$0x3] }
 0x272   :  { %v1086_v57 = vadd.f32 1e-05, %v1076_v49 }
 0x273   :  { %1864 = vmatpush.bf16.msrb.mxu0 %v1730_v56 }
 0x274   :  { %6918 = vrsqrt.f32 %v1086_v57  ;;  %v978_v60 = vpop.f32.mrf.mxu3  ;;  %vm1103_vm4 = vweird.f32 %v1086_v57 }
 0x275   :  { %v979_v9 = vadd.f32 %v978_v60, %v924_v41  ;;  %v1568_v14 = vpop.f32.mrf.mxu1  ;;  %v7796_v41 = vadd.f32 %v1011_v19, %v1002_v3 }
 0x276   :  { %v1734_v15 = vpack.c.bf16 %v1568_v14, %v1566_v46 }
 0x277   :  { %v1006_v28 = vadd.f32 %v979_v9, %v7738_v12  ;;  %1865 = vmatpush.bf16.msrb.mxu0 %v1728_v45  ;;  %v1043_v12 = vmul.f32 %v7792_v18, %v7792_v18  ;;  %v1041_v6 = vmul.f32 %v7796_v41, %v7796_v41  ;;  %v1023_v25 = vadd.f32 %v7792_v18, %v7796_v41 }
 0x278   :  { %1774 = vmatpush.bf16.msra.mxu1 %v1734_v15 }
 0x279   :  { %v7798_v23 = vadd.f32 %v1011_v19, %v1006_v28 }
 0x27a   :  { %v6919_v55 = vpop.eup %6918  ;;  %5774 = vmatmul.msk.bf16.vlgmr.msrb.gmra.mxu0 %vm1217_vm2, %v7787_v17 }
 0x27b   :  { %v1098_v1 = vmul.f32 %v6919_v55, %v1086_v57  ;;  %v1045_v31 = vmul.f32 %v7798_v23, %v7798_v23  ;;  %v1024_v34 = vadd.f32 %v1023_v25, %v7798_v23  ;;  %vm1104_vm3 = vweird.f32 %v6919_v55 }
 0x27c   :  { %v980_v0 = vpop.f32.mrf.mxu3  ;;  %1775 = vmatpush.bf16.msra.mxu1 %v1732_v16  ;;  %vm1105_vm5 = vmor %vm1103_vm4, %vm1104_vm3  ;;  %v1117_v57 = vperm.slane %v7829_v7, 1 }
 0x27d   :  { %v1099_v29 = vmul.f32 %v6919_v55, %v1098_v1  ;;  %v981_v24 = vadd.f32 %v980_v0, %v926_v4  ;;  %v1049_v4 = vadd.f32 %v1043_v12, %v1041_v6  ;;  %v1084_v1 = vsub.f32 %v7767_v58, %v7776_v36  ;;  %v7837_v0 = vld [vmem:[%s8935_s9 + $0x18] sm:$0xff] }
 0x27e   :  { %2250 = vxpose.xlu1.c.b16.end [4/4] (short) (narrow) %v7837_v0, 32 }
 0x27f   :  { %v1008_v32 = vadd.f32 %v981_v24, %v7742_v13  ;;  %5750 = vmatmul.msk.bf16.vlgmr.msra.gmra.mxu1 %vm1217_vm2, %v7773_v10  ;;  %v1100_v2 = vmul.f32 0.5, %v1099_v29  ;;  %v1050_v37 = vadd.f32 %v1049_v4, %v1045_v31  ;;  %v7840_v29 = vld [vmem:[%s8938_s21] sm:$0x3]  ;;  %v1080_v31 = vsub.f32 %v7752_v38, %v7776_v36 }
 0x281   :  { %v7816_v35 = vadd.f32 %v1011_v19, %v1008_v32  ;;  %v1101_v46 = vsub.f32 1.5, %v1100_v2  ;;  %v1082_v19 = vsub.f32 %v7756_v40, %v7776_v36  ;;  %v1078_v40 = vsub.f32 %v7754_v39, %v7776_v36 }
 0x282   :  { %v1130_v2 = vperm.slane %v7840_v29, 1 }
 0x283   :  { %v1025_v42 = vadd.f32 %v1024_v34, %v7816_v35  ;;  %v1047_v43 = vmul.f32 %v7816_v35, %v7816_v35  ;;  %v1102_v59 = vmul.f32 %v6919_v55, %v1101_v46 }
 0x284   :  { %v7821_v13 = vpop.f32.mrf.mxu3 }
 0x285   :  { %v1026_v47 = vrot.slane %v1025_v42, 4  ;;  %v1051_v49 = vadd.f32 %v1050_v37, %v1047_v43  ;;  %v1106_v15 = vsel %vm1105_vm5, %v6919_v55, %v1102_v59 }
 0x286   :  { %v1112_v12 = vmul.f32 %v1106_v15, %v1082_v19  ;;  %v1114_v55 = vmul.f32 %v1106_v15, %v1084_v1  ;;  %v1108_v32 = vmul.f32 %v1106_v15, %v1078_v40 }
 0x287   :  { %v1027_v54 = vadd.f32 %v1026_v47, %v1025_v42  ;;  %v1052_v56 = vrot.slane %v1051_v49, 4  ;;  %v1110_v42 = vmul.f32 %v1106_v15, %v1080_v31 }
 0x288   :  { %v1125_v37 = vmul.f32 %v1117_v57, %v1112_v12  ;;  %v1127_v39 = vmul.f32 %v1117_v57, %v1114_v55  ;;  %v1121_v47 = vmul.f32 %v1117_v57, %v1108_v32  ;;  %v7875_v32 = vld [vmem:[%s8936_s13 + $0x18] sm:$0xff] }
 0x289   :  { %v1028_v60 = vrot.slane %v1027_v54, 2  ;;  %v1053_v45 = vadd.f32 %v1052_v56, %v1051_v49  ;;  %v7855_v49 = vld [vmem:[%s8936_s13 + $0x10] sm:$0xff]  ;;  %v1123_v59 = vmul.f32 %v1117_v57, %v1110_v42 }
 0x28a   :  { %5775 = vmatmul.msk.bf16.gmra.mxu0 %vm1217_vm2, %v7824_v53  ;;  %v7857_v56 = vadd.f32 %v1130_v2, %v1125_v37  ;;  %v7859_v38 = vadd.f32 %v1130_v2, %v1127_v39  ;;  %v1116_v37 = vperm.slane %v7829_v7, 0  ;;  %v1129_v7 = vperm.slane %v7840_v29, 0 }
 0x28b   :  { %v1029_v9 = vadd.f32 %v1028_v60, %v1027_v54  ;;  %v1054_v14 = vrot.slane %v1053_v45, 2  ;;  %v7861_v60 = vadd.f32 %v1130_v2, %v1121_v47 }
 0x28c   :  { %v1544_v3 = vpop.f32.mrf.mxu3  ;;  %vm1159_vm10 = vcmp.gt.f32.partialorder %v7857_v56, 20.0  ;;  %vm1160_vm11 = vcmp.gt.f32.partialorder %v7859_v38, 20.0 }
 0x28d   :  { %v1030_v28 = vrot.slane %v1029_v9, 1  ;;  %v1055_v16 = vadd.f32 %v1054_v14, %v1053_v45  ;;  %v1163_v45 = vmin.f32 %v7857_v56, 20.0  ;;  %v1164_v14 = vmin.f32 %v7859_v38, 20.0 }
 0x28e   :  { %vm1157_vm12 = vcmp.gt.f32.partialorder %v7861_v60, 20.0 }
 0x28f   :  { %v1031_v24 = vadd.f32 %v1030_v28, %v1029_v9  ;;  %v1056_v6 = vrot.slane %v1055_v16, 1  ;;  %5751 = vmatmul.msk.bf16.gmra.mxu1 %vm1217_vm2, %v7781_v48  ;;  %v7866_v9 = vadd.f32 %v1130_v2, %v1123_v59  ;;  %v1161_v28 = vmin.f32 %v7861_v60, 20.0 }
 0x290   :  { %v1171_v57 = vmul.f32 1.442695, %v1164_v14 }
 0x291   :  { %v1057_v58 = vadd.f32 %v1056_v6, %v1055_v16  ;;  %v7847_v25 = vmul.f32 0.03125, %v1031_v24  ;;  %v1169_v16 = vmul.f32 1.442695, %v1163_v45  ;;  %v1162_v1 = vmin.f32 %v7866_v9, 20.0 }
 0x292   :  { %v1729_v24 = vpack.c.bf16 %v1544_v3, %v7821_v13  ;;  %v1165_v6 = vmul.f32 1.442695, %v1161_v28  ;;  %vm1158_vm13 = vcmp.gt.f32.partialorder %v7866_v9, 20.0 }
 0x293   :  { %v1069_v4 = vmul.f32 0.03125, %v1057_v58  ;;  %v1071_v34 = vmul.f32 %v7847_v25, %v7847_v25  ;;  %v1167_v55 = vmul.f32 1.442695, %v1162_v1  ;;  %v1081_v39 = vsub.f32 %v7798_v23, %v7847_v25 }
 0x294   :  { %v1547_v43 = vpop.f32.mrf.mxu3 }
 0x295   :  { %v1073_v46 = vsub.f32 %v1069_v4, %v1071_v34  ;;  %v7879_v34 = vpop.f32.mrf.mxu0 }
 0x297   :  { %v1075_v54 = vmax.f32 %v1073_v46, 0.0  ;;  %v1079_v46 = vsub.f32 %v7792_v18, %v7847_v25 }
 0x299   :  { %v1085_v36 = vadd.f32 1e-05, %v1075_v54 }
 0x29a   :  { %5776 = vmatmul.msk.bf16.gmra.mxu0 %vm1217_vm2, %v7855_v49 }
 0x29b   :  { %6920 = vrsqrt.f32 %v1085_v36  ;;  %vm1093_vm7 = vweird.f32 %v1085_v36 }
 0x29c   :  { %v1549_v15 = vpop.f32.mrf.mxu3  ;;  %6922 = vpow2.f32 %v1169_v16 }
 0x29d   :  { %v1731_v19 = vpack.c.bf16 %v1549_v15, %v1547_v43  ;;  %6924 = vpow2.f32 %v1171_v57  ;;  %v1077_v43 = vsub.f32 %v7796_v41, %v7847_v25 }
 0x29e   :  { %6926 = vpow2.f32 %v1165_v6 }
 0x29f   :  { %1893 = vmatpush.bf16.msrb.mxu3 %v1731_v19  ;;  %5752 = vmatmul.msk.bf16.gmra.mxu1 %vm1217_vm2, %v7803_v30  ;;  %6928 = vpow2.f32 %v1167_v55 }
 0x2a1   :  { %v6921_v12 = vpop.eup %6920 }
 0x2a2   :  { %v1088_v40 = vmul.f32 %v6921_v12, %v1085_v36  ;;  %vm1094_vm6 = vweird.f32 %v6921_v12  ;;  %v6923_v4 = vpop.eup %6922 }
 0x2a3   :  { %1894 = vmatpush.bf16.msrb.mxu3 %v1729_v24  ;;  %v6925_v13 = vpop.eup %6924  ;;  %vm1095_vm8 = vmor %vm1093_vm7, %vm1094_vm6  ;;  %v1175_v54 = vadd.f32 1.0, %v6923_v4 }
 0x2a4   :  { %v1089_v58 = vmul.f32 %v6921_v12, %v1088_v40  ;;  %v6927_v42 = vpop.eup %6926  ;;  %v1176_v23 = vadd.f32 1.0, %v6925_v13 }
 0x2a5   :  { %v6929_v59 = vpop.eup %6928  ;;  %v1173_v19 = vadd.f32 1.0, %v6927_v42  ;;  %6930 = vlog2.f32 %v1175_v54 }
 0x2a6   :  { %v1090_v31 = vmul.f32 0.5, %v1089_v58  ;;  %5778 = vmatmul.msk.bf16.vlgmr.msrb.gmra.mxu3 %vm1217_vm2, %v7787_v17  ;;  %v1083_v17 = vsub.f32 %v7816_v35, %v7847_v25  ;;  %v1174_v18 = vadd.f32 1.0, %v6929_v59  ;;  %6932 = vlog2.f32 %v1176_v23 }
 0x2a7   :  { %6934 = vlog2.f32 %v1173_v19 }
 0x2a8   :  { %v1091_v2 = vsub.f32 1.5, %v1090_v31  ;;  %6936 = vlog2.f32 %v1174_v18 }
 0x2aa   :  { %v1092_v3 = vmul.f32 %v6921_v12, %v1091_v2  ;;  %5777 = vmatmul.msk.bf16.gmra.mxu0 %vm1217_vm2, %v7875_v32 }
 0x2ab   :  { %v6931_v58 = vpop.eup %6930 }
 0x2ac   :  { %v1096_v47 = vsel %vm1095_vm8, %v6921_v12, %v1092_v3  ;;  %v7895_v12 = vpop.f32.mrf.mxu0  ;;  %v6933_v31 = vpop.eup %6932  ;;  %v1182_v3 = vmul.f32 0.6931472, %v6931_v58 }
 0x2ad   :  { %v1111_v36 = vmul.f32 %v1096_v47, %v1081_v39  ;;  %v1113_v45 = vmul.f32 %v1096_v47, %v1083_v17  ;;  %v1107_v14 = vmul.f32 %v1096_v47, %v1077_v43  ;;  %v1109_v15 = vmul.f32 %v1096_v47, %v1079_v46  ;;  %v6935_v2 = vpop.eup %6934 }
 0x2ae   :  { %v6937_v4 = vpop.eup %6936  ;;  %v1184_v39 = vmul.f32 0.6931472, %v6933_v31  ;;  %v1178_v47 = vmul.f32 0.6931472, %v6935_v2  ;;  %v1187_v44 = vsel %vm1159_vm10, %v7857_v56, %v1182_v3  ;;  %v6630_v31 = vld [vmem:[#allocation6 + $0xac] sm:$0xf] }
 0x2af   :  { %v1126_v28 = vmul.f32 %v1116_v37, %v1113_v45  ;;  %5753 = vmatmul.msk.bf16.gmra.mxu1 %vm1217_vm2, %v7837_v0  ;;  %v1124_v35 = vmul.f32 %v1116_v37, %v1111_v36  ;;  %v1120_v41 = vmul.f32 %v1116_v37, %v1107_v14  ;;  %v1122_v16 = vmul.f32 %v1116_v37, %v1109_v15  ;;  %v5634_v2 = vld [vmem:[#allocation6 + $0xb8] sm:$0xf0]  ;;  %v6626_v3 = vld [vmem:[#allocation6 + $0x8c] sm:$0xf] }
 0x2b0   :  { %v1180_v59 = vmul.f32 0.6931472, %v6937_v4  ;;  %v7905_v36 = vsel %vm223_vm9, 1.0, %v7403_v50  ;;  %v1188_v15 = vsel %vm1160_vm11, %v7859_v38, %v1184_v39  ;;  %v5637_v4 = vor.u32 %v6630_v31, %v5634_v2  ;;  %v5602_v39 = vld [vmem:[#allocation6 + $0x78] sm:$0xf0] }
 0x2b1   :  { %v1139_v25 = vadd.f32 %v1129_v7, %v1126_v28  ;;  %v1137_v1 = vadd.f32 %v1129_v7, %v1124_v35  ;;  %v1133_v29 = vadd.f32 %v1129_v7, %v1120_v41  ;;  %v1135_v57 = vadd.f32 %v1129_v7, %v1122_v16 }
 0x2b2   :  { %v1185_v41 = vsel %vm1157_vm12, %v7861_v60, %v1178_v47  ;;  %v1186_v50 = vsel %vm1158_vm13, %v7866_v9, %v1180_v59  ;;  %v6634_v9 = vld [vmem:[#allocation6 + $0xcc] sm:$0xf]  ;;  %v5586_v47 = vld [vmem:[#allocation6 + $0x58] sm:$0xf0] }
 0x2b3   :  { %v1143_v24 = vmul.f32 0.5, %v1137_v1  ;;  %v1144_v6 = vmul.f32 0.5, %v1139_v25  ;;  %v1141_v40 = vmul.f32 0.5, %v1133_v29  ;;  %v1142_v55 = vmul.f32 0.5, %v1135_v57  ;;  %v6638_v57 = vld [vmem:[#allocation6 + $0xec] sm:$0xf] }
 0x2b4   :  { %v7900_v43 = vpop.f32.mrf.mxu0  ;;  %v5570_v59 = vld [vmem:[#allocation6 + $0x38] sm:$0xf0] }
 0x2b5   :  { %6938 = vtanh.f32 %v1143_v24  ;;  %v5666_v24 = vld [vmem:[#allocation6 + $0xf8] sm:$0xf0] }
 0x2b6   :  { %6940 = vtanh.f32 %v1144_v6  ;;  %5779 = vmatmul.msk.bf16.gmra.mxu3 %vm1217_vm2, %v7824_v53  ;;  %v5669_v60 = vor.u32 %v6638_v57, %v5666_v24 }
 0x2b7   :  { %6942 = vtanh.f32 %v1141_v40 }
 0x2b8   :  { %6944 = vtanh.f32 %v1142_v55  ;;  %v5650_v55 = vld [vmem:[#allocation6 + $0xd8] sm:$0xf0] }
 0x2b9   :  { %v5653_v58 = vor.u32 %v6634_v9, %v5650_v55 }
 0x2bb   :  { %v6939_v13 = vpop.eup %6938 }
 0x2bc   :  { %v6941_v37 = vpop.eup %6940  ;;  %v1151_v42 = vmul.f32 0.5, %v6939_v13  ;;  %v7919_v6 = vpop.f32.mrf.mxu0 }
 0x2bd   :  { %v6943_v17 = vpop.eup %6942  ;;  %v1152_v46 = vmul.f32 0.5, %v6941_v37 }
 0x2be   :  { %v6945_v53 = vpop.eup %6944  ;;  %v1155_v7 = vadd.f32 0.5, %v1151_v42  ;;  %v1149_v54 = vmul.f32 0.5, %v6943_v17  ;;  %v6622_v42 = vld [vmem:[#allocation6 + $0x6c] sm:$0xf] }
 0x2bf   :  { %v1156_v45 = vadd.f32 0.5, %v1152_v46  ;;  %v1150_v14 = vmul.f32 0.5, %v6945_v53  ;;  %v5605_v17 = vor.u32 %v6622_v42, %v5602_v39  ;;  %v6618_v46 = vld [vmem:[#allocation6 + $0x4c] sm:$0xf] }
 0x2c0   :  { %v1191_v23 = vmul.f32 %v1187_v44, %v1155_v7  ;;  %v1153_v19 = vadd.f32 0.5, %v1149_v54  ;;  %v5589_v7 = vor.u32 %v6618_v46, %v5586_v47  ;;  %v6614_v54 = vld [vmem:[#allocation6 + $0x2c] sm:$0xf] }
 0x2c1   :  { %v1192_v28 = vmul.f32 %v1188_v15, %v1156_v45  ;;  %v1154_v35 = vadd.f32 0.5, %v1150_v14  ;;  %v5573_v45 = vor.u32 %v6614_v54, %v5570_v59  ;;  %v6610_v44 = vld [vmem:[#allocation6 + $0xc] sm:$0xf]  ;;  %v5554_v14 = vld [vmem:[#allocation6 + $0x18] sm:$0xf0] }
 0x2c2   :  { %v1195_v16 = vmul.f32 %v7905_v36, %v1191_v23  ;;  %v1189_v18 = vmul.f32 %v1185_v41, %v1153_v19  ;;  %v5557_v15 = vor.u32 %v6610_v44, %v5554_v14 }
 0x2c3   :  { %v1196_v56 = vmul.f32 %v7905_v36, %v1192_v28  ;;  %v1190_v25 = vmul.f32 %v1186_v50, %v1154_v35 }
 0x2c4   :  { %v1193_v38 = vmul.f32 %v7905_v36, %v1189_v18  ;;  %v1689_v13 = vpop.f32.mrf.mxu0  ;;  %v7928_v18 = vld [vmem:[%s8939_s25] sm:$0x3] }
 0x2c5   :  { %v1198_v1 = vpack.c.bf16 %v1196_v56, %v1195_v16  ;;  %v1194_v29 = vmul.f32 %v7905_v36, %v1190_v25 }
 0x2c6   :  { %5780 = vmatmul.msk.bf16.gmra.mxu3 %vm1217_vm2, %v7855_v49  ;;  %v5618_v49 = vld [vmem:[#allocation6 + $0x98] sm:$0xf0] }
 0x2c7   :  { %1227 = vmatpush.bf16.msra.mxu2 %v1198_v1  ;;  %v1197_v40 = vpack.c.bf16 %v1194_v29, %v1193_v38  ;;  %v5621_v37 = vor.u32 %v6626_v3, %v5618_v49  ;;  %v1933_v38 = vperm.slane %v7928_v18, 0 }
 0x2cb   :  { %1228 = vmatpush.bf16.msra.mxu2 %v1197_v40 }
 0x2cc   :  { %v1691_v53 = vpop.f32.mrf.mxu0 }
 0x2ce   :  { %5541 = vmatmul.msk.bf16.vlgmr.msra.gmra.mxu2 %vm1217_vm2, %v7703_v63 }
 0x2cf   :  { %1571 = vmatpush.bf16.msrb.mxu2 %v5669_v60 }
 0x2d3   :  { %1572 = vmatpush.bf16.msrb.mxu2 %v5653_v58 }
 0x2d4   :  { %v1694_v23 = vpop.f32.mrf.mxu0 }
 0x2d6   :  { %5781 = vmatmul.msk.bf16.gmra.mxu3 %vm1217_vm2, %v7875_v32 }
 0x2d7   :  { %1573 = vmatpush.bf16.msrb.mxu2 %v5637_v4 }
 0x2db   :  { %1574 = vmatpush.bf16.msrb.mxu2 %v5621_v37 }
 0x2dc   :  { %v1696_v32 = vpop.f32.mrf.mxu0 }
 0x2df   :  { %1575 = vmatpush.bf16.msrb.mxu2 %v5605_v17 }
 0x2e3   :  { %1576 = vmatpush.bf16.msrb.mxu2 %v5589_v7 }
 0x2e7   :  { %1577 = vmatpush.bf16.msrb.mxu2 %v5573_v45 }
 0x2eb   :  { %1578 = vmatpush.bf16.msrb.mxu2 %v5557_v15 }
 0x2ee   :  { %1579 = vmatmul.bf16.vlgmr.msrb.gmra.mxu2 %v7657_v8 }
 0x2f7   :  { %v1867_v19 = vpop.f32.mrf.mxu0 }
 0x2fc   :  { %v1777_v28 = vpop.f32.mrf.mxu1 }
 0x2fd   :  { %v1868_v16 = vadd.f32 %v1867_v19, %v1777_v28 }
 0x2fe   :  { %1584 = vmatmul.bf16.gmra.mxu2 %v7668_v22 }
 0x2ff   :  { %v1869_v35 = vpop.f32.mrf.mxu0  ;;  %v1916_v1 = vadd.f32 %v1868_v16, %v7879_v34 }
 0x301   :  { %v7935_v57 = vadd.f32 %v1933_v38, %v1916_v1 }
 0x304   :  { %v1779_v41 = vpop.f32.mrf.mxu1 }
 0x305   :  { %v1870_v50 = vadd.f32 %v1869_v35, %v1779_v41 }
 0x307   :  { %v1918_v56 = vadd.f32 %v1870_v50, %v7895_v12  ;;  %v1872_v25 = vpop.f32.mrf.mxu0  ;;  %v1979_v12 = vmul.f32 %v7935_v57, %v7935_v57 }
 0x309   :  { %v7933_v29 = vadd.f32 %v1933_v38, %v1918_v56 }
 0x30b   :  { %v1981_v24 = vmul.f32 %v7933_v29, %v7933_v29  ;;  %v1953_v34 = vadd.f32 %v7933_v29, %v7935_v57 }
 0x30c   :  { %v1782_v8 = vpop.f32.mrf.mxu1 }
 0x30d   :  { %v1873_v22 = vadd.f32 %v1872_v25, %v1782_v8  ;;  %v1995_v55 = vadd.f32 %v1981_v24, %v1979_v12 }
 0x30f   :  { %v1920_v60 = vadd.f32 %v1873_v22, %v7900_v43  ;;  %v1874_v40 = vpop.f32.mrf.mxu0 }
 0x311   :  { %v7944_v9 = vadd.f32 %v1933_v38, %v1920_v60 }
 0x313   :  { %v1954_v58 = vadd.f32 %v1953_v34, %v7944_v9  ;;  %v1983_v31 = vmul.f32 %v7944_v9, %v7944_v9 }
 0x314   :  { %v1784_v2 = vpop.f32.mrf.mxu1 }
 0x315   :  { %v1996_v4 = vadd.f32 %v1995_v55, %v1983_v31  ;;  %v1875_v3 = vadd.f32 %v1874_v40, %v1784_v2 }
 0x317   :  { %v1922_v43 = vadd.f32 %v1875_v3, %v7919_v6  ;;  %v1877_v49 = vpop.f32.mrf.mxu0 }
 0x319   :  { %v7950_v37 = vadd.f32 %v1933_v38, %v1922_v43 }
 0x31b   :  { %v1985_v17 = vmul.f32 %v7950_v37, %v7950_v37  ;;  %v1955_v7 = vadd.f32 %v1954_v58, %v7950_v37 }
 0x31c   :  { %v1787_v42 = vpop.f32.mrf.mxu1 }
 0x31d   :  { %v1878_v39 = vadd.f32 %v1877_v49, %v1787_v42  ;;  %v1997_v59 = vadd.f32 %v1996_v4, %v1985_v17 }
 0x31f   :  { %v1924_v46 = vadd.f32 %v1878_v39, %v1689_v13  ;;  %v1879_v47 = vpop.f32.mrf.mxu0 }
 0x321   :  { %v7955_v54 = vadd.f32 %v1933_v38, %v1924_v46 }
 0x323   :  { %v1956_v45 = vadd.f32 %v1955_v7, %v7955_v54  ;;  %v1987_v6 = vmul.f32 %v7955_v54, %v7955_v54 }
 0x324   :  { %v1789_v44 = vpop.f32.mrf.mxu1 }
 0x325   :  { %v1998_v14 = vadd.f32 %v1997_v59, %v1987_v6  ;;  %v1880_v19 = vadd.f32 %v1879_v47, %v1789_v44 }
 0x327   :  { %v1882_v15 = vpop.f32.mrf.mxu0  ;;  %v1926_v35 = vadd.f32 %v1880_v19, %v1691_v53 }
 0x329   :  { %v7960_v13 = vadd.f32 %v1933_v38, %v1926_v35 }
 0x32b   :  { %v1989_v1 = vmul.f32 %v7960_v13, %v7960_v13  ;;  %v1957_v22 = vadd.f32 %v1956_v45, %v7960_v13 }
 0x32c   :  { %v1792_v28 = vpop.f32.mrf.mxu1 }
 0x32d   :  { %v1883_v41 = vadd.f32 %v1882_v15, %v1792_v28  ;;  %v1999_v40 = vadd.f32 %v1998_v14, %v1989_v1 }
 0x32f   :  { %v1928_v16 = vadd.f32 %v1883_v41, %v1694_v23  ;;  %v1884_v50 = vpop.f32.mrf.mxu0 }
 0x331   :  { %v7962_v56 = vadd.f32 %v1933_v38, %v1928_v16 }
 0x333   :  { %v1991_v24 = vmul.f32 %v7962_v56, %v7962_v56  ;;  %v1958_v53 = vadd.f32 %v1957_v22, %v7962_v56 }
 0x334   :  { %v1794_v25 = vpop.f32.mrf.mxu1 }
 0x335   :  { %v1885_v8 = vadd.f32 %v1884_v50, %v1794_v25  ;;  %v2000_v12 = vadd.f32 %v1999_v40, %v1991_v24 }
 0x337   :  { %v1930_v60 = vadd.f32 %v1885_v8, %v1696_v32 }
 0x339   :  { %v1951_v23 = vadd.f32 %v1933_v38, %v1930_v60 }
 0x33b   :  { %v1959_v34 = vadd.f32 %v1958_v53, %v1951_v23  ;;  %v1993_v55 = vmul.f32 %v1951_v23, %v1951_v23 }
 0x33d   :  { %v1960_v58 = vrot.slane %v1959_v34, 4  ;;  %v2001_v31 = vadd.f32 %v2000_v12, %v1993_v55 }
 0x33f   :  { %v1961_v2 = vadd.f32 %v1960_v58, %v1959_v34  ;;  %v2002_v4 = vrot.slane %v2001_v31, 4 }
 0x341   :  { %v1962_v3 = vrot.slane %v1961_v2, 2  ;;  %v2003_v43 = vadd.f32 %v2002_v4, %v2001_v31 }
 0x343   :  { %v1963_v49 = vadd.f32 %v1962_v3, %v1961_v2  ;;  %v2004_v42 = vrot.slane %v2003_v43, 2 }
 0x345   :  { %v1964_v39 = vrot.slane %v1963_v49, 1  ;;  %v2005_v17 = vadd.f32 %v2004_v42, %v2003_v43 }
 0x347   :  { %v1965_v46 = vadd.f32 %v1964_v39, %v1963_v49  ;;  %v2006_v47 = vrot.slane %v2005_v17, 1 }
 0x349   :  { %v2007_v32 = vadd.f32 %v2006_v47, %v2005_v17  ;;  %v2021_v7 = vmul.f32 0.015625, %v1965_v46 }
 0x34b   :  { %v2023_v59 = vmul.f32 0.015625, %v2007_v32  ;;  %v2025_v45 = vmul.f32 %v2021_v7, %v2021_v7  ;;  %v2039_v38 = vsub.f32 %v7955_v54, %v2021_v7  ;;  %v2035_v6 = vsub.f32 %v7944_v9, %v2021_v7 }
 0x34c   :  { %v2031_v14 = vsub.f32 %v7935_v57, %v2021_v7  ;;  %v2033_v15 = vsub.f32 %v7933_v29, %v2021_v7  ;;  %v2045_v58 = vsub.f32 %v1951_v23, %v2021_v7  ;;  %v2043_v31 = vsub.f32 %v7962_v56, %v2021_v7 }
 0x34d   :  { %v2027_v44 = vsub.f32 %v2023_v59, %v2025_v45  ;;  %v2041_v2 = vsub.f32 %v7960_v13, %v2021_v7  ;;  %v2037_v49 = vsub.f32 %v7950_v37, %v2021_v7  ;;  %v6686_v45 = vld [vmem:[#allocation2 + $0x1ec] sm:$0xf] }
 0x34f   :  { %v2029_v19 = vmax.f32 %v2027_v44, 0.0  ;;  %v5913_v44 = vld [vmem:[#allocation2 + $0x1f8] sm:$0xf0] }
 0x351   :  { %v2047_v28 = vadd.f32 1e-05, %v2029_v19  ;;  %v7974_v35 = vpop.f32.mrf.mxu2  ;;  %v5916_v19 = vor.u32 %v6686_v45, %v5913_v44  ;;  %v6658_v45 = vld [vmem:[#allocation2 + $0x10c] sm:$0xf]  ;;  %v5801_v44 = vld [vmem:[#allocation2 + $0x118] sm:$0xf0] }
 0x352   :  { %v1242_v41 = vmul.f32 %v7974_v35, %v7974_v35 }
 0x353   :  { %6946 = vrsqrt.f32 %v2047_v28  ;;  %vm2055_vm15 = vweird.f32 %v2047_v28  ;;  %2654 = vmatpush.bf16.msra.mxu0 %v5916_v19 }
 0x359   :  { %v6947_v16 = vpop.eup %6946  ;;  %v7978_v50 = vpop.f32.mrf.mxu2 }
 0x35a   :  { %v2050_v25 = vmul.f32 %v6947_v16, %v2047_v28  ;;  %v1235_v9 = vadd.f32 %v7978_v50, %v7974_v35  ;;  %v1243_v57 = vmul.f32 %v7978_v50, %v7978_v50  ;;  %vm2056_vm14 = vweird.f32 %v6947_v16 }
 0x35b   :  { %vm2057_vm0 = vmor %vm2055_vm15, %vm2056_vm14 }
 0x35c   :  { %v2051_v54 = vmul.f32 %v6947_v16, %v2050_v25  ;;  %v1236_v29 = vrot.slane %v1235_v9, 4  ;;  %v1244_v1 = vadd.f32 %v1243_v57, %v1242_v41  ;;  %v6682_v41 = vld [vmem:[#allocation2 + $0x1cc] sm:$0xf] }
 0x35e   :  { %v2052_v8 = vmul.f32 0.5, %v2051_v54  ;;  %v1237_v22 = vadd.f32 %v1236_v29, %v1235_v9  ;;  %v1245_v24 = vrot.slane %v1244_v1, 4  ;;  %v6678_v29 = vld [vmem:[#allocation2 + $0x1ac] sm:$0xf] }
 0x360   :  { %v2053_v60 = vsub.f32 1.5, %v2052_v8  ;;  %v1238_v40 = vrot.slane %v1237_v22, 2  ;;  %v1246_v53 = vadd.f32 %v1245_v24, %v1244_v1  ;;  %v5881_v1 = vld [vmem:[#allocation2 + $0x1b8] sm:$0xf0] }
 0x361   :  { %v5884_v8 = vor.u32 %v6678_v29, %v5881_v1  ;;  %v5865_v24 = vld [vmem:[#allocation2 + $0x198] sm:$0xf0] }
 0x362   :  { %v2054_v12 = vmul.f32 %v6947_v16, %v2053_v60  ;;  %v1239_v34 = vadd.f32 %v1238_v40, %v1237_v22  ;;  %v1247_v55 = vrot.slane %v1246_v53, 2  ;;  %v6674_v22 = vld [vmem:[#allocation2 + $0x18c] sm:$0xf] }
 0x363   :  { %v5868_v60 = vor.u32 %v6674_v22, %v5865_v24  ;;  %v6687_v24 = vld [vmem:[#allocation2 + $0x1ec] sm:$0xf0] }
 0x364   :  { %v2058_v4 = vsel %vm2057_vm0, %v6947_v16, %v2054_v12  ;;  %v1240_v3 = vrot.slane %v1239_v34, 1  ;;  %v1248_v43 = vadd.f32 %v1247_v55, %v1246_v53  ;;  %v6670_v53 = vld [vmem:[#allocation2 + $0x16c] sm:$0xf]  ;;  %v5849_v12 = vld [vmem:[#allocation2 + $0x178] sm:$0xf0] }
 0x365   :  { %v7987_v42 = vmul.f32 %v2058_v4, %v2045_v58  ;;  %v7989_v39 = vmul.f32 %v2058_v4, %v2043_v31  ;;  %v7991_v17 = vmul.f32 %v2058_v4, %v2039_v38  ;;  %v7993_v46 = vmul.f32 %v2058_v4, %v2041_v2  ;;  %v5897_v38 = vld [vmem:[#allocation2 + $0x1d8] sm:$0xf0] }
 0x366   :  { %v1241_v47 = vadd.f32 %v1240_v3, %v1239_v34  ;;  %v1249_v23 = vrot.slane %v1248_v43, 1  ;;  %v7995_v32 = vmul.f32 %v2058_v4, %v2035_v6  ;;  %v7997_v56 = vmul.f32 %v2058_v4, %v2037_v49  ;;  %v5833_v58 = vld [vmem:[#allocation2 + $0x158] sm:$0xf0]  ;;  %v6662_v49 = vld [vmem:[#allocation2 + $0x12c] sm:$0xf] }
 0x367   :  { %v7999_v16 = vmul.f32 %v2058_v4, %v2031_v14  ;;  %v5900_v25 = vor.u32 %v6682_v41, %v5897_v38  ;;  %v8001_v9 = vmul.f32 %v2058_v4, %v2033_v15  ;;  %v6666_v15 = vld [vmem:[#allocation2 + $0x14c] sm:$0xf]  ;;  %v5852_v55 = vor.u32 %v6670_v53, %v5849_v12  ;;  %v5887_v12 = vld [vmem:[#allocation2 + $0x1c0] sm:$0xf] }
 0x368   :  { %v1250_v13 = vadd.f32 %v1249_v23, %v1248_v43  ;;  %v1251_v59 = vmul.f32 0.0625, %v1241_v47  ;;  %v5836_v2 = vor.u32 %v6666_v15, %v5833_v58  ;;  %v5817_v47 = vld [vmem:[#allocation2 + $0x138] sm:$0xf0]  ;;  %v5804_v41 = vor.u32 %v6658_v45, %v5801_v44  ;;  %v6683_v15 = vld [vmem:[#allocation2 + $0x1cc] sm:$0xf0] }
 0x369   :  { %2655 = vmatpush.bf16.msra.mxu0 %v5900_v25 }
 0x36a   :  { %v1252_v37 = vmul.f32 0.0625, %v1250_v13  ;;  %v1253_v7 = vmul.f32 %v1251_v59, %v1251_v59  ;;  %v5820_v13 = vor.u32 %v6662_v49, %v5817_v47  ;;  %v1256_v19 = vsub.f32 %v7974_v35, %v1251_v59 }
 0x36c   :  { %v1254_v28 = vsub.f32 %v1252_v37, %v1253_v7  ;;  %v1257_v37 = vsub.f32 %v7978_v50, %v1251_v59  ;;  %v6883_v7 = vld [vmem:[%s8940_s29] ss:$0 sm:$0xff] }
 0x36d   :  { %2656 = vmatpush.bf16.msra.mxu0 %v5884_v8 }
 0x36e   :  { %v1255_v6 = vmax.f32 %v1254_v28, 0.0 }
 0x370   :  { %v1258_v54 = vadd.f32 1e-05, %v1255_v6  ;;  %v6884_v6 = vld [vmem:[%s8941_s19] ss:$0 sm:$0xff] }
 0x371   :  { %v8003_v57 = vpop.f32.mrf.mxu2  ;;  %2657 = vmatpush.bf16.msra.mxu0 %v5868_v60 }
 0x372   :  { %6948 = vrsqrt.f32 %v1258_v54  ;;  %vm1265_vm4 = vweird.f32 %v1258_v54 }
 0x375   :  { %2658 = vmatpush.bf16.msra.mxu0 %v5852_v55 }
 0x378   :  { %v6949_v14 = vpop.eup %6948 }
 0x379   :  { %v1582_v40 = vpop.f32.mrf.mxu2  ;;  %v1260_v34 = vmul.f32 %v6949_v14, %v1258_v54  ;;  %vm1266_vm3 = vweird.f32 %v6949_v14  ;;  %2659 = vmatpush.bf16.msra.mxu0 %v5836_v2  ;;  %v5903_v54 = vld [vmem:[#allocation2 + $0x1e0] sm:$0xf]  ;;  %v5888_v2 = vor.u32 %v6683_v15, %v5887_v12  ;;  %v6684_v12 = vld [vmem:[#allocation2 + $0x1d4] sm:$0xf0] }
 0x37a   :  { %vm1267_vm5 = vmor %vm1265_vm4, %vm1266_vm3  ;;  %v5904_v59 = vor.u32 %v6687_v24, %v5903_v54  ;;  %v5791_v54 = vld [vmem:[#allocation2 + $0x100] sm:$0xf]  ;;  %v6659_v24 = vld [vmem:[#allocation2 + $0x10c] sm:$0xf0] }
 0x37b   :  { %v1261_v31 = vmul.f32 %v6949_v14, %v1260_v34 }
 0x37d   :  { %v1262_v4 = vmul.f32 0.5, %v1261_v31  ;;  %2660 = vmatpush.bf16.msra.mxu0 %v5820_v13  ;;  %v6671_v13 = vld [vmem:[#allocation2 + $0x16c] sm:$0xf0] }
 0x37f   :  { %v1263_v43 = vsub.f32 1.5, %v1262_v4  ;;  %v5871_v4 = vld [vmem:[#allocation2 + $0x1a0] sm:$0xf] }
 0x381   :  { %v1585_v3 = vpop.f32.mrf.mxu2  ;;  %v1264_v23 = vmul.f32 %v6949_v14, %v1263_v43  ;;  %2661 = vmatpush.bf16.msra.mxu0 %v5804_v41  ;;  %v6663_v41 = vld [vmem:[#allocation2 + $0x12c] sm:$0xf0] }
 0x383   :  { %v1268_v28 = vsel %vm1267_vm5, %v6949_v14, %v1264_v23  ;;  %v1733_v14 = vpack.c.bf16 %v1582_v40, %v8003_v57  ;;  %v6675_v57 = vld [vmem:[#allocation2 + $0x18c] sm:$0xf0]  ;;  %v5839_v23 = vld [vmem:[#allocation2 + $0x160] sm:$0xf]  ;;  %vm2263_vm5 = vcmask 523264  }
 0x384   :  { %v1269_v38 = vmul.f32 %v1268_v28, %v1256_v19  ;;  %v1270_v25 = vmul.f32 %v1268_v28, %v1257_v37  ;;  %v5840_v44 = vor.u32 %v6671_v13, %v5839_v23  ;;  %v5823_v19 = vld [vmem:[#allocation2 + $0x140] sm:$0xf]  ;;  %v6667_v37 = vld [vmem:[#allocation2 + $0x14c] sm:$0xf0]  ;;  %v6664_v23 = vld [vmem:[#allocation2 + $0x134] sm:$0xf0] }
 0x385   :  { %v5807_v28 = vld [vmem:[#allocation2 + $0x120] sm:$0xf] }
 0x386   :  { %v1274_v29 = vmul.f32 %v6883_v7, %v1269_v38  ;;  %v1275_v1 = vmul.f32 %v6883_v7, %v1270_v25 }
 0x388   :  { %v1279_v60 = vadd.f32 %v6884_v6, %v1274_v29  ;;  %v1280_v53 = vadd.f32 %v6884_v6, %v1275_v1  ;;  %v5808_v1 = vor.u32 %v6663_v41, %v5807_v28 }
 0x389   :  { %v1587_v8 = vpop.f32.mrf.mxu2 }
 0x38a   :  { %v1735_v22 = vpack.c.bf16 %v1587_v8, %v1585_v3  ;;  %v1281_v35 = vadd.f32 %v1279_v60, %v7636_v26  ;;  %v1282_v50 = vadd.f32 %v1280_v53, %v7638_v27  ;;  %v6679_v3 = vld [vmem:[#allocation2 + $0x1ac] sm:$0xf0]  ;;  %v5855_v27 = vld [vmem:[#allocation2 + $0x180] sm:$0xf]  ;;  %v5911_v53 = vld [vmem:[#allocation2 + $0x1e8] sm:$0xf] }
 0x38b   :  { %v5872_v26 = vor.u32 %v6679_v3, %v5871_v4  ;;  %v5856_v43 = vor.u32 %v6675_v57, %v5855_v27  ;;  %v5847_v3 = vld [vmem:[#allocation2 + $0x168] sm:$0xf]  ;;  %v1708_v27 = vpop.f32.mrf.mxu3 }
 0x38c   :  { %1803 = vmatpush.bf16.msra.mxu2 %v1735_v22  ;;  %v1285_v34 = vmin.f32 %v1281_v35, 20.0  ;;  %v1286_v55 = vmin.f32 %v1282_v50, 20.0  ;;  %vm1283_vm6 = vcmp.gt.f32.partialorder %v1281_v35, 20.0  ;;  %vm1284_vm7 = vcmp.gt.f32.partialorder %v1282_v50, 20.0 }
 0x38e   :  { %v1287_v58 = vmul.f32 1.442695, %v1285_v34  ;;  %v1289_v31 = vmul.f32 1.442695, %v1286_v55  ;;  %v5879_v34 = vld [vmem:[#allocation2 + $0x1a8] sm:$0xf] }
 0x38f   :  { %v6680_v55 = vld [vmem:[#allocation2 + $0x1b4] sm:$0xf0] }
 0x390   :  { %1804 = vmatpush.bf16.msra.mxu2 %v1733_v14  ;;  %6950 = vpow2.f32 %v1287_v58  ;;  %v5792_v14 = vor.u32 %v6659_v24, %v5791_v54  ;;  %v5880_v58 = vor.u32 %v6680_v55, %v5879_v34 }
 0x391   :  { %6952 = vpow2.f32 %v1289_v31  ;;  %v5863_v31 = vld [vmem:[#allocation2 + $0x188] sm:$0xf] }
 0x393   :  { %5754 = vmatmul.msk.bf16.vlgmr.msra.gmra.mxu2 %vm1217_vm2, %v7773_v10  ;;  %v5824_v10 = vor.u32 %v6667_v37, %v5823_v19 }
 0x394   :  { %2612 = vmatpush.bf16.msrb.mxu2 %v5904_v59  ;;  %v6688_v59 = vld [vmem:[#allocation2 + $0x1f4] sm:$0xf0] }
 0x396   :  { %v6951_v40 = vpop.eup %6950 }
 0x397   :  { %v6953_v49 = vpop.eup %6952  ;;  %v1291_v47 = vadd.f32 1.0, %v6951_v40  ;;  %v5831_v40 = vld [vmem:[#allocation2 + $0x148] sm:$0xf] }
 0x398   :  { %2613 = vmatpush.bf16.msrb.mxu2 %v5888_v2  ;;  %v1292_v45 = vadd.f32 1.0, %v6953_v49  ;;  %v6676_v2 = vld [vmem:[#allocation2 + $0x194] sm:$0xf0] }
 0x399   :  { %6954 = vlog2.f32 %v1291_v47  ;;  %v5864_v4 = vor.u32 %v6676_v2, %v5863_v31  ;;  %v5815_v47 = vld [vmem:[#allocation2 + $0x128] sm:$0xf] }
 0x39a   :  { %6956 = vlog2.f32 %v1292_v45  ;;  %v5816_v13 = vor.u32 %v6664_v23, %v5815_v47  ;;  %v6660_v45 = vld [vmem:[#allocation2 + $0x114] sm:$0xf0] }
 0x39c   :  { %2614 = vmatpush.bf16.msrb.mxu2 %v5872_v26  ;;  %v6672_v26 = vld [vmem:[#allocation2 + $0x174] sm:$0xf0] }
 0x39d   :  { %v5848_v57 = vor.u32 %v6672_v26, %v5847_v3  ;;  %v1934_v26 = vperm.slane %v7928_v18, 1 }
 0x39f   :  { %v6955_v7 = vpop.eup %6954 }
 0x3a0   :  { %2615 = vmatpush.bf16.msrb.mxu2 %v5856_v43  ;;  %v6957_v38 = vpop.eup %6956  ;;  %v1294_v25 = vmul.f32 0.6931472, %v6955_v7  ;;  %v6668_v43 = vld [vmem:[#allocation2 + $0x154] sm:$0xf0] }
 0x3a1   :  { %v1296_v6 = vmul.f32 0.6931472, %v6957_v38  ;;  %v5832_v49 = vor.u32 %v6668_v43, %v5831_v40 }
 0x3a2   :  { %v1297_v29 = vsel %vm1283_vm6, %v1281_v35, %v1294_v25  ;;  %v5912_v35 = vor.u32 %v6688_v59, %v5911_v53 }
 0x3a3   :  { %5755 = vmatmul.msk.bf16.gmra.mxu2 %vm1217_vm2, %v7781_v48  ;;  %v1298_v8 = vsel %vm1284_vm7, %v1282_v50, %v1296_v6  ;;  %v8017_v22 = vmul.f32 %v7905_v36, %v1297_v29  ;;  %v5895_v50 = vld [vmem:[#allocation2 + $0x1c8] sm:$0xf] }
 0x3a4   :  { %2616 = vmatpush.bf16.msrb.mxu2 %v5840_v44  ;;  %v8020_v60 = vmul.f32 %v7905_v36, %v1298_v8  ;;  %v5896_v15 = vor.u32 %v6684_v12, %v5895_v50  ;;  %v1710_v44 = vpop.f32.mrf.mxu3  ;;  %v8036_v12 = vld [vmem:[%s7452_s8] sm:$0xff] }
 0x3a6   :  { %v8024_v48 = vpack.c.bf16 %v8020_v60, %v8017_v22 }
 0x3a8   :  { %2617 = vmatpush.bf16.msrb.mxu2 %v5824_v10  ;;  %2662 = vmatmul.bf16.vlgmr.msra.gmra.mxu0 %v8024_v48 }
 0x3ac   :  { %2618 = vmatpush.bf16.msrb.mxu2 %v5808_v1  ;;  %v1713_v37 = vpop.f32.mrf.mxu3 }
 0x3b0   :  { %2619 = vmatpush.bf16.msrb.mxu2 %v5792_v14 }
 0x3b3   :  { %5756 = vmatmul.msk.bf16.gmra.mxu2 %vm1217_vm2, %v7803_v30  ;;  %v5799_v30 = vld [vmem:[#allocation2 + $0x108] sm:$0xf] }
 0x3b4   :  { %2640 = vmatpush.bf16.msra.mxu2 %v5912_v35  ;;  %v5800_v19 = vor.u32 %v6660_v45, %v5799_v30  ;;  %v1715_v10 = vpop.f32.mrf.mxu3 }
 0x3b8   :  { %2641 = vmatpush.bf16.msra.mxu2 %v5896_v15 }
 0x3bc   :  { %2642 = vmatpush.bf16.msra.mxu2 %v5880_v58  ;;  %v1718_v7 = vpop.f32.mrf.mxu3 }
 0x3c0   :  { %2643 = vmatpush.bf16.msra.mxu2 %v5864_v4 }
 0x3c3   :  { %5757 = vmatmul.msk.bf16.gmra.mxu2 %vm1217_vm2, %v7837_v0 }
 0x3c4   :  { %2644 = vmatpush.bf16.msra.mxu2 %v5848_v57  ;;  %v1720_v28 = vpop.f32.mrf.mxu3 }
 0x3c8   :  { %2645 = vmatpush.bf16.msra.mxu2 %v5832_v49 }
 0x3cc   :  { %2646 = vmatpush.bf16.msra.mxu2 %v5816_v13  ;;  %v1723_v41 = vpop.f32.mrf.mxu3 }
 0x3d0   :  { %2647 = vmatpush.bf16.msra.mxu2 %v5800_v19 }
 0x3d3   :  { %2620 = vmatmul.bf16.vlgmr.msrb.gmra.mxu2 %v8024_v48 }
 0x3d4   :  { %v8033_v38 = vpop.f32.mrf.mxu3 }
 0x3dc   :  { %v1896_v25 = vpop.f32.mrf.mxu3 }
 0x3e3   :  { %2648 = vmatmul.bf16.vlgmr.msra.gmra.mxu2 %v8024_v48 }
 0x3e4   :  { %v1898_v0 = vpop.f32.mrf.mxu3 }
 0x3ec   :  { %v1901_v29 = vpop.f32.mrf.mxu3 }
 0x3f4   :  { %v1903_v54 = vpop.f32.mrf.mxu3 }
 0x3fc   :  { %v1906_v59 = vpop.f32.mrf.mxu3 }
 0x404   :  { %v1908_v15 = vpop.f32.mrf.mxu3 }
 0x40c   :  { %v1911_v13 = vpop.f32.mrf.mxu3 }
 0x416   :  { %v1806_v6 = vpop.f32.mrf.mxu2 }
 0x417   :  { %v1897_v55 = vadd.f32 %v1896_v25, %v1806_v6  ;;  %v8048_v25 = vld [vmem:[%s7452_s8 + $0x8] sm:$0xff] }
 0x419   :  { %v1917_v3 = vadd.f32 %v1897_v55, %v1708_v27 }
 0x41b   :  { %v8043_v23 = vadd.f32 %v1934_v26, %v1917_v3 }
 0x41e   :  { %v1808_v1 = vpop.f32.mrf.mxu2 }
 0x41f   :  { %v1899_v34 = vadd.f32 %v1898_v0, %v1808_v1 }
 0x421   :  { %v1919_v2 = vadd.f32 %v1899_v34, %v1710_v44 }
 0x423   :  { %v8041_v43 = vadd.f32 %v1934_v26, %v1919_v2 }
 0x425   :  { %v2663_v24 = vpop.f32.mrf.mxu0  ;;  %v1982_v18 = vmul.f32 %v8041_v43, %v8041_v43  ;;  %v1966_v0 = vadd.f32 %v8041_v43, %v8043_v23 }
 0x426   :  { %v1811_v8 = vpop.f32.mrf.mxu2 }
 0x427   :  { %v1902_v58 = vadd.f32 %v1901_v29, %v1811_v8 }
 0x429   :  { %v1921_v57 = vadd.f32 %v1902_v58, %v1713_v37 }
 0x42b   :  { %v8045_v30 = vadd.f32 %v1934_v26, %v1921_v57 }
 0x42d   :  { %v2665_v14 = vpop.f32.mrf.mxu0  ;;  %v1967_v8 = vadd.f32 %v1966_v0, %v8045_v30 }
 0x42e   :  { %v1813_v53 = vpop.f32.mrf.mxu2  ;;  %v2789_v35 = vpack.c.bf16 %v2665_v14, %v2663_v24 }
 0x42f   :  { %v1904_v4 = vadd.f32 %v1903_v54, %v1813_v53 }
 0x430   :  { %2816 = vmatpush.bf16.msrb.mxu0 %v2789_v35  ;;  %v1913_v35 = vpop.f32.mrf.mxu3 }
 0x431   :  { %v1923_v49 = vadd.f32 %v1904_v4, %v1715_v10  ;;  %v1980_v10 = vmul.f32 %v8043_v23, %v8043_v23 }
 0x433   :  { %5983 = vmatmul.msk.bf16.vlgmr.msrb.gmra.mxu0 %vm903_vm1, %v8036_v12  ;;  %v8054_v27 = vadd.f32 %v1934_v26, %v1923_v49  ;;  %v2008_v1 = vadd.f32 %v1982_v18, %v1980_v10 }
 0x435   :  { %v1986_v54 = vmul.f32 %v8054_v27, %v8054_v27  ;;  %v1968_v53 = vadd.f32 %v1967_v8, %v8054_v27 }
 0x436   :  { %v1816_v50 = vpop.f32.mrf.mxu2 }
 0x437   :  { %v1907_v40 = vadd.f32 %v1906_v59, %v1816_v50 }
 0x439   :  { %v1925_v45 = vadd.f32 %v1907_v40, %v1718_v7  ;;  %v1984_v7 = vmul.f32 %v8045_v30, %v8045_v30 }
 0x43b   :  { %v8062_v6 = vadd.f32 %v1934_v26, %v1925_v45  ;;  %v2009_v24 = vadd.f32 %v2008_v1, %v1984_v7 }
 0x43d   :  { %v1988_v59 = vmul.f32 %v8062_v6, %v8062_v6 }
 0x43e   :  { %v1818_v31 = vpop.f32.mrf.mxu2 }
 0x43f   :  { %v1909_v47 = vadd.f32 %v1908_v15, %v1818_v31  ;;  %v2010_v15 = vadd.f32 %v2009_v24, %v1986_v54 }
 0x441   :  { %v1927_v44 = vadd.f32 %v1909_v47, %v1720_v28  ;;  %v2011_v58 = vadd.f32 %v2010_v15, %v1988_v59  ;;  %v1350_v59 = vld [vmem:[%s8942_s28] sm:$0x3] }
 0x443   :  { %5984 = vmatmul.msk.bf16.gmra.mxu0 %vm903_vm1, %v8048_v25  ;;  %v8067_v28 = vadd.f32 %v1934_v26, %v1927_v44 }
 0x445   :  { %v1990_v34 = vmul.f32 %v8067_v28, %v8067_v28 }
 0x446   :  { %v1821_v19 = vpop.f32.mrf.mxu2 }
 0x447   :  { %v1912_v37 = vadd.f32 %v1911_v13, %v1821_v19  ;;  %v2012_v3 = vadd.f32 %v2011_v58, %v1990_v34  ;;  %v2086_v34 = vperm.slane %v1350_v59, 0 }
 0x449   :  { %v1929_v29 = vadd.f32 %v1912_v37, %v1723_v41  ;;  %v1969_v41 = vadd.f32 %v1968_v53, %v8062_v6 }
 0x44b   :  { %v8072_v14 = vadd.f32 %v1934_v26, %v1929_v29  ;;  %v1970_v31 = vadd.f32 %v1969_v41, %v8067_v28 }
 0x44d   :  { %v1992_v2 = vmul.f32 %v8072_v14, %v8072_v14  ;;  %v1971_v57 = vadd.f32 %v1970_v31, %v8072_v14 }
 0x44e   :  { %v1823_v50 = vpop.f32.mrf.mxu2 }
 0x44f   :  { %v1914_v55 = vadd.f32 %v1913_v35, %v1823_v50  ;;  %v2013_v49 = vadd.f32 %v2012_v3, %v1992_v2  ;;  %v2104_v3 = vmul.f32 %v2086_v34, %v7987_v42  ;;  %v2090_v42 = vmul.f32 %v2086_v34, %v7999_v16 }
 0x451   :  { %v1931_v4 = vadd.f32 %v1914_v55, %v8033_v38  ;;  %v1351_v55 = vld [vmem:[%s8943_s1] sm:$0x3] }
 0x452   :  { %v2107_v2 = vperm.slane %v1351_v55, 0 }
 0x453   :  { %v8082_v40 = vadd.f32 %v1934_v26, %v1931_v4  ;;  %v2102_v4 = vmul.f32 %v2086_v34, %v7989_v39 }
 0x455   :  { %v1972_v47 = vadd.f32 %v1971_v57, %v8082_v40  ;;  %v1994_v13 = vmul.f32 %v8082_v40, %v8082_v40 }
 0x456   :  { %v2621_v45 = vpop.f32.mrf.mxu2 }
 0x457   :  { %v1973_v19 = vrot.slane %v1972_v47, 4  ;;  %v2014_v18 = vadd.f32 %v2013_v49, %v1994_v13  ;;  %v2098_v49 = vmul.f32 %v2086_v34, %v7991_v17  ;;  %v2100_v13 = vmul.f32 %v2086_v34, %v7993_v46 }
 0x459   :  { %v1974_v44 = vadd.f32 %v1973_v19, %v1972_v47  ;;  %v2015_v37 = vrot.slane %v2014_v18, 4 }
 0x45b   :  { %v1975_v10 = vrot.slane %v1974_v44, 2  ;;  %v2016_v0 = vadd.f32 %v2015_v37, %v2014_v18  ;;  %v2123_v18 = vadd.f32 %v2107_v2, %v2102_v4  ;;  %v2094_v37 = vmul.f32 %v2086_v34, %v7995_v32 }
 0x45d   :  { %v1976_v38 = vadd.f32 %v1975_v10, %v1974_v44  ;;  %v2017_v7 = vrot.slane %v2016_v0, 2  ;;  %v2125_v44 = vadd.f32 %v2107_v2, %v2104_v3  ;;  %v2119_v10 = vadd.f32 %v2107_v2, %v2098_v49 }
 0x45e   :  { %v2623_v29 = vpop.f32.mrf.mxu2 }
 0x45f   :  { %v1977_v26 = vrot.slane %v1976_v38, 1  ;;  %v2018_v1 = vadd.f32 %v2017_v7, %v2016_v0  ;;  %v2786_v19 = vpack.c.bf16 %v2623_v29, %v2621_v45  ;;  %v2096_v0 = vmul.f32 %v2086_v34, %v7997_v56 }
 0x460   :  { %v2092_v7 = vmul.f32 %v2086_v34, %v8001_v9  ;;  %v2134_v46 = vmul.f32 0.5, %v2125_v44  ;;  %v2115_v45 = vadd.f32 %v2107_v2, %v2094_v37 }
 0x461   :  { %v1978_v8 = vadd.f32 %v1977_v26, %v1976_v38  ;;  %v2019_v54 = vrot.slane %v2018_v1, 1  ;;  %v2121_v38 = vadd.f32 %v2107_v2, %v2100_v13  ;;  %v2133_v26 = vmul.f32 0.5, %v2123_v18 }
 0x462   :  { %v2117_v32 = vadd.f32 %v2107_v2, %v2096_v0 }
 0x463   :  { %v2020_v24 = vadd.f32 %v2019_v54, %v2018_v1  ;;  %v8087_v53 = vmul.f32 0.015625, %v1978_v8  ;;  %v2131_v1 = vmul.f32 0.5, %v2119_v10  ;;  %v2132_v8 = vmul.f32 0.5, %v2121_v38 }
 0x464   :  { %v2111_v54 = vadd.f32 %v2107_v2, %v2090_v42  ;;  %v2130_v9 = vmul.f32 0.5, %v2117_v32 }
 0x465   :  { %v2024_v35 = vmul.f32 0.015625, %v2020_v24  ;;  %v2026_v50 = vmul.f32 %v8087_v53, %v8087_v53  ;;  %v2113_v24 = vadd.f32 %v2107_v2, %v2092_v7  ;;  %v2044_v2 = vsub.f32 %v8072_v14, %v8087_v53 }
 0x466   :  { %v2649_v15 = vpop.f32.mrf.mxu2  ;;  %v2040_v4 = vsub.f32 %v8062_v6, %v8087_v53  ;;  %v2042_v3 = vsub.f32 %v8067_v28, %v8087_v53  ;;  %v2034_v14 = vsub.f32 %v8041_v43, %v8087_v53 }
 0x467   :  { %v2028_v41 = vsub.f32 %v2024_v35, %v2026_v50  ;;  %v2129_v35 = vmul.f32 0.5, %v2115_v45  ;;  %v2087_v50 = vperm.slane %v1350_v59, 1  ;;  %v2036_v59 = vsub.f32 %v8045_v30, %v8087_v53 }
 0x469   :  { %v2030_v58 = vmax.f32 %v2028_v41, 0.0  ;;  %v2046_v41 = vsub.f32 %v8082_v40, %v8087_v53  ;;  %v2038_v40 = vsub.f32 %v8054_v27, %v8087_v53 }
 0x46b   :  { %v2048_v31 = vadd.f32 1e-05, %v2030_v58  ;;  %v2108_v58 = vperm.slane %v1351_v55, 1  ;;  %v2032_v55 = vsub.f32 %v8043_v23, %v8087_v53 }
 0x46d   :  { %6958 = vrsqrt.f32 %v2048_v31  ;;  %vm2065_vm9 = vweird.f32 %v2048_v31 }
 0x46e   :  { %v2651_v57 = vpop.f32.mrf.mxu2  ;;  %6960 = vtanh.f32 %v2133_v26 }
 0x46f   :  { %v2788_v47 = vpack.c.bf16 %v2651_v57, %v2649_v15  ;;  %6962 = vtanh.f32 %v2134_v46  ;;  %v2127_v15 = vmul.f32 0.5, %v2111_v54 }
 0x470   :  { %6964 = vtanh.f32 %v2131_v1 }
 0x471   :  { %2797 = vmatpush.bf16.msrb.mxu2 %v2788_v47  ;;  %6966 = vtanh.f32 %v2132_v8 }
 0x472   :  { %6968 = vtanh.f32 %v2129_v35 }
 0x473   :  { %v6959_v39 = vpop.eup %6958  ;;  %6970 = vtanh.f32 %v2130_v9 }
 0x474   :  { %v2060_v17 = vmul.f32 %v6959_v39, %v2048_v31  ;;  %5981 = vmatmul.msk.bf16.vlgmr.msrb.gmra.mxu2 %vm903_vm1, %v8036_v12  ;;  %vm2066_vm8 = vweird.f32 %v6959_v39  ;;  %v2128_v12 = vmul.f32 0.5, %v2113_v24  ;;  %v8113_v57 = vpop.eup %6960  ;;  %6972 = vtanh.f32 %v2127_v15 }
 0x475   :  { %2835 = vmatpush.bf16.msra.mxu2 %v2786_v19  ;;  %vm2067_vm10 = vmor %vm2065_vm9, %vm2066_vm8  ;;  %v8121_v31 = vpop.eup %6962 }
 0x476   :  { %v2061_v29 = vmul.f32 %v6959_v39, %v2060_v17  ;;  %v8123_v19 = vpop.eup %6964  ;;  %6974 = vtanh.f32 %v2128_v12 }
 0x477   :  { %v6967_v10 = vpop.eup %6966 }
 0x478   :  { %v2062_v56 = vmul.f32 0.5, %v2061_v29 }
 0x47a   :  { %v2063_v16 = vsub.f32 1.5, %v2062_v56 }
 0x47c   :  { %v2064_v34 = vmul.f32 %v6959_v39, %v2063_v16 }
 0x47e   :  { %v2068_v49 = vsel %vm2067_vm10, %v6959_v39, %v2064_v34 }
 0x47f   :  { %v2084_v6 = vmul.f32 %v2068_v49, %v2046_v41  ;;  %v2082_v47 = vmul.f32 %v2068_v49, %v2044_v2  ;;  %v2078_v28 = vmul.f32 %v2068_v49, %v2040_v4  ;;  %v2080_v13 = vmul.f32 %v2068_v49, %v2042_v3  ;;  %v6969_v2 = vpop.eup %6968 }
 0x480   :  { %v2074_v30 = vmul.f32 %v2068_v49, %v2036_v59  ;;  %v2076_v18 = vmul.f32 %v2068_v49, %v2038_v40  ;;  %v2070_v44 = vmul.f32 %v2068_v49, %v2032_v55  ;;  %v2072_v37 = vmul.f32 %v2068_v49, %v2034_v14  ;;  %v6971_v59 = vpop.eup %6970 }
 0x481   :  { %v2105_v27 = vmul.f32 %v2087_v50, %v2084_v6  ;;  %v2103_v0 = vmul.f32 %v2087_v50, %v2082_v47  ;;  %v2099_v39 = vmul.f32 %v2087_v50, %v2078_v28  ;;  %v2101_v23 = vmul.f32 %v2087_v50, %v2080_v13  ;;  %v6973_v49 = vpop.eup %6972 }
 0x482   :  { %v2095_v38 = vmul.f32 %v2087_v50, %v2074_v30  ;;  %v2097_v42 = vmul.f32 %v2087_v50, %v2076_v18  ;;  %v2091_v43 = vmul.f32 %v2087_v50, %v2070_v44  ;;  %v2093_v53 = vmul.f32 %v2087_v50, %v2072_v37  ;;  %v6975_v40 = vpop.eup %6974 }
 0x483   :  { %v8125_v7 = vadd.f32 %v2108_v58, %v2105_v27  ;;  %v8127_v17 = vadd.f32 %v2108_v58, %v2103_v0  ;;  %v8129_v26 = vadd.f32 %v2108_v58, %v2099_v39  ;;  %v8131_v46 = vadd.f32 %v2108_v58, %v2101_v23 }
 0x484   :  { %v8133_v45 = vadd.f32 %v2108_v58, %v2095_v38  ;;  %v8135_v29 = vadd.f32 %v2108_v58, %v2097_v42  ;;  %5982 = vmatmul.msk.bf16.gmra.mxu2 %vm903_vm1, %v8048_v25  ;;  %v8141_v8 = vadd.f32 %v2108_v58, %v2091_v43  ;;  %v8145_v56 = vadd.f32 %v2108_v58, %v2093_v53 }
 0x485   :  { %v2174_v1 = vmin.f32 %v8125_v7, 20.0  ;;  %v2173_v32 = vmin.f32 %v8127_v17, 20.0  ;;  %v2171_v54 = vmin.f32 %v8129_v26, 20.0  ;;  %v2172_v24 = vmin.f32 %v8131_v46, 20.0 }
 0x486   :  { %v2169_v25 = vmin.f32 %v8133_v45, 20.0  ;;  %v2170_v34 = vmin.f32 %v8135_v29, 20.0  ;;  %v2167_v9 = vmin.f32 %v8141_v8, 20.0  ;;  %v2168_v58 = vmin.f32 %v8145_v56, 20.0 }
 0x487   :  { %v2189_v16 = vmul.f32 1.442695, %v2174_v1  ;;  %v2187_v50 = vmul.f32 1.442695, %v2173_v32  ;;  %v2183_v35 = vmul.f32 1.442695, %v2171_v54 }
 0x488   :  { %v2185_v41 = vmul.f32 1.442695, %v2172_v24  ;;  %v2179_v4 = vmul.f32 1.442695, %v2169_v25  ;;  %v2181_v3 = vmul.f32 1.442695, %v2170_v34 }
 0x489   :  { %6976 = vpow2.f32 %v2187_v50  ;;  %v2175_v15 = vmul.f32 1.442695, %v2167_v9  ;;  %v2177_v12 = vmul.f32 1.442695, %v2168_v58  ;;  %v2149_v28 = vmul.f32 0.5, %v8113_v57  ;;  %v8155_v57 = vld [vmem:[%s7447_s3] sm:$0xff] }
 0x48a   :  { %6978 = vpow2.f32 %v2189_v16  ;;  %v2150_v18 = vmul.f32 0.5, %v8121_v31  ;;  %v2147_v44 = vmul.f32 0.5, %v8123_v19  ;;  %v2148_v0 = vmul.f32 0.5, %v6967_v10 }
 0x48b   :  { %6980 = vpow2.f32 %v2183_v35  ;;  %v2145_v23 = vmul.f32 0.5, %v6969_v2  ;;  %v2146_v42 = vmul.f32 0.5, %v6971_v59  ;;  %v2143_v53 = vmul.f32 0.5, %v6973_v49 }
 0x48c   :  { %6982 = vpow2.f32 %v2185_v41  ;;  %v2144_v19 = vmul.f32 0.5, %v6975_v40  ;;  %v2157_v54 = vadd.f32 0.5, %v2149_v28  ;;  %v2158_v24 = vadd.f32 0.5, %v2150_v18 }
 0x48d   :  { %6984 = vpow2.f32 %v2179_v4  ;;  %v2155_v16 = vadd.f32 0.5, %v2147_v44  ;;  %v2156_v50 = vadd.f32 0.5, %v2148_v0  ;;  %v2153_v25 = vadd.f32 0.5, %v2145_v23 }
 0x48e   :  { %6986 = vpow2.f32 %v2181_v3  ;;  %v2154_v34 = vadd.f32 0.5, %v2146_v42  ;;  %v2151_v9 = vadd.f32 0.5, %v2143_v53  ;;  %vm2165_vm11 = vcmp.gt.f32.partialorder %v8127_v17, 20.0 }
 0x48f   :  { %v6977_v55 = vpop.eup %6976  ;;  %6988 = vpow2.f32 %v2175_v15  ;;  %v2152_v3 = vadd.f32 0.5, %v2144_v19  ;;  %vm2166_vm12 = vcmp.gt.f32.partialorder %v8125_v7, 20.0  ;;  %vm2163_vm13 = vcmp.gt.f32.partialorder %v8129_v26, 20.0 }
 0x490   :  { %v6979_v14 = vpop.eup %6978  ;;  %v2197_v6 = vadd.f32 1.0, %v6977_v55  ;;  %6990 = vpow2.f32 %v2177_v12  ;;  %vm2164_vm14 = vcmp.gt.f32.partialorder %v8131_v46, 20.0  ;;  %vm2161_vm15 = vcmp.gt.f32.partialorder %v8133_v45, 20.0 }
 0x491   :  { %v6981_v47 = vpop.eup %6980  ;;  %v2198_v13 = vadd.f32 1.0, %v6979_v14  ;;  %vm2162_vm0 = vcmp.gt.f32.partialorder %v8135_v29, 20.0  ;;  %vm2159_vm3 = vcmp.gt.f32.partialorder %v8141_v8, 20.0  ;;  %vm2160_vm4 = vcmp.gt.f32.partialorder %v8145_v56, 20.0 }
 0x492   :  { %v6983_v30 = vpop.eup %6982  ;;  %6992 = vlog2.f32 %v2197_v6  ;;  %v2195_v37 = vadd.f32 1.0, %v6981_v47 }
 0x493   :  { %v6985_v27 = vpop.eup %6984  ;;  %6994 = vlog2.f32 %v2198_v13  ;;  %v2196_v39 = vadd.f32 1.0, %v6983_v30 }
 0x494   :  { %v6987_v38 = vpop.eup %6986  ;;  %6996 = vlog2.f32 %v2195_v37  ;;  %v2193_v43 = vadd.f32 1.0, %v6985_v27  ;;  %5985 = vmatmul.msk.bf16.vlgmr.msra.gmra.mxu2 %vm903_vm1, %v8155_v57 }
 0x495   :  { %v6989_v31 = vpop.eup %6988  ;;  %6998 = vlog2.f32 %v2196_v39  ;;  %v2194_v1 = vadd.f32 1.0, %v6987_v38 }
 0x496   :  { %v6991_v32 = vpop.eup %6990  ;;  %7000 = vlog2.f32 %v2193_v43  ;;  %v2191_v10 = vadd.f32 1.0, %v6989_v31 }
 0x497   :  { %7002 = vlog2.f32 %v2194_v1  ;;  %v2192_v35 = vadd.f32 1.0, %v6991_v32 }
 0x498   :  { %v6993_v41 = vpop.eup %6992  ;;  %7004 = vlog2.f32 %v2191_v10 }
 0x499   :  { %v6995_v2 = vpop.eup %6994  ;;  %v2212_v4 = vmul.f32 0.6931472, %v6993_v41  ;;  %7006 = vlog2.f32 %v2192_v35 }
 0x49a   :  { %v6997_v58 = vpop.eup %6996  ;;  %v2214_v59 = vmul.f32 0.6931472, %v6995_v2  ;;  %v5889_v2 = vld [vmem:[#allocation2 + $0x1d0] sm:$0xf0] }
 0x49b   :  { %v6999_v15 = vpop.eup %6998  ;;  %v2221_v49 = vsel %vm2165_vm11, %v8127_v17, %v2212_v4  ;;  %v2208_v12 = vmul.f32 0.6931472, %v6997_v58  ;;  %v8198_v4 = vpop.trf.xlu1  ;;  %v6677_v58 = vld [vmem:[#allocation2 + $0x1a4] sm:$0xf] }
 0x49c   :  { %v7001_v40 = vpop.eup %7000  ;;  %v2222_v55 = vsel %vm2166_vm12, %v8125_v7, %v2214_v59  ;;  %v2229_v14 = vmul.f32 %v2221_v49, %v2157_v54  ;;  %v2210_v6 = vmul.f32 0.6931472, %v6999_v15  ;;  %v5873_v59 = vld [vmem:[#allocation2 + $0x1b0] sm:$0xf0]  ;;  %v6673_v49 = vld [vmem:[#allocation2 + $0x184] sm:$0xf] }
 0x49d   :  { %v7003_v47 = vpop.eup %7002  ;;  %v2230_v28 = vmul.f32 %v2222_v55, %v2158_v24  ;;  %v2219_v13 = vsel %vm2163_vm13, %v8129_v26, %v2208_v12  ;;  %v2204_v30 = vmul.f32 0.6931472, %v7001_v40  ;;  %v5876_v15 = vor.u32 %v6677_v58, %v5873_v59  ;;  %v5857_v12 = vld [vmem:[#allocation2 + $0x190] sm:$0xf0]  ;;  %v6669_v55 = vld [vmem:[#allocation2 + $0x164] sm:$0xf] }
 0x49e   :  { %v7005_v17 = vpop.eup %7004  ;;  %v2237_v18 = vmul.f32 %v7647_v51, %v2229_v14  ;;  %v2220_v44 = vsel %vm2164_vm14, %v8131_v46, %v2210_v6  ;;  %v2227_v37 = vmul.f32 %v2219_v13, %v2155_v16  ;;  %v2206_v7 = vmul.f32 0.6931472, %v7003_v47  ;;  %v5841_v14 = vld [vmem:[#allocation2 + $0x170] sm:$0xf0]  ;;  %v6665_v47 = vld [vmem:[#allocation2 + $0x144] sm:$0xf] }
 0x49f   :  { %v7007_v27 = vpop.eup %7006  ;;  %v2238_v0 = vmul.f32 %v7647_v51, %v2230_v28  ;;  %v2228_v39 = vmul.f32 %v2220_v44, %v2156_v50  ;;  %v2217_v26 = vsel %vm2161_vm15, %v8133_v45, %v2204_v30  ;;  %v2200_v23 = vmul.f32 0.6931472, %v7005_v17  ;;  %v8193_v50 = vld [vmem:[%s7447_s3 + $0x8] sm:$0xff]  ;;  %v5825_v28 = vld [vmem:[#allocation2 + $0x150] sm:$0xf0] }
 0x4a0   :  { %v2235_v38 = vmul.f32 %v7647_v51, %v2227_v37  ;;  %v2218_v42 = vsel %vm2162_vm0, %v8135_v29, %v2206_v7  ;;  %v2225_v43 = vmul.f32 %v2217_v26, %v2153_v25  ;;  %v2202_v46 = vmul.f32 0.6931472, %v7007_v27  ;;  %v6685_v25 = vld [vmem:[#allocation2 + $0x1e4] sm:$0xf]  ;;  %v5793_v7 = vld [vmem:[#allocation2 + $0x110] sm:$0xf0] }
 0x4a1   :  { %v2242_v53 = vpack.c.bf16 %v2238_v0, %v2237_v18  ;;  %v2236_v31 = vmul.f32 %v7647_v51, %v2228_v39  ;;  %v2226_v1 = vmul.f32 %v2218_v42, %v2154_v34  ;;  %v2215_v19 = vsel %vm2159_vm3, %v8141_v8, %v2200_v23  ;;  %v6661_v17 = vld [vmem:[#allocation2 + $0x124] sm:$0xf]  ;;  %v5809_v18 = vld [vmem:[#allocation2 + $0x130] sm:$0xf0]  ;;  %v5975_v0 = vld [vmem:[#allocation4 + $0xf0] sm:$0xf] }
 0x4a2   :  { %v2233_v45 = vmul.f32 %v7647_v51, %v2225_v43  ;;  %v2216_v32 = vsel %vm2160_vm4, %v8145_v56, %v2202_v46  ;;  %v2223_v54 = vmul.f32 %v2215_v19, %v2151_v9  ;;  %v5905_v56 = vld [vmem:[#allocation2 + $0x1f0] sm:$0xf0]  ;;  %v6681_v9 = vld [vmem:[#allocation2 + $0x1c4] sm:$0xf]  ;;  %v5860_v40 = vor.u32 %v6673_v49, %v5857_v12  ;;  %v6704_v39 = vld [vmem:[#allocation4 + $0xf4] sm:$0xf0] }
 0x4a3   :  { %2274 = vmatpush.bf16.msrb.mxu1 %v2242_v53  ;;  %v2241_v24 = vpack.c.bf16 %v2236_v31, %v2235_v38  ;;  %v2234_v29 = vmul.f32 %v7647_v51, %v2226_v1  ;;  %v2224_v10 = vmul.f32 %v2216_v32, %v2152_v3  ;;  %v5908_v34 = vor.u32 %v6685_v25, %v5905_v56  ;;  %v8202_v13 = vpop.trf.xlu1  ;;  %v6657_v37 = vld [vmem:[#allocation2 + $0x104] sm:$0xf]  ;;  %v5967_v23 = vld [vmem:[#allocation4 + $0xe0] sm:$0xf]  ;;  %v6702_v38 = vld [vmem:[#allocation4 + $0xe4] sm:$0xf0] }
 0x4a4   :  { %v2231_v16 = vmul.f32 %v7647_v51, %v2223_v54  ;;  %5986 = vmatmul.msk.bf16.gmra.mxu2 %vm903_vm1, %v8193_v50  ;;  %v5892_v3 = vor.u32 %v6681_v9, %v5889_v2  ;;  %v5844_v6 = vor.u32 %v6669_v55, %v5841_v14  ;;  %v5828_v30 = vor.u32 %v6665_v47, %v5825_v28  ;;  %v5959_v42 = vld [vmem:[#allocation4 + $0xd0] sm:$0xf]  ;;  %v6700_v46 = vld [vmem:[#allocation4 + $0xd4] sm:$0xf0]  ;;  %v5951_v31 = vld [vmem:[#allocation4 + $0xc0] sm:$0xf] }
 0x4a5   :  { %v2240_v8 = vpack.c.bf16 %v2234_v29, %v2233_v45  ;;  %v2232_v35 = vmul.f32 %v7647_v51, %v2224_v10  ;;  %v5812_v44 = vor.u32 %v6661_v17, %v5809_v18  ;;  %v5796_v27 = vor.u32 %v6657_v37, %v5793_v7  ;;  %v6698_v1 = vld [vmem:[#allocation4 + $0xc4] sm:$0xf0]  ;;  %v5943_v32 = vld [vmem:[#allocation4 + $0xb0] sm:$0xf]  ;;  %v5919_v25 = vld [vmem:[#allocation4 + $0x80] sm:$0xf] }
 0x4a6   :  { %v5976_v26 = vor.u32 %v6704_v39, %v5975_v0  ;;  %v5968_v43 = vor.u32 %v6702_v38, %v5967_v23  ;;  %v5960_v53 = vor.u32 %v6700_v46, %v5959_v42  ;;  %v5952_v19 = vor.u32 %v6698_v1, %v5951_v31  ;;  %v6694_v29 = vld [vmem:[#allocation4 + $0xa4] sm:$0xf0]  ;;  %v6703_v31 = vld [vmem:[#allocation4 + $0xf4] sm:$0xf]  ;;  %v5977_v1 = vld [vmem:[#allocation4 + $0xf8] sm:$0xf0] }
 0x4a7   :  { %2275 = vmatpush.bf16.msrb.mxu1 %v2241_v24  ;;  %v2239_v41 = vpack.c.bf16 %v2232_v35, %v2231_v16  ;;  %v5935_v24 = vld [vmem:[#allocation4 + $0xa0] sm:$0xf]  ;;  %v6692_v35 = vld [vmem:[#allocation4 + $0x94] sm:$0xf0]  ;;  %v6690_v56 = vld [vmem:[#allocation4 + $0x84] sm:$0xf0] }
 0x4a8   :  { %2748 = vmatpush.bf16.msra.mxu3 %v5976_v26  ;;  %v5936_v10 = vor.u32 %v6694_v29, %v5935_v24 }
 0x4ab   :  { %2276 = vmatpush.bf16.msrb.mxu1 %v2240_v8  ;;  %v5927_v8 = vld [vmem:[#allocation4 + $0x90] sm:$0xf] }
 0x4ac   :  { %2749 = vmatpush.bf16.msra.mxu3 %v5968_v43 }
 0x4af   :  { %2277 = vmatpush.bf16.msrb.mxu1 %v2239_v41  ;;  %v5928_v41 = vor.u32 %v6692_v35, %v5927_v8  ;;  %v5969_v8 = vld [vmem:[#allocation4 + $0xe8] sm:$0xf0]  ;;  %v6729_v35 = vld [vmem:[#allocation6 + $0x1c4] sm:$0xf] }
 0x4b0   :  { %2750 = vmatpush.bf16.msra.mxu3 %v5960_v53 }
 0x4b2   :  { %5782 = vmatmul.msk.bf16.vlgmr.msrb.gmra.mxu1 %vm2263_vm5, %v8198_v4 }
 0x4b3   :  { %2626 = vmatpush.bf16.msra.mxu1 %v5908_v34  ;;  %v5920_v34 = vor.u32 %v6690_v56, %v5919_v25  ;;  %v6095_v56 = vld [vmem:[#allocation6 + $0x1d0] sm:$0xf0] }
 0x4b4   :  { %2751 = vmatpush.bf16.msra.mxu3 %v5952_v19  ;;  %v6733_v19 = vld [vmem:[#allocation6 + $0x1e4] sm:$0xf] }
 0x4b7   :  { %2627 = vmatpush.bf16.msra.mxu1 %v5892_v3 }
 0x4bb   :  { %2628 = vmatpush.bf16.msra.mxu1 %v5876_v15 }
 0x4bf   :  { %2629 = vmatpush.bf16.msra.mxu1 %v5860_v40 }
 0x4c2   :  { %5783 = vmatmul.msk.bf16.gmra.mxu1 %vm2263_vm5, %v8202_v13 }
 0x4c3   :  { %2630 = vmatpush.bf16.msra.mxu1 %v5844_v6 }
 0x4c7   :  { %2631 = vmatpush.bf16.msra.mxu1 %v5828_v30 }
 0x4cb   :  { %2632 = vmatpush.bf16.msra.mxu1 %v5812_v44 }
 0x4cf   :  { %2633 = vmatpush.bf16.msra.mxu1 %v5796_v27 }
 0x4d2   :  { %2634 = vmatmul.bf16.vlgmr.msra.gmra.mxu1 %v8024_v48  ;;  %v6696_v48 = vld [vmem:[#allocation4 + $0xb4] sm:$0xf0] }
 0x4d3   :  { %v5944_v54 = vor.u32 %v6696_v48, %v5943_v32  ;;  %v5980_v48 = vor.u32 %v6703_v31, %v5977_v1  ;;  %v6031_v31 = vld [vmem:[#allocation6 + $0x150] sm:$0xf0] }
 0x4d5   :  { %2752 = vmatpush.bf16.msra.mxu3 %v5944_v54  ;;  %v6111_v54 = vld [vmem:[#allocation6 + $0x1f0] sm:$0xf0]  ;;  %2767 = vmatpush.bf16.msrb.mxu1 %v5980_v48 }
 0x4d6   :  { %v6114_v24 = vor.u32 %v6733_v19, %v6111_v54 }
 0x4d8   :  { %3382 = vmatpush.bf16.msrb.mxu2 %v6114_v24 }
 0x4d9   :  { %2753 = vmatpush.bf16.msra.mxu3 %v5936_v10  ;;  %v6701_v10 = vld [vmem:[#allocation4 + $0xe4] sm:$0xf] }
 0x4da   :  { %v5972_v25 = vor.u32 %v6701_v10, %v5969_v8  ;;  %v6691_v8 = vld [vmem:[#allocation4 + $0x94] sm:$0xf] }
 0x4dc   :  { %2768 = vmatpush.bf16.msrb.mxu1 %v5972_v25 }
 0x4dd   :  { %2754 = vmatpush.bf16.msra.mxu3 %v5928_v41 }
 0x4e1   :  { %2755 = vmatpush.bf16.msra.mxu3 %v5920_v34  ;;  %v6098_v34 = vor.u32 %v6729_v35, %v6095_v56  ;;  %v5929_v35 = vld [vmem:[#allocation4 + $0x98] sm:$0xf0] }
 0x4e3   :  { %3383 = vmatpush.bf16.msrb.mxu2 %v6098_v34 }
 0x52f   :  { %v8207_v45 = vpop.f32.mrf.mxu1 }
 0x530   :  { %v2298_v3 = vmul.f32 %v8207_v45, %v8207_v45 }
 0x537   :  { %v8209_v16 = vpop.f32.mrf.mxu1 }
 0x538   :  { %v2299_v2 = vmul.f32 %v8209_v16, %v8209_v16  ;;  %v2289_v58 = vadd.f32 %v8209_v16, %v8207_v45 }
 0x53a   :  { %v2302_v49 = vadd.f32 %v2299_v2, %v2298_v3  ;;  %v6699_v2 = vld [vmem:[#allocation4 + $0xd4] sm:$0xf]  ;;  %v5961_v3 = vld [vmem:[#allocation4 + $0xd8] sm:$0xf0] }
 0x53f   :  { %v8211_v9 = vpop.f32.mrf.mxu1 }
 0x540   :  { %v2300_v59 = vmul.f32 %v8211_v9, %v8211_v9  ;;  %v2290_v15 = vadd.f32 %v2289_v58, %v8211_v9  ;;  %v6725_v58 = vld [vmem:[#allocation6 + $0x1a4] sm:$0xf] }
 0x542   :  { %v2303_v40 = vadd.f32 %v2302_v49, %v2300_v59  ;;  %v5964_v59 = vor.u32 %v6699_v2, %v5961_v3  ;;  %v6886_v2 = vld [vmem:[%s8945_s30] ss:$0 sm:$0xff]  ;;  %v5932_v3 = vor.u32 %v6691_v8, %v5929_v35  ;;  %v6167_v8 = vld [vmem:[#allocation7 + $0xd8] sm:$0xf0] }
 0x544   :  { %2769 = vmatpush.bf16.msrb.mxu1 %v5964_v59 }
 0x547   :  { %v8222_v12 = vpop.f32.mrf.mxu1 }
 0x548   :  { %v2291_v55 = vadd.f32 %v2290_v15, %v8222_v12  ;;  %v2301_v14 = vmul.f32 %v8222_v12, %v8222_v12  ;;  %v6079_v15 = vld [vmem:[#allocation6 + $0x1b0] sm:$0xf0] }
 0x549   :  { %v6082_v49 = vor.u32 %v6725_v58, %v6079_v15 }
 0x54a   :  { %v2292_v6 = vrot.slane %v2291_v55, 4  ;;  %v2304_v47 = vadd.f32 %v2303_v40, %v2301_v14  ;;  %v6697_v40 = vld [vmem:[#allocation4 + $0xc4] sm:$0xf] }
 0x54b   :  { %3384 = vmatpush.bf16.msrb.mxu2 %v6082_v49  ;;  %v6721_v14 = vld [vmem:[#allocation6 + $0x184] sm:$0xf]  ;;  %v5921_v49 = vld [vmem:[#allocation4 + $0x88] sm:$0xf0] }
 0x54c   :  { %v2293_v28 = vadd.f32 %v2292_v6, %v2291_v55  ;;  %v2305_v30 = vrot.slane %v2304_v47, 4  ;;  %v5953_v55 = vld [vmem:[#allocation4 + $0xc8] sm:$0xf0] }
 0x54e   :  { %v2294_v17 = vrot.slane %v2293_v28, 2  ;;  %v2306_v18 = vadd.f32 %v2305_v30, %v2304_v47  ;;  %v5956_v47 = vor.u32 %v6697_v40, %v5953_v55  ;;  %v6705_v40 = vld [vmem:[#allocation6 + $0x104] sm:$0xf] }
 0x54f   :  { %v2635_v44 = vpop.f32.mrf.mxu1 }
 0x550   :  { %v2295_v37 = vadd.f32 %v2294_v17, %v2293_v28  ;;  %v2307_v7 = vrot.slane %v2306_v18, 2  ;;  %v6063_v28 = vld [vmem:[#allocation6 + $0x190] sm:$0xf0]  ;;  %2770 = vmatpush.bf16.msrb.mxu1 %v5956_v47 }
 0x551   :  { %v6066_v17 = vor.u32 %v6721_v14, %v6063_v28  ;;  %v5999_v14 = vld [vmem:[#allocation6 + $0x110] sm:$0xf0] }
 0x552   :  { %v2296_v27 = vrot.slane %v2295_v37, 1  ;;  %v2308_v0 = vadd.f32 %v2307_v7, %v2306_v18  ;;  %v6717_v7 = vld [vmem:[#allocation6 + $0x164] sm:$0xf] }
 0x553   :  { %3385 = vmatpush.bf16.msrb.mxu2 %v6066_v17  ;;  %v6002_v17 = vor.u32 %v6705_v40, %v5999_v14 }
 0x554   :  { %v2297_v39 = vadd.f32 %v2296_v27, %v2295_v37  ;;  %v2309_v26 = vrot.slane %v2308_v0, 1  ;;  %v5945_v37 = vld [vmem:[#allocation4 + $0xb8] sm:$0xf0] }
 0x556   :  { %v2310_v23 = vadd.f32 %v2309_v26, %v2308_v0  ;;  %v8227_v38 = vmul.f32 0.03125, %v2297_v39  ;;  %v6047_v0 = vld [vmem:[#allocation6 + $0x170] sm:$0xf0] }
 0x557   :  { %v2637_v42 = vpop.f32.mrf.mxu1  ;;  %v6050_v26 = vor.u32 %v6717_v7, %v6047_v0 }
 0x558   :  { %v2312_v43 = vmul.f32 0.03125, %v2310_v23  ;;  %v2313_v46 = vmul.f32 %v8227_v38, %v8227_v38  ;;  %v2787_v53 = vpack.c.bf16 %v2637_v42, %v2635_v44  ;;  %v6695_v44 = vld [vmem:[#allocation4 + $0xb4] sm:$0xf]  ;;  %v6693_v42 = vld [vmem:[#allocation4 + $0xa4] sm:$0xf]  ;;  %v2317_v48 = vsub.f32 %v8209_v16, %v8227_v38 }
 0x559   :  { %v5948_v27 = vor.u32 %v6695_v44, %v5945_v37  ;;  %3386 = vmatpush.bf16.msrb.mxu2 %v6050_v26  ;;  %v2318_v54 = vsub.f32 %v8211_v9, %v8227_v38  ;;  %v2319_v24 = vsub.f32 %v8222_v12, %v8227_v38  ;;  %v6015_v16 = vld [vmem:[#allocation6 + $0x130] sm:$0xf0]  ;;  %v6735_v44 = vld [vmem:[#allocation6 + $0x1ec] sm:$0xf0]  ;;  %v6183_v26 = vld [vmem:[#allocation7 + $0xf8] sm:$0xf0] }
 0x55a   :  { %v2314_v32 = vsub.f32 %v2312_v43, %v2313_v46  ;;  %2854 = vmatpush.bf16.msrb.mxu3 %v2787_v53  ;;  %v5937_v43 = vld [vmem:[#allocation4 + $0xa8] sm:$0xf0]  ;;  %v6713_v53 = vld [vmem:[#allocation6 + $0x144] sm:$0xf]  ;;  %v6751_v37 = vld [vmem:[#allocation7 + $0xf4] sm:$0xf] }
 0x55b   :  { %2771 = vmatpush.bf16.msrb.mxu1 %v5948_v27  ;;  %v5940_v46 = vor.u32 %v6693_v42, %v5937_v43  ;;  %v6034_v19 = vor.u32 %v6713_v53, %v6031_v31  ;;  %v6731_v42 = vld [vmem:[#allocation6 + $0x1cc] sm:$0xf0]  ;;  %v6749_v53 = vld [vmem:[#allocation7 + $0xe4] sm:$0xf]  ;;  %v6175_v31 = vld [vmem:[#allocation7 + $0xe8] sm:$0xf0] }
 0x55c   :  { %v2315_v29 = vmax.f32 %v2314_v32, 0.0  ;;  %v2316_v32 = vsub.f32 %v8207_v45, %v8227_v38  ;;  %v6689_v38 = vld [vmem:[#allocation4 + $0x84] sm:$0xf] }
 0x55d   :  { %3387 = vmatpush.bf16.msrb.mxu2 %v6034_v19  ;;  %v5924_v55 = vor.u32 %v6689_v38, %v5921_v49  ;;  %v6045_v38 = vld [vmem:[#allocation6 + $0x160] sm:$0xf]  ;;  %v6719_v49 = vld [vmem:[#allocation6 + $0x16c] sm:$0xf0] }
 0x55e   :  { %v2320_v41 = vadd.f32 1e-05, %v2315_v29  ;;  %v6885_v29 = vld [vmem:[%s8944_s11] ss:$0 sm:$0xff]  ;;  %v6046_v14 = vor.u32 %v6719_v49, %v6045_v38  ;;  %v6750_v38 = vld [vmem:[#allocation7 + $0xe4] sm:$0xf0] }
 0x55f   :  { %2772 = vmatpush.bf16.msrb.mxu1 %v5940_v46  ;;  %v6186_v46 = vor.u32 %v6751_v37, %v6183_v26 }
 0x560   :  { %7008 = vrsqrt.f32 %v2320_v41  ;;  %vm2327_vm7 = vweird.f32 %v2320_v41 }
 0x563   :  { %2773 = vmatpush.bf16.msrb.mxu1 %v5932_v3 }
 0x566   :  { %v7009_v6 = vpop.eup %7008 }
 0x567   :  { %v2322_v30 = vmul.f32 %v7009_v6, %v2320_v41  ;;  %vm2328_vm6 = vweird.f32 %v7009_v6  ;;  %v6709_v41 = vld [vmem:[#allocation6 + $0x124] sm:$0xf]  ;;  %2774 = vmatpush.bf16.msrb.mxu1 %v5924_v55 }
 0x568   :  { %vm2329_vm8 = vmor %vm2327_vm7, %vm2328_vm6  ;;  %v6018_v58 = vor.u32 %v6709_v41, %v6015_v16 }
 0x569   :  { %v2323_v18 = vmul.f32 %v7009_v6, %v2322_v30 }
 0x56a   :  { %3388 = vmatpush.bf16.msrb.mxu2 %v6018_v58 }
 0x56b   :  { %v2324_v39 = vmul.f32 0.5, %v2323_v18  ;;  %v6109_v18 = vld [vmem:[#allocation6 + $0x1e0] sm:$0xf] }
 0x56c   :  { %v6110_v43 = vor.u32 %v6735_v44, %v6109_v18  ;;  %v6741_v18 = vld [vmem:[#allocation7 + $0xa4] sm:$0xf]  ;;  %v6143_v44 = vld [vmem:[#allocation7 + $0xa8] sm:$0xf0] }
 0x56d   :  { %v2325_v23 = vsub.f32 1.5, %v2324_v39 }
 0x56e   :  { %3389 = vmatpush.bf16.msrb.mxu2 %v6002_v17  ;;  %3363 = vmatpush.bf16.msra.mxu1 %v6110_v43  ;;  %v6715_v17 = vld [vmem:[#allocation6 + $0x14c] sm:$0xf0] }
 0x56f   :  { %v2326_v1 = vmul.f32 %v7009_v6, %v2325_v23  ;;  %v6093_v23 = vld [vmem:[#allocation6 + $0x1c0] sm:$0xf]  ;;  %v6711_v43 = vld [vmem:[#allocation6 + $0x12c] sm:$0xf0] }
 0x571   :  { %v2330_v10 = vsel %vm2329_vm8, %v7009_v6, %v2326_v1 }
 0x572   :  { %v2331_v25 = vmul.f32 %v2330_v10, %v2316_v32  ;;  %v2332_v45 = vmul.f32 %v2330_v10, %v2317_v48  ;;  %v2333_v56 = vmul.f32 %v2330_v10, %v2318_v54  ;;  %v2334_v34 = vmul.f32 %v2330_v10, %v2319_v24  ;;  %3548 = vmatpush.bf16.msra.mxu2 %v6186_v46  ;;  %v6727_v48 = vld [vmem:[#allocation6 + $0x1ac] sm:$0xf0]  ;;  %v6747_v54 = vld [vmem:[#allocation7 + $0xd4] sm:$0xf] }
 0x573   :  { %v6178_v32 = vor.u32 %v6749_v53, %v6175_v31  ;;  %v6739_v46 = vld [vmem:[#allocation7 + $0x94] sm:$0xf]  ;;  %v6135_v53 = vld [vmem:[#allocation7 + $0x98] sm:$0xf0] }
 0x574   :  { %v2338_v9 = vmul.f32 %v6885_v29, %v2331_v25  ;;  %v2339_v59 = vmul.f32 %v6885_v29, %v2332_v45  ;;  %v2340_v15 = vmul.f32 %v6885_v29, %v2333_v56  ;;  %v2341_v12 = vmul.f32 %v6885_v29, %v2334_v34  ;;  %v6061_v45 = vld [vmem:[#allocation6 + $0x180] sm:$0xf]  ;;  %v6723_v56 = vld [vmem:[#allocation6 + $0x18c] sm:$0xf0]  ;;  %v6745_v34 = vld [vmem:[#allocation7 + $0xc4] sm:$0xf] }
 0x575   :  { %v6170_v25 = vor.u32 %v6747_v54, %v6167_v8  ;;  %v6062_v16 = vor.u32 %v6723_v56, %v6061_v45  ;;  %v6117_v56 = vld [vmem:[#allocation6 + $0x1e8] sm:$0xf] }
 0x576   :  { %v2345_v6 = vadd.f32 %v6886_v2, %v2338_v9  ;;  %v2346_v47 = vadd.f32 %v6886_v2, %v2339_v59  ;;  %v2347_v28 = vadd.f32 %v6886_v2, %v2340_v15  ;;  %v2348_v30 = vadd.f32 %v6886_v2, %v2341_v12  ;;  %3549 = vmatpush.bf16.msra.mxu2 %v6178_v32  ;;  %v6159_v2 = vld [vmem:[#allocation7 + $0xc8] sm:$0xf0]  ;;  %v5997_v32 = vld [vmem:[#allocation6 + $0x100] sm:$0xf] }
 0x577   :  { %v6162_v3 = vor.u32 %v6745_v34, %v6159_v2  ;;  %v6736_v34 = vld [vmem:[#allocation6 + $0x1f4] sm:$0xf0]  ;;  %v6181_v2 = vld [vmem:[#allocation7 + $0xf0] sm:$0xf] }
 0x578   :  { %v8242_v7 = vadd.f32 %v2345_v6, %v7650_v61  ;;  %v8245_v27 = vadd.f32 %v2346_v47, %v7653_v62  ;;  %v8248_v0 = vadd.f32 %v2347_v28, %v7661_v20  ;;  %v8251_v39 = vadd.f32 %v2348_v30, %v7664_v21  ;;  %v6077_v20 = vld [vmem:[#allocation6 + $0x1a0] sm:$0xf]  ;;  %v6743_v6 = vld [vmem:[#allocation7 + $0xb4] sm:$0xf]  ;;  %v6151_v47 = vld [vmem:[#allocation7 + $0xb8] sm:$0xf0] }
 0x579   :  { %v6094_v21 = vor.u32 %v6731_v42, %v6093_v23  ;;  %v6078_v41 = vor.u32 %v6727_v48, %v6077_v20  ;;  %v6154_v28 = vor.u32 %v6743_v6, %v6151_v47  ;;  %v6029_v30 = vld [vmem:[#allocation6 + $0x140] sm:$0xf]  ;;  %v6146_v23 = vor.u32 %v6741_v18, %v6143_v44  ;;  %v6707_v48 = vld [vmem:[#allocation6 + $0x10c] sm:$0xf0]  ;;  %v6748_v47 = vld [vmem:[#allocation7 + $0xd4] sm:$0xf0] }
 0x57a   :  { %v2357_v61 = vmin.f32 %v8242_v7, 20.0  ;;  %v2358_v62 = vmin.f32 %v8245_v27, 20.0  ;;  %v2359_v1 = vmin.f32 %v8248_v0, 20.0  ;;  %v2360_v19 = vmin.f32 %v8251_v39, 20.0  ;;  %3550 = vmatpush.bf16.msra.mxu2 %v6170_v25  ;;  %v6013_v42 = vld [vmem:[#allocation6 + $0x120] sm:$0xf] }
 0x57b   :  { %3364 = vmatpush.bf16.msra.mxu1 %v6094_v21  ;;  %v6030_v26 = vor.u32 %v6715_v17, %v6029_v30  ;;  %vm2353_vm9 = vcmp.gt.f32.partialorder %v8242_v7, 20.0  ;;  %v6014_v20 = vor.u32 %v6711_v43, %v6013_v42  ;;  %vm2354_vm10 = vcmp.gt.f32.partialorder %v8245_v27, 20.0  ;;  %v6165_v6 = vld [vmem:[#allocation7 + $0xd0] sm:$0xf]  ;;  %v6157_v42 = vld [vmem:[#allocation7 + $0xc0] sm:$0xf] }
 0x57c   :  { %v2361_v24 = vmul.f32 1.442695, %v2357_v61  ;;  %v2363_v29 = vmul.f32 1.442695, %v2358_v62  ;;  %v2365_v10 = vmul.f32 1.442695, %v2359_v1  ;;  %v6166_v18 = vor.u32 %v6748_v47, %v6165_v6 }
 0x57d   :  { %v2367_v35 = vmul.f32 1.442695, %v2360_v19  ;;  %v6138_v19 = vor.u32 %v6739_v46, %v6135_v53  ;;  %vm2356_vm11 = vcmp.gt.f32.partialorder %v8251_v39, 20.0  ;;  %vm2355_vm12 = vcmp.gt.f32.partialorder %v8248_v0, 20.0  ;;  %v6746_v43 = vld [vmem:[#allocation7 + $0xc4] sm:$0xf0] }
 0x57e   :  { %7010 = vpow2.f32 %v2361_v24  ;;  %3551 = vmatpush.bf16.msra.mxu2 %v6162_v3  ;;  %v6752_v3 = vld [vmem:[#allocation7 + $0xf4] sm:$0xf0]  ;;  %v6053_v53 = vld [vmem:[#allocation6 + $0x168] sm:$0xf] }
 0x57f   :  { %7012 = vpow2.f32 %v2363_v29  ;;  %3365 = vmatpush.bf16.msra.mxu1 %v6078_v41  ;;  %v6737_v29 = vld [vmem:[#allocation7 + $0x84] sm:$0xf]  ;;  %v5998_v41 = vor.u32 %v6707_v48, %v5997_v32  ;;  %v6141_v32 = vld [vmem:[#allocation7 + $0xa0] sm:$0xf]  ;;  %v6742_v48 = vld [vmem:[#allocation7 + $0xa4] sm:$0xf0] }
 0x580   :  { %7014 = vpow2.f32 %v2365_v10  ;;  %v6127_v10 = vld [vmem:[#allocation7 + $0x88] sm:$0xf0] }
 0x581   :  { %7016 = vpow2.f32 %v2367_v35 }
 0x582   :  { %3552 = vmatpush.bf16.msra.mxu2 %v6154_v28 }
 0x583   :  { %3366 = vmatpush.bf16.msra.mxu1 %v6062_v16  ;;  %v6118_v16 = vor.u32 %v6736_v34, %v6117_v56  ;;  %v6005_v56 = vld [vmem:[#allocation6 + $0x108] sm:$0xf]  ;;  %v6708_v34 = vld [vmem:[#allocation6 + $0x114] sm:$0xf0] }
 0x584   :  { %v7011_v58 = vpop.eup %7010 }
 0x585   :  { %v7013_v9 = vpop.eup %7012  ;;  %v2369_v59 = vadd.f32 1.0, %v7011_v58  ;;  %v6101_v58 = vld [vmem:[#allocation6 + $0x1c8] sm:$0xf] }
 0x586   :  { %v7015_v15 = vpop.eup %7014  ;;  %v2370_v12 = vadd.f32 1.0, %v7013_v9  ;;  %3553 = vmatpush.bf16.msra.mxu2 %v6146_v23  ;;  %v6732_v9 = vld [vmem:[#allocation6 + $0x1d4] sm:$0xf0] }
 0x587   :  { %7018 = vlog2.f32 %v2369_v59  ;;  %v7017_v40 = vpop.eup %7016  ;;  %v2371_v55 = vadd.f32 1.0, %v7015_v15  ;;  %3367 = vmatpush.bf16.msra.mxu1 %v6046_v14  ;;  %v6182_v15 = vor.u32 %v6752_v3, %v6181_v2  ;;  %v6102_v49 = vor.u32 %v6732_v9, %v6101_v58  ;;  %v6728_v14 = vld [vmem:[#allocation6 + $0x1b4] sm:$0xf0]  ;;  %v6125_v2 = vld [vmem:[#allocation7 + $0x80] sm:$0xf]  ;;  %v2799_v9 = vpop.f32.mrf.mxu2 }
 0x588   :  { %7020 = vlog2.f32 %v2370_v12  ;;  %v2372_v37 = vadd.f32 1.0, %v7017_v40  ;;  %v6173_v12 = vld [vmem:[#allocation7 + $0xe0] sm:$0xf]  ;;  %v6724_v23 = vld [vmem:[#allocation6 + $0x194] sm:$0xf0]  ;;  %v6006_v3 = vor.u32 %v6708_v34, %v6005_v56 }
 0x589   :  { %7022 = vlog2.f32 %v2371_v55  ;;  %v6174_v40 = vor.u32 %v6750_v38, %v6173_v12  ;;  %v6085_v55 = vld [vmem:[#allocation6 + $0x1a8] sm:$0xf] }
 0x58a   :  { %7024 = vlog2.f32 %v2372_v37  ;;  %3554 = vmatpush.bf16.msra.mxu2 %v6138_v19  ;;  %v6086_v17 = vor.u32 %v6728_v14, %v6085_v55  ;;  %v6716_v19 = vld [vmem:[#allocation6 + $0x154] sm:$0xf0] }
 0x58b   :  { %3368 = vmatpush.bf16.msra.mxu1 %v6030_v26  ;;  %v6069_v26 = vld [vmem:[#allocation6 + $0x188] sm:$0xf] }
 0x58c   :  { %v6070_v46 = vor.u32 %v6724_v23, %v6069_v26 }
 0x58d   :  { %v7019_v31 = vpop.eup %7018 }
 0x58e   :  { %v7021_v61 = vpop.eup %7020  ;;  %v2374_v62 = vmul.f32 0.6931472, %v7019_v31  ;;  %v6720_v31 = vld [vmem:[#allocation6 + $0x174] sm:$0xf0] }
 0x58f   :  { %v2376_v1 = vmul.f32 0.6931472, %v7021_v61  ;;  %v7023_v35 = vpop.eup %7022  ;;  %3369 = vmatpush.bf16.msra.mxu1 %v6014_v20  ;;  %v6149_v61 = vld [vmem:[#allocation7 + $0xb0] sm:$0xf]  ;;  %v6037_v20 = vld [vmem:[#allocation6 + $0x148] sm:$0xf] }
 0x590   :  { %v2381_v21 = vsel %vm2353_vm9, %v8242_v7, %v2374_v62  ;;  %v6130_v7 = vor.u32 %v6737_v29, %v6127_v10  ;;  %v7025_v45 = vpop.eup %7024  ;;  %v6054_v62 = vor.u32 %v6720_v31, %v6053_v53  ;;  %v6142_v29 = vor.u32 %v6742_v48, %v6141_v32  ;;  %v6021_v10 = vld [vmem:[#allocation6 + $0x128] sm:$0xf] }
 0x591   :  { %v2382_v54 = vsel %vm2354_vm10, %v8245_v27, %v2376_v1  ;;  %v8262_v24 = vmul.f32 %v7647_v51, %v2381_v21  ;;  %v2378_v27 = vmul.f32 0.6931472, %v7023_v35  ;;  %v2380_v59 = vmul.f32 0.6931472, %v7025_v45  ;;  %v6744_v1 = vld [vmem:[#allocation7 + $0xb4] sm:$0xf0] }
 0x592   :  { %v8265_v8 = vmul.f32 %v7647_v51, %v2382_v54  ;;  %3555 = vmatpush.bf16.msra.mxu2 %v6130_v7  ;;  %v6150_v21 = vor.u32 %v6744_v1, %v6149_v61  ;;  %v6038_v54 = vor.u32 %v6716_v19, %v6037_v20  ;;  %v6712_v35 = vld [vmem:[#allocation6 + $0x134] sm:$0xf0] }
 0x593   :  { %3370 = vmatpush.bf16.msra.mxu1 %v5998_v41  ;;  %v2384_v28 = vsel %vm2356_vm11, %v8251_v39, %v2380_v59  ;;  %v2383_v30 = vsel %vm2355_vm12, %v8248_v0, %v2378_v27  ;;  %v6158_v39 = vor.u32 %v6746_v43, %v6157_v42  ;;  %v6133_v41 = vld [vmem:[#allocation7 + $0x90] sm:$0xf]  ;;  %v6740_v7 = vld [vmem:[#allocation7 + $0x94] sm:$0xf0]  ;;  %v6022_v45 = vor.u32 %v6712_v35, %v6021_v10  ;;  %v2801_v59 = vpop.f32.mrf.mxu2  ;;  %v2818_v35 = vpop.f32.mrf.mxu0 }
 0x594   :  { %v8269_v25 = vpack.c.bf16 %v8265_v8, %v8262_v24  ;;  %v8279_v44 = vmul.f32 %v7647_v51, %v2384_v28  ;;  %v8282_v37 = vmul.f32 %v7647_v51, %v2383_v30  ;;  %v6134_v27 = vor.u32 %v6740_v7, %v6133_v41 }
 0x596   :  { %2756 = vmatmul.bf16.vlgmr.msra.gmra.mxu3 %v8269_v25  ;;  %2775 = vmatmul.bf16.vlgmr.msrb.gmra.mxu1 %v8269_v25  ;;  %v8286_v0 = vpack.c.bf16 %v8279_v44, %v8282_v37 }
 0x597   :  { %3390 = vmatmul.bf16.vlgmr.msrb.gmra.mxu2 %v8269_v25  ;;  %3401 = vmatpush.bf16.msra.mxu3 %v6118_v16  ;;  %v6738_v16 = vld [vmem:[#allocation7 + $0x84] sm:$0xf0] }
 0x598   :  { %3519 = vmatpush.bf16.msrb.mxu1 %v6182_v15  ;;  %v6126_v58 = vor.u32 %v6738_v16, %v6125_v2 }
 0x59b   :  { %3402 = vmatpush.bf16.msra.mxu3 %v6102_v49  ;;  %v2804_v15 = vpop.f32.mrf.mxu2 }
 0x59c   :  { %3520 = vmatpush.bf16.msrb.mxu1 %v6174_v40 }
 0x59f   :  { %3403 = vmatpush.bf16.msra.mxu3 %v6086_v17  ;;  %v8312_v17 = vld [vmem:[%s8934_s5 + $0x2] sm:$0x3] }
 0x5a0   :  { %3521 = vmatpush.bf16.msrb.mxu1 %v6166_v18 }
 0x5a3   :  { %3404 = vmatpush.bf16.msra.mxu3 %v6070_v46  ;;  %v2806_v12 = vpop.f32.mrf.mxu2 }
 0x5a4   :  { %3522 = vmatpush.bf16.msrb.mxu1 %v6158_v39 }
 0x5a6   :  { %2761 = vmatmul.bf16.gmra.mxu3 %v8286_v0  ;;  %2780 = vmatmul.bf16.gmra.mxu1 %v8286_v0 }
 0x5a7   :  { %3395 = vmatmul.bf16.gmra.mxu2 %v8286_v0  ;;  %3405 = vmatpush.bf16.msra.mxu3 %v6054_v62 }
 0x5a8   :  { %3523 = vmatpush.bf16.msrb.mxu1 %v6150_v21 }
 0x5ab   :  { %3406 = vmatpush.bf16.msra.mxu3 %v6038_v54 }
 0x5ac   :  { %3524 = vmatpush.bf16.msrb.mxu1 %v6142_v29 }
 0x5af   :  { %3407 = vmatpush.bf16.msra.mxu3 %v6022_v45 }
 0x5b0   :  { %3525 = vmatpush.bf16.msrb.mxu1 %v6134_v27 }
 0x5b3   :  { %3408 = vmatpush.bf16.msra.mxu3 %v6006_v3 }
 0x5b4   :  { %3526 = vmatpush.bf16.msrb.mxu1 %v6126_v58 }
 0x5b6   :  { %5987 = vmatmul.msk.bf16.vlgmr.msrb.gmra.mxu3 %vm903_vm1, %v8155_v57  ;;  %3371 = vmatmul.bf16.vlgmr.msra.gmra.mxu1 %v8269_v25  ;;  %v2837_v57 = vpop.f32.mrf.mxu2 }
 0x5b7   :  { %3556 = vmatmul.bf16.vlgmr.msra.gmra.mxu2 %v7710_v33  ;;  %v2838_v38 = vadd.f32 %v2837_v57, %v2799_v9  ;;  %v7196_v57 = vld [vmem:[%s8936_s13] sm:$0xff] }
 0x5be   :  { %v2839_v49 = vpop.f32.mrf.mxu2 }
 0x5bf   :  { %v2840_v30 = vadd.f32 %v2839_v49, %v2801_v59 }
 0x5c6   :  { %5988 = vmatmul.msk.bf16.gmra.mxu3 %vm903_vm1, %v8193_v50  ;;  %3376 = vmatmul.bf16.gmra.mxu1 %v8286_v0  ;;  %v2842_v50 = vpop.f32.mrf.mxu2 }
 0x5c7   :  { %3561 = vmatmul.bf16.gmra.mxu2 %v7718_v52  ;;  %v2843_v40 = vadd.f32 %v2842_v50, %v2804_v15 }
 0x5ce   :  { %v2844_v55 = vpop.f32.mrf.mxu2 }
 0x5cf   :  { %v2845_v20 = vadd.f32 %v2844_v55, %v2806_v12 }
 0x5d6   :  { %3409 = vmatmul.bf16.vlgmr.msra.gmra.mxu3 %v8269_v25  ;;  %3527 = vmatmul.bf16.vlgmr.msrb.gmra.mxu1 %v7710_v33 }
 0x5d7   :  { %3566 = vmatmul.bf16.gmra.mxu2 %v7728_v5 }
 0x5e6   :  { %3414 = vmatmul.bf16.gmra.mxu3 %v8286_v0  ;;  %3532 = vmatmul.bf16.gmra.mxu1 %v7718_v52 }
 0x5e7   :  { %3571 = vmatmul.bf16.gmra.mxu2 %v7736_v11 }
 0x5f6   :  { %3537 = vmatmul.bf16.gmra.mxu1 %v7728_v5  ;;  %v2875_v5 = vperm.slane %v8312_v17, 0 }
 0x606   :  { %3542 = vmatmul.bf16.gmra.mxu1 %v7736_v11 }
 0x613   :  { %v8307_v33 = vpop.f32.mrf.mxu1 }
 0x619   :  { %v2757_v14 = vpop.f32.mrf.mxu3 }
 0x61a   :  { %v2866_v6 = vadd.f32 %v2838_v38, %v2757_v14  ;;  %v3391_v47 = vpop.f32.mrf.mxu2  ;;  %v2820_v38 = vpop.f32.mrf.mxu0 }
 0x61b   :  { %v8309_v28 = vpop.f32.mrf.mxu1 }
 0x61c   :  { %v8319_v11 = vadd.f32 %v2875_v5, %v2866_v6 }
 0x61e   :  { %v2905_v61 = vmul.f32 %v8319_v11, %v8319_v11 }
 0x621   :  { %v2759_v52 = vpop.f32.mrf.mxu3 }
 0x622   :  { %v2868_v18 = vadd.f32 %v2840_v30, %v2759_v52  ;;  %v3393_v26 = vpop.f32.mrf.mxu2 }
 0x623   :  { %v8314_v23 = vpop.f32.mrf.mxu1  ;;  %v3578_v34 = vpack.c.bf16 %v3393_v26, %v3391_v47 }
 0x624   :  { %v8317_v42 = vadd.f32 %v2875_v5, %v2868_v18 }
 0x626   :  { %v2907_v46 = vmul.f32 %v8317_v42, %v8317_v42  ;;  %v2887_v62 = vadd.f32 %v8317_v42, %v8319_v11 }
 0x628   :  { %v2913_v19 = vadd.f32 %v2907_v46, %v2905_v61 }
 0x629   :  { %v2762_v43 = vpop.f32.mrf.mxu3 }
 0x62a   :  { %v2870_v39 = vadd.f32 %v2843_v40, %v2762_v43  ;;  %v3396_v53 = vpop.f32.mrf.mxu2 }
 0x62b   :  { %v8323_v31 = vpop.f32.mrf.mxu1 }
 0x62c   :  { %v8329_v1 = vadd.f32 %v2875_v5, %v2870_v39  ;;  %v2823_v39 = vpop.f32.mrf.mxu0 }
 0x62e   :  { %v2888_v21 = vadd.f32 %v2887_v62, %v8329_v1  ;;  %v2909_v32 = vmul.f32 %v8329_v1, %v8329_v1 }
 0x630   :  { %v2914_v48 = vadd.f32 %v2913_v19, %v2909_v32 }
 0x631   :  { %v2764_v54 = vpop.f32.mrf.mxu3 }
 0x632   :  { %v2872_v29 = vadd.f32 %v2845_v20, %v2764_v54  ;;  %v3398_v10 = vpop.f32.mrf.mxu2 }
 0x633   :  { %v3580_v41 = vpack.c.bf16 %v3398_v10, %v3396_v53  ;;  %v3372_v7 = vpop.f32.mrf.mxu1 }
 0x634   :  { %v8334_v45 = vadd.f32 %v2875_v5, %v2872_v29 }
 0x635   :  { %3678 = vmatpush.bf16.msrb.mxu2 %v3580_v41 }
 0x636   :  { %v2889_v27 = vadd.f32 %v2888_v21, %v8334_v45  ;;  %v2911_v56 = vmul.f32 %v8334_v45, %v8334_v45 }
 0x638   :  { %v2890_v2 = vrot.slane %v2889_v27, 4  ;;  %v2915_v16 = vadd.f32 %v2914_v48, %v2911_v56  ;;  %v2876_v48 = vperm.slane %v8312_v17, 1  ;;  %v2825_v17 = vpop.f32.mrf.mxu0 }
 0x639   :  { %3679 = vmatpush.bf16.msrb.mxu2 %v3578_v34  ;;  %v2856_v3 = vpop.f32.mrf.mxu3 }
 0x63a   :  { %v2891_v58 = vadd.f32 %v2890_v2, %v2889_v27  ;;  %v2916_v9 = vrot.slane %v2915_v16, 4  ;;  %v2857_v62 = vadd.f32 %v2856_v3, %v2818_v35  ;;  %v7197_v27 = vld [vmem:[%s8936_s13 + $0x8] sm:$0xff] }
 0x63b   :  { %v3374_v59 = vpop.f32.mrf.mxu1 }
 0x63c   :  { %v2892_v15 = vrot.slane %v2891_v58, 2  ;;  %v2917_v12 = vadd.f32 %v2916_v9, %v2915_v16  ;;  %6199 = vmatmul.msk.bf16.vlgmr.msrb.gmra.mxu2 %vm1217_vm2, %v7196_v57  ;;  %v2867_v10 = vadd.f32 %v2857_v62, %v8307_v33 }
 0x63e   :  { %v2893_v49 = vadd.f32 %v2892_v15, %v2891_v58  ;;  %v2918_v50 = vrot.slane %v2917_v12, 2  ;;  %v8357_v35 = vadd.f32 %v2876_v48, %v2867_v10 }
 0x640   :  { %v2894_v40 = vrot.slane %v2893_v49, 1  ;;  %v2919_v55 = vadd.f32 %v2918_v50, %v2917_v12  ;;  %v2906_v3 = vmul.f32 %v8357_v35, %v8357_v35 }
 0x641   :  { %v2858_v14 = vpop.f32.mrf.mxu3 }
 0x642   :  { %v2895_v6 = vadd.f32 %v2894_v40, %v2893_v49  ;;  %v2920_v47 = vrot.slane %v2919_v55, 1  ;;  %v2859_v46 = vadd.f32 %v2858_v14, %v2820_v38 }
 0x643   :  { %v3377_v30 = vpop.f32.mrf.mxu1 }
 0x644   :  { %v2921_v52 = vadd.f32 %v2920_v47, %v2919_v55  ;;  %v8341_v18 = vmul.f32 0.03125, %v2895_v6  ;;  %v2869_v21 = vadd.f32 %v2859_v46, %v8309_v28  ;;  %v3577_v28 = vpack.c.bf16 %v3374_v59, %v3372_v7 }
 0x646   :  { %v2933_v26 = vmul.f32 0.03125, %v2921_v52  ;;  %v2935_v5 = vmul.f32 %v8341_v18, %v8341_v18  ;;  %v2945_v43 = vsub.f32 %v8329_v1, %v8341_v18  ;;  %v2941_v53 = vsub.f32 %v8319_v11, %v8341_v18 }
 0x647   :  { %v8355_v56 = vadd.f32 %v2876_v48, %v2869_v21  ;;  %v2947_v46 = vsub.f32 %v8334_v45, %v8341_v18 }
 0x648   :  { %v2937_v61 = vsub.f32 %v2933_v26, %v2935_v5  ;;  %v7198_v26 = vld [vmem:[%s8936_s13 + $0x10] sm:$0xff] }
 0x649   :  { %v2861_v20 = vpop.f32.mrf.mxu3  ;;  %v2908_v33 = vmul.f32 %v8355_v56, %v8355_v56  ;;  %v2896_v58 = vadd.f32 %v8355_v56, %v8357_v35 }
 0x64a   :  { %v2939_v19 = vmax.f32 %v2937_v61, 0.0  ;;  %v2862_v32 = vadd.f32 %v2861_v20, %v2823_v39  ;;  %v2943_v20 = vsub.f32 %v8317_v42, %v8341_v18 }
 0x64b   :  { %v3379_v54 = vpop.f32.mrf.mxu1  ;;  %v2922_v15 = vadd.f32 %v2908_v33, %v2906_v3  ;;  %v7199_v3 = vld [vmem:[%s8936_s13 + $0x18] sm:$0xff] }
 0x64c   :  { %v2949_v29 = vadd.f32 1e-05, %v2939_v19  ;;  %v2871_v1 = vadd.f32 %v2862_v32, %v8314_v23  ;;  %v3579_v41 = vpack.c.bf16 %v3379_v54, %v3377_v30  ;;  %6200 = vmatmul.msk.bf16.gmra.mxu2 %vm1217_vm2, %v7197_v27 }
 0x64e   :  { %7026 = vrsqrt.f32 %v2949_v29  ;;  %3649 = vmatpush.bf16.msra.mxu1 %v3579_v41  ;;  %v8359_v34 = vadd.f32 %v2876_v48, %v2871_v1  ;;  %vm2957_vm14 = vweird.f32 %v2949_v29 }
 0x650   :  { %v2910_v9 = vmul.f32 %v8359_v34, %v8359_v34  ;;  %v2897_v12 = vadd.f32 %v2896_v58, %v8359_v34 }
 0x651   :  { %v2863_v2 = vpop.f32.mrf.mxu3 }
 0x652   :  { %v2864_v16 = vadd.f32 %v2863_v2, %v2825_v17  ;;  %3650 = vmatpush.bf16.msra.mxu1 %v3577_v28  ;;  %v2923_v50 = vadd.f32 %v2922_v15, %v2910_v9  ;;  %v5786_v15 = vld [vmem:[%s8938_s21 + $0x2] sm:$0x3] }
 0x654   :  { %v7027_v23 = vpop.eup %7026  ;;  %v2873_v7 = vadd.f32 %v2864_v16, %v8323_v31 }
 0x655   :  { %v2952_v59 = vmul.f32 %v7027_v23, %v2949_v29  ;;  %6195 = vmatmul.msk.bf16.vlgmr.msra.gmra.mxu1 %vm1217_vm2, %v7196_v57  ;;  %vm2958_vm13 = vweird.f32 %v7027_v23 }
 0x656   :  { %v8372_v38 = vadd.f32 %v2876_v48, %v2873_v7  ;;  %vm2959_vm15 = vmor %vm2957_vm14, %vm2958_vm13  ;;  %v5785_v7 = vld [vmem:[%s8937_s17 + $0x2] sm:$0x3] }
 0x657   :  { %v2953_v49 = vmul.f32 %v7027_v23, %v2952_v59 }
 0x658   :  { %v2898_v40 = vadd.f32 %v2897_v12, %v8372_v38  ;;  %v2912_v55 = vmul.f32 %v8372_v38, %v8372_v38  ;;  %v2980_v12 = vperm.slane %v5785_v7, 0 }
 0x659   :  { %v2954_v14 = vmul.f32 0.5, %v2953_v49  ;;  %v3410_v6 = vpop.f32.mrf.mxu3 }
 0x65a   :  { %v2899_v47 = vrot.slane %v2898_v40, 4  ;;  %v2924_v31 = vadd.f32 %v2923_v50, %v2912_v55  ;;  %v8395_v50 = vld [vmem:[%s8935_s9] sm:$0xff]  ;;  %v2993_v55 = vperm.slane %v5786_v15, 0 }
 0x65b   :  { %v2955_v30 = vsub.f32 1.5, %v2954_v14 }
 0x65c   :  { %v2900_v57 = vadd.f32 %v2899_v47, %v2898_v40  ;;  %v2925_v52 = vrot.slane %v2924_v31, 4  ;;  %6201 = vmatmul.msk.bf16.gmra.mxu2 %vm1217_vm2, %v7198_v26 }
 0x65d   :  { %v2956_v5 = vmul.f32 %v7027_v23, %v2955_v30 }
 0x65e   :  { %v2901_v39 = vrot.slane %v2900_v57, 2  ;;  %v2926_v61 = vadd.f32 %v2925_v52, %v2924_v31  ;;  %v2981_v31 = vperm.slane %v5785_v7, 1 }
 0x65f   :  { %v2960_v62 = vsel %vm2959_vm15, %v7027_v23, %v2956_v5  ;;  %v2994_v5 = vperm.slane %v5786_v15, 1 }
 0x660   :  { %v2975_v19 = vmul.f32 %v2960_v62, %v2945_v43  ;;  %v2977_v21 = vmul.f32 %v2960_v62, %v2947_v46  ;;  %v2902_v32 = vadd.f32 %v2901_v39, %v2900_v57  ;;  %v2927_v48 = vrot.slane %v2926_v61, 2 }
 0x661   :  { %v3412_v54 = vpop.f32.mrf.mxu3  ;;  %v2971_v29 = vmul.f32 %v2960_v62, %v2941_v53  ;;  %v8386_v10 = vmul.f32 %v2960_v62, %v2943_v20 }
 0x662   :  { %v2903_v45 = vrot.slane %v2902_v32, 1  ;;  %v2928_v1 = vadd.f32 %v2927_v48, %v2926_v61  ;;  %v3581_v58 = vpack.c.bf16 %v3412_v54, %v3410_v6  ;;  %v2990_v14 = vmul.f32 %v2980_v12, %v2977_v21 }
 0x663   :  { %v2988_v21 = vmul.f32 %v2980_v12, %v2975_v19 }
 0x664   :  { %v2904_v41 = vadd.f32 %v2903_v45, %v2902_v32  ;;  %v2929_v28 = vrot.slane %v2928_v1, 1  ;;  %v3003_v20 = vadd.f32 %v2993_v55, %v2990_v14 }
 0x665   :  { %6196 = vmatmul.msk.bf16.gmra.mxu1 %vm1217_vm2, %v7197_v27 }
 0x666   :  { %v2930_v17 = vadd.f32 %v2929_v28, %v2928_v1  ;;  %v2932_v42 = vmul.f32 0.03125, %v2904_v41  ;;  %v3008_v41 = vmul.f32 0.5, %v3003_v20  ;;  %v2986_v28 = vmul.f32 %v2980_v12, %v8386_v10 }
 0x668   :  { %v2934_v43 = vmul.f32 0.03125, %v2930_v17  ;;  %v2936_v2 = vmul.f32 %v2932_v42, %v2932_v42  ;;  %v2946_v6 = vsub.f32 %v8359_v34, %v2932_v42  ;;  %v2948_v30 = vsub.f32 %v8372_v38, %v2932_v42 }
 0x669   :  { %v3415_v33 = vpop.f32.mrf.mxu3  ;;  %v2942_v57 = vsub.f32 %v8357_v35, %v2932_v42  ;;  %v2944_v52 = vsub.f32 %v8355_v56, %v2932_v42  ;;  %v2984_v34 = vmul.f32 %v2980_v12, %v2971_v29  ;;  %v3001_v17 = vadd.f32 %v2993_v55, %v2988_v21 }
 0x66a   :  { %v2938_v16 = vsub.f32 %v2934_v43, %v2936_v2 }
 0x66b   :  { %v2997_v43 = vadd.f32 %v2993_v55, %v2984_v34 }
 0x66c   :  { %v2940_v23 = vmax.f32 %v2938_v16, 0.0  ;;  %6202 = vmatmul.msk.bf16.gmra.mxu2 %vm1217_vm2, %v7199_v3 }
 0x66e   :  { %v2950_v11 = vadd.f32 1e-05, %v2940_v23  ;;  %v8415_v23 = vld [vmem:[%s8935_s9 + $0x8] sm:$0xff] }
 0x670   :  { %7028 = vrsqrt.f32 %v2950_v11  ;;  %vm2967_vm3 = vweird.f32 %v2950_v11 }
 0x671   :  { %v3417_v18 = vpop.f32.mrf.mxu3  ;;  %7030 = vtanh.f32 %v3008_v41 }
 0x672   :  { %v3583_v53 = vpack.c.bf16 %v3417_v18, %v3415_v33  ;;  %v3007_v18 = vmul.f32 0.5, %v3001_v17 }
 0x674   :  { %3591 = vmatpush.bf16.msrb.mxu3 %v3583_v53  ;;  %v3005_v53 = vmul.f32 0.5, %v2997_v43 }
 0x675   :  { %6197 = vmatmul.msk.bf16.gmra.mxu1 %vm1217_vm2, %v7198_v26 }
 0x676   :  { %v7029_v27 = vpop.eup %7028 }
 0x677   :  { %v2962_v9 = vmul.f32 %v7029_v27, %v2950_v11  ;;  %vm2968_vm0 = vweird.f32 %v7029_v27 }
 0x678   :  { %3592 = vmatpush.bf16.msrb.mxu3 %v3581_v58  ;;  %vm2969_vm4 = vmor %vm2967_vm3, %vm2968_vm0  ;;  %v7031_v58 = vpop.eup %7030 }
 0x679   :  { %v2963_v59 = vmul.f32 %v7029_v27, %v2962_v9 }
 0x67b   :  { %v2964_v49 = vmul.f32 0.5, %v2963_v59  ;;  %6187 = vmatmul.msk.bf16.vlgmr.msrb.gmra.mxu3 %vm1217_vm2, %v8395_v50 }
 0x67d   :  { %v2965_v40 = vsub.f32 1.5, %v2964_v49 }
 0x67f   :  { %v2966_v47 = vmul.f32 %v7029_v27, %v2965_v40 }
 0x681   :  { %v2970_v26 = vsel %vm2969_vm4, %v7029_v27, %v2966_v47 }
 0x682   :  { %v2976_v46 = vmul.f32 %v2970_v26, %v2946_v6  ;;  %v2978_v39 = vmul.f32 %v2970_v26, %v2948_v30  ;;  %v2972_v61 = vmul.f32 %v2970_v26, %v2942_v57  ;;  %v2974_v62 = vmul.f32 %v2970_v26, %v2944_v52  ;;  %v8420_v26 = vld [vmem:[%s8935_s9 + $0x10] sm:$0xff] }
 0x683   :  { %v3016_v30 = vmul.f32 0.5, %v7031_v58  ;;  %v6103_v58 = vld [vmem:[#allocation6 + $0x1d8] sm:$0xf0] }
 0x684   :  { %v2991_v32 = vmul.f32 %v2981_v31, %v2978_v39  ;;  %v2989_v48 = vmul.f32 %v2981_v31, %v2976_v46  ;;  %v2985_v54 = vmul.f32 %v2981_v31, %v2972_v61  ;;  %v2987_v45 = vmul.f32 %v2981_v31, %v2974_v62 }
 0x685   :  { %6198 = vmatmul.msk.bf16.gmra.mxu1 %vm1217_vm2, %v7199_v3  ;;  %v2999_v3 = vadd.f32 %v2993_v55, %v2986_v28  ;;  %v3020_v20 = vadd.f32 0.5, %v3016_v30  ;;  %v6714_v30 = vld [vmem:[#allocation6 + $0x14c] sm:$0xf] }
 0x686   :  { %v8404_v38 = vadd.f32 %v2994_v5, %v2991_v32  ;;  %v3002_v35 = vadd.f32 %v2994_v5, %v2989_v48  ;;  %v8406_v56 = vadd.f32 %v2994_v5, %v2985_v54  ;;  %v8408_v1 = vadd.f32 %v2994_v5, %v2987_v45 }
 0x687   :  { %v3006_v27 = vmul.f32 0.5, %v2999_v3 }
 0x688   :  { %v3028_v19 = vmin.f32 %v8404_v38, 20.0  ;;  %v3027_v42 = vmin.f32 %v3002_v35, 20.0  ;;  %v3025_v29 = vmin.f32 %v8406_v56, 20.0  ;;  %v3026_v2 = vmin.f32 %v8408_v1, 20.0 }
 0x689   :  { %vm3023_vm6 = vcmp.gt.f32.partialorder %v3002_v35, 20.0  ;;  %vm3024_vm7 = vcmp.gt.f32.partialorder %v8404_v38, 20.0  ;;  %vm3021_vm8 = vcmp.gt.f32.partialorder %v8406_v56, 20.0  ;;  %vm3022_vm9 = vcmp.gt.f32.partialorder %v8408_v1, 20.0 }
 0x68a   :  { %v3035_v33 = vmul.f32 1.442695, %v3028_v19  ;;  %v3033_v16 = vmul.f32 1.442695, %v3027_v42  ;;  %v3029_v11 = vmul.f32 1.442695, %v3025_v29  ;;  %v8427_v19 = vpop.f32.mrf.mxu1 }
 0x68b   :  { %6188 = vmatmul.msk.bf16.gmra.mxu3 %vm1217_vm2, %v8415_v23  ;;  %v3031_v10 = vmul.f32 1.442695, %v3026_v2 }
 0x68c   :  { %7032 = vpow2.f32 %v3033_v16 }
 0x68d   :  { %7034 = vpow2.f32 %v3035_v33 }
 0x68e   :  { %7036 = vpow2.f32 %v3029_v11 }
 0x68f   :  { %7038 = vpow2.f32 %v3031_v10  ;;  %v6734_v10 = vld [vmem:[#allocation6 + $0x1ec] sm:$0xf] }
 0x690   :  { %7040 = vtanh.f32 %v3007_v18  ;;  %v6119_v18 = vld [vmem:[#allocation6 + $0x1f8] sm:$0xf0] }
 0x691   :  { %7042 = vtanh.f32 %v3005_v53 }
 0x692   :  { %v7033_v9 = vpop.eup %7032  ;;  %7044 = vtanh.f32 %v3006_v27  ;;  %v6122_v27 = vor.u32 %v6734_v10, %v6119_v18 }
 0x693   :  { %v7035_v7 = vpop.eup %7034  ;;  %v3039_v59 = vadd.f32 1.0, %v7033_v9  ;;  %v3530_v9 = vpop.f32.mrf.mxu1 }
 0x694   :  { %v7037_v15 = vpop.eup %7036  ;;  %v3040_v12 = vadd.f32 1.0, %v7035_v7 }
 0x695   :  { %v7039_v49 = vpop.eup %7038  ;;  %7046 = vlog2.f32 %v3039_v59  ;;  %v3037_v40 = vadd.f32 1.0, %v7037_v15  ;;  %v6726_v59 = vld [vmem:[#allocation6 + $0x1ac] sm:$0xf]  ;;  %v6087_v15 = vld [vmem:[#allocation6 + $0x1b8] sm:$0xf0] }
 0x696   :  { %v7041_v55 = vpop.eup %7040  ;;  %7048 = vlog2.f32 %v3040_v12  ;;  %v3038_v14 = vadd.f32 1.0, %v7039_v49  ;;  %v6090_v12 = vor.u32 %v6726_v59, %v6087_v15  ;;  %v6722_v49 = vld [vmem:[#allocation6 + $0x18c] sm:$0xf] }
 0x697   :  { %v7043_v47 = vpop.eup %7042  ;;  %7050 = vlog2.f32 %v3037_v40  ;;  %v3015_v6 = vmul.f32 0.5, %v7041_v55  ;;  %v6071_v40 = vld [vmem:[#allocation6 + $0x198] sm:$0xf0] }
 0x698   :  { %7052 = vlog2.f32 %v3038_v14  ;;  %v7045_v31 = vpop.eup %7044  ;;  %v3013_v57 = vmul.f32 0.5, %v7043_v47  ;;  %v6074_v55 = vor.u32 %v6722_v49, %v6071_v40  ;;  %v6718_v47 = vld [vmem:[#allocation6 + $0x16c] sm:$0xf] }
 0x699   :  { %v3014_v39 = vmul.f32 0.5, %v7045_v31  ;;  %v3019_v62 = vadd.f32 0.5, %v3015_v6  ;;  %v6055_v31 = vld [vmem:[#allocation6 + $0x178] sm:$0xf0] }
 0x69a   :  { %v3017_v54 = vadd.f32 0.5, %v3013_v57  ;;  %v6058_v6 = vor.u32 %v6718_v47, %v6055_v31  ;;  %v6039_v57 = vld [vmem:[#allocation6 + $0x158] sm:$0xf0] }
 0x69b   :  { %v7047_v52 = vpop.eup %7046  ;;  %6189 = vmatmul.msk.bf16.gmra.mxu3 %vm1217_vm2, %v8420_v26  ;;  %v3018_v42 = vadd.f32 0.5, %v3014_v39  ;;  %v3533_v14 = vpop.f32.mrf.mxu1 }
 0x69c   :  { %v7049_v5 = vpop.eup %7048  ;;  %v3046_v46 = vmul.f32 0.6931472, %v7047_v52  ;;  %v6042_v52 = vor.u32 %v6714_v30, %v6039_v57 }
 0x69d   :  { %v7051_v61 = vpop.eup %7050  ;;  %v3048_v21 = vmul.f32 0.6931472, %v7049_v5  ;;  %v6710_v5 = vld [vmem:[#allocation6 + $0x12c] sm:$0xf] }
 0x69e   :  { %v7053_v32 = vpop.eup %7052  ;;  %v3051_v48 = vsel %vm3023_vm6, %v3002_v35, %v3046_v46  ;;  %v3042_v45 = vmul.f32 0.6931472, %v7051_v61  ;;  %v6023_v46 = vld [vmem:[#allocation6 + $0x138] sm:$0xf0] }
 0x69f   :  { %v3052_v34 = vsel %vm3024_vm7, %v8404_v38, %v3048_v21  ;;  %v3055_v41 = vmul.f32 %v3051_v48, %v3019_v62  ;;  %v3044_v28 = vmul.f32 0.6931472, %v7053_v32  ;;  %v6026_v61 = vor.u32 %v6710_v5, %v6023_v46  ;;  %v6706_v62 = vld [vmem:[#allocation6 + $0x10c] sm:$0xf] }
 0x6a0   :  { %v3056_v17 = vmul.f32 %v3052_v34, %v3020_v20  ;;  %v3049_v43 = vsel %vm3021_vm8, %v8406_v56, %v3042_v45  ;;  %v6730_v56 = vld [vmem:[#allocation6 + $0x1cc] sm:$0xf]  ;;  %v6007_v20 = vld [vmem:[#allocation6 + $0x118] sm:$0xf0] }
 0x6a1   :  { %v3059_v29 = vmul.f32 %v7905_v36, %v3055_v41  ;;  %v3050_v35 = vsel %vm3022_vm9, %v8408_v1, %v3044_v28  ;;  %v3053_v2 = vmul.f32 %v3049_v43, %v3017_v54  ;;  %v8437_v1 = vld [vmem:[%s8935_s9 + $0x18] sm:$0xff]  ;;  %v6106_v7 = vor.u32 %v6730_v56, %v6103_v58 }
 0x6a2   :  { %v3060_v38 = vmul.f32 %v7905_v36, %v3056_v17  ;;  %v3054_v33 = vmul.f32 %v3050_v35, %v3018_v42  ;;  %v6010_v21 = vor.u32 %v6706_v62, %v6007_v20  ;;  %v8448_v42 = vld [vmem:[%s8939_s25 + $0x2] sm:$0x3] }
 0x6a3   :  { %v3057_v16 = vmul.f32 %v7905_v36, %v3053_v2  ;;  %v3535_v39 = vpop.f32.mrf.mxu1  ;;  %v8452_v35 = vperm.slane %v8448_v42, 0 }
 0x6a4   :  { %v3062_v3 = vpack.c.bf16 %v3060_v38, %v3059_v29  ;;  %v3058_v11 = vmul.f32 %v7905_v36, %v3054_v33 }
 0x6a6   :  { %3069 = vmatpush.bf16.msra.mxu0 %v3062_v3  ;;  %v3061_v53 = vpack.c.bf16 %v3058_v11, %v3057_v16 }
 0x6aa   :  { %3070 = vmatpush.bf16.msra.mxu0 %v3061_v53 }
 0x6ab   :  { %6190 = vmatmul.msk.bf16.gmra.mxu3 %vm1217_vm2, %v8437_v1  ;;  %v3538_v32 = vpop.f32.mrf.mxu1 }
 0x6ad   :  { %5989 = vmatmul.msk.bf16.vlgmr.msra.gmra.mxu0 %vm1217_vm2, %v7703_v63 }
 0x6ae   :  { %3420 = vmatpush.bf16.msrb.mxu0 %v6122_v27 }
 0x6b2   :  { %3421 = vmatpush.bf16.msrb.mxu0 %v6106_v7 }
 0x6b3   :  { %v3540_v48 = vpop.f32.mrf.mxu1 }
 0x6b6   :  { %3422 = vmatpush.bf16.msrb.mxu0 %v6090_v12 }
 0x6ba   :  { %3423 = vmatpush.bf16.msrb.mxu0 %v6074_v55 }
 0x6bb   :  { %v3543_v54 = vpop.f32.mrf.mxu1 }
 0x6be   :  { %3424 = vmatpush.bf16.msrb.mxu0 %v6058_v6 }
 0x6c2   :  { %3425 = vmatpush.bf16.msrb.mxu0 %v6042_v52 }
 0x6c3   :  { %v8445_v45 = vpop.f32.mrf.mxu1 }
 0x6c6   :  { %3426 = vmatpush.bf16.msrb.mxu0 %v6026_v61 }
 0x6ca   :  { %3427 = vmatpush.bf16.msrb.mxu0 %v6010_v21 }
 0x6cd   :  { %3428 = vmatmul.bf16.vlgmr.msrb.gmra.mxu0 %v8269_v25 }
 0x6d2   :  { %v3652_v34 = vpop.f32.mrf.mxu1 }
 0x6da   :  { %v3654_v41 = vpop.f32.mrf.mxu1 }
 0x6dd   :  { %3433 = vmatmul.bf16.gmra.mxu0 %v8286_v0 }
 0x6e2   :  { %v3657_v43 = vpop.f32.mrf.mxu1 }
 0x6ea   :  { %v3659_v16 = vpop.f32.mrf.mxu1 }
 0x6f2   :  { %v3662_v59 = vpop.f32.mrf.mxu1 }
 0x6fa   :  { %v3664_v30 = vpop.f32.mrf.mxu1 }
 0x6fe   :  { %v3594_v28 = vpop.f32.mrf.mxu3 }
 0x6ff   :  { %v3653_v17 = vadd.f32 %v3652_v34, %v3594_v28 }
 0x701   :  { %v3701_v29 = vadd.f32 %v3653_v17, %v8427_v19 }
 0x702   :  { %v3667_v21 = vpop.f32.mrf.mxu1 }
 0x703   :  { %v8455_v38 = vadd.f32 %v8452_v35, %v3701_v29 }
 0x705   :  { %v3764_v3 = vmul.f32 %v8455_v38, %v8455_v38 }
 0x706   :  { %v3596_v2 = vpop.f32.mrf.mxu3 }
 0x707   :  { %v3655_v25 = vadd.f32 %v3654_v41, %v3596_v2 }
 0x709   :  { %v3703_v0 = vadd.f32 %v3655_v25, %v3530_v9 }
 0x70b   :  { %v8458_v33 = vadd.f32 %v8452_v35, %v3703_v0 }
 0x70d   :  { %v3738_v11 = vadd.f32 %v8458_v33, %v8455_v38  ;;  %v3766_v19 = vmul.f32 %v8458_v33, %v8458_v33 }
 0x70e   :  { %v3599_v10 = vpop.f32.mrf.mxu3 }
 0x70f   :  { %v3780_v18 = vadd.f32 %v3766_v19, %v3764_v3  ;;  %v3658_v53 = vadd.f32 %v3657_v43, %v3599_v10 }
 0x711   :  { %v3705_v27 = vadd.f32 %v3658_v53, %v3533_v14 }
 0x713   :  { %v8467_v56 = vadd.f32 %v8452_v35, %v3705_v27 }
 0x715   :  { %v3739_v58 = vadd.f32 %v3738_v11, %v8467_v56  ;;  %v3768_v9 = vmul.f32 %v8467_v56, %v8467_v56 }
 0x716   :  { %v3601_v7 = vpop.f32.mrf.mxu3 }
 0x717   :  { %v3781_v15 = vadd.f32 %v3780_v18, %v3768_v9  ;;  %v3660_v12 = vadd.f32 %v3659_v16, %v3601_v7 }
 0x719   :  { %v3707_v49 = vadd.f32 %v3660_v12, %v3535_v39 }
 0x71b   :  { %v8473_v40 = vadd.f32 %v8452_v35, %v3707_v49 }
 0x71d   :  { %v3740_v55 = vadd.f32 %v3739_v58, %v8473_v40  ;;  %v3770_v14 = vmul.f32 %v8473_v40, %v8473_v40 }
 0x71e   :  { %v3604_v47 = vpop.f32.mrf.mxu3 }
 0x71f   :  { %v3782_v31 = vadd.f32 %v3781_v15, %v3770_v14  ;;  %v3663_v6 = vadd.f32 %v3662_v59, %v3604_v47 }
 0x721   :  { %v3709_v57 = vadd.f32 %v3663_v6, %v3538_v32 }
 0x723   :  { %v8479_v52 = vadd.f32 %v8452_v35, %v3709_v57 }
 0x725   :  { %v3741_v5 = vadd.f32 %v3740_v55, %v8479_v52  ;;  %v3772_v46 = vmul.f32 %v8479_v52, %v8479_v52 }
 0x726   :  { %v3606_v39 = vpop.f32.mrf.mxu3 }
 0x727   :  { %v3783_v61 = vadd.f32 %v3782_v31, %v3772_v46  ;;  %v3665_v62 = vadd.f32 %v3664_v30, %v3606_v39 }
 0x729   :  { %v3711_v34 = vadd.f32 %v3665_v62, %v3540_v48  ;;  %v3669_v48 = vpop.f32.mrf.mxu1 }
 0x72a   :  { %v8484_v20 = vpop.f32.mrf.mxu0 }
 0x72b   :  { %v8487_v32 = vadd.f32 %v8452_v35, %v3711_v34  ;;  %v3084_v29 = vmul.f32 %v8484_v20, %v8484_v20  ;;  %v6782_v34 = vld [vmem:[#allocation2 + $0x2ec] sm:$0xf] }
 0x72d   :  { %v3774_v3 = vmul.f32 %v8487_v32, %v8487_v32  ;;  %v3742_v27 = vadd.f32 %v3741_v5, %v8487_v32 }
 0x72e   :  { %v3609_v41 = vpop.f32.mrf.mxu3 }
 0x72f   :  { %v3668_v28 = vadd.f32 %v3667_v21, %v3609_v41  ;;  %v3784_v59 = vadd.f32 %v3783_v61, %v3774_v3  ;;  %v6318_v3 = vld [vmem:[#allocation2 + $0x2d8] sm:$0xf0] }
 0x731   :  { %v3713_v17 = vadd.f32 %v3668_v28, %v3543_v54 }
 0x732   :  { %v8489_v43 = vpop.f32.mrf.mxu0 }
 0x733   :  { %v3077_v2 = vadd.f32 %v8489_v43, %v8484_v20  ;;  %v3085_v25 = vmul.f32 %v8489_v43, %v8489_v43  ;;  %v8498_v0 = vadd.f32 %v8452_v35, %v3713_v17 }
 0x735   :  { %v3078_v16 = vrot.slane %v3077_v2, 4  ;;  %v3086_v54 = vadd.f32 %v3085_v25, %v3084_v29  ;;  %v3776_v53 = vmul.f32 %v8498_v0, %v8498_v0  ;;  %v3743_v15 = vadd.f32 %v3742_v27, %v8498_v0 }
 0x736   :  { %v3611_v11 = vpop.f32.mrf.mxu3 }
 0x737   :  { %v3079_v19 = vadd.f32 %v3078_v16, %v3077_v2  ;;  %v3087_v10 = vrot.slane %v3086_v54, 4  ;;  %v3670_v18 = vadd.f32 %v3669_v48, %v3611_v11  ;;  %v3785_v14 = vadd.f32 %v3784_v59, %v3776_v53  ;;  %v6302_v59 = vld [vmem:[#allocation2 + $0x2b8] sm:$0xf0] }
 0x739   :  { %v3080_v58 = vrot.slane %v3079_v19, 2  ;;  %v3088_v9 = vadd.f32 %v3087_v10, %v3086_v54  ;;  %v3715_v7 = vadd.f32 %v3670_v18, %v8445_v45  ;;  %v6778_v54 = vld [vmem:[#allocation2 + $0x2cc] sm:$0xf] }
 0x73a   :  { %v6321_v10 = vor.u32 %v6778_v54, %v6318_v3 }
 0x73b   :  { %v3081_v12 = vadd.f32 %v3080_v58, %v3079_v19  ;;  %v3089_v49 = vrot.slane %v3088_v9, 2  ;;  %v8508_v55 = vadd.f32 %v8452_v35, %v3715_v7  ;;  %v6334_v35 = vld [vmem:[#allocation2 + $0x2f8] sm:$0xf0]  ;;  %v6774_v7 = vld [vmem:[#allocation2 + $0x2ac] sm:$0xf] }
 0x73c   :  { %v6337_v2 = vor.u32 %v6782_v34, %v6334_v35  ;;  %v6270_v34 = vld [vmem:[#allocation2 + $0x278] sm:$0xf0] }
 0x73d   :  { %v3082_v47 = vrot.slane %v3081_v12, 1  ;;  %v3090_v31 = vadd.f32 %v3089_v49, %v3088_v9  ;;  %v3744_v6 = vadd.f32 %v3743_v15, %v8508_v55  ;;  %v3778_v30 = vmul.f32 %v8508_v55, %v8508_v55 }
 0x73e   :  { %4412 = vmatpush.bf16.msrb.mxu1 %v6337_v2  ;;  %v6305_v15 = vor.u32 %v6774_v7, %v6302_v59  ;;  %v6762_v2 = vld [vmem:[#allocation2 + $0x24c] sm:$0xf] }
 0x73f   :  { %v3083_v57 = vadd.f32 %v3082_v47, %v3081_v12  ;;  %v3091_v5 = vrot.slane %v3090_v31, 1  ;;  %v3745_v46 = vrot.slane %v3744_v6, 4  ;;  %v3786_v45 = vadd.f32 %v3785_v14, %v3778_v30 }
 0x741   :  { %v3092_v39 = vadd.f32 %v3091_v5, %v3090_v31  ;;  %v8513_v61 = vmul.f32 0.0625, %v3083_v57  ;;  %v3746_v62 = vadd.f32 %v3745_v46, %v3744_v6  ;;  %v3787_v21 = vrot.slane %v3786_v45, 4  ;;  %v6770_v31 = vld [vmem:[#allocation2 + $0x28c] sm:$0xf]  ;;  %v6286_v6 = vld [vmem:[#allocation2 + $0x298] sm:$0xf0] }
 0x742   :  { %4413 = vmatpush.bf16.msrb.mxu1 %v6321_v10  ;;  %v6289_v57 = vor.u32 %v6770_v31, %v6286_v6 }
 0x743   :  { %v3094_v41 = vmul.f32 0.0625, %v3092_v39  ;;  %v3095_v28 = vmul.f32 %v8513_v61, %v8513_v61  ;;  %v3747_v17 = vrot.slane %v3746_v62, 2  ;;  %v3788_v29 = vadd.f32 %v3787_v21, %v3786_v45  ;;  %v6766_v21 = vld [vmem:[#allocation2 + $0x26c] sm:$0xf] }
 0x744   :  { %v3098_v59 = vsub.f32 %v8484_v20, %v8513_v61  ;;  %v6783_v20 = vld [vmem:[#allocation2 + $0x2ec] sm:$0xf0] }
 0x745   :  { %v3096_v25 = vsub.f32 %v3094_v41, %v3095_v28  ;;  %v3748_v48 = vadd.f32 %v3747_v17, %v3746_v62  ;;  %v3789_v16 = vrot.slane %v3788_v29, 2 }
 0x746   :  { %4414 = vmatpush.bf16.msrb.mxu1 %v6305_v15  ;;  %v3099_v15 = vsub.f32 %v8489_v43, %v8513_v61 }
 0x747   :  { %v3097_v11 = vmax.f32 %v3096_v25, 0.0  ;;  %v3749_v18 = vrot.slane %v3748_v48, 1  ;;  %v3790_v53 = vadd.f32 %v3789_v16, %v3788_v29  ;;  %v6273_v29 = vor.u32 %v6766_v21, %v6270_v34  ;;  %v6254_v25 = vld [vmem:[#allocation2 + $0x258] sm:$0xf0] }
 0x748   :  { %v6257_v3 = vor.u32 %v6762_v2, %v6254_v25  ;;  %v6324_v2 = vld [vmem:[#allocation2 + $0x2e0] sm:$0xf] }
 0x749   :  { %v3100_v27 = vadd.f32 1e-05, %v3097_v11  ;;  %v3750_v58 = vadd.f32 %v3749_v18, %v3748_v48  ;;  %v3791_v9 = vrot.slane %v3790_v53, 1  ;;  %v6758_v18 = vld [vmem:[#allocation2 + $0x22c] sm:$0xf] }
 0x74a   :  { %v8517_v19 = vpop.f32.mrf.mxu0  ;;  %4415 = vmatpush.bf16.msrb.mxu1 %v6289_v57 }
 0x74b   :  { %7054 = vrsqrt.f32 %v3100_v27  ;;  %v3792_v12 = vadd.f32 %v3791_v9, %v3790_v53  ;;  %v8519_v49 = vmul.f32 0.015625, %v3750_v58  ;;  %v6238_v53 = vld [vmem:[#allocation2 + $0x238] sm:$0xf0]  ;;  %vm3107_vm11 = vweird.f32 %v3100_v27  ;;  %v6887_v9 = vld [vmem:[%s8940_s29 + $0x1] ss:$0 sm:$0xff] }
 0x74c   :  { %v6241_v7 = vor.u32 %v6758_v18, %v6238_v53  ;;  %v6308_v53 = vld [vmem:[#allocation2 + $0x2c0] sm:$0xf] }
 0x74d   :  { %v3808_v14 = vmul.f32 0.015625, %v3792_v12  ;;  %v3810_v47 = vmul.f32 %v8519_v49, %v8519_v49  ;;  %v3824_v5 = vsub.f32 %v8479_v52, %v8519_v49  ;;  %v3820_v45 = vsub.f32 %v8467_v56, %v8519_v49  ;;  %v6754_v12 = vld [vmem:[#allocation2 + $0x20c] sm:$0xf] }
 0x74e   :  { %v3822_v39 = vsub.f32 %v8473_v40, %v8519_v49  ;;  %v3816_v35 = vsub.f32 %v8455_v38, %v8519_v49  ;;  %v3818_v41 = vsub.f32 %v8458_v33, %v8519_v49  ;;  %4416 = vmatpush.bf16.msrb.mxu1 %v6273_v29  ;;  %v6228_v33 = vld [vmem:[#allocation2 + $0x220] sm:$0xf] }
 0x74f   :  { %v3812_v46 = vsub.f32 %v3808_v14, %v3810_v47  ;;  %v6222_v14 = vld [vmem:[#allocation2 + $0x218] sm:$0xf0] }
 0x751   :  { %v7055_v62 = vpop.eup %7054  ;;  %v3814_v17 = vmax.f32 %v3812_v46, 0.0  ;;  %v6888_v46 = vld [vmem:[%s8941_s19 + $0x1] ss:$0 sm:$0xff] }
 0x752   :  { %v8523_v30 = vpop.f32.mrf.mxu0  ;;  %v3102_v28 = vmul.f32 %v7055_v62, %v3100_v27  ;;  %vm3108_vm10 = vweird.f32 %v7055_v62  ;;  %4417 = vmatpush.bf16.msrb.mxu1 %v6257_v3  ;;  %v6225_v27 = vor.u32 %v6754_v12, %v6222_v14 }
 0x753   :  { %v3832_v16 = vadd.f32 1e-05, %v3814_v17  ;;  %vm3109_vm12 = vmor %vm3107_vm11, %vm3108_vm10  ;;  %v3582_v18 = vpack.c.bf16 %v8523_v30, %v8517_v19 }
 0x754   :  { %v3103_v48 = vmul.f32 %v7055_v62, %v3102_v28 }
 0x755   :  { %7056 = vrsqrt.f32 %v3832_v16  ;;  %vm3840_vm14 = vweird.f32 %v3832_v16 }
 0x756   :  { %v3104_v54 = vmul.f32 0.5, %v3103_v48  ;;  %4418 = vmatpush.bf16.msrb.mxu1 %v6241_v7 }
 0x758   :  { %v3105_v10 = vsub.f32 1.5, %v3104_v54  ;;  %v6325_v54 = vor.u32 %v6783_v20, %v6324_v2 }
 0x75a   :  { %v3434_v11 = vpop.f32.mrf.mxu0  ;;  %v3106_v58 = vmul.f32 %v7055_v62, %v3105_v10  ;;  %4419 = vmatpush.bf16.msrb.mxu1 %v6225_v27  ;;  %v6767_v27 = vld [vmem:[#allocation2 + $0x26c] sm:$0xf0] }
 0x75b   :  { %v7057_v47 = vpop.eup %7056 }
 0x75c   :  { %v3110_v31 = vsel %vm3109_vm12, %v7055_v62, %v3106_v58  ;;  %v3835_v21 = vmul.f32 %v7057_v47, %v3832_v16  ;;  %vm3841_vm13 = vweird.f32 %v7057_v47  ;;  %v6779_v58 = vld [vmem:[#allocation2 + $0x2cc] sm:$0xf0] }
 0x75d   :  { %v3111_v6 = vmul.f32 %v3110_v31, %v3098_v59  ;;  %v3112_v57 = vmul.f32 %v3110_v31, %v3099_v15  ;;  %vm3842_vm15 = vmor %vm3840_vm14, %vm3841_vm13  ;;  %v3826_v59 = vsub.f32 %v8487_v32, %v8519_v49  ;;  %v6309_v12 = vor.u32 %v6779_v58, %v6308_v53  ;;  %v6292_v31 = vld [vmem:[#allocation2 + $0x2a0] sm:$0xf]  ;;  %v6775_v16 = vld [vmem:[#allocation2 + $0x2ac] sm:$0xf0] }
 0x75e   :  { %v3836_v17 = vmul.f32 %v7057_v47, %v3835_v21  ;;  %v6260_v21 = vld [vmem:[#allocation2 + $0x260] sm:$0xf]  ;;  %v6784_v53 = vld [vmem:[#allocation2 + $0x2f4] sm:$0xf0] }
 0x75f   :  { %v3116_v34 = vmul.f32 %v6887_v9, %v3111_v6  ;;  %v3117_v28 = vmul.f32 %v6887_v9, %v3112_v57  ;;  %v6276_v57 = vld [vmem:[#allocation2 + $0x280] sm:$0xf] }
 0x760   :  { %v3837_v61 = vmul.f32 0.5, %v3836_v17 }
 0x761   :  { %v3121_v48 = vadd.f32 %v6888_v46, %v3116_v34  ;;  %v3122_v43 = vadd.f32 %v6888_v46, %v3117_v28  ;;  %v6244_v34 = vld [vmem:[#allocation2 + $0x240] sm:$0xf]  ;;  %v6763_v28 = vld [vmem:[#allocation2 + $0x24c] sm:$0xf0] }
 0x762   :  { %v3436_v29 = vpop.f32.mrf.mxu0  ;;  %v3838_v10 = vsub.f32 1.5, %v3837_v61  ;;  %v6245_v17 = vor.u32 %v6763_v28, %v6244_v34 }
 0x763   :  { %v3584_v25 = vpack.c.bf16 %v3436_v29, %v3434_v11  ;;  %v8542_v62 = vadd.f32 %v3121_v48, %v8017_v22  ;;  %v8545_v3 = vadd.f32 %v3122_v43, %v8020_v60  ;;  %v3830_v22 = vsub.f32 %v8508_v55, %v8519_v49 }
 0x764   :  { %v3839_v7 = vmul.f32 %v7057_v47, %v3838_v10  ;;  %v3828_v60 = vsub.f32 %v8498_v0, %v8519_v49  ;;  %v6759_v49 = vld [vmem:[#allocation2 + $0x22c] sm:$0xf0] }
 0x765   :  { %3620 = vmatpush.bf16.msra.mxu0 %v3584_v25  ;;  %v3127_v11 = vmin.f32 %v8542_v62, 20.0  ;;  %v3128_v9 = vmin.f32 %v8545_v3, 20.0  ;;  %vm3125_vm0 = vcmp.gt.f32.partialorder %v8542_v62, 20.0  ;;  %vm3126_vm3 = vcmp.gt.f32.partialorder %v8545_v3, 20.0  ;;  %v6755_v10 = vld [vmem:[#allocation2 + $0x20c] sm:$0xf0] }
 0x766   :  { %v3843_v15 = vsel %vm3842_vm15, %v7057_v47, %v3839_v7  ;;  %v6229_v48 = vor.u32 %v6759_v49, %v6228_v33 }
 0x767   :  { %v3129_v19 = vmul.f32 1.442695, %v3127_v11  ;;  %v3131_v30 = vmul.f32 1.442695, %v3128_v9  ;;  %v8557_v14 = vmul.f32 %v3843_v15, %v3830_v22  ;;  %v8559_v6 = vmul.f32 %v3843_v15, %v3828_v60  ;;  %v6780_v9 = vld [vmem:[#allocation2 + $0x2d4] sm:$0xf0] }
 0x768   :  { %v8564_v55 = vmul.f32 %v3843_v15, %v3824_v5  ;;  %v8566_v0 = vmul.f32 %v3843_v15, %v3826_v59  ;;  %v8573_v32 = vmul.f32 %v3843_v15, %v3820_v45  ;;  %v8578_v47 = vmul.f32 %v3843_v15, %v3822_v39  ;;  %v6300_v22 = vld [vmem:[#allocation2 + $0x2a8] sm:$0xf]  ;;  %v6776_v60 = vld [vmem:[#allocation2 + $0x2b4] sm:$0xf0] }
 0x769   :  { %3621 = vmatpush.bf16.msra.mxu0 %v3582_v18  ;;  %7058 = vpow2.f32 %v3129_v19  ;;  %v8583_v52 = vmul.f32 %v3843_v15, %v3816_v35  ;;  %v6293_v5 = vor.u32 %v6775_v16, %v6292_v31  ;;  %v8588_v56 = vmul.f32 %v3843_v15, %v3818_v41  ;;  %v6284_v19 = vld [vmem:[#allocation2 + $0x288] sm:$0xf]  ;;  %v3557_v15 = vpop.f32.mrf.mxu2  ;;  %v6768_v16 = vld [vmem:[#allocation2 + $0x274] sm:$0xf0] }
 0x76a   :  { %7060 = vpow2.f32 %v3131_v30  ;;  %v6261_v35 = vor.u32 %v6767_v27, %v6260_v21  ;;  %v6301_v59 = vor.u32 %v6776_v60, %v6300_v22  ;;  %v6772_v30 = vld [vmem:[#allocation2 + $0x294] sm:$0xf0]  ;;  %v6268_v31 = vld [vmem:[#allocation2 + $0x268] sm:$0xf] }
 0x76b   :  { %v6756_v27 = vld [vmem:[#allocation2 + $0x214] sm:$0xf0] }
 0x76c   :  { %6191 = vmatmul.msk.bf16.vlgmr.msra.gmra.mxu0 %vm1217_vm2, %v8395_v50  ;;  %v6771_v50 = vld [vmem:[#allocation2 + $0x28c] sm:$0xf0] }
 0x76d   :  { %4370 = vmatpush.bf16.msrb.mxu0 %v6325_v54  ;;  %v6277_v40 = vor.u32 %v6771_v50, %v6276_v57  ;;  %v6212_v54 = vld [vmem:[#allocation2 + $0x200] sm:$0xf]  ;;  %v6252_v57 = vld [vmem:[#allocation2 + $0x248] sm:$0xf]  ;;  %v6764_v50 = vld [vmem:[#allocation2 + $0x254] sm:$0xf0] }
 0x76f   :  { %v7059_v45 = vpop.eup %7058 }
 0x770   :  { %v7061_v39 = vpop.eup %7060  ;;  %v3133_v46 = vadd.f32 1.0, %v7059_v45 }
 0x771   :  { %4371 = vmatpush.bf16.msrb.mxu0 %v6309_v12  ;;  %v3134_v38 = vadd.f32 1.0, %v7061_v39  ;;  %v6285_v12 = vor.u32 %v6772_v30, %v6284_v19  ;;  %v3559_v45 = vpop.f32.mrf.mxu2  ;;  %v6236_v39 = vld [vmem:[#allocation2 + $0x228] sm:$0xf] }
 0x772   :  { %7062 = vlog2.f32 %v3133_v46  ;;  %v6760_v46 = vld [vmem:[#allocation2 + $0x234] sm:$0xf0] }
 0x773   :  { %7064 = vlog2.f32 %v3134_v38  ;;  %v6237_v21 = vor.u32 %v6760_v46, %v6236_v39 }
 0x775   :  { %4372 = vmatpush.bf16.msrb.mxu0 %v6293_v5  ;;  %v6269_v5 = vor.u32 %v6768_v16, %v6268_v31 }
 0x778   :  { %v7063_v29 = vpop.eup %7062 }
 0x779   :  { %4373 = vmatpush.bf16.msrb.mxu0 %v6277_v40  ;;  %v7065_v41 = vpop.eup %7064  ;;  %v3136_v2 = vmul.f32 0.6931472, %v7063_v29  ;;  %v6253_v40 = vor.u32 %v6764_v50, %v6252_v57 }
 0x77a   :  { %v3138_v20 = vmul.f32 0.6931472, %v7065_v41 }
 0x77b   :  { %v3139_v25 = vsel %vm3125_vm0, %v8542_v62, %v3136_v2  ;;  %v6213_v62 = vor.u32 %v6755_v10, %v6212_v54 }
 0x77c   :  { %6192 = vmatmul.msk.bf16.gmra.mxu0 %vm1217_vm2, %v8415_v23  ;;  %v3140_v43 = vsel %vm3126_vm3, %v8545_v3, %v3138_v20  ;;  %v8597_v61 = vmul.f32 %v7905_v36, %v3139_v25  ;;  %v6332_v23 = vld [vmem:[#allocation2 + $0x2e8] sm:$0xf] }
 0x77d   :  { %4374 = vmatpush.bf16.msrb.mxu0 %v6261_v35  ;;  %v8600_v18 = vmul.f32 %v7905_v36, %v3140_v43  ;;  %v6333_v11 = vor.u32 %v6784_v53, %v6332_v23  ;;  %v6316_v3 = vld [vmem:[#allocation2 + $0x2c8] sm:$0xf]  ;;  %v3562_v35 = vpop.f32.mrf.mxu2 }
 0x77e   :  { %v6317_v7 = vor.u32 %v6780_v9, %v6316_v3 }
 0x77f   :  { %v8604_v58 = vpack.c.bf16 %v8600_v18, %v8597_v61 }
 0x781   :  { %4375 = vmatpush.bf16.msrb.mxu0 %v6245_v17  ;;  %4420 = vmatmul.bf16.vlgmr.msrb.gmra.mxu1 %v8604_v58 }
 0x785   :  { %4376 = vmatpush.bf16.msrb.mxu0 %v6229_v48  ;;  %v3564_v34 = vpop.f32.mrf.mxu2 }
 0x789   :  { %4377 = vmatpush.bf16.msrb.mxu0 %v6213_v62 }
 0x78c   :  { %6193 = vmatmul.msk.bf16.gmra.mxu0 %vm1217_vm2, %v8420_v26  ;;  %v6220_v26 = vld [vmem:[#allocation2 + $0x208] sm:$0xf] }
 0x78d   :  { %4398 = vmatpush.bf16.msra.mxu0 %v6333_v11  ;;  %v6221_v38 = vor.u32 %v6756_v27, %v6220_v26  ;;  %v3567_v28 = vpop.f32.mrf.mxu2 }
 0x791   :  { %4399 = vmatpush.bf16.msra.mxu0 %v6317_v7  ;;  %v8616_v7 = vld [vmem:[%s7452_s8] sm:$0xff] }
 0x795   :  { %4400 = vmatpush.bf16.msra.mxu0 %v6301_v59  ;;  %v3569_v17 = vpop.f32.mrf.mxu2 }
 0x799   :  { %4401 = vmatpush.bf16.msra.mxu0 %v6285_v12  ;;  %v3719_v12 = vperm.slane %v8448_v42, 1 }
 0x79c   :  { %6194 = vmatmul.msk.bf16.gmra.mxu0 %vm1217_vm2, %v8437_v1 }
 0x79d   :  { %4402 = vmatpush.bf16.msra.mxu0 %v6269_v5  ;;  %v3572_v29 = vpop.f32.mrf.mxu2 }
 0x7a1   :  { %4403 = vmatpush.bf16.msra.mxu0 %v6253_v40 }
 0x7a5   :  { %4404 = vmatpush.bf16.msra.mxu0 %v6237_v21  ;;  %v8613_v33 = vpop.f32.mrf.mxu2 }
 0x7a9   :  { %4405 = vmatpush.bf16.msra.mxu0 %v6221_v38 }
 0x7ac   :  { %4378 = vmatmul.bf16.vlgmr.msrb.gmra.mxu0 %v8604_v58 }
 0x7ad   :  { %v3681_v49 = vpop.f32.mrf.mxu2 }
 0x7b5   :  { %v3683_v41 = vpop.f32.mrf.mxu2 }
 0x7bc   :  { %4406 = vmatmul.bf16.vlgmr.msra.gmra.mxu0 %v8604_v58 }
 0x7bd   :  { %v3686_v2 = vpop.f32.mrf.mxu2 }
 0x7c5   :  { %v3688_v48 = vpop.f32.mrf.mxu2 }
 0x7cd   :  { %v3691_v10 = vpop.f32.mrf.mxu2 }
 0x7d5   :  { %v3693_v11 = vpop.f32.mrf.mxu2 }
 0x7dd   :  { %v3696_v39 = vpop.f32.mrf.mxu2 }
 0x7e9   :  { %v3623_v1 = vpop.f32.mrf.mxu0 }
 0x7ea   :  { %v3682_v9 = vadd.f32 %v3681_v49, %v3623_v1 }
 0x7ec   :  { %v3702_v30 = vadd.f32 %v3682_v9, %v3557_v15 }
 0x7ee   :  { %v8623_v40 = vadd.f32 %v3719_v12, %v3702_v30 }
 0x7f0   :  { %v3765_v38 = vmul.f32 %v8623_v40, %v8623_v40 }
 0x7f1   :  { %v3625_v20 = vpop.f32.mrf.mxu0 }
 0x7f2   :  { %v3684_v3 = vadd.f32 %v3683_v41, %v3625_v20  ;;  %v8645_v20 = vld [vmem:[%s7452_s8 + $0x8] sm:$0xff] }
 0x7f4   :  { %v3704_v59 = vadd.f32 %v3684_v3, %v3559_v45 }
 0x7f6   :  { %v8621_v5 = vadd.f32 %v3719_v12, %v3704_v59 }
 0x7f8   :  { %v3767_v45 = vmul.f32 %v8621_v5, %v8621_v5 }
 0x7f9   :  { %v3628_v25 = vpop.f32.mrf.mxu0 }
 0x7fa   :  { %v3687_v22 = vadd.f32 %v3686_v2, %v3628_v25  ;;  %v3793_v41 = vadd.f32 %v3767_v45, %v3765_v38 }
 0x7fc   :  { %v3706_v31 = vadd.f32 %v3687_v22, %v3562_v35  ;;  %v3751_v35 = vadd.f32 %v8621_v5, %v8623_v40 }
 0x7fe   :  { %v4421_v43 = vpop.f32.mrf.mxu1  ;;  %v8625_v46 = vadd.f32 %v3719_v12, %v3706_v31 }
 0x800   :  { %v3752_v1 = vadd.f32 %v3751_v35, %v8625_v46 }
 0x801   :  { %v3630_v54 = vpop.f32.mrf.mxu0 }
 0x802   :  { %v3689_v19 = vadd.f32 %v3688_v48, %v3630_v54  ;;  %v3698_v54 = vpop.f32.mrf.mxu2 }
 0x804   :  { %v3708_v57 = vadd.f32 %v3689_v19, %v3564_v34  ;;  %v3769_v34 = vmul.f32 %v8625_v46, %v8625_v46 }
 0x806   :  { %v4423_v23 = vpop.f32.mrf.mxu1  ;;  %v8629_v15 = vadd.f32 %v3719_v12, %v3708_v57  ;;  %v3794_v25 = vadd.f32 %v3793_v41, %v3769_v34 }
 0x807   :  { %v4547_v62 = vpack.c.bf16 %v4423_v23, %v4421_v43 }
 0x808   :  { %v3771_v2 = vmul.f32 %v8629_v15, %v8629_v15  ;;  %v3753_v48 = vadd.f32 %v3752_v1, %v8629_v15 }
 0x809   :  { %v3633_v53 = vpop.f32.mrf.mxu0  ;;  %4574 = vmatpush.bf16.msra.mxu1 %v4547_v62 }
 0x80a   :  { %v3692_v16 = vadd.f32 %v3691_v10, %v3633_v53  ;;  %v3795_v23 = vadd.f32 %v3794_v25, %v3771_v2 }
 0x80c   :  { %6404 = vmatmul.msk.bf16.vlgmr.msra.gmra.mxu1 %vm903_vm1, %v8616_v7  ;;  %v3710_v21 = vadd.f32 %v3692_v16, %v3567_v28 }
 0x80e   :  { %v8637_v49 = vadd.f32 %v3719_v12, %v3710_v21 }
 0x810   :  { %v3773_v43 = vmul.f32 %v8637_v49, %v8637_v49  ;;  %v3754_v53 = vadd.f32 %v3753_v48, %v8637_v49 }
 0x811   :  { %v3635_v60 = vpop.f32.mrf.mxu0 }
 0x812   :  { %v3694_v50 = vadd.f32 %v3693_v11, %v3635_v60  ;;  %v3796_v3 = vadd.f32 %v3795_v23, %v3773_v43  ;;  %v5991_v43 = vld [vmem:[%s8942_s28 + $0x2] sm:$0x3] }
 0x814   :  { %v3712_v42 = vadd.f32 %v3694_v50, %v3569_v17 }
 0x816   :  { %v8642_v17 = vadd.f32 %v3719_v12, %v3712_v42 }
 0x818   :  { %v3775_v62 = vmul.f32 %v8642_v17, %v8642_v17  ;;  %v3755_v9 = vadd.f32 %v3754_v53, %v8642_v17 }
 0x819   :  { %v3638_v26 = vpop.f32.mrf.mxu0 }
 0x81a   :  { %v3697_v27 = vadd.f32 %v3696_v39, %v3638_v26  ;;  %v3797_v59 = vadd.f32 %v3796_v3, %v3775_v62  ;;  %v3871_v62 = vperm.slane %v5991_v43, 0  ;;  %v5992_v3 = vld [vmem:[%s8943_s1 + $0x2] sm:$0x3] }
 0x81c   :  { %v3714_v28 = vadd.f32 %v3697_v27, %v3572_v29  ;;  %6405 = vmatmul.msk.bf16.gmra.mxu1 %vm903_vm1, %v8645_v20 }
 0x81e   :  { %v8652_v29 = vadd.f32 %v3719_v12, %v3714_v28 }
 0x820   :  { %v3777_v22 = vmul.f32 %v8652_v29, %v8652_v29  ;;  %v3756_v19 = vadd.f32 %v3755_v9, %v8652_v29 }
 0x821   :  { %v3640_v10 = vpop.f32.mrf.mxu0 }
 0x822   :  { %v3699_v11 = vadd.f32 %v3698_v54, %v3640_v10  ;;  %v3798_v31 = vadd.f32 %v3797_v59, %v3777_v22  ;;  %v3892_v22 = vperm.slane %v5992_v3, 0  ;;  %v3889_v59 = vmul.f32 %v3871_v62, %v8557_v14 }
 0x823   :  { %v3877_v14 = vmul.f32 %v3871_v62, %v8588_v56 }
 0x824   :  { %v3716_v60 = vadd.f32 %v3699_v11, %v8613_v33 }
 0x826   :  { %v8662_v30 = vadd.f32 %v3719_v12, %v3716_v60  ;;  %v3887_v60 = vmul.f32 %v3871_v62, %v8559_v6  ;;  %v3875_v6 = vmul.f32 %v3871_v62, %v8583_v52 }
 0x828   :  { %v3757_v16 = vadd.f32 %v3756_v19, %v8662_v30  ;;  %v3779_v57 = vmul.f32 %v8662_v30, %v8662_v30 }
 0x829   :  { %v4379_v50 = vpop.f32.mrf.mxu0 }
 0x82a   :  { %v3758_v39 = vrot.slane %v3757_v16, 4  ;;  %v3799_v21 = vadd.f32 %v3798_v31, %v3779_v57 }
 0x82c   :  { %v3759_v26 = vadd.f32 %v3758_v39, %v3757_v16  ;;  %v3800_v45 = vrot.slane %v3799_v21, 4  ;;  %v3883_v16 = vmul.f32 %v3871_v62, %v8564_v55  ;;  %v3885_v39 = vmul.f32 %v3871_v62, %v8566_v0 }
 0x82e   :  { %v3760_v42 = vrot.slane %v3759_v26, 2  ;;  %v3801_v27 = vadd.f32 %v3800_v45, %v3799_v21  ;;  %v3908_v21 = vadd.f32 %v3892_v22, %v3887_v60  ;;  %v3879_v45 = vmul.f32 %v3871_v62, %v8573_v32 }
 0x82f   :  { %v3896_v32 = vadd.f32 %v3892_v22, %v3875_v6 }
 0x830   :  { %v3761_v33 = vadd.f32 %v3760_v42, %v3759_v26  ;;  %v3802_v38 = vrot.slane %v3801_v27, 2  ;;  %v3910_v26 = vadd.f32 %v3892_v22, %v3889_v59  ;;  %v3918_v55 = vmul.f32 0.5, %v3908_v21 }
 0x831   :  { %v4381_v35 = vpop.f32.mrf.mxu0 }
 0x832   :  { %v3762_v12 = vrot.slane %v3761_v33, 1  ;;  %v3803_v34 = vadd.f32 %v3802_v38, %v3801_v27  ;;  %v4544_v57 = vpack.c.bf16 %v4381_v35, %v4379_v50  ;;  %v3904_v27 = vadd.f32 %v3892_v22, %v3883_v16 }
 0x833   :  { %v3919_v0 = vmul.f32 0.5, %v3910_v26  ;;  %v3900_v35 = vadd.f32 %v3892_v22, %v3879_v45 }
 0x834   :  { %v3763_v28 = vadd.f32 %v3762_v12, %v3761_v33  ;;  %v3804_v41 = vrot.slane %v3803_v34, 1  ;;  %v3881_v33 = vmul.f32 %v3871_v62, %v8578_v47  ;;  %v3906_v12 = vadd.f32 %v3892_v22, %v3885_v39 }
 0x835   :  { %v3914_v52 = vmul.f32 0.5, %v3900_v35 }
 0x836   :  { %v3805_v1 = vadd.f32 %v3804_v41, %v3803_v34  ;;  %v8667_v2 = vmul.f32 0.015625, %v3763_v28  ;;  %v3916_v34 = vmul.f32 0.5, %v3904_v27  ;;  %v3902_v28 = vadd.f32 %v3892_v22, %v3881_v33 }
 0x837   :  { %v3898_v41 = vadd.f32 %v3892_v22, %v3877_v14 }
 0x838   :  { %v3809_v25 = vmul.f32 0.015625, %v3805_v1  ;;  %v3811_v48 = vmul.f32 %v8667_v2, %v8667_v2  ;;  %v3817_v23 = vsub.f32 %v8623_v40, %v8667_v2  ;;  %v3819_v53 = vsub.f32 %v8621_v5, %v8667_v2 }
 0x839   :  { %v4407_v54 = vpop.f32.mrf.mxu0  ;;  %v3915_v56 = vmul.f32 0.5, %v3902_v28  ;;  %v3831_v62 = vsub.f32 %v8662_v30, %v8667_v2  ;;  %v3825_v22 = vsub.f32 %v8637_v49, %v8667_v2  ;;  %v3827_v60 = vsub.f32 %v8642_v17, %v8667_v2 }
 0x83a   :  { %v3813_v10 = vsub.f32 %v3809_v25, %v3811_v48  ;;  %v3917_v25 = vmul.f32 0.5, %v3906_v12  ;;  %v3912_v48 = vmul.f32 0.5, %v3896_v32 }
 0x83c   :  { %v3815_v11 = vmax.f32 %v3813_v10, 0.0  ;;  %v3872_v10 = vperm.slane %v5991_v43, 1  ;;  %v3823_v43 = vsub.f32 %v8629_v15, %v8667_v2 }
 0x83e   :  { %v3833_v9 = vadd.f32 1e-05, %v3815_v11  ;;  %v3829_v11 = vsub.f32 %v8652_v29, %v8667_v2 }
 0x840   :  { %7066 = vrsqrt.f32 %v3833_v9  ;;  %vm3850_vm6 = vweird.f32 %v3833_v9 }
 0x841   :  { %v4409_v19 = vpop.f32.mrf.mxu0  ;;  %7068 = vtanh.f32 %v3918_v55 }
 0x842   :  { %v4546_v31 = vpack.c.bf16 %v4409_v19, %v4407_v54  ;;  %7070 = vtanh.f32 %v3919_v0  ;;  %v3913_v54 = vmul.f32 0.5, %v3898_v41  ;;  %v3893_v19 = vperm.slane %v5992_v3, 1 }
 0x843   :  { %7072 = vtanh.f32 %v3916_v34 }
 0x844   :  { %4555 = vmatpush.bf16.msrb.mxu0 %v4546_v31  ;;  %7074 = vtanh.f32 %v3917_v25 }
 0x845   :  { %7076 = vtanh.f32 %v3914_v52 }
 0x846   :  { %v7067_v42 = vpop.eup %7066  ;;  %7078 = vtanh.f32 %v3915_v56 }
 0x847   :  { %v3845_v38 = vmul.f32 %v7067_v42, %v3833_v9  ;;  %6402 = vmatmul.msk.bf16.vlgmr.msrb.gmra.mxu0 %vm903_vm1, %v8616_v7  ;;  %vm3851_vm4 = vweird.f32 %v7067_v42  ;;  %v3821_v9 = vsub.f32 %v8625_v46, %v8667_v2  ;;  %v8699_v31 = vpop.eup %7068  ;;  %7080 = vtanh.f32 %v3912_v48 }
 0x848   :  { %4593 = vmatpush.bf16.msra.mxu0 %v4544_v57  ;;  %vm3852_vm7 = vmor %vm3850_vm6, %vm3851_vm4  ;;  %v7071_v39 = vpop.eup %7070  ;;  %7082 = vtanh.f32 %v3913_v54 }
 0x849   :  { %v3846_v50 = vmul.f32 %v7067_v42, %v3845_v38  ;;  %v7073_v3 = vpop.eup %7072 }
 0x84a   :  { %v7075_v27 = vpop.eup %7074 }
 0x84b   :  { %v3847_v1 = vmul.f32 0.5, %v3846_v50  ;;  %v7077_v56 = vpop.eup %7076 }
 0x84d   :  { %v3848_v47 = vsub.f32 1.5, %v3847_v1 }
 0x84f   :  { %v3849_v7 = vmul.f32 %v7067_v42, %v3848_v47 }
 0x851   :  { %v3853_v59 = vsel %vm3852_vm7, %v7067_v42, %v3849_v7 }
 0x852   :  { %v3869_v30 = vmul.f32 %v3853_v59, %v3831_v62  ;;  %v3867_v16 = vmul.f32 %v3853_v59, %v3829_v11  ;;  %v3863_v57 = vmul.f32 %v3853_v59, %v3825_v22  ;;  %v3865_v29 = vmul.f32 %v3853_v59, %v3827_v60  ;;  %v7079_v11 = vpop.eup %7078 }
 0x853   :  { %v3859_v21 = vmul.f32 %v3853_v59, %v3821_v9  ;;  %v3861_v49 = vmul.f32 %v3853_v59, %v3823_v43  ;;  %v3855_v17 = vmul.f32 %v3853_v59, %v3817_v23  ;;  %v3857_v46 = vmul.f32 %v3853_v59, %v3819_v53  ;;  %v7081_v22 = vpop.eup %7080 }
 0x854   :  { %v3890_v26 = vmul.f32 %v3872_v10, %v3869_v30  ;;  %v3888_v15 = vmul.f32 %v3872_v10, %v3867_v16  ;;  %v3884_v45 = vmul.f32 %v3872_v10, %v3863_v57  ;;  %v3886_v42 = vmul.f32 %v3872_v10, %v3865_v29  ;;  %v7083_v60 = vpop.eup %7082 }
 0x855   :  { %v3880_v33 = vmul.f32 %v3872_v10, %v3859_v21  ;;  %v3882_v6 = vmul.f32 %v3872_v10, %v3861_v49  ;;  %v3876_v14 = vmul.f32 %v3872_v10, %v3855_v17  ;;  %v3878_v38 = vmul.f32 %v3872_v10, %v3857_v46 }
 0x856   :  { %v8707_v12 = vadd.f32 %v3893_v19, %v3890_v26  ;;  %v8709_v55 = vadd.f32 %v3893_v19, %v3888_v15  ;;  %v8711_v40 = vadd.f32 %v3893_v19, %v3884_v45  ;;  %v8713_v23 = vadd.f32 %v3893_v19, %v3886_v42 }
 0x857   :  { %v8715_v5 = vadd.f32 %v3893_v19, %v3880_v33  ;;  %v8717_v2 = vadd.f32 %v3893_v19, %v3882_v6  ;;  %6403 = vmatmul.msk.bf16.gmra.mxu0 %vm903_vm1, %v8645_v20  ;;  %v8723_v50 = vadd.f32 %v3893_v19, %v3876_v14  ;;  %v8727_v28 = vadd.f32 %v3893_v19, %v3878_v38  ;;  %v8735_v14 = vld [vmem:[%s7447_s3] sm:$0xff] }
 0x858   :  { %v3959_v53 = vmin.f32 %v8707_v12, 20.0  ;;  %v3958_v0 = vmin.f32 %v8709_v55, 20.0  ;;  %v3956_v35 = vmin.f32 %v8711_v40, 20.0  ;;  %v3957_v34 = vmin.f32 %v8713_v23, 20.0 }
 0x859   :  { %v3954_v20 = vmin.f32 %v8715_v5, 20.0  ;;  %v3955_v47 = vmin.f32 %v8717_v2, 20.0  ;;  %v3952_v52 = vmin.f32 %v8723_v50, 20.0  ;;  %v3953_v62 = vmin.f32 %v8727_v28, 20.0 }
 0x85a   :  { %v3974_v32 = vmul.f32 1.442695, %v3959_v53  ;;  %v3972_v41 = vmul.f32 1.442695, %v3958_v0  ;;  %v3968_v1 = vmul.f32 1.442695, %v3956_v35 }
 0x85b   :  { %v3970_v25 = vmul.f32 1.442695, %v3957_v34  ;;  %v3964_v7 = vmul.f32 1.442695, %v3954_v20  ;;  %v3966_v10 = vmul.f32 1.442695, %v3955_v47 }
 0x85c   :  { %7084 = vpow2.f32 %v3974_v32  ;;  %v3960_v48 = vmul.f32 1.442695, %v3952_v52  ;;  %v3962_v54 = vmul.f32 1.442695, %v3953_v62  ;;  %v3934_v30 = vmul.f32 0.5, %v8699_v31 }
 0x85d   :  { %7086 = vpow2.f32 %v3972_v41  ;;  %v3935_v29 = vmul.f32 0.5, %v7071_v39  ;;  %v3932_v21 = vmul.f32 0.5, %v7073_v3  ;;  %v3933_v46 = vmul.f32 0.5, %v7075_v27 }
 0x85e   :  { %7088 = vpow2.f32 %v3968_v1  ;;  %v3930_v15 = vmul.f32 0.5, %v7077_v56  ;;  %v3931_v42 = vmul.f32 0.5, %v7079_v11  ;;  %v3928_v6 = vmul.f32 0.5, %v7081_v22 }
 0x85f   :  { %7090 = vpow2.f32 %v3970_v25  ;;  %v3929_v3 = vmul.f32 0.5, %v7083_v60  ;;  %v3942_v53 = vadd.f32 0.5, %v3934_v30  ;;  %v3943_v0 = vadd.f32 0.5, %v3935_v29 }
 0x860   :  { %7092 = vpow2.f32 %v3964_v7  ;;  %v3940_v35 = vadd.f32 0.5, %v3932_v21  ;;  %v3941_v34 = vadd.f32 0.5, %v3933_v46  ;;  %v3938_v1 = vadd.f32 0.5, %v3930_v15 }
 0x861   :  { %7094 = vpow2.f32 %v3966_v10  ;;  %v3939_v25 = vadd.f32 0.5, %v3931_v42  ;;  %v3936_v20 = vadd.f32 0.5, %v3928_v6  ;;  %vm3950_vm8 = vcmp.gt.f32.partialorder %v8709_v55, 20.0 }
 0x862   :  { %v7085_v59 = vpop.eup %7084  ;;  %7096 = vpow2.f32 %v3960_v48  ;;  %v3937_v56 = vadd.f32 0.5, %v3929_v3  ;;  %vm3951_vm9 = vcmp.gt.f32.partialorder %v8707_v12, 20.0  ;;  %vm3948_vm10 = vcmp.gt.f32.partialorder %v8711_v40, 20.0 }
 0x863   :  { %v7087_v19 = vpop.eup %7086  ;;  %v3983_v9 = vadd.f32 1.0, %v7085_v59  ;;  %7098 = vpow2.f32 %v3962_v54  ;;  %vm3949_vm11 = vcmp.gt.f32.partialorder %v8713_v23, 20.0  ;;  %vm3946_vm12 = vcmp.gt.f32.partialorder %v8715_v5, 20.0 }
 0x864   :  { %v7089_v43 = vpop.eup %7088  ;;  %v3982_v16 = vadd.f32 1.0, %v7087_v19  ;;  %vm3947_vm13 = vcmp.gt.f32.partialorder %v8717_v2, 20.0  ;;  %vm3944_vm14 = vcmp.gt.f32.partialorder %v8723_v50, 20.0  ;;  %vm3945_vm15 = vcmp.gt.f32.partialorder %v8727_v28, 20.0 }
 0x865   :  { %v7091_v57 = vpop.eup %7090  ;;  %7100 = vlog2.f32 %v3983_v9  ;;  %v3980_v49 = vadd.f32 1.0, %v7089_v43 }
 0x866   :  { %v7093_v17 = vpop.eup %7092  ;;  %7102 = vlog2.f32 %v3982_v16  ;;  %v3981_v26 = vadd.f32 1.0, %v7091_v57 }
 0x867   :  { %v7095_v45 = vpop.eup %7094  ;;  %7104 = vlog2.f32 %v3980_v49  ;;  %v3978_v33 = vadd.f32 1.0, %v7093_v17  ;;  %6406 = vmatmul.msk.bf16.vlgmr.msra.gmra.mxu0 %vm903_vm1, %v8735_v14 }
 0x868   :  { %v7097_v31 = vpop.eup %7096  ;;  %7106 = vlog2.f32 %v3981_v26  ;;  %v3979_v39 = vadd.f32 1.0, %v7095_v45 }
 0x869   :  { %v7099_v38 = vpop.eup %7098  ;;  %7108 = vlog2.f32 %v3978_v33  ;;  %v3976_v27 = vadd.f32 1.0, %v7097_v31 }
 0x86a   :  { %7110 = vlog2.f32 %v3979_v39  ;;  %v3977_v32 = vadd.f32 1.0, %v7099_v38 }
 0x86b   :  { %v7101_v41 = vpop.eup %7100  ;;  %7112 = vlog2.f32 %v3976_v27  ;;  %v8773_v27 = vld [vmem:[%s7447_s3 + $0x8] sm:$0xff]  ;;  %s8946_s3 = sld [smem:[#allocation18_spill]] }
 0x86c   :  { %v7103_v47 = vpop.eup %7102  ;;  %v3999_v52 = vmul.f32 0.6931472, %v7101_v41  ;;  %7114 = vlog2.f32 %v3977_v32  ;;  %v6781_v32 = vld [vmem:[#allocation2 + $0x2e4] sm:$0xf] }
 0x86d   :  { %v7105_v7 = vpop.eup %7104  ;;  %v3997_v10 = vmul.f32 0.6931472, %v7103_v47  ;;  %v6773_v47 = vld [vmem:[#allocation2 + $0x2a4] sm:$0xf] }
 0x86e   :  { %v7107_v62 = vpop.eup %7106  ;;  %v4007_v11 = vsel %vm3951_vm9, %v8707_v12, %v3999_v52  ;;  %v3993_v48 = vmul.f32 0.6931472, %v7105_v7  ;;  %v6294_v52 = vld [vmem:[#allocation2 + $0x2b0] sm:$0xf0]  ;;  %v6769_v7 = vld [vmem:[#allocation2 + $0x284] sm:$0xf] }
 0x86f   :  { %v7109_v22 = vpop.eup %7108  ;;  %v4006_v54 = vsel %vm3950_vm8, %v8709_v55, %v3997_v10  ;;  %v4015_v60 = vmul.f32 %v4007_v11, %v3943_v0  ;;  %v3995_v59 = vmul.f32 0.6931472, %v7107_v62  ;;  %v6278_v10 = vld [vmem:[#allocation2 + $0x290] sm:$0xf0]  ;;  %v6765_v11 = vld [vmem:[#allocation2 + $0x264] sm:$0xf] }
 0x870   :  { %v7111_v19 = vpop.eup %7110  ;;  %v4014_v9 = vmul.f32 %v4006_v54, %v3942_v53  ;;  %v4004_v43 = vsel %vm3948_vm10, %v8711_v40, %v3993_v48  ;;  %v3989_v30 = vmul.f32 0.6931472, %v7109_v22  ;;  %v6281_v62 = vor.u32 %v6769_v7, %v6278_v10  ;;  %v6262_v48 = vld [vmem:[#allocation2 + $0x270] sm:$0xf0]  ;;  %v6761_v54 = vld [vmem:[#allocation2 + $0x244] sm:$0xf] }
 0x871   :  { %v7113_v12 = vpop.eup %7112  ;;  %v4023_v16 = vmul.f32 %v7647_v51, %v4015_v60  ;;  %v4005_v57 = vsel %vm3949_vm11, %v8713_v23, %v3995_v59  ;;  %v4012_v29 = vmul.f32 %v4004_v43, %v3940_v35  ;;  %v3991_v55 = vmul.f32 0.6931472, %v7111_v19  ;;  %v6246_v60 = vld [vmem:[#allocation2 + $0x250] sm:$0xf0]  ;;  %v6757_v19 = vld [vmem:[#allocation2 + $0x224] sm:$0xf] }
 0x872   :  { %v7115_v21 = vpop.eup %7114  ;;  %v4022_v49 = vmul.f32 %v7647_v51, %v4014_v9  ;;  %v4013_v17 = vmul.f32 %v4005_v57, %v3941_v34  ;;  %v4002_v40 = vsel %vm3946_vm12, %v8715_v5, %v3989_v30  ;;  %v3985_v46 = vmul.f32 0.6931472, %v7113_v12  ;;  %v6230_v9 = vld [vmem:[#allocation2 + $0x230] sm:$0xf0]  ;;  %v6753_v43 = vld [vmem:[#allocation2 + $0x204] sm:$0xf] }
 0x873   :  { %v4020_v26 = vmul.f32 %v7647_v51, %v4012_v29  ;;  %v4003_v15 = vsel %vm3947_vm13, %v8717_v2, %v3991_v55  ;;  %v4010_v45 = vmul.f32 %v4002_v40, %v3938_v1  ;;  %v3987_v23 = vmul.f32 0.6931472, %v7115_v21  ;;  %v6777_v1 = vld [vmem:[#allocation2 + $0x2c4] sm:$0xf]  ;;  %v6214_v30 = vld [vmem:[#allocation2 + $0x210] sm:$0xf0] }
 0x874   :  { %v4027_v42 = vpack.c.bf16 %v4023_v16, %v4022_v49  ;;  %v4021_v33 = vmul.f32 %v7647_v51, %v4013_v17  ;;  %v4011_v6 = vmul.f32 %v4003_v15, %v3939_v25  ;;  %v4000_v31 = vsel %vm3944_vm14, %v8723_v50, %v3985_v46  ;;  %v6310_v25 = vld [vmem:[#allocation2 + $0x2d0] sm:$0xf0]  ;;  %v6797_v7 = vld [vmem:[#allocation4 + $0x164] sm:$0xf] }
 0x875   :  { %v4018_v5 = vmul.f32 %v7647_v51, %v4010_v45  ;;  %v4001_v39 = vsel %vm3945_vm15, %v8727_v28, %v3987_v23  ;;  %v4008_v3 = vmul.f32 %v4000_v31, %v3936_v20  ;;  %v6326_v28 = vld [vmem:[#allocation2 + $0x2f0] sm:$0xf0]  ;;  %v6313_v20 = vor.u32 %v6777_v1, %v6310_v25  ;;  %v6398_v25 = vld [vmem:[#allocation4 + $0x178] sm:$0xf0] }
 0x876   :  { %4032 = vmatpush.bf16.msra.mxu3 %v4027_v42  ;;  %v4026_v38 = vpack.c.bf16 %v4021_v33, %v4020_v26  ;;  %v4019_v2 = vmul.f32 %v7647_v51, %v4011_v6  ;;  %v4009_v53 = vmul.f32 %v4001_v39, %v3937_v56  ;;  %v6329_v41 = vor.u32 %v6781_v32, %v6326_v28  ;;  %v6800_v32 = vld [vmem:[#allocation4 + $0x174] sm:$0xf0]  ;;  %v6799_v1 = vld [vmem:[#allocation4 + $0x174] sm:$0xf] }
 0x877   :  { %v4016_v0 = vmul.f32 %v7647_v51, %v4008_v3  ;;  %6407 = vmatmul.msk.bf16.gmra.mxu0 %vm903_vm1, %v8773_v27  ;;  %v6297_v56 = vor.u32 %v6773_v47, %v6294_v52  ;;  %v6265_v22 = vor.u32 %v6765_v11, %v6262_v48  ;;  %v6249_v59 = vor.u32 %v6761_v54, %v6246_v60  ;;  %v6390_v11 = vld [vmem:[#allocation4 + $0x168] sm:$0xf0]  ;;  %v6380_v54 = vld [vmem:[#allocation4 + $0x150] sm:$0xf]  ;;  %v6796_v60 = vld [vmem:[#allocation4 + $0x154] sm:$0xf0] }
 0x878   :  { %v4025_v50 = vpack.c.bf16 %v4019_v2, %v4018_v5  ;;  %v4017_v35 = vmul.f32 %v7647_v51, %v4009_v53  ;;  %v6217_v12 = vor.u32 %v6753_v43, %v6214_v30  ;;  %v6381_v43 = vor.u32 %v6796_v60, %v6380_v54 }
 0x87a   :  { %4033 = vmatpush.bf16.msra.mxu3 %v4026_v38  ;;  %v4024_v34 = vpack.c.bf16 %v4017_v35, %v4016_v0 }
 0x87e   :  { %4034 = vmatpush.bf16.msra.mxu3 %v4025_v50 }
 0x882   :  { %4035 = vmatpush.bf16.msra.mxu3 %v4024_v34  ;;  %v6396_v34 = vld [vmem:[#allocation4 + $0x170] sm:$0xf] }
 0x885   :  { %6203 = vmatmul.msk.bf16.vlgmr.msra.gmra.mxu3 %vm2263_vm5, %v8198_v4  ;;  %v6233_v4 = vor.u32 %v6757_v19, %v6230_v9  ;;  %v6795_v9 = vld [vmem:[#allocation4 + $0x154] sm:$0xf] }
 0x886   :  { %4384 = vmatpush.bf16.msrb.mxu3 %v6329_v41  ;;  %v6397_v41 = vor.u32 %v6800_v32, %v6396_v34  ;;  %v6787_v34 = vld [vmem:[#allocation4 + $0x114] sm:$0xf]  ;;  %v6350_v32 = vld [vmem:[#allocation4 + $0x118] sm:$0xf0] }
 0x888   :  { %4506 = vmatpush.bf16.msra.mxu2 %v6397_v41 }
 0x88a   :  { %4385 = vmatpush.bf16.msrb.mxu3 %v6313_v20  ;;  %v6388_v20 = vld [vmem:[#allocation4 + $0x160] sm:$0xf] }
 0x88e   :  { %4386 = vmatpush.bf16.msrb.mxu3 %v6297_v56  ;;  %v6798_v56 = vld [vmem:[#allocation4 + $0x164] sm:$0xf0] }
 0x892   :  { %4387 = vmatpush.bf16.msrb.mxu3 %v6281_v62  ;;  %v6401_v62 = vor.u32 %v6799_v1, %v6398_v25  ;;  %v6340_v1 = vld [vmem:[#allocation4 + $0x100] sm:$0xf]  ;;  %v6786_v25 = vld [vmem:[#allocation4 + $0x104] sm:$0xf0] }
 0x895   :  { %6204 = vmatmul.msk.bf16.gmra.mxu3 %vm2263_vm5, %v8202_v13 }
 0x896   :  { %4388 = vmatpush.bf16.msrb.mxu3 %v6265_v22  ;;  %v6389_v22 = vor.u32 %v6798_v56, %v6388_v20 }
 0x898   :  { %4507 = vmatpush.bf16.msra.mxu2 %v6389_v22  ;;  %v6341_v22 = vor.u32 %v6786_v25, %v6340_v1 }
 0x89a   :  { %4389 = vmatpush.bf16.msrb.mxu3 %v6249_v59  ;;  %v6393_v59 = vor.u32 %v6797_v7, %v6390_v11  ;;  %v6342_v11 = vld [vmem:[#allocation4 + $0x108] sm:$0xf0] }
 0x89c   :  { %4508 = vmatpush.bf16.msra.mxu2 %v6381_v43 }
 0x89e   :  { %4390 = vmatpush.bf16.msrb.mxu3 %v6233_v4  ;;  %v6382_v4 = vld [vmem:[#allocation4 + $0x158] sm:$0xf0] }
 0x8a2   :  { %4391 = vmatpush.bf16.msrb.mxu3 %v6217_v12  ;;  %v6372_v12 = vld [vmem:[#allocation4 + $0x140] sm:$0xf] }
 0x8a5   :  { %4392 = vmatmul.bf16.vlgmr.msrb.gmra.mxu3 %v8604_v58 }
 0x8a6   :  { %4525 = vmatpush.bf16.msra.mxu3 %v6401_v62 }
 0x8aa   :  { %4526 = vmatpush.bf16.msra.mxu3 %v6393_v59 }
 0x908   :  { %v8783_v16 = vpop.f32.mrf.mxu3 }
 0x909   :  { %v4056_v13 = vmul.f32 %v8783_v16, %v8783_v16 }
 0x910   :  { %v8785_v57 = vpop.f32.mrf.mxu3 }
 0x911   :  { %v4057_v55 = vmul.f32 %v8785_v57, %v8785_v57  ;;  %v4047_v21 = vadd.f32 %v8785_v57, %v8783_v16 }
 0x913   :  { %v4060_v17 = vadd.f32 %v4057_v55, %v4056_v13  ;;  %v6794_v55 = vld [vmem:[#allocation4 + $0x144] sm:$0xf0]  ;;  %v6385_v13 = vor.u32 %v6795_v9, %v6382_v4 }
 0x915   :  { %4527 = vmatpush.bf16.msra.mxu3 %v6385_v13 }
 0x918   :  { %v8787_v29 = vpop.f32.mrf.mxu3 }
 0x919   :  { %v4058_v49 = vmul.f32 %v8787_v29, %v8787_v29  ;;  %v4048_v58 = vadd.f32 %v4047_v21, %v8787_v29  ;;  %v6793_v21 = vld [vmem:[#allocation4 + $0x144] sm:$0xf] }
 0x91b   :  { %v4061_v46 = vadd.f32 %v4060_v17, %v4058_v49  ;;  %v6374_v49 = vld [vmem:[#allocation4 + $0x148] sm:$0xf0]  ;;  %v6373_v17 = vor.u32 %v6794_v55, %v6372_v12 }
 0x91d   :  { %4509 = vmatpush.bf16.msra.mxu2 %v6373_v17 }
 0x920   :  { %v8798_v40 = vpop.f32.mrf.mxu3 }
 0x921   :  { %v4049_v26 = vadd.f32 %v4048_v58, %v8798_v40  ;;  %v4059_v15 = vmul.f32 %v8798_v40, %v8798_v40  ;;  %v6364_v58 = vld [vmem:[#allocation4 + $0x130] sm:$0xf] }
 0x923   :  { %v4050_v45 = vrot.slane %v4049_v26, 4  ;;  %v4062_v23 = vadd.f32 %v4061_v46, %v4059_v15  ;;  %v6792_v46 = vld [vmem:[#allocation4 + $0x134] sm:$0xf0]  ;;  %v6791_v15 = vld [vmem:[#allocation4 + $0x134] sm:$0xf] }
 0x925   :  { %v4051_v42 = vadd.f32 %v4050_v45, %v4049_v26  ;;  %v4063_v33 = vrot.slane %v4062_v23, 4  ;;  %v6377_v26 = vor.u32 %v6793_v21, %v6374_v49  ;;  %v6366_v45 = vld [vmem:[#allocation4 + $0x138] sm:$0xf0] }
 0x927   :  { %v4052_v6 = vrot.slane %v4051_v42, 2  ;;  %v4064_v31 = vadd.f32 %v4063_v33, %v4062_v23  ;;  %v6365_v23 = vor.u32 %v6792_v46, %v6364_v58  ;;  %v6356_v33 = vld [vmem:[#allocation4 + $0x120] sm:$0xf]  ;;  %4528 = vmatpush.bf16.msra.mxu3 %v6377_v26 }
 0x928   :  { %v4393_v5 = vpop.f32.mrf.mxu3 }
 0x929   :  { %v4053_v39 = vadd.f32 %v4052_v6, %v4051_v42  ;;  %v4065_v3 = vrot.slane %v4064_v31, 2  ;;  %v6790_v6 = vld [vmem:[#allocation4 + $0x124] sm:$0xf0]  ;;  %4510 = vmatpush.bf16.msra.mxu2 %v6365_v23 }
 0x92b   :  { %v4054_v38 = vrot.slane %v4053_v39, 1  ;;  %v4066_v2 = vadd.f32 %v4065_v3, %v4064_v31 }
 0x92d   :  { %v4055_v53 = vadd.f32 %v4054_v38, %v4053_v39  ;;  %v4067_v0 = vrot.slane %v4066_v2, 1  ;;  %v6358_v39 = vld [vmem:[#allocation4 + $0x128] sm:$0xf0]  ;;  %v6357_v38 = vor.u32 %v6790_v6, %v6356_v33 }
 0x92f   :  { %v4068_v50 = vadd.f32 %v4067_v0, %v4066_v2  ;;  %v8803_v35 = vmul.f32 0.03125, %v4055_v53  ;;  %v6348_v2 = vld [vmem:[#allocation4 + $0x110] sm:$0xf]  ;;  %v6788_v53 = vld [vmem:[#allocation4 + $0x114] sm:$0xf0]  ;;  %4511 = vmatpush.bf16.msra.mxu2 %v6357_v38 }
 0x930   :  { %v4395_v28 = vpop.f32.mrf.mxu3  ;;  %v6349_v41 = vor.u32 %v6788_v53, %v6348_v2 }
 0x931   :  { %v4070_v47 = vmul.f32 0.03125, %v4068_v50  ;;  %v4071_v52 = vmul.f32 %v8803_v35, %v8803_v35  ;;  %v4545_v10 = vpack.c.bf16 %v4395_v28, %v4393_v5  ;;  %v6789_v5 = vld [vmem:[#allocation4 + $0x124] sm:$0xf]  ;;  %v4074_v56 = vsub.f32 %v8783_v16, %v8803_v35 }
 0x932   :  { %v6361_v50 = vor.u32 %v6789_v5, %v6358_v39  ;;  %v4075_v7 = vsub.f32 %v8785_v57, %v8803_v35  ;;  %v4077_v62 = vsub.f32 %v8798_v40, %v8803_v35 }
 0x933   :  { %v4072_v48 = vsub.f32 %v4070_v47, %v4071_v52  ;;  %4612 = vmatpush.bf16.msrb.mxu1 %v4545_v10  ;;  %v6889_v47 = vld [vmem:[%s8944_s11 + $0x1] ss:$0 sm:$0xff]  ;;  %v6353_v52 = vor.u32 %v6787_v34, %v6350_v32  ;;  %v4076_v10 = vsub.f32 %v8787_v29, %v8803_v35  ;;  %4512 = vmatpush.bf16.msra.mxu2 %v6349_v41 }
 0x935   :  { %v4073_v19 = vmax.f32 %v4072_v48, 0.0 }
 0x936   :  { %6408 = vmatmul.msk.bf16.vlgmr.msrb.gmra.mxu1 %vm903_vm1, %v8735_v14  ;;  %v6369_v14 = vor.u32 %v6791_v15, %v6366_v45 }
 0x937   :  { %v4078_v30 = vadd.f32 1e-05, %v4073_v19  ;;  %v6890_v19 = vld [vmem:[%s8945_s30 + $0x1] ss:$0 sm:$0xff]  ;;  %4513 = vmatpush.bf16.msra.mxu2 %v6341_v22 }
 0x938   :  { %4529 = vmatpush.bf16.msra.mxu3 %v6369_v14 }
 0x939   :  { %7116 = vrsqrt.f32 %v4078_v30  ;;  %vm4085_vm0 = vweird.f32 %v4078_v30 }
 0x93c   :  { %4530 = vmatpush.bf16.msra.mxu3 %v6361_v50 }
 0x93f   :  { %v7117_v42 = vpop.eup %7116 }
 0x940   :  { %v4080_v31 = vmul.f32 %v7117_v42, %v4078_v30  ;;  %vm4086_vm5 = vweird.f32 %v7117_v42  ;;  %4531 = vmatpush.bf16.msra.mxu3 %v6353_v52 }
 0x941   :  { %vm4087_vm3 = vmor %vm4085_vm0, %vm4086_vm5 }
 0x942   :  { %v4081_v3 = vmul.f32 %v7117_v42, %v4080_v31 }
 0x944   :  { %v4082_v0 = vmul.f32 0.5, %v4081_v3 }
 0x946   :  { %v4083_v28 = vsub.f32 1.5, %v4082_v0  ;;  %6409 = vmatmul.msk.bf16.gmra.mxu1 %vm903_vm1, %v8773_v27  ;;  %v6785_v27 = vld [vmem:[#allocation4 + $0x104] sm:$0xf] }
 0x947   :  { %v6345_v57 = vor.u32 %v6785_v27, %v6342_v11 }
 0x948   :  { %v4084_v20 = vmul.f32 %v7117_v42, %v4083_v28 }
 0x949   :  { %4532 = vmatpush.bf16.msra.mxu3 %v6345_v57 }
 0x94a   :  { %v4088_v48 = vsel %vm4087_vm3, %v7117_v42, %v4084_v20 }
 0x94b   :  { %v4089_v54 = vmul.f32 %v4088_v48, %v4074_v56  ;;  %v4090_v60 = vmul.f32 %v4088_v48, %v4075_v7  ;;  %v4091_v59 = vmul.f32 %v4088_v48, %v4076_v10  ;;  %v4092_v16 = vmul.f32 %v4088_v48, %v4077_v62  ;;  %v4576_v7 = vpop.f32.mrf.mxu1  ;;  %v4557_v10 = vpop.f32.mrf.mxu0 }
 0x94d   :  { %v4096_v9 = vmul.f32 %v6889_v47, %v4089_v54  ;;  %v4097_v4 = vmul.f32 %v6889_v47, %v4090_v60  ;;  %v4099_v29 = vmul.f32 %v6889_v47, %v4092_v16  ;;  %v4098_v43 = vmul.f32 %v6889_v47, %v4091_v59 }
 0x94f   :  { %v4103_v40 = vadd.f32 %v6890_v19, %v4096_v9  ;;  %v4104_v35 = vadd.f32 %v6890_v19, %v4097_v4  ;;  %v4106_v30 = vadd.f32 %v6890_v19, %v4099_v29  ;;  %v4105_v12 = vadd.f32 %v6890_v19, %v4098_v43 }
 0x951   :  { %v4107_v55 = vadd.f32 %v4103_v40, %v8262_v24  ;;  %v4108_v13 = vadd.f32 %v4104_v35, %v8265_v8  ;;  %v4109_v21 = vadd.f32 %v4105_v12, %v8282_v37  ;;  %v4110_v49 = vadd.f32 %v4106_v30, %v8279_v44  ;;  %v6205_v30 = vld [vmem:[%s8934_s5 + $0x4] sm:$0x3] }
 0x953   :  { %v4115_v17 = vmin.f32 %v4107_v55, 20.0  ;;  %v4116_v58 = vmin.f32 %v4108_v13, 20.0  ;;  %v4117_v46 = vmin.f32 %v4109_v21, 20.0  ;;  %v4118_v26 = vmin.f32 %v4110_v49, 20.0  ;;  %v4578_v62 = vpop.f32.mrf.mxu1  ;;  %v4559_v27 = vpop.f32.mrf.mxu0 }
 0x954   :  { %vm4111_vm4 = vcmp.gt.f32.partialorder %v4107_v55, 20.0  ;;  %vm4112_vm6 = vcmp.gt.f32.partialorder %v4108_v13, 20.0  ;;  %vm4113_vm7 = vcmp.gt.f32.partialorder %v4109_v21, 20.0  ;;  %vm4114_vm8 = vcmp.gt.f32.partialorder %v4110_v49, 20.0 }
 0x955   :  { %v4119_v15 = vmul.f32 1.442695, %v4115_v17  ;;  %v4121_v45 = vmul.f32 1.442695, %v4116_v58  ;;  %v4123_v23 = vmul.f32 1.442695, %v4117_v46 }
 0x956   :  { %v4125_v42 = vmul.f32 1.442695, %v4118_v26  ;;  %v4633_v46 = vperm.slane %v6205_v30, 0 }
 0x957   :  { %7118 = vpow2.f32 %v4119_v15  ;;  %v4634_v15 = vperm.slane %v6205_v30, 1 }
 0x958   :  { %7120 = vpow2.f32 %v4121_v45 }
 0x959   :  { %7122 = vpow2.f32 %v4123_v23 }
 0x95a   :  { %7124 = vpow2.f32 %v4125_v42 }
 0x95b   :  { %v4581_v11 = vpop.f32.mrf.mxu1  ;;  %v4562_v48 = vpop.f32.mrf.mxu0 }
 0x95d   :  { %v7119_v33 = vpop.eup %7118 }
 0x95e   :  { %v7121_v24 = vpop.eup %7120  ;;  %v4127_v6 = vadd.f32 1.0, %v7119_v33 }
 0x95f   :  { %v4128_v8 = vadd.f32 1.0, %v7121_v24  ;;  %v7123_v37 = vpop.eup %7122 }
 0x960   :  { %7126 = vlog2.f32 %v4127_v6  ;;  %v7125_v44 = vpop.eup %7124  ;;  %v4129_v31 = vadd.f32 1.0, %v7123_v37 }
 0x961   :  { %7128 = vlog2.f32 %v4128_v8  ;;  %v4130_v14 = vadd.f32 1.0, %v7125_v44 }
 0x962   :  { %7130 = vlog2.f32 %v4129_v31 }
 0x963   :  { %7132 = vlog2.f32 %v4130_v14  ;;  %v4583_v22 = vpop.f32.mrf.mxu1  ;;  %v4564_v54 = vpop.f32.mrf.mxu0 }
 0x966   :  { %v7127_v5 = vpop.eup %7126 }
 0x967   :  { %v7129_v39 = vpop.eup %7128  ;;  %v4132_v3 = vmul.f32 0.6931472, %v7127_v5 }
 0x968   :  { %v4134_v38 = vmul.f32 0.6931472, %v7129_v39  ;;  %v7131_v32 = vpop.eup %7130 }
 0x969   :  { %v4139_v2 = vsel %vm4111_vm4, %v4107_v55, %v4132_v3  ;;  %v7133_v28 = vpop.eup %7132  ;;  %v4136_v41 = vmul.f32 0.6931472, %v7131_v32 }
 0x96a   :  { %v4140_v53 = vsel %vm4112_vm6, %v4108_v13, %v4134_v38  ;;  %v4143_v0 = vmul.f32 %v7647_v51, %v4139_v2  ;;  %v4138_v1 = vmul.f32 0.6931472, %v7133_v28 }
 0x96b   :  { %v4144_v50 = vmul.f32 %v7647_v51, %v4140_v53  ;;  %v4141_v25 = vsel %vm4113_vm7, %v4109_v21, %v4136_v41  ;;  %v4595_v59 = vpop.f32.mrf.mxu0 }
 0x96c   :  { %v4142_v20 = vsel %vm4114_vm8, %v4110_v49, %v4138_v1  ;;  %v4145_v47 = vmul.f32 %v7647_v51, %v4141_v25  ;;  %v4596_v55 = vadd.f32 %v4595_v59, %v4557_v10 }
 0x96d   :  { %v4147_v34 = vpack.c.bf16 %v4144_v50, %v4143_v0  ;;  %v4146_v52 = vmul.f32 %v7647_v51, %v4142_v20 }
 0x96f   :  { %4514 = vmatmul.bf16.vlgmr.msra.gmra.mxu2 %v4147_v34  ;;  %4533 = vmatmul.bf16.vlgmr.msra.gmra.mxu3 %v4147_v34  ;;  %v4148_v56 = vpack.c.bf16 %v4146_v52, %v4145_v47 }
 0x973   :  { %v4597_v19 = vpop.f32.mrf.mxu0 }
 0x974   :  { %v4598_v35 = vadd.f32 %v4597_v19, %v4559_v27 }
 0x97b   :  { %v4600_v43 = vpop.f32.mrf.mxu0 }
 0x97c   :  { %v4601_v17 = vadd.f32 %v4600_v43, %v4562_v48 }
 0x97f   :  { %4519 = vmatmul.bf16.gmra.mxu2 %v4148_v56  ;;  %4538 = vmatmul.bf16.gmra.mxu3 %v4148_v56 }
 0x983   :  { %v4602_v31 = vpop.f32.mrf.mxu0 }
 0x984   :  { %v4603_v2 = vadd.f32 %v4602_v31, %v4564_v54 }
 0x9b3   :  { %v4614_v60 = vpop.f32.mrf.mxu1 }
 0x9b4   :  { %v4615_v12 = vadd.f32 %v4614_v60, %v4576_v7 }
 0x9bb   :  { %v4616_v16 = vpop.f32.mrf.mxu1 }
 0x9bc   :  { %v4617_v40 = vadd.f32 %v4616_v16, %v4578_v62 }
 0x9c3   :  { %v4619_v29 = vpop.f32.mrf.mxu1 }
 0x9c4   :  { %v4620_v49 = vadd.f32 %v4619_v29, %v4581_v11 }
 0x9cb   :  { %v4621_v44 = vpop.f32.mrf.mxu1 }
 0x9cc   :  { %v4622_v38 = vadd.f32 %v4621_v44, %v4583_v22 }
 0x9f2   :  { %v4515_v57 = vpop.f32.mrf.mxu2  ;;  %v4534_v9 = vpop.f32.mrf.mxu3 }
 0x9f3   :  { %v4624_v58 = vadd.f32 %v4596_v55, %v4515_v57  ;;  %v4625_v26 = vadd.f32 %v4615_v12, %v4534_v9 }
 0x9f5   :  { %v8835_v8 = vadd.f32 %v4633_v46, %v4624_v58  ;;  %v8837_v37 = vadd.f32 %v4634_v15, %v4625_v26 }
 0x9f7   :  { %v4663_v53 = vmul.f32 %v8835_v8, %v8835_v8  ;;  %v4664_v0 = vmul.f32 %v8837_v37, %v8837_v37 }
 0x9fa   :  { %v4517_v4 = vpop.f32.mrf.mxu2  ;;  %v4536_v51 = vpop.f32.mrf.mxu3 }
 0x9fb   :  { %v4626_v13 = vadd.f32 %v4598_v35, %v4517_v4  ;;  %v4627_v21 = vadd.f32 %v4617_v40, %v4536_v51 }
 0x9fd   :  { %v8831_v24 = vadd.f32 %v4633_v46, %v4626_v13  ;;  %v8833_v6 = vadd.f32 %v4634_v15, %v4627_v21 }
 0x9ff   :  { %v4665_v39 = vmul.f32 %v8831_v24, %v8831_v24  ;;  %v4666_v3 = vmul.f32 %v8833_v6, %v8833_v6  ;;  %v4645_v41 = vadd.f32 %v8831_v24, %v8835_v8  ;;  %v4654_v1 = vadd.f32 %v8833_v6, %v8837_v37 }
 0xa01   :  { %v4671_v47 = vadd.f32 %v4665_v39, %v4663_v53  ;;  %v4680_v52 = vadd.f32 %v4666_v3, %v4664_v0 }
 0xa02   :  { %v4520_v45 = vpop.f32.mrf.mxu2  ;;  %v4539_v23 = vpop.f32.mrf.mxu3 }
 0xa03   :  { %v4628_v42 = vadd.f32 %v4601_v17, %v4520_v45  ;;  %v4629_v33 = vadd.f32 %v4620_v49, %v4539_v23 }
 0xa05   :  { %v8839_v14 = vadd.f32 %v4633_v46, %v4628_v42  ;;  %v8841_v5 = vadd.f32 %v4634_v15, %v4629_v33 }
 0xa07   :  { %v4667_v50 = vmul.f32 %v8839_v14, %v8839_v14  ;;  %v4668_v34 = vmul.f32 %v8841_v5, %v8841_v5  ;;  %v4646_v56 = vadd.f32 %v4645_v41, %v8839_v14  ;;  %v4655_v7 = vadd.f32 %v4654_v1, %v8841_v5 }
 0xa09   :  { %v4672_v27 = vadd.f32 %v4671_v47, %v4667_v50  ;;  %v4681_v11 = vadd.f32 %v4680_v52, %v4668_v34 }
 0xa0a   :  { %v4522_v32 = vpop.f32.mrf.mxu2  ;;  %v4541_v28 = vpop.f32.mrf.mxu3 }
 0xa0b   :  { %v4630_v25 = vadd.f32 %v4603_v2, %v4522_v32  ;;  %v4631_v20 = vadd.f32 %v4622_v38, %v4541_v28 }
 0xa0d   :  { %v8861_v10 = vadd.f32 %v4633_v46, %v4630_v25  ;;  %v8863_v62 = vadd.f32 %v4634_v15, %v4631_v20 }
 0xa0f   :  { %v4647_v48 = vadd.f32 %v4646_v56, %v8861_v10  ;;  %v4669_v22 = vmul.f32 %v8861_v10, %v8861_v10  ;;  %v4656_v54 = vadd.f32 %v4655_v7, %v8863_v62  ;;  %v4670_v60 = vmul.f32 %v8863_v62, %v8863_v62  ;;  %v6206_v7 = vld [vmem:[%s8937_s17 + $0x4] sm:$0x3] }
 0xa11   :  { %v4648_v59 = vrot.slane %v4647_v48, 4  ;;  %v4673_v16 = vadd.f32 %v4672_v27, %v4669_v22  ;;  %v4657_v19 = vrot.slane %v4656_v54, 4  ;;  %v4682_v57 = vadd.f32 %v4681_v11, %v4670_v60  ;;  %v6207_v60 = vld [vmem:[%s8938_s21 + $0x4] sm:$0x3] }
 0xa13   :  { %v4649_v9 = vadd.f32 %v4648_v59, %v4647_v48  ;;  %v4674_v4 = vrot.slane %v4673_v16, 4  ;;  %v4658_v51 = vadd.f32 %v4657_v19, %v4656_v54  ;;  %v4683_v29 = vrot.slane %v4682_v57, 4 }
 0xa14   :  { %v4738_v54 = vperm.slane %v6206_v7, 0 }
 0xa15   :  { %v4650_v43 = vrot.slane %v4649_v9, 2  ;;  %v4675_v40 = vadd.f32 %v4674_v4, %v4673_v16  ;;  %v4659_v35 = vrot.slane %v4658_v51, 2  ;;  %v4684_v30 = vadd.f32 %v4683_v29, %v4682_v57 }
 0xa17   :  { %v4651_v12 = vadd.f32 %v4650_v43, %v4649_v9  ;;  %v4676_v55 = vrot.slane %v4675_v40, 2  ;;  %v4660_v13 = vadd.f32 %v4659_v35, %v4658_v51  ;;  %v4685_v21 = vrot.slane %v4684_v30, 2 }
 0xa18   :  { %v4739_v35 = vperm.slane %v6206_v7, 1 }
 0xa19   :  { %v4652_v49 = vrot.slane %v4651_v12, 1  ;;  %v4677_v17 = vadd.f32 %v4676_v55, %v4675_v40  ;;  %v4661_v58 = vrot.slane %v4660_v13, 1  ;;  %v4686_v46 = vadd.f32 %v4685_v21, %v4684_v30 }
 0xa1b   :  { %v4653_v26 = vadd.f32 %v4652_v49, %v4651_v12  ;;  %v4678_v15 = vrot.slane %v4677_v17, 1  ;;  %v4662_v45 = vadd.f32 %v4661_v58, %v4660_v13  ;;  %v4687_v23 = vrot.slane %v4686_v46, 1 }
 0xa1c   :  { %v4751_v49 = vperm.slane %v6207_v60, 0 }
 0xa1d   :  { %v4679_v42 = vadd.f32 %v4678_v15, %v4677_v17  ;;  %v4689_v33 = vmul.f32 0.03125, %v4653_v26  ;;  %v4690_v44 = vmul.f32 0.03125, %v4662_v45  ;;  %v4688_v31 = vadd.f32 %v4687_v23, %v4686_v46 }
 0xa1f   :  { %v4691_v39 = vmul.f32 0.03125, %v4679_v42  ;;  %v4693_v3 = vmul.f32 %v4689_v33, %v4689_v33  ;;  %v4692_v38 = vmul.f32 0.03125, %v4688_v31  ;;  %v4694_v2 = vmul.f32 %v4690_v44, %v4690_v44 }
 0xa20   :  { %v4699_v59 = vsub.f32 %v8835_v8, %v4689_v33  ;;  %v4701_v16 = vsub.f32 %v8831_v24, %v4689_v33  ;;  %v4703_v19 = vsub.f32 %v8839_v14, %v4689_v33  ;;  %v4705_v9 = vsub.f32 %v8861_v10, %v4689_v33 }
 0xa21   :  { %v4695_v53 = vsub.f32 %v4691_v39, %v4693_v3  ;;  %v4696_v0 = vsub.f32 %v4692_v38, %v4694_v2  ;;  %v4700_v51 = vsub.f32 %v8837_v37, %v4690_v44  ;;  %v4702_v43 = vsub.f32 %v8833_v6, %v4690_v44 }
 0xa22   :  { %v4704_v40 = vsub.f32 %v8841_v5, %v4690_v44  ;;  %v4706_v24 = vsub.f32 %v8863_v62, %v4690_v44  ;;  %v4752_v14 = vperm.slane %v6207_v60, 1 }
 0xa23   :  { %v4697_v50 = vmax.f32 %v4695_v53, 0.0  ;;  %v4698_v34 = vmax.f32 %v4696_v0, 0.0 }
 0xa25   :  { %v4707_v32 = vadd.f32 1e-05, %v4697_v50  ;;  %v4708_v28 = vadd.f32 1e-05, %v4698_v34 }
 0xa27   :  { %7134 = vrsqrt.f32 %v4707_v32  ;;  %vm4715_vm10 = vweird.f32 %v4707_v32  ;;  %vm4725_vm13 = vweird.f32 %v4708_v28 }
 0xa28   :  { %7136 = vrsqrt.f32 %v4708_v28 }
 0xa2d   :  { %v7135_v41 = vpop.eup %7134 }
 0xa2e   :  { %v7137_v1 = vpop.eup %7136  ;;  %v4710_v25 = vmul.f32 %v7135_v41, %v4707_v32  ;;  %vm4716_vm9 = vweird.f32 %v7135_v41 }
 0xa2f   :  { %v4720_v20 = vmul.f32 %v7137_v1, %v4708_v28  ;;  %vm4726_vm11 = vweird.f32 %v7137_v1  ;;  %vm4717_vm12 = vmor %vm4715_vm10, %vm4716_vm9 }
 0xa30   :  { %v4711_v47 = vmul.f32 %v7135_v41, %v4710_v25  ;;  %vm4727_vm14 = vmor %vm4725_vm13, %vm4726_vm11 }
 0xa31   :  { %v4721_v52 = vmul.f32 %v7137_v1, %v4720_v20 }
 0xa32   :  { %v4712_v56 = vmul.f32 0.5, %v4711_v47 }
 0xa33   :  { %v4722_v27 = vmul.f32 0.5, %v4721_v52 }
 0xa34   :  { %v4713_v11 = vsub.f32 1.5, %v4712_v56 }
 0xa35   :  { %v4723_v48 = vsub.f32 1.5, %v4722_v27 }
 0xa36   :  { %v4714_v22 = vmul.f32 %v7135_v41, %v4713_v11 }
 0xa37   :  { %v4724_v57 = vmul.f32 %v7137_v1, %v4723_v48 }
 0xa38   :  { %v4718_v4 = vsel %vm4717_vm12, %v7135_v41, %v4714_v22 }
 0xa39   :  { %v4733_v29 = vmul.f32 %v4718_v4, %v4703_v19  ;;  %v4735_v8 = vmul.f32 %v4718_v4, %v4705_v9  ;;  %v4728_v30 = vsel %vm4727_vm14, %v7137_v1, %v4724_v57  ;;  %v4729_v12 = vmul.f32 %v4718_v4, %v4699_v59 }
 0xa3a   :  { %v4730_v55 = vmul.f32 %v4728_v30, %v4700_v51  ;;  %v4732_v13 = vmul.f32 %v4728_v30, %v4702_v43  ;;  %v4734_v10 = vmul.f32 %v4728_v30, %v4704_v40  ;;  %v4731_v21 = vmul.f32 %v4718_v4, %v4701_v16 }
 0xa3b   :  { %v4736_v37 = vmul.f32 %v4728_v30, %v4706_v24  ;;  %v4746_v17 = vmul.f32 %v4738_v54, %v4733_v29  ;;  %v4748_v26 = vmul.f32 %v4738_v54, %v4735_v8  ;;  %v4742_v45 = vmul.f32 %v4738_v54, %v4729_v12 }
 0xa3c   :  { %v4747_v58 = vmul.f32 %v4739_v35, %v4734_v10  ;;  %v4743_v46 = vmul.f32 %v4739_v35, %v4730_v55  ;;  %v4745_v6 = vmul.f32 %v4739_v35, %v4732_v13  ;;  %v4744_v33 = vmul.f32 %v4738_v54, %v4731_v21 }
 0xa3d   :  { %v4749_v5 = vmul.f32 %v4739_v35, %v4736_v37  ;;  %v4759_v44 = vadd.f32 %v4751_v49, %v4746_v17  ;;  %v4761_v39 = vadd.f32 %v4751_v49, %v4748_v26  ;;  %v4755_v2 = vadd.f32 %v4751_v49, %v4742_v45 }
 0xa3e   :  { %v4760_v15 = vadd.f32 %v4752_v14, %v4747_v58  ;;  %v8881_v23 = vadd.f32 %v4752_v14, %v4743_v46  ;;  %v8883_v62 = vadd.f32 %v4752_v14, %v4745_v6  ;;  %v4757_v34 = vadd.f32 %v4751_v49, %v4744_v33 }
 0xa3f   :  { %v4762_v42 = vadd.f32 %v4752_v14, %v4749_v5  ;;  %v4765_v32 = vmul.f32 0.5, %v4759_v44  ;;  %v4766_v1 = vmul.f32 0.5, %v4761_v39  ;;  %v4763_v25 = vmul.f32 0.5, %v4755_v2 }
 0xa40   :  { %v4785_v31 = vmin.f32 %v4760_v15, 20.0  ;;  %v4783_v53 = vmin.f32 %v8881_v23, 20.0  ;;  %v4784_v0 = vmin.f32 %v8883_v62, 20.0  ;;  %v4764_v20 = vmul.f32 0.5, %v4757_v34 }
 0xa41   :  { %v4786_v3 = vmin.f32 %v4762_v42, 20.0  ;;  %vm4781_vm15 = vcmp.gt.f32.partialorder %v4760_v15, 20.0  ;;  %vm4779_vm5 = vcmp.gt.f32.partialorder %v8881_v23, 20.0  ;;  %vm4782_vm0 = vcmp.gt.f32.partialorder %v4762_v42, 20.0 }
 0xa42   :  { %v4791_v38 = vmul.f32 1.442695, %v4785_v31  ;;  %v4787_v28 = vmul.f32 1.442695, %v4783_v53  ;;  %v4789_v41 = vmul.f32 1.442695, %v4784_v0 }
 0xa43   :  { %v4793_v50 = vmul.f32 1.442695, %v4786_v3  ;;  %vm4780_vm3 = vcmp.gt.f32.partialorder %v8883_v62, 20.0 }
 0xa44   :  { %7138 = vpow2.f32 %v4791_v38 }
 0xa45   :  { %7140 = vpow2.f32 %v4793_v50 }
 0xa46   :  { %7142 = vpow2.f32 %v4787_v28 }
 0xa47   :  { %7144 = vpow2.f32 %v4789_v41 }
 0xa48   :  { %7146 = vtanh.f32 %v4765_v32 }
 0xa49   :  { %7148 = vtanh.f32 %v4766_v1 }
 0xa4a   :  { %v7139_v47 = vpop.eup %7138  ;;  %7150 = vtanh.f32 %v4763_v25 }
 0xa4b   :  { %v7141_v52 = vpop.eup %7140  ;;  %v4797_v56 = vadd.f32 1.0, %v7139_v47  ;;  %7152 = vtanh.f32 %v4764_v20 }
 0xa4c   :  { %v7143_v7 = vpop.eup %7142  ;;  %v4798_v27 = vadd.f32 1.0, %v7141_v52 }
 0xa4d   :  { %v7145_v11 = vpop.eup %7144  ;;  %7154 = vlog2.f32 %v4797_v56  ;;  %v4795_v48 = vadd.f32 1.0, %v7143_v7 }
 0xa4e   :  { %v7147_v22 = vpop.eup %7146  ;;  %7156 = vlog2.f32 %v4798_v27  ;;  %v4796_v54 = vadd.f32 1.0, %v7145_v11 }
 0xa4f   :  { %v7149_v60 = vpop.eup %7148  ;;  %7158 = vlog2.f32 %v4795_v48  ;;  %v4773_v19 = vmul.f32 0.5, %v7147_v22 }
 0xa50   :  { %v7151_v59 = vpop.eup %7150  ;;  %7160 = vlog2.f32 %v4796_v54  ;;  %v4774_v57 = vmul.f32 0.5, %v7149_v60 }
 0xa51   :  { %v7153_v16 = vpop.eup %7152  ;;  %v4771_v4 = vmul.f32 0.5, %v7151_v59  ;;  %v4777_v35 = vadd.f32 0.5, %v4773_v19 }
 0xa52   :  { %v4772_v43 = vmul.f32 0.5, %v7153_v16  ;;  %v4778_v30 = vadd.f32 0.5, %v4774_v57  ;;  %v6891_v57 = vld [vmem:[%s8940_s29 + $0x2] ss:$0 sm:$0xff] }
 0xa53   :  { %v7155_v9 = vpop.eup %7154  ;;  %v4775_v10 = vadd.f32 0.5, %v4771_v4 }
 0xa54   :  { %v7157_v51 = vpop.eup %7156  ;;  %v4804_v29 = vmul.f32 0.6931472, %v7155_v9  ;;  %v4776_v37 = vadd.f32 0.5, %v4772_v43 }
 0xa55   :  { %v7159_v40 = vpop.eup %7158  ;;  %v4806_v8 = vmul.f32 0.6931472, %v7157_v51 }
 0xa56   :  { %v7161_v24 = vpop.eup %7160  ;;  %v4809_v14 = vsel %vm4781_vm15, %v4760_v15, %v4804_v29  ;;  %v4800_v12 = vmul.f32 0.6931472, %v7159_v40  ;;  %v6892_v29 = vld [vmem:[%s8941_s19 + $0x2] ss:$0 sm:$0xff] }
 0xa57   :  { %v4810_v55 = vsel %vm4782_vm0, %v4762_v42, %v4806_v8  ;;  %v4813_v13 = vmul.f32 %v4809_v14, %v4777_v35  ;;  %v4802_v21 = vmul.f32 0.6931472, %v7161_v24  ;;  %v6470_v14 = vld [vmem:[#allocation9 + $0x70] sm:$0xf] }
 0xa58   :  { %v4814_v49 = vmul.f32 %v4810_v55, %v4778_v30  ;;  %v4807_v17 = vsel %vm4779_vm5, %v8881_v23, %v4800_v12  ;;  %v6816_v12 = vld [vmem:[#allocation9 + $0x74] sm:$0xf0]  ;;  %v6815_v55 = vld [vmem:[#allocation9 + $0x74] sm:$0xf] }
 0xa59   :  { %v4817_v58 = vmul.f32 %v7905_v36, %v4813_v13  ;;  %v4808_v46 = vsel %vm4780_vm3, %v8883_v62, %v4802_v21  ;;  %v4811_v6 = vmul.f32 %v4807_v17, %v4775_v10  ;;  %v6472_v21 = vld [vmem:[#allocation9 + $0x78] sm:$0xf0]  ;;  %v6462_v17 = vld [vmem:[#allocation9 + $0x60] sm:$0xf] }
 0xa5a   :  { %v4818_v26 = vmul.f32 %v7905_v36, %v4814_v49  ;;  %v4812_v5 = vmul.f32 %v4808_v46, %v4776_v37  ;;  %v6471_v49 = vor.u32 %v6816_v12, %v6470_v14  ;;  %v6475_v37 = vor.u32 %v6815_v55, %v6472_v21  ;;  %v6813_v46 = vld [vmem:[#allocation9 + $0x64] sm:$0xf]  ;;  %v6416_v14 = vld [vmem:[#allocation9 + $0x8] sm:$0xf0] }
 0xa5b   :  { %v4815_v45 = vmul.f32 %v7905_v36, %v4811_v6 }
 0xa5c   :  { %v4820_v15 = vpack.c.bf16 %v4818_v26, %v4817_v58  ;;  %v4816_v42 = vmul.f32 %v7905_v36, %v4812_v5  ;;  %v6814_v58 = vld [vmem:[#allocation9 + $0x64] sm:$0xf0]  ;;  %v6464_v5 = vld [vmem:[#allocation9 + $0x68] sm:$0xf0]  ;;  %5030 = vmatpush.bf16.msrb.mxu0 %v6471_v49  ;;  %5043 = vmatpush.bf16.msra.mxu1 %v6475_v37 }
 0xa5e   :  { %4827 = vmatpush.bf16.msrb.mxu2 %v4820_v15  ;;  %v4819_v33 = vpack.c.bf16 %v4816_v42, %v4815_v45  ;;  %v6463_v15 = vor.u32 %v6814_v58, %v6462_v17 }
 0xa60   :  { %5031 = vmatpush.bf16.msrb.mxu0 %v6463_v15  ;;  %v6823_v15 = vld [vmem:[#allocation10 + $0x30] sm:$0xff] }
 0xa62   :  { %4828 = vmatpush.bf16.msrb.mxu2 %v4819_v33 }
 0xa65   :  { %6410 = vmatmul.msk.bf16.vlgmr.msrb.gmra.mxu2 %vm1217_vm2, %v7703_v63 }
 0xae8   :  { %v4830_v23 = vpop.f32.mrf.mxu2 }
 0xae9   :  { %v4842_v31 = vmul.f32 %v4830_v23, %v4830_v23 }
 0xaf0   :  { %v4832_v44 = vpop.f32.mrf.mxu2 }
 0xaf1   :  { %v4835_v39 = vadd.f32 %v4832_v44, %v4830_v23  ;;  %v4843_v62 = vmul.f32 %v4832_v44, %v4832_v44 }
 0xaf3   :  { %v4836_v3 = vrot.slane %v4835_v39, 4  ;;  %v4844_v38 = vadd.f32 %v4843_v62, %v4842_v31 }
 0xaf5   :  { %v4837_v2 = vadd.f32 %v4836_v3, %v4835_v39  ;;  %v4845_v53 = vrot.slane %v4844_v38, 4 }
 0xaf7   :  { %v4838_v0 = vrot.slane %v4837_v2, 2  ;;  %v4846_v50 = vadd.f32 %v4845_v53, %v4844_v38 }
 0xaf9   :  { %v4839_v34 = vadd.f32 %v4838_v0, %v4837_v2  ;;  %v4847_v32 = vrot.slane %v4846_v50, 2  ;;  %v4901_v0 = vld [vmem:[%s8946_s3] sm:$0x1] }
 0xafb   :  { %v4840_v28 = vrot.slane %v4839_v34, 1  ;;  %v4848_v41 = vadd.f32 %v4847_v32, %v4846_v50  ;;  %v6454_v50 = vld [vmem:[#allocation9 + $0x50] sm:$0xf]  ;;  %v6811_v32 = vld [vmem:[#allocation9 + $0x54] sm:$0xf] }
 0xafd   :  { %v4841_v1 = vadd.f32 %v4840_v28, %v4839_v34  ;;  %v4849_v25 = vrot.slane %v4848_v41, 1  ;;  %v6812_v34 = vld [vmem:[#allocation9 + $0x54] sm:$0xf0] }
 0xafe   :  { %v6455_v28 = vor.u32 %v6812_v34, %v6454_v50  ;;  %v6820_v34 = vld [vmem:[#allocation10 + $0x18] sm:$0xff] }
 0xaff   :  { %v4850_v20 = vadd.f32 %v4849_v25, %v4848_v41  ;;  %v4851_v47 = vmul.f32 0.0625, %v4841_v1  ;;  %v6456_v41 = vld [vmem:[#allocation9 + $0x58] sm:$0xf0]  ;;  %v6446_v25 = vld [vmem:[#allocation9 + $0x40] sm:$0xf] }
 0xb00   :  { %v6459_v1 = vor.u32 %v6811_v32, %v6456_v41  ;;  %5032 = vmatpush.bf16.msrb.mxu0 %v6455_v28  ;;  %v6828_v32 = vld [vmem:[#allocation10 + $0x58] sm:$0xff] }
 0xb01   :  { %v4852_v63 = vmul.f32 0.0625, %v4850_v20  ;;  %v4853_v52 = vmul.f32 %v4851_v47, %v4851_v47  ;;  %v4856_v16 = vsub.f32 %v4830_v23, %v4851_v47  ;;  %v4857_v19 = vsub.f32 %v4832_v44, %v4851_v47  ;;  %v6810_v20 = vld [vmem:[#allocation9 + $0x44] sm:$0xf0]  ;;  %v6809_v47 = vld [vmem:[#allocation9 + $0x44] sm:$0xf] }
 0xb03   :  { %v4854_v56 = vsub.f32 %v4852_v63, %v4853_v52  ;;  %v6447_v63 = vor.u32 %v6810_v20, %v6446_v25  ;;  %v6448_v52 = vld [vmem:[#allocation9 + $0x48] sm:$0xf0]  ;;  %v6827_v25 = vld [vmem:[#allocation10 + $0x50] sm:$0xff] }
 0xb05   :  { %v4855_v7 = vmax.f32 %v4854_v56, 0.0  ;;  %v6451_v56 = vor.u32 %v6809_v47, %v6448_v52  ;;  %5033 = vmatpush.bf16.msrb.mxu0 %v6447_v63  ;;  %v6818_v47 = vld [vmem:[#allocation10 + $0x8] sm:$0xff] }
 0xb06   :  { %v6826_v63 = vld [vmem:[#allocation10 + $0x48] sm:$0xff] }
 0xb07   :  { %v4858_v27 = vadd.f32 1e-05, %v4855_v7  ;;  %v6808_v7 = vld [vmem:[#allocation9 + $0x34] sm:$0xf0] }
 0xb09   :  { %7162 = vrsqrt.f32 %v4858_v27  ;;  %vm4865_vm4 = vweird.f32 %v4858_v27 }
 0xb0f   :  { %v7163_v11 = vpop.eup %7162 }
 0xb10   :  { %v4860_v48 = vmul.f32 %v7163_v11, %v4858_v27  ;;  %vm4866_vm2 = vweird.f32 %v7163_v11  ;;  %v6807_v27 = vld [vmem:[#allocation9 + $0x34] sm:$0xf] }
 0xb11   :  { %vm4867_vm6 = vmor %vm4865_vm4, %vm4866_vm2 }
 0xb12   :  { %v4861_v22 = vmul.f32 %v7163_v11, %v4860_v48  ;;  %v6440_v48 = vld [vmem:[#allocation9 + $0x38] sm:$0xf0] }
 0xb14   :  { %v4862_v54 = vmul.f32 0.5, %v4861_v22  ;;  %v6443_v22 = vor.u32 %v6807_v27, %v6440_v48  ;;  %v6825_v27 = vld [vmem:[#allocation10 + $0x40] sm:$0xff] }
 0xb16   :  { %v4863_v60 = vsub.f32 1.5, %v4862_v54  ;;  %v6430_v54 = vld [vmem:[#allocation9 + $0x20] sm:$0xf] }
 0xb18   :  { %v4864_v59 = vmul.f32 %v7163_v11, %v4863_v60  ;;  %v6806_v60 = vld [vmem:[#allocation9 + $0x24] sm:$0xf0] }
 0xb1a   :  { %v4868_v9 = vsel %vm4867_vm6, %v7163_v11, %v4864_v59  ;;  %v6805_v59 = vld [vmem:[#allocation9 + $0x24] sm:$0xf] }
 0xb1b   :  { %v4869_v4 = vmul.f32 %v4868_v9, %v4856_v16  ;;  %v4870_v51 = vmul.f32 %v4868_v9, %v4857_v19  ;;  %v6431_v16 = vor.u32 %v6806_v60, %v6430_v54  ;;  %v6432_v19 = vld [vmem:[#allocation9 + $0x28] sm:$0xf0]  ;;  %v6422_v9 = vld [vmem:[#allocation9 + $0x10] sm:$0xf] }
 0xb1d   :  { %v4874_v43 = vmul.f32 %v6891_v57, %v4869_v4  ;;  %v4875_v40 = vmul.f32 %v6891_v57, %v4870_v51  ;;  %v6435_v57 = vor.u32 %v6805_v59, %v6432_v19  ;;  %v6804_v4 = vld [vmem:[#allocation9 + $0x14] sm:$0xf0]  ;;  %v6803_v51 = vld [vmem:[#allocation9 + $0x14] sm:$0xf] }
 0xb1f   :  { %v4879_v35 = vadd.f32 %v6892_v29, %v4874_v43  ;;  %v4880_v8 = vadd.f32 %v6892_v29, %v4875_v40  ;;  %v6423_v29 = vor.u32 %v6804_v4, %v6422_v9  ;;  %v6424_v43 = vld [vmem:[#allocation9 + $0x18] sm:$0xf0] }
 0xb20   :  { %v6427_v40 = vor.u32 %v6803_v51, %v6424_v43 }
 0xb21   :  { %v4881_v24 = vadd.f32 %v4879_v35, %v8597_v61  ;;  %v4882_v30 = vadd.f32 %v4880_v8, %v8600_v18  ;;  %v6467_v61 = vor.u32 %v6813_v46, %v6464_v5  ;;  %v6414_v35 = vld [vmem:[#allocation9] sm:$0xf]  ;;  %v6802_v8 = vld [vmem:[#allocation9 + $0x4] sm:$0xf0]  ;;  %v6832_v5 = vld [vmem:[#allocation10 + $0x78] sm:$0xff] }
 0xb23   :  { %v4885_v13 = vmin.f32 %v4881_v24, 20.0  ;;  %v4886_v10 = vmin.f32 %v4882_v30, 20.0  ;;  %5044 = vmatpush.bf16.msra.mxu1 %v6467_v61  ;;  %vm4884_vm7 = vcmp.gt.f32.partialorder %v4882_v30, 20.0  ;;  %vm4883_vm8 = vcmp.gt.f32.partialorder %v4881_v24, 20.0  ;;  %v6831_v61 = vld [vmem:[#allocation10 + $0x70] sm:$0xff] }
 0xb25   :  { %v4887_v6 = vmul.f32 1.442695, %v4885_v13  ;;  %v4889_v26 = vmul.f32 1.442695, %v4886_v10 }
 0xb27   :  { %7164 = vpow2.f32 %v4889_v26  ;;  %5045 = vmatpush.bf16.msra.mxu1 %v6459_v1  ;;  %v6824_v26 = vld [vmem:[#allocation10 + $0x38] sm:$0xff]  ;;  %v6819_v1 = vld [vmem:[#allocation10 + $0x10] sm:$0xff] }
 0xb28   :  { %7166 = vpow2.f32 %v4887_v6  ;;  %5222 = vmatpush.bf16.msra.mxu2 %v6824_v26 }
 0xb2b   :  { %5046 = vmatpush.bf16.msra.mxu1 %v6451_v56 }
 0xb2c   :  { %5223 = vmatpush.bf16.msra.mxu2 %v6823_v15 }
 0xb2d   :  { %v7165_v18 = vpop.eup %7164 }
 0xb2e   :  { %v7167_v45 = vpop.eup %7166  ;;  %v4892_v42 = vadd.f32 1.0, %v7165_v18  ;;  %v4944_v18 = vld [vmem:[%s7547_s14] sm:$0x3] }
 0xb2f   :  { %v4891_v33 = vadd.f32 1.0, %v7167_v45  ;;  %5047 = vmatpush.bf16.msra.mxu1 %v6443_v22  ;;  %v4946_v45 = vperm.slane %v4944_v18, 0 }
 0xb30   :  { %7168 = vlog2.f32 %v4892_v42  ;;  %v4947_v42 = vperm.slane %v4944_v18, 1 }
 0xb31   :  { %7170 = vlog2.f32 %v4891_v33  ;;  %v6822_v33 = vld [vmem:[#allocation10 + $0x28] sm:$0xff] }
 0xb32   :  { %5224 = vmatpush.bf16.msra.mxu2 %v6822_v33 }
 0xb33   :  { %5048 = vmatpush.bf16.msra.mxu1 %v6435_v57 }
 0xb36   :  { %v7169_v23 = vpop.eup %7168 }
 0xb37   :  { %v7171_v44 = vpop.eup %7170  ;;  %v4896_v31 = vmul.f32 0.6931472, %v7169_v23  ;;  %5049 = vmatpush.bf16.msra.mxu1 %v6427_v40  ;;  %v6830_v23 = vld [vmem:[#allocation10 + $0x68] sm:$0xff] }
 0xb38   :  { %v4894_v39 = vmul.f32 0.6931472, %v7171_v44 }
 0xb39   :  { %v4898_v62 = vsel %vm4884_vm7, %v4882_v30, %v4896_v31  ;;  %v6415_v30 = vor.u32 %v6802_v8, %v6414_v35 }
 0xb3a   :  { %v4897_v3 = vsel %vm4883_vm8, %v4881_v24, %v4894_v39  ;;  %v4900_v38 = vmul.f32 %v7905_v36, %v4898_v62  ;;  %v6801_v24 = vld [vmem:[#allocation9 + $0x4] sm:$0xf] }
 0xb3b   :  { %v4899_v2 = vmul.f32 %v7905_v36, %v4897_v3  ;;  %v6438_v36 = vld [vmem:[#allocation9 + $0x30] sm:$0xf]  ;;  %v6419_v12 = vor.u32 %v6801_v24, %v6416_v14  ;;  %v6821_v3 = vld [vmem:[#allocation10 + $0x20] sm:$0xff] }
 0xb3c   :  { %v6439_v11 = vor.u32 %v6808_v7, %v6438_v36  ;;  %5225 = vmatpush.bf16.msra.mxu2 %v6821_v3  ;;  %v6817_v7 = vld [vmem:[#allocation10] sm:$0xff] }
 0xb3d   :  { %v4902_v53 = vpack.c.bf16 %v4900_v38, %v4899_v2  ;;  %5050 = vmatpush.bf16.msra.mxu1 %v6419_v12  ;;  %v6829_v38 = vld [vmem:[#allocation10 + $0x60] sm:$0xff] }
 0xb3e   :  { %5034 = vmatpush.bf16.msrb.mxu0 %v6439_v11 }
 0xb3f   :  { %4913 = vmatpush.bf16.msrb.mxu3 %v4902_v53 }
 0xb40   :  { %5226 = vmatpush.bf16.msra.mxu2 %v6820_v34 }
 0xb42   :  { %6411 = vmatmul.msk.bf16.vlgmr.msrb.gmra.mxu3 %vm903_vm1, %v4901_v0  ;;  %5035 = vmatpush.bf16.msrb.mxu0 %v6431_v16 }
 0xb43   :  { %5235 = vmatpush.bf16.msra.mxu3 %v6832_v5 }
 0xb44   :  { %5227 = vmatpush.bf16.msra.mxu2 %v6819_v1 }
 0xb46   :  { %5036 = vmatpush.bf16.msrb.mxu0 %v6423_v29 }
 0xb47   :  { %5236 = vmatpush.bf16.msra.mxu3 %v6831_v61 }
 0xb48   :  { %5228 = vmatpush.bf16.msra.mxu2 %v6818_v47 }
 0xb4a   :  { %5037 = vmatpush.bf16.msrb.mxu0 %v6415_v30 }
 0xb4b   :  { %5237 = vmatpush.bf16.msra.mxu3 %v6830_v23 }
 0xb4c   :  { %5229 = vmatpush.bf16.msra.mxu2 %v6817_v7 }
 0xb4f   :  { %5238 = vmatpush.bf16.msra.mxu3 %v6829_v38 }
 0xb53   :  { %5239 = vmatpush.bf16.msra.mxu3 %v6828_v32 }
 0xb57   :  { %5240 = vmatpush.bf16.msra.mxu3 %v6827_v25 }
 0xb5b   :  { %5241 = vmatpush.bf16.msra.mxu3 %v6826_v63 }
 0xb5f   :  { %5242 = vmatpush.bf16.msra.mxu3 %v6825_v27 }
 0xbc5   :  { %v4915_v55 = vpop.f32.mrf.mxu3 }
 0xbc6   :  { %v4920_v13 = vmin.f32 %v4915_v55, 20.0  ;;  %vm4919_vm1 = vcmp.gt.f32.partialorder %v4915_v55, 20.0 }
 0xbc8   :  { %v4921_v10 = vmul.f32 1.442695, %v4920_v13  ;;  %v6893_v13 = vld [vmem:[%s7557_s4] ss:$0 sm:$0xff] }
 0xbca   :  { %7172 = vpow2.f32 %v4921_v10 }
 0xbcd   :  { %v4917_v21 = vpop.f32.mrf.mxu3 }
 0xbd0   :  { %v7173_v49 = vpop.eup %7172 }
 0xbd1   :  { %v4923_v37 = vadd.f32 1.0, %v7173_v49 }
 0xbd3   :  { %7174 = vlog2.f32 %v4923_v37 }
 0xbd9   :  { %v7175_v17 = vpop.eup %7174 }
 0xbda   :  { %v4925_v58 = vmul.f32 0.6931472, %v7175_v17 }
 0xbdc   :  { %v4926_v46 = vsel %vm4919_vm1, %v4915_v55, %v4925_v58 }
 0xbdd   :  { %v4927_v6 = vpack.c.bf16 %v4926_v46, %v4926_v46 }
 0xbdf   :  { %5038 = vmatmul.bf16.vlgmr.msrb.gmra.mxu0 %v4927_v6  ;;  %5051 = vmatmul.bf16.vlgmr.msra.gmra.mxu1 %v4927_v6 }
 0xc5c   :  { %v5039_v44 = vpop.f32.mrf.mxu0  ;;  %v5052_v31 = vpop.f32.mrf.mxu1 }
 0xc5d   :  { %v5040_v39 = vadd.f32 %v5039_v44, %v4946_v45  ;;  %v5053_v62 = vadd.f32 %v5052_v31, %v4947_v42 }
 0xc5f   :  { %v5058_v2 = vmin.f32 %v5040_v39, 20.0  ;;  %v5059_v53 = vmin.f32 %v5053_v62, 20.0  ;;  %vm5056_vm9 = vcmp.gt.f32.partialorder %v5040_v39, 20.0  ;;  %vm5057_vm10 = vcmp.gt.f32.partialorder %v5053_v62, 20.0 }
 0xc61   :  { %v5060_v0 = vmul.f32 1.442695, %v5058_v2  ;;  %v5062_v50 = vmul.f32 1.442695, %v5059_v53 }
 0xc63   :  { %7176 = vpow2.f32 %v5060_v0 }
 0xc64   :  { %7178 = vpow2.f32 %v5062_v50  ;;  %v5041_v28 = vpop.f32.mrf.mxu0  ;;  %v5054_v41 = vpop.f32.mrf.mxu1 }
 0xc69   :  { %v7177_v20 = vpop.eup %7176 }
 0xc6a   :  { %v7179_v52 = vpop.eup %7178  ;;  %v5064_v56 = vadd.f32 1.0, %v7177_v20 }
 0xc6b   :  { %v5065_v36 = vadd.f32 1.0, %v7179_v52 }
 0xc6c   :  { %7180 = vlog2.f32 %v5064_v56 }
 0xc6d   :  { %7182 = vlog2.f32 %v5065_v36 }
 0xc72   :  { %v7181_v11 = vpop.eup %7180 }
 0xc73   :  { %v7183_v48 = vpop.eup %7182  ;;  %v5067_v22 = vmul.f32 0.6931472, %v7181_v11 }
 0xc74   :  { %v5069_v54 = vmul.f32 0.6931472, %v7183_v48 }
 0xc75   :  { %v5070_v60 = vsel %vm5056_vm9, %v5040_v39, %v5067_v22 }
 0xc76   :  { %v5074_v59 = vmin.f32 %v5070_v60, 20.0  ;;  %v5071_v16 = vsel %vm5057_vm10, %v5053_v62, %v5069_v54  ;;  %vm5072_vm11 = vcmp.gt.f32.partialorder %v5070_v60, 20.0 }
 0xc77   :  { %v5075_v19 = vmin.f32 %v5071_v16, 20.0  ;;  %vm5073_vm12 = vcmp.gt.f32.partialorder %v5071_v16, 20.0 }
 0xc78   :  { %v5076_v57 = vmul.f32 1.442695, %v5074_v59 }
 0xc79   :  { %v5078_v9 = vmul.f32 1.442695, %v5075_v19 }
 0xc7a   :  { %7184 = vpow2.f32 %v5076_v57 }
 0xc7b   :  { %7186 = vpow2.f32 %v5078_v9 }
 0xc80   :  { %v7185_v4 = vpop.eup %7184 }
 0xc81   :  { %v7187_v51 = vpop.eup %7186  ;;  %v5080_v29 = vadd.f32 1.0, %v7185_v4 }
 0xc82   :  { %v5081_v43 = vadd.f32 1.0, %v7187_v51 }
 0xc83   :  { %7188 = vlog2.f32 %v5080_v29 }
 0xc84   :  { %7190 = vlog2.f32 %v5081_v43 }
 0xc89   :  { %v7189_v40 = vpop.eup %7188 }
 0xc8a   :  { %v7191_v35 = vpop.eup %7190  ;;  %v5083_v8 = vmul.f32 0.6931472, %v7189_v40 }
 0xc8b   :  { %v5085_v24 = vmul.f32 0.6931472, %v7191_v35 }
 0xc8c   :  { %v5086_v30 = vsel %vm5072_vm11, %v5070_v60, %v5083_v8 }
 0xc8d   :  { %v5088_v14 = vpack.c.bf16 %v5086_v30, %v5086_v30  ;;  %v5087_v12 = vsel %vm5073_vm12, %v5071_v16, %v5085_v24 }
 0xc8e   :  { %v5089_v55 = vpack.c.bf16 %v5087_v12, %v5087_v12 }
 0xc8f   :  { %5230 = vmatmul.bf16.vlgmr.msra.gmra.mxu2 %v5088_v14 }
 0xc90   :  { %5243 = vmatmul.bf16.vlgmr.msra.gmra.mxu3 %v5089_v55 }
 0xd12   :  { %v5231_v10 = vpop.f32.mrf.mxu2 }
 0xd13   :  { %v5232_v21 = vadd.f32 %v6893_v13, %v5231_v10  ;;  %v5244_v49 = vpop.f32.mrf.mxu3 }
 0xd15   :  { %v5245_v37 = vadd.f32 %v5244_v49, %v5232_v21 }
 0xd17   :  { %5248 = vst [vmem:[%s7562_s12] sm:$0x3] %v5245_v37 }
 0xd1a   :  { %v5233_v17 = vpop.f32.mrf.mxu2 }
 0xd1b   :  { %v5246_v58 = vpop.f32.mrf.mxu3 }
 0xd1c   :  { %5253 = vsyncpa [#allocation3], 1 }
 0xd1d   :  { %5254 = vsyncpa [#allocation5], 1 }
 0xd1e   :  { %5255 = vsyncpa [#allocation8], 1 }
 0xd1f   :  { %5256 = vsyncpa [#allocation11], 1 }

</bundles_post_ra>
